<compile_context>
chip_gen: v6e
topology: v6e:2x2x1
jax: 0.10.0
libtpu: 0.0.40
codegen_flags: <defaults>
</compile_context>

<pallas_src>
import functools

import jax
import jax.numpy as jnp
from jax.experimental import pallas as pl
from jax.experimental.pallas import tpu as pltpu


# ------------------------- fused kernel: conv1+pool1+conv2+pool2+fc1+fc2 -------------------------

def _embedder_kernel(xp_ref, w1p_ref, b1_ref, w2_ref, b2_ref, msk_ref, sel_ref,
                     wf1_ref, bf1_ref, wf2_ref, bf2_ref, o_ref,
                     p1sc, accsc, qsc, *, bt):
    f32 = jnp.float32
    bf16 = jnp.bfloat16

    for b in range(bt):
        # ---- conv1 + 2x2 maxpool, fused: one MXU matmul -> 4 pool phases x 32 channels ----
        # (pool-max before +bias/ReLU is valid because max, +bias and ReLU commute here)
        xp = xp_ref[0, b]                                                  # (196,16) bf16
        z = jnp.dot(xp, w1p_ref[...], preferred_element_type=f32)          # (196,128)
        zmax = jnp.maximum(jnp.maximum(z[:, 0:32], z[:, 32:64]),
                           jnp.maximum(z[:, 64:96], z[:, 96:128]))
        p1 = jnp.maximum(zmax + b1_ref[...], 0.0)                          # (196,32), row = 14*y + x

        # ---- stage p1 into the row-guard-padded scratch (rows 16..211), one variant per dx ----
        # dx==0 taps read source rows with x==13 zeroed; dx==2 taps read x==0 zeroed
        # (exactly equivalent to masking the shifted output, see boundary derivation).
        zeros_g = jnp.zeros((16, 32), f32)
        for v, slab in ((0, p1 * msk_ref[0]), (1, p1), (2, p1 * msk_ref[1])):
            p1sc[b, v, 0:16, :] = zeros_g          # top guard (y < 0  -> SAME-pad zeros)
            p1sc[b, v, 212:228, :] = zeros_g       # bottom guard (y > 13 -> SAME-pad zeros)
            p1sc[b, v, 16:212, :] = slab

        # ---- conv2: 9 accumulating (196,32)@(32,64) bf16 matmuls over shifted scratch reads ----
        acc = jnp.zeros((196, 64), f32)
        for dy in range(3):
            for dx in range(3):
                t = 3 * dy + dx
                s = 14 * (dy - 1) + (dx - 1)                               # row shift of this tap
                tap = p1sc[b, dx, 16 + s:16 + s + 196, :]                  # (196,32), zero outside
                acc = acc + jnp.dot(tap.astype(bf16), w2_ref[t],
                                    preferred_element_type=f32)

        # ---- 2x2 maxpool via guarded-scratch offset reads + exact 0/1 selection matmul ----
        # pooled output row p=28a+2c only ever reads acc rows {p,p+1,p+14,p+15} <= 195, so the
        # zero guard rows / out-of-window rows never reach a selected output (fragile: keep the
        # selection matrix and this geometry in sync).
        accsc[b, 196:212, :] = jnp.zeros((16, 64), f32)
        accsc[b, 0:196, :] = acc
        m2 = jnp.maximum(jnp.maximum(acc, accsc[b, 1:197, :]),
                         jnp.maximum(accsc[b, 14:210, :], accsc[b, 15:211, :]))
        q = jnp.dot(sel_ref[...], m2.astype(bf16),
                    preferred_element_type=f32)                            # (49,64)
        qsc[b] = jnp.maximum(q + b2_ref[...], 0.0)

    # ---- fc1: a1[b,:] = sum_s q[b,s,:] @ wf1[s]  (flatten absorbed into the weight layout) ----
    a1 = jnp.zeros((bt, 128), f32)
    for s in range(49):
        a1 = a1 + jnp.dot(qsc[:, s, :].astype(bf16), wf1_ref[s],
                          preferred_element_type=f32)
    a1 = jnp.maximum(a1 + bf1_ref[...], 0.0)                               # (bt,128)

    # ---- fc2 ----
    a2 = jnp.dot(a1, wf2_ref[...], preferred_element_type=f32)             # (bt,20)
    o_ref[0] = jnp.maximum(a2 + bf2_ref[...], 0.0)


def _embedder_call(xp4, prep, bt, nblk):
    kernel = functools.partial(_embedder_kernel, bt=bt)
    c2 = lambda i: (0, 0)
    c3 = lambda i: (0, 0, 0)
    return pl.pallas_call(
        kernel,
        out_shape=jax.ShapeDtypeStruct((nblk, bt, 20), jnp.float32),
        grid=(nblk,),
        in_specs=[
            pl.BlockSpec((1, bt, 196, 16), lambda i: (i, 0, 0, 0)),   # patches
            pl.BlockSpec((16, 128), c2),                              # conv1 (pool-folded) weight
            pl.BlockSpec((1, 32), c2),                                # conv1 bias
            pl.BlockSpec((9, 32, 64), c3),                            # conv2 tap weights
            pl.BlockSpec((1, 64), c2),                                # conv2 bias
            pl.BlockSpec((2, 196, 32), c3),                           # x-boundary source masks
            pl.BlockSpec((49, 196), c2),                              # pool2 selection matrix
            pl.BlockSpec((49, 64, 128), c3),                          # fc1 weight (per position)
            pl.BlockSpec((1, 128), c2),                               # fc1 bias
            pl.BlockSpec((128, 20), c2),                              # fc2 weight
            pl.BlockSpec((1, 20), c2),                                # fc2 bias
        ],
        out_specs=pl.BlockSpec((1, bt, 20), lambda i: (i, 0, 0)),
        scratch_shapes=[
            pltpu.VMEM((bt, 3, 228, 32), jnp.float32),                # guard-padded p1 variants
            pltpu.VMEM((bt, 212, 64), jnp.float32),                   # guard-padded conv2 acc
            pltpu.VMEM((bt, 49, 64), jnp.float32),                    # pooled activations (fc in)
        ],
        compiler_params=pltpu.CompilerParams(dimension_semantics=("parallel",)),
    )(xp4, prep["w1p"], prep["b1"], prep["w2s"], prep["b2"], prep["mask"],
      prep["sel"], prep["wf1"], prep["bf1"], prep["wf2"], prep["bf2"])


# ------------------------- one-time weight preparation -------------------------

def init_params(key):
    k = jax.random.split(key, 8)

    def normal(kk, shape, scale):
        return (scale * jax.random.normal(kk, shape)).astype(jnp.float32)

    return {
        "conv1_w": normal(k[0], (32, 1, 3, 3), 0.2),
        "conv1_b": normal(k[1], (32,), 0.05),
        "conv2_w": normal(k[2], (64, 32, 3, 3), 0.05),
        "conv2_b": normal(k[3], (64,), 0.05),
        "fc1_w": normal(k[4], (128, 64 * 7 * 7), 0.02),
        "fc1_b": normal(k[5], (128,), 0.02),
        "fc2_w": normal(k[6], (20, 128), 0.05),
        "fc2_b": normal(k[7], (20,), 0.02),
    }


def prepare_params(params):
    """Hoist every weight re-layout / cast out of the forward path (run once)."""
    f32 = jnp.float32
    bf16 = jnp.bfloat16

    # conv1 folded with pool1: 4x4 patch positions -> (4 pool phases x 32 channels).
    w1hwc = jnp.transpose(params["conv1_w"][:, 0], (1, 2, 0))              # (3,3,32)
    rows = []
    for oy in range(4):
        for ox in range(4):
            blocks = []
            for py in range(2):
                for px in range(2):
                    dy, dx = oy - py, ox - px
                    if 0 <= dy <= 2 and 0 <= dx <= 2:
                        blocks.append(w1hwc[dy, dx])
                    else:
                        blocks.append(jnp.zeros((32,), f32))
            rows.append(jnp.concatenate(blocks, axis=0))                   # (128,)
    w1p = jnp.stack(rows, axis=0)                                          # (16,128)

    # conv2 tap weights, tap index t = 3*dy + dx, layout (t, ci, co).
    w2s = jnp.transpose(params["conv2_w"], (2, 3, 1, 0)).reshape(9, 32, 64)

    # Pre-broadcast x-boundary SOURCE masks for the row-shifted conv2 taps:
    #   mask[0]: zero source column x==13  (used by dx==0 taps)
    #   mask[1]: zero source column x==0   (used by dx==2 taps)
    r = jnp.arange(196)
    m_dx0 = ((r % 14) != 13).astype(f32)
    m_dx2 = ((r % 14) != 0).astype(f32)
    mask = jnp.stack([jnp.tile(m_dx0[:, None], (1, 32)),
                      jnp.tile(m_dx2[:, None], (1, 32))], axis=0)          # (2,196,32)

    # Exact 0/1 selection matrix compacting the 196 conv2 rows to the 49 pooled rows (28a+2c).
    s_idx = jnp.arange(49)
    sel = jax.nn.one_hot(28 * (s_idx // 7) + 2 * (s_idx % 7), 196, dtype=f32)   # (49,196)

    # fc1 weight arranged per pooled spatial position: wf1[s, d, h] = fc1_w[h, 49*d + s].
    # This absorbs PyTorch's channel-major view(-1, 64*7*7) flatten, so no in-kernel flatten.
    wf1 = jnp.transpose(params["fc1_w"].reshape(128, 64, 49), (2, 1, 0))   # (49,64,128)

    return {
        "w1p": w1p.astype(bf16),
        "b1": params["conv1_b"].reshape(1, 32).astype(f32),
        "w2s": w2s.astype(bf16),
        "b2": params["conv2_b"].reshape(1, 64).astype(f32),
        "mask": mask,
        "sel": sel.astype(bf16),                                           # exact in bf16 (0/1)
        "wf1": wf1.astype(bf16),
        "bf1": params["fc1_b"].reshape(1, 128).astype(f32),
        "wf2": jnp.transpose(params["fc2_w"]).astype(f32),                 # (128,20)
        "bf2": params["fc2_b"].reshape(1, 20).astype(f32),
    }


# ------------------------- forward -------------------------

@jax.jit
def image_embedder_forward(prep, x_nchw):
    """x_nchw: (B, 1, 28, 28) float32 (PyTorch layout, post transform)."""
    B = x_nchw.shape[0]
    # Batch tile: amortize the per-grid-step cost, but keep >=2 grid steps for v7x's two TCs.
    bt = max(1, min(8, B // 2)) if B > 1 else 1
    nblk = -(-B // bt)
    bpad = nblk * bt

    x = x_nchw[:, 0]                                                       # (B,28,28)
    xpad = jnp.pad(x, ((0, 0), (1, 1), (1, 1)))                            # (B,30,30)
    # 4x4 patch around each pooled output position (tiny tensor, built once in XLA).
    patches = jnp.stack(
        [xpad[:, oy:oy + 28:2, ox:ox + 28:2] for oy in range(4) for ox in range(4)],
        axis=-1)                                                           # (B,14,14,16)
    xp = patches.reshape(B, 196, 16).astype(jnp.bfloat16)
    if bpad != B:
        xp = jnp.concatenate(
            [xp, jnp.zeros((bpad - B, 196, 16), jnp.bfloat16)], axis=0)
    xp4 = xp.reshape(nblk, bt, 196, 16)

    out = _embedder_call(xp4, prep, bt, nblk)                              # (nblk, bt, 20)
    return out.reshape(bpad, 20)[:B]


# ------------------------- pure-JAX reference -------------------------

def reference_forward(params, x_nchw):
    def conv(x, w, b):
        y = jax.lax.conv_general_dilated(
            x, w, window_strides=(1, 1), padding="SAME",
            dimension_numbers=("NCHW", "OIHW", "NCHW"))
        return jnp.maximum(y + b[None, :, None, None], 0.0)

    def pool(x):
        return jax.lax.reduce_window(
            x, -jnp.inf, jax.lax.max, (1, 1, 2, 2), (1, 1, 2, 2), "VALID")

    x = pool(conv(x_nchw, params["conv1_w"], params["conv1_b"]))
    x = pool(conv(x, params["conv2_w"], params["conv2_b"]))
    x = x.reshape(x.shape[0], -1)
    x = jnp.maximum(x @ params["fc1_w"].T + params["fc1_b"], 0.0)
    x = jnp.maximum(x @ params["fc2_w"].T + params["fc2_b"], 0.0)
    return x


if __name__ == "__main__":
    key = jax.random.PRNGKey(0)
    pkey, xkey = jax.random.split(key)
    params = init_params(pkey)
    prep = prepare_params(params)

    # Grayscale 28x28 input (what Resize((28,28)) + ToTensor + Normalize((0.5,),(0.5,)) yields).
    x = jax.random.uniform(xkey, (2, 1, 28, 28), jnp.float32, minval=-1.0, maxval=1.0)

    out = jax.block_until_ready(image_embedder_forward(prep, x))
    ref = jax.block_until_ready(reference_forward(params, x))

    assert out.shape == (2, 20) and out.dtype == jnp.float32
    # bf16 MXU operands throughout (recommended by perf review) vs. f32 reference:
    # slightly relaxed, documented tolerance.
    assert jnp.allclose(out, ref, rtol=8e-2, atol=2e-2), float(jnp.max(jnp.abs(out - ref)))
    print("KERNEL_OK")
</pallas_src>

<mosaic_0001>
module attributes {stable_mosaic.version = 11 : i64} {
  func.func @_embedder_kernel(%arg0: i32, %arg1: memref<1x1x196x16xbf16, #tpu.memory_space<vmem>>, %arg2: memref<16x128xbf16, #tpu.memory_space<vmem>>, %arg3: memref<1x32xf32, #tpu.memory_space<vmem>>, %arg4: memref<9x32x64xbf16, #tpu.memory_space<vmem>>, %arg5: memref<1x64xf32, #tpu.memory_space<vmem>>, %arg6: memref<2x196x32xf32, #tpu.memory_space<vmem>>, %arg7: memref<49x196xbf16, #tpu.memory_space<vmem>>, %arg8: memref<49x64x128xbf16, #tpu.memory_space<vmem>>, %arg9: memref<1x128xf32, #tpu.memory_space<vmem>>, %arg10: memref<128x20xf32, #tpu.memory_space<vmem>>, %arg11: memref<1x20xf32, #tpu.memory_space<vmem>>, %arg12: memref<1x1x20xf32, #tpu.memory_space<vmem>>, %arg13: memref<1x3x228x32xf32, #tpu.memory_space<vmem>>, %arg14: memref<1x212x64xf32, #tpu.memory_space<vmem>>, %arg15: memref<1x49x64xf32, #tpu.memory_space<vmem>>) attributes {dimension_semantics = [#tpu.dimension_semantics<parallel>], iteration_bounds = array<i64: 2>, scalar_prefetch = 0 : i64, scratch_operands = 3 : i64, tpu.core_type = #tpu.core_type<tc>, window_params = [{transform_indices = @transform_0, window_bounds = array<i64: 1, 1, 196, 16>}, {pipeline_mode = #tpu.pipeline_mode<synchronous>, transform_indices = @transform_1, window_bounds = array<i64: 16, 128>}, {pipeline_mode = #tpu.pipeline_mode<synchronous>, transform_indices = @transform_2, window_bounds = array<i64: 1, 32>}, {pipeline_mode = #tpu.pipeline_mode<synchronous>, transform_indices = @transform_3, window_bounds = array<i64: 9, 32, 64>}, {pipeline_mode = #tpu.pipeline_mode<synchronous>, transform_indices = @transform_4, window_bounds = array<i64: 1, 64>}, {pipeline_mode = #tpu.pipeline_mode<synchronous>, transform_indices = @transform_5, window_bounds = array<i64: 2, 196, 32>}, {pipeline_mode = #tpu.pipeline_mode<synchronous>, transform_indices = @transform_6, window_bounds = array<i64: 49, 196>}, {pipeline_mode = #tpu.pipeline_mode<synchronous>, transform_indices = @transform_7, window_bounds = array<i64: 49, 64, 128>}, {pipeline_mode = #tpu.pipeline_mode<synchronous>, transform_indices = @transform_8, window_bounds = array<i64: 1, 128>}, {pipeline_mode = #tpu.pipeline_mode<synchronous>, transform_indices = @transform_9, window_bounds = array<i64: 128, 20>}, {pipeline_mode = #tpu.pipeline_mode<synchronous>, transform_indices = @transform_10, window_bounds = array<i64: 1, 20>}, {transform_indices = @transform_11, window_bounds = array<i64: 1, 1, 20>}]} {
    %c0 = arith.constant 0 : index
    %c0_0 = arith.constant 0 : index
    %c0_1 = arith.constant 0 : index
    %c0_2 = arith.constant 0 : index
    %0 = vector.load %arg1[%c0, %c0_0, %c0_1, %c0_2] : memref<1x1x196x16xbf16, #tpu.memory_space<vmem>>, vector<1x1x196x16xbf16>
    %1 = vector.shape_cast %0 : vector<1x1x196x16xbf16> to vector<196x16xbf16>
    %c0_3 = arith.constant 0 : index
    %c0_4 = arith.constant 0 : index
    %2 = vector.load %arg2[%c0_3, %c0_4] : memref<16x128xbf16, #tpu.memory_space<vmem>>, vector<16x128xbf16>
    %cst = arith.constant dense<0.000000e+00> : vector<196x128xf32>
    %3 = tpu.matmul %1, %2, %cst {dimension_numbers = #tpu.dot_dimension_numbers<[1], [0], [0], [1], [0, 0, 1, 1], [], []>} : vector<196x16xbf16>, vector<16x128xbf16>, vector<196x128xf32> -> vector<196x128xf32>
    %4 = vector.extract_strided_slice %3 {offsets = [0, 0], sizes = [196, 32], strides = [1, 1]} : vector<196x128xf32> to vector<196x32xf32>
    %5 = vector.extract_strided_slice %3 {offsets = [0, 32], sizes = [196, 32], strides = [1, 1]} : vector<196x128xf32> to vector<196x32xf32>
    %6 = arith.maximumf %4, %5 : vector<196x32xf32>
    %7 = vector.extract_strided_slice %3 {offsets = [0, 64], sizes = [196, 32], strides = [1, 1]} : vector<196x128xf32> to vector<196x32xf32>
    %8 = vector.extract_strided_slice %3 {offsets = [0, 96], sizes = [196, 32], strides = [1, 1]} : vector<196x128xf32> to vector<196x32xf32>
    %9 = arith.maximumf %7, %8 : vector<196x32xf32>
    %10 = arith.maximumf %6, %9 : vector<196x32xf32>
    %c0_5 = arith.constant 0 : index
    %c0_6 = arith.constant 0 : index
    %11 = vector.load %arg3[%c0_5, %c0_6] : memref<1x32xf32, #tpu.memory_space<vmem>>, vector<1x32xf32>
    %12 = vector.broadcast %11 : vector<1x32xf32> to vector<196x32xf32>
    %13 = arith.addf %10, %12 : vector<196x32xf32>
    %cst_7 = arith.constant 0.000000e+00 : f32
    %14 = vector.broadcast %cst_7 : f32 to vector<196x32xf32>
    %15 = arith.maximumf %13, %14 : vector<196x32xf32>
    %cst_8 = arith.constant 0.000000e+00 : f32
    %16 = vector.broadcast %cst_8 : f32 to vector<16x32xf32>
    %c0_9 = arith.constant 0 : index
    %c0_10 = arith.constant 0 : index
    %c0_11 = arith.constant 0 : index
    %17 = vector.load %arg6[%c0_9, %c0_10, %c0_11] : memref<2x196x32xf32, #tpu.memory_space<vmem>>, vector<1x196x32xf32>
    %18 = vector.shape_cast %17 : vector<1x196x32xf32> to vector<196x32xf32>
    %19 = arith.mulf %15, %18 : vector<196x32xf32>
    %c1 = arith.constant 1 : index
    %c0_12 = arith.constant 0 : index
    %c0_13 = arith.constant 0 : index
    %20 = vector.load %arg6[%c1, %c0_12, %c0_13] : memref<2x196x32xf32, #tpu.memory_space<vmem>>, vector<1x196x32xf32>
    %21 = vector.shape_cast %20 : vector<1x196x32xf32> to vector<196x32xf32>
    %22 = arith.mulf %15, %21 : vector<196x32xf32>
    %c0_14 = arith.constant 0 : index
    %c0_15 = arith.constant 0 : index
    %c0_16 = arith.constant 0 : index
    %c0_17 = arith.constant 0 : index
    %23 = vector.load %arg13[%c0_14, %c0_15, %c0_16, %c0_17] : memref<1x3x228x32xf32, #tpu.memory_space<vmem>>, vector<1x1x16x32xf32>
    %24 = vector.shape_cast %23 : vector<1x1x16x32xf32> to vector<16x32xf32>
    %25 = vector.shape_cast %16 : vector<16x32xf32> to vector<1x1x16x32xf32>
    tpu.vector_store %arg13[%c0_14, %c0_15, %c0_16, %c0_17], %25 {strides = array<i32>} : memref<1x3x228x32xf32, #tpu.memory_space<vmem>>, vector<1x1x16x32xf32>,
    %c0_18 = arith.constant 0 : index
    %c0_19 = arith.constant 0 : index
    %c212 = arith.constant 212 : index
    %c0_20 = arith.constant 0 : index
    %26 = vector.load %arg13[%c0_18, %c0_19, %c212, %c0_20] : memref<1x3x228x32xf32, #tpu.memory_space<vmem>>, vector<1x1x16x32xf32>
    %27 = vector.shape_cast %26 : vector<1x1x16x32xf32> to vector<16x32xf32>
    %28 = vector.shape_cast %16 : vector<16x32xf32> to vector<1x1x16x32xf32>
    tpu.vector_store %arg13[%c0_18, %c0_19, %c212, %c0_20], %28 {strides = array<i32>} : memref<1x3x228x32xf32, #tpu.memory_space<vmem>>, vector<1x1x16x32xf32>,
    %c0_21 = arith.constant 0 : index
    %c0_22 = arith.constant 0 : index
    %c16 = arith.constant 16 : index
    %c0_23 = arith.constant 0 : index
    %29 = vector.load %arg13[%c0_21, %c0_22, %c16, %c0_23] : memref<1x3x228x32xf32, #tpu.memory_space<vmem>>, vector<1x1x196x32xf32>
    %30 = vector.shape_cast %29 : vector<1x1x196x32xf32> to vector<196x32xf32>
    %31 = vector.shape_cast %19 : vector<196x32xf32> to vector<1x1x196x32xf32>
    tpu.vector_store %arg13[%c0_21, %c0_22, %c16, %c0_23], %31 {strides = array<i32>} : memref<1x3x228x32xf32, #tpu.memory_space<vmem>>, vector<1x1x196x32xf32>,
    %c0_24 = arith.constant 0 : index
    %c1_25 = arith.constant 1 : index
    %c0_26 = arith.constant 0 : index
    %c0_27 = arith.constant 0 : index
    %32 = vector.load %arg13[%c0_24, %c1_25, %c0_26, %c0_27] : memref<1x3x228x32xf32, #tpu.memory_space<vmem>>, vector<1x1x16x32xf32>
    %33 = vector.shape_cast %32 : vector<1x1x16x32xf32> to vector<16x32xf32>
    %34 = vector.shape_cast %16 : vector<16x32xf32> to vector<1x1x16x32xf32>
    tpu.vector_store %arg13[%c0_24, %c1_25, %c0_26, %c0_27], %34 {strides = array<i32>} : memref<1x3x228x32xf32, #tpu.memory_space<vmem>>, vector<1x1x16x32xf32>,
    %c0_28 = arith.constant 0 : index
    %c1_29 = arith.constant 1 : index
    %c212_30 = arith.constant 212 : index
    %c0_31 = arith.constant 0 : index
    %35 = vector.load %arg13[%c0_28, %c1_29, %c212_30, %c0_31] : memref<1x3x228x32xf32, #tpu.memory_space<vmem>>, vector<1x1x16x32xf32>
    %36 = vector.shape_cast %35 : vector<1x1x16x32xf32> to vector<16x32xf32>
    %37 = vector.shape_cast %16 : vector<16x32xf32> to vector<1x1x16x32xf32>
    tpu.vector_store %arg13[%c0_28, %c1_29, %c212_30, %c0_31], %37 {strides = array<i32>} : memref<1x3x228x32xf32, #tpu.memory_space<vmem>>, vector<1x1x16x32xf32>,
    %c0_32 = arith.constant 0 : index
    %c1_33 = arith.constant 1 : index
    %c16_34 = arith.constant 16 : index
    %c0_35 = arith.constant 0 : index
    %38 = vector.load %arg13[%c0_32, %c1_33, %c16_34, %c0_35] : memref<1x3x228x32xf32, #tpu.memory_space<vmem>>, vector<1x1x196x32xf32>
    %39 = vector.shape_cast %38 : vector<1x1x196x32xf32> to vector<196x32xf32>
    %40 = vector.shape_cast %15 : vector<196x32xf32> to vector<1x1x196x32xf32>
    tpu.vector_store %arg13[%c0_32, %c1_33, %c16_34, %c0_35], %40 {strides = array<i32>} : memref<1x3x228x32xf32, #tpu.memory_space<vmem>>, vector<1x1x196x32xf32>,
    %c0_36 = arith.constant 0 : index
    %c2 = arith.constant 2 : index
    %c0_37 = arith.constant 0 : index
    %c0_38 = arith.constant 0 : index
    %41 = vector.load %arg13[%c0_36, %c2, %c0_37, %c0_38] : memref<1x3x228x32xf32, #tpu.memory_space<vmem>>, vector<1x1x16x32xf32>
    %42 = vector.shape_cast %41 : vector<1x1x16x32xf32> to vector<16x32xf32>
    %43 = vector.shape_cast %16 : vector<16x32xf32> to vector<1x1x16x32xf32>
    tpu.vector_store %arg13[%c0_36, %c2, %c0_37, %c0_38], %43 {strides = array<i32>} : memref<1x3x228x32xf32, #tpu.memory_space<vmem>>, vector<1x1x16x32xf32>,
    %c0_39 = arith.constant 0 : index
    %c2_40 = arith.constant 2 : index
    %c212_41 = arith.constant 212 : index
    %c0_42 = arith.constant 0 : index
    %44 = vector.load %arg13[%c0_39, %c2_40, %c212_41, %c0_42] : memref<1x3x228x32xf32, #tpu.memory_space<vmem>>, vector<1x1x16x32xf32>
    %45 = vector.shape_cast %44 : vector<1x1x16x32xf32> to vector<16x32xf32>
    %46 = vector.shape_cast %16 : vector<16x32xf32> to vector<1x1x16x32xf32>
    tpu.vector_store %arg13[%c0_39, %c2_40, %c212_41, %c0_42], %46 {strides = array<i32>} : memref<1x3x228x32xf32, #tpu.memory_space<vmem>>, vector<1x1x16x32xf32>,
    %c0_43 = arith.constant 0 : index
    %c2_44 = arith.constant 2 : index
    %c16_45 = arith.constant 16 : index
    %c0_46 = arith.constant 0 : index
    %47 = vector.load %arg13[%c0_43, %c2_44, %c16_45, %c0_46] : memref<1x3x228x32xf32, #tpu.memory_space<vmem>>, vector<1x1x196x32xf32>
    %48 = vector.shape_cast %47 : vector<1x1x196x32xf32> to vector<196x32xf32>
    %49 = vector.shape_cast %22 : vector<196x32xf32> to vector<1x1x196x32xf32>
    tpu.vector_store %arg13[%c0_43, %c2_44, %c16_45, %c0_46], %49 {strides = array<i32>} : memref<1x3x228x32xf32, #tpu.memory_space<vmem>>, vector<1x1x196x32xf32>,
    %cst_47 = arith.constant 0.000000e+00 : f32
    %50 = vector.broadcast %cst_47 : f32 to vector<196x64xf32>
    %c0_48 = arith.constant 0 : index
    %c0_49 = arith.constant 0 : index
    %c1_50 = arith.constant 1 : index
    %c0_51 = arith.constant 0 : index
    %51 = vector.load %arg13[%c0_48, %c0_49, %c1_50, %c0_51] : memref<1x3x228x32xf32, #tpu.memory_space<vmem>>, vector<1x1x196x32xf32>
    %52 = vector.shape_cast %51 : vector<1x1x196x32xf32> to vector<196x32xf32>
    %53 = arith.truncf %52 : vector<196x32xf32> to vector<196x32xbf16>
    %c0_52 = arith.constant 0 : index
    %c0_53 = arith.constant 0 : index
    %c0_54 = arith.constant 0 : index
    %54 = vector.load %arg4[%c0_52, %c0_53, %c0_54] : memref<9x32x64xbf16, #tpu.memory_space<vmem>>, vector<1x32x64xbf16>
    %55 = vector.shape_cast %54 : vector<1x32x64xbf16> to vector<32x64xbf16>
    %cst_55 = arith.constant dense<0.000000e+00> : vector<196x64xf32>
    %56 = tpu.matmul %53, %55, %cst_55 {dimension_numbers = #tpu.dot_dimension_numbers<[1], [0], [0], [1], [0, 0, 1, 1], [], []>} : vector<196x32xbf16>, vector<32x64xbf16>, vector<196x64xf32> -> vector<196x64xf32>
    %57 = arith.addf %50, %56 : vector<196x64xf32>
    %c0_56 = arith.constant 0 : index
    %c1_57 = arith.constant 1 : index
    %c2_58 = arith.constant 2 : index
    %c0_59 = arith.constant 0 : index
    %58 = vector.load %arg13[%c0_56, %c1_57, %c2_58, %c0_59] : memref<1x3x228x32xf32, #tpu.memory_space<vmem>>, vector<1x1x196x32xf32>
    %59 = vector.shape_cast %58 : vector<1x1x196x32xf32> to vector<196x32xf32>
    %60 = arith.truncf %59 : vector<196x32xf32> to vector<196x32xbf16>
    %c1_60 = arith.constant 1 : index
    %c0_61 = arith.constant 0 : index
    %c0_62 = arith.constant 0 : index
    %61 = vector.load %arg4[%c1_60, %c0_61, %c0_62] : memref<9x32x64xbf16, #tpu.memory_space<vmem>>, vector<1x32x64xbf16>
    %62 = vector.shape_cast %61 : vector<1x32x64xbf16> to vector<32x64xbf16>
    %cst_63 = arith.constant dense<0.000000e+00> : vector<196x64xf32>
    %63 = tpu.matmul %60, %62, %cst_63 {dimension_numbers = #tpu.dot_dimension_numbers<[1], [0], [0], [1], [0, 0, 1, 1], [], []>} : vector<196x32xbf16>, vector<32x64xbf16>, vector<196x64xf32> -> vector<196x64xf32>
    %64 = arith.addf %57, %63 : vector<196x64xf32>
    %c0_64 = arith.constant 0 : index
    %c2_65 = arith.constant 2 : index
    %c3 = arith.constant 3 : index
    %c0_66 = arith.constant 0 : index
    %65 = vector.load %arg13[%c0_64, %c2_65, %c3, %c0_66] : memref<1x3x228x32xf32, #tpu.memory_space<vmem>>, vector<1x1x196x32xf32>
    %66 = vector.shape_cast %65 : vector<1x1x196x32xf32> to vector<196x32xf32>
    %67 = arith.truncf %66 : vector<196x32xf32> to vector<196x32xbf16>
    %c2_67 = arith.constant 2 : index
    %c0_68 = arith.constant 0 : index
    %c0_69 = arith.constant 0 : index
    %68 = vector.load %arg4[%c2_67, %c0_68, %c0_69] : memref<9x32x64xbf16, #tpu.memory_space<vmem>>, vector<1x32x64xbf16>
    %69 = vector.shape_cast %68 : vector<1x32x64xbf16> to vector<32x64xbf16>
    %cst_70 = arith.constant dense<0.000000e+00> : vector<196x64xf32>
    %70 = tpu.matmul %67, %69, %cst_70 {dimension_numbers = #tpu.dot_dimension_numbers<[1], [0], [0], [1], [0, 0, 1, 1], [], []>} : vector<196x32xbf16>, vector<32x64xbf16>, vector<196x64xf32> -> vector<196x64xf32>
    %71 = arith.addf %64, %70 : vector<196x64xf32>
    %c0_71 = arith.constant 0 : index
    %c0_72 = arith.constant 0 : index
    %c15 = arith.constant 15 : index
    %c0_73 = arith.constant 0 : index
    %72 = vector.load %arg13[%c0_71, %c0_72, %c15, %c0_73] : memref<1x3x228x32xf32, #tpu.memory_space<vmem>>, vector<1x1x196x32xf32>
    %73 = vector.shape_cast %72 : vector<1x1x196x32xf32> to vector<196x32xf32>
    %74 = arith.truncf %73 : vector<196x32xf32> to vector<196x32xbf16>
    %c3_74 = arith.constant 3 : index
    %c0_75 = arith.constant 0 : index
    %c0_76 = arith.constant 0 : index
    %75 = vector.load %arg4[%c3_74, %c0_75, %c0_76] : memref<9x32x64xbf16, #tpu.memory_space<vmem>>, vector<1x32x64xbf16>
    %76 = vector.shape_cast %75 : vector<1x32x64xbf16> to vector<32x64xbf16>
    %cst_77 = arith.constant dense<0.000000e+00> : vector<196x64xf32>
    %77 = tpu.matmul %74, %76, %cst_77 {dimension_numbers = #tpu.dot_dimension_numbers<[1], [0], [0], [1], [0, 0, 1, 1], [], []>} : vector<196x32xbf16>, vector<32x64xbf16>, vector<196x64xf32> -> vector<196x64xf32>
    %78 = arith.addf %71, %77 : vector<196x64xf32>
    %c0_78 = arith.constant 0 : index
    %c1_79 = arith.constant 1 : index
    %c16_80 = arith.constant 16 : index
    %c0_81 = arith.constant 0 : index
    %79 = vector.load %arg13[%c0_78, %c1_79, %c16_80, %c0_81] : memref<1x3x228x32xf32, #tpu.memory_space<vmem>>, vector<1x1x196x32xf32>
    %80 = vector.shape_cast %79 : vector<1x1x196x32xf32> to vector<196x32xf32>
    %81 = arith.truncf %80 : vector<196x32xf32> to vector<196x32xbf16>
    %c4 = arith.constant 4 : index
    %c0_82 = arith.constant 0 : index
    %c0_83 = arith.constant 0 : index
    %82 = vector.load %arg4[%c4, %c0_82, %c0_83] : memref<9x32x64xbf16, #tpu.memory_space<vmem>>, vector<1x32x64xbf16>
    %83 = vector.shape_cast %82 : vector<1x32x64xbf16> to vector<32x64xbf16>
    %cst_84 = arith.constant dense<0.000000e+00> : vector<196x64xf32>
    %84 = tpu.matmul %81, %83, %cst_84 {dimension_numbers = #tpu.dot_dimension_numbers<[1], [0], [0], [1], [0, 0, 1, 1], [], []>} : vector<196x32xbf16>, vector<32x64xbf16>, vector<196x64xf32> -> vector<196x64xf32>
    %85 = arith.addf %78, %84 : vector<196x64xf32>
    %c0_85 = arith.constant 0 : index
    %c2_86 = arith.constant 2 : index
    %c17 = arith.constant 17 : index
    %c0_87 = arith.constant 0 : index
    %86 = vector.load %arg13[%c0_85, %c2_86, %c17, %c0_87] : memref<1x3x228x32xf32, #tpu.memory_space<vmem>>, vector<1x1x196x32xf32>
    %87 = vector.shape_cast %86 : vector<1x1x196x32xf32> to vector<196x32xf32>
    %88 = arith.truncf %87 : vector<196x32xf32> to vector<196x32xbf16>
    %c5 = arith.constant 5 : index
    %c0_88 = arith.constant 0 : index
    %c0_89 = arith.constant 0 : index
    %89 = vector.load %arg4[%c5, %c0_88, %c0_89] : memref<9x32x64xbf16, #tpu.memory_space<vmem>>, vector<1x32x64xbf16>
    %90 = vector.shape_cast %89 : vector<1x32x64xbf16> to vector<32x64xbf16>
    %cst_90 = arith.constant dense<0.000000e+00> : vector<196x64xf32>
    %91 = tpu.matmul %88, %90, %cst_90 {dimension_numbers = #tpu.dot_dimension_numbers<[1], [0], [0], [1], [0, 0, 1, 1], [], []>} : vector<196x32xbf16>, vector<32x64xbf16>, vector<196x64xf32> -> vector<196x64xf32>
    %92 = arith.addf %85, %91 : vector<196x64xf32>
    %c0_91 = arith.constant 0 : index
    %c0_92 = arith.constant 0 : index
    %c29 = arith.constant 29 : index
    %c0_93 = arith.constant 0 : index
    %93 = vector.load %arg13[%c0_91, %c0_92, %c29, %c0_93] : memref<1x3x228x32xf32, #tpu.memory_space<vmem>>, vector<1x1x196x32xf32>
    %94 = vector.shape_cast %93 : vector<1x1x196x32xf32> to vector<196x32xf32>
    %95 = arith.truncf %94 : vector<196x32xf32> to vector<196x32xbf16>
    %c6 = arith.constant 6 : index
    %c0_94 = arith.constant 0 : index
    %c0_95 = arith.constant 0 : index
    %96 = vector.load %arg4[%c6, %c0_94, %c0_95] : memref<9x32x64xbf16, #tpu.memory_space<vmem>>, vector<1x32x64xbf16>
    %97 = vector.shape_cast %96 : vector<1x32x64xbf16> to vector<32x64xbf16>
    %cst_96 = arith.constant dense<0.000000e+00> : vector<196x64xf32>
    %98 = tpu.matmul %95, %97, %cst_96 {dimension_numbers = #tpu.dot_dimension_numbers<[1], [0], [0], [1], [0, 0, 1, 1], [], []>} : vector<196x32xbf16>, vector<32x64xbf16>, vector<196x64xf32> -> vector<196x64xf32>
    %99 = arith.addf %92, %98 : vector<196x64xf32>
    %c0_97 = arith.constant 0 : index
    %c1_98 = arith.constant 1 : index
    %c30 = arith.constant 30 : index
    %c0_99 = arith.constant 0 : index
    %100 = vector.load %arg13[%c0_97, %c1_98, %c30, %c0_99] : memref<1x3x228x32xf32, #tpu.memory_space<vmem>>, vector<1x1x196x32xf32>
    %101 = vector.shape_cast %100 : vector<1x1x196x32xf32> to vector<196x32xf32>
    %102 = arith.truncf %101 : vector<196x32xf32> to vector<196x32xbf16>
    %c7 = arith.constant 7 : index
    %c0_100 = arith.constant 0 : index
    %c0_101 = arith.constant 0 : index
    %103 = vector.load %arg4[%c7, %c0_100, %c0_101] : memref<9x32x64xbf16, #tpu.memory_space<vmem>>, vector<1x32x64xbf16>
    %104 = vector.shape_cast %103 : vector<1x32x64xbf16> to vector<32x64xbf16>
    %cst_102 = arith.constant dense<0.000000e+00> : vector<196x64xf32>
    %105 = tpu.matmul %102, %104, %cst_102 {dimension_numbers = #tpu.dot_dimension_numbers<[1], [0], [0], [1], [0, 0, 1, 1], [], []>} : vector<196x32xbf16>, vector<32x64xbf16>, vector<196x64xf32> -> vector<196x64xf32>
    %106 = arith.addf %99, %105 : vector<196x64xf32>
    %c0_103 = arith.constant 0 : index
    %c2_104 = arith.constant 2 : index
    %c31 = arith.constant 31 : index
    %c0_105 = arith.constant 0 : index
    %107 = vector.load %arg13[%c0_103, %c2_104, %c31, %c0_105] : memref<1x3x228x32xf32, #tpu.memory_space<vmem>>, vector<1x1x196x32xf32>
    %108 = vector.shape_cast %107 : vector<1x1x196x32xf32> to vector<196x32xf32>
    %109 = arith.truncf %108 : vector<196x32xf32> to vector<196x32xbf16>
    %c8 = arith.constant 8 : index
    %c0_106 = arith.constant 0 : index
    %c0_107 = arith.constant 0 : index
    %110 = vector.load %arg4[%c8, %c0_106, %c0_107] : memref<9x32x64xbf16, #tpu.memory_space<vmem>>, vector<1x32x64xbf16>
    %111 = vector.shape_cast %110 : vector<1x32x64xbf16> to vector<32x64xbf16>
    %cst_108 = arith.constant dense<0.000000e+00> : vector<196x64xf32>
    %112 = tpu.matmul %109, %111, %cst_108 {dimension_numbers = #tpu.dot_dimension_numbers<[1], [0], [0], [1], [0, 0, 1, 1], [], []>} : vector<196x32xbf16>, vector<32x64xbf16>, vector<196x64xf32> -> vector<196x64xf32>
    %113 = arith.addf %106, %112 : vector<196x64xf32>
    %cst_109 = arith.constant 0.000000e+00 : f32
    %114 = vector.broadcast %cst_109 : f32 to vector<16x64xf32>
    %c0_110 = arith.constant 0 : index
    %c196 = arith.constant 196 : index
    %c0_111 = arith.constant 0 : index
    %115 = vector.load %arg14[%c0_110, %c196, %c0_111] : memref<1x212x64xf32, #tpu.memory_space<vmem>>, vector<1x16x64xf32>
    %116 = vector.shape_cast %115 : vector<1x16x64xf32> to vector<16x64xf32>
    %117 = vector.shape_cast %114 : vector<16x64xf32> to vector<1x16x64xf32>
    tpu.vector_store %arg14[%c0_110, %c196, %c0_111], %117 {strides = array<i32>} : memref<1x212x64xf32, #tpu.memory_space<vmem>>, vector<1x16x64xf32>,
    %c0_112 = arith.constant 0 : index
    %c0_113 = arith.constant 0 : index
    %c0_114 = arith.constant 0 : index
    %118 = vector.load %arg14[%c0_112, %c0_113, %c0_114] : memref<1x212x64xf32, #tpu.memory_space<vmem>>, vector<1x196x64xf32>
    %119 = vector.shape_cast %118 : vector<1x196x64xf32> to vector<196x64xf32>
    %120 = vector.shape_cast %113 : vector<196x64xf32> to vector<1x196x64xf32>
    tpu.vector_store %arg14[%c0_112, %c0_113, %c0_114], %120 {strides = array<i32>} : memref<1x212x64xf32, #tpu.memory_space<vmem>>, vector<1x196x64xf32>,
    %c0_115 = arith.constant 0 : index
    %c1_116 = arith.constant 1 : index
    %c0_117 = arith.constant 0 : index
    %121 = vector.load %arg14[%c0_115, %c1_116, %c0_117] : memref<1x212x64xf32, #tpu.memory_space<vmem>>, vector<1x196x64xf32>
    %122 = vector.shape_cast %121 : vector<1x196x64xf32> to vector<196x64xf32>
    %123 = arith.maximumf %113, %122 : vector<196x64xf32>
    %c0_118 = arith.constant 0 : index
    %c14 = arith.constant 14 : index
    %c0_119 = arith.constant 0 : index
    %124 = vector.load %arg14[%c0_118, %c14, %c0_119] : memref<1x212x64xf32, #tpu.memory_space<vmem>>, vector<1x196x64xf32>
    %125 = vector.shape_cast %124 : vector<1x196x64xf32> to vector<196x64xf32>
    %c0_120 = arith.constant 0 : index
    %c15_121 = arith.constant 15 : index
    %c0_122 = arith.constant 0 : index
    %126 = vector.load %arg14[%c0_120, %c15_121, %c0_122] : memref<1x212x64xf32, #tpu.memory_space<vmem>>, vector<1x196x64xf32>
    %127 = vector.shape_cast %126 : vector<1x196x64xf32> to vector<196x64xf32>
    %128 = arith.maximumf %125, %127 : vector<196x64xf32>
    %129 = arith.maximumf %123, %128 : vector<196x64xf32>
    %c0_123 = arith.constant 0 : index
    %c0_124 = arith.constant 0 : index
    %130 = vector.load %arg7[%c0_123, %c0_124] : memref<49x196xbf16, #tpu.memory_space<vmem>>, vector<49x196xbf16>
    %131 = arith.truncf %129 : vector<196x64xf32> to vector<196x64xbf16>
    %cst_125 = arith.constant dense<0.000000e+00> : vector<49x64xf32>
    %132 = tpu.matmul %130, %131, %cst_125 {dimension_numbers = #tpu.dot_dimension_numbers<[1], [0], [0], [1], [0, 0, 1, 1], [], []>} : vector<49x196xbf16>, vector<196x64xbf16>, vector<49x64xf32> -> vector<49x64xf32>
    %c0_126 = arith.constant 0 : index
    %c0_127 = arith.constant 0 : index
    %133 = vector.load %arg5[%c0_126, %c0_127] : memref<1x64xf32, #tpu.memory_space<vmem>>, vector<1x64xf32>
    %134 = vector.broadcast %133 : vector<1x64xf32> to vector<49x64xf32>
    %135 = arith.addf %132, %134 : vector<49x64xf32>
    %cst_128 = arith.constant 0.000000e+00 : f32
    %136 = vector.broadcast %cst_128 : f32 to vector<49x64xf32>
    %137 = arith.maximumf %135, %136 : vector<49x64xf32>
    %c0_129 = arith.constant 0 : index
    %c0_130 = arith.constant 0 : index
    %c0_131 = arith.constant 0 : index
    %138 = vector.load %arg15[%c0_129, %c0_130, %c0_131] : memref<1x49x64xf32, #tpu.memory_space<vmem>>, vector<1x49x64xf32>
    %139 = vector.shape_cast %138 : vector<1x49x64xf32> to vector<49x64xf32>
    %140 = vector.shape_cast %137 : vector<49x64xf32> to vector<1x49x64xf32>
    tpu.vector_store %arg15[%c0_129, %c0_130, %c0_131], %140 {strides = array<i32>} : memref<1x49x64xf32, #tpu.memory_space<vmem>>, vector<1x49x64xf32>,
    %cst_132 = arith.constant 0.000000e+00 : f32
    %141 = vector.broadcast %cst_132 : f32 to vector<1x128xf32>
    %c0_133 = arith.constant 0 : index
    %c0_134 = arith.constant 0 : index
    %c0_135 = arith.constant 0 : index
    %142 = vector.load %arg15[%c0_133, %c0_134, %c0_135] : memref<1x49x64xf32, #tpu.memory_space<vmem>>, vector<1x1x64xf32>
    %143 = vector.shape_cast %142 : vector<1x1x64xf32> to vector<1x64xf32>
    %144 = arith.truncf %143 : vector<1x64xf32> to vector<1x64xbf16>
    %c0_136 = arith.constant 0 : index
    %c0_137 = arith.constant 0 : index
    %c0_138 = arith.constant 0 : index
    %145 = vector.load %arg8[%c0_136, %c0_137, %c0_138] : memref<49x64x128xbf16, #tpu.memory_space<vmem>>, vector<1x64x128xbf16>
    %146 = vector.shape_cast %145 : vector<1x64x128xbf16> to vector<64x128xbf16>
    %cst_139 = arith.constant dense<0.000000e+00> : vector<1x128xf32>
    %147 = tpu.matmul %144, %146, %cst_139 {dimension_numbers = #tpu.dot_dimension_numbers<[1], [0], [0], [1], [0, 0, 1, 1], [], []>} : vector<1x64xbf16>, vector<64x128xbf16>, vector<1x128xf32> -> vector<1x128xf32>
    %148 = arith.addf %141, %147 : vector<1x128xf32>
    %c0_140 = arith.constant 0 : index
    %c1_141 = arith.constant 1 : index
    %c0_142 = arith.constant 0 : index
    %149 = vector.load %arg15[%c0_140, %c1_141, %c0_142] : memref<1x49x64xf32, #tpu.memory_space<vmem>>, vector<1x1x64xf32>
    %150 = vector.shape_cast %149 : vector<1x1x64xf32> to vector<1x64xf32>
    %151 = arith.truncf %150 : vector<1x64xf32> to vector<1x64xbf16>
    %c1_143 = arith.constant 1 : index
    %c0_144 = arith.constant 0 : index
    %c0_145 = arith.constant 0 : index
    %152 = vector.load %arg8[%c1_143, %c0_144, %c0_145] : memref<49x64x128xbf16, #tpu.memory_space<vmem>>, vector<1x64x128xbf16>
    %153 = vector.shape_cast %152 : vector<1x64x128xbf16> to vector<64x128xbf16>
    %cst_146 = arith.constant dense<0.000000e+00> : vector<1x128xf32>
    %154 = tpu.matmul %151, %153, %cst_146 {dimension_numbers = #tpu.dot_dimension_numbers<[1], [0], [0], [1], [0, 0, 1, 1], [], []>} : vector<1x64xbf16>, vector<64x128xbf16>, vector<1x128xf32> -> vector<1x128xf32>
    %155 = arith.addf %148, %154 : vector<1x128xf32>
    %c0_147 = arith.constant 0 : index
    %c2_148 = arith.constant 2 : index
    %c0_149 = arith.constant 0 : index
    %156 = vector.load %arg15[%c0_147, %c2_148, %c0_149] : memref<1x49x64xf32, #tpu.memory_space<vmem>>, vector<1x1x64xf32>
    %157 = vector.shape_cast %156 : vector<1x1x64xf32> to vector<1x64xf32>
    %158 = arith.truncf %157 : vector<1x64xf32> to vector<1x64xbf16>
    %c2_150 = arith.constant 2 : index
    %c0_151 = arith.constant 0 : index
    %c0_152 = arith.constant 0 : index
    %159 = vector.load %arg8[%c2_150, %c0_151, %c0_152] : memref<49x64x128xbf16, #tpu.memory_space<vmem>>, vector<1x64x128xbf16>
    %160 = vector.shape_cast %159 : vector<1x64x128xbf16> to vector<64x128xbf16>
    %cst_153 = arith.constant dense<0.000000e+00> : vector<1x128xf32>
    %161 = tpu.matmul %158, %160, %cst_153 {dimension_numbers = #tpu.dot_dimension_numbers<[1], [0], [0], [1], [0, 0, 1, 1], [], []>} : vector<1x64xbf16>, vector<64x128xbf16>, vector<1x128xf32> -> vector<1x128xf32>
    %162 = arith.addf %155, %161 : vector<1x128xf32>
    %c0_154 = arith.constant 0 : index
    %c3_155 = arith.constant 3 : index
    %c0_156 = arith.constant 0 : index
    %163 = vector.load %arg15[%c0_154, %c3_155, %c0_156] : memref<1x49x64xf32, #tpu.memory_space<vmem>>, vector<1x1x64xf32>
    %164 = vector.shape_cast %163 : vector<1x1x64xf32> to vector<1x64xf32>
    %165 = arith.truncf %164 : vector<1x64xf32> to vector<1x64xbf16>
    %c3_157 = arith.constant 3 : index
    %c0_158 = arith.constant 0 : index
    %c0_159 = arith.constant 0 : index
    %166 = vector.load %arg8[%c3_157, %c0_158, %c0_159] : memref<49x64x128xbf16, #tpu.memory_space<vmem>>, vector<1x64x128xbf16>
    %167 = vector.shape_cast %166 : vector<1x64x128xbf16> to vector<64x128xbf16>
    %cst_160 = arith.constant dense<0.000000e+00> : vector<1x128xf32>
    %168 = tpu.matmul %165, %167, %cst_160 {dimension_numbers = #tpu.dot_dimension_numbers<[1], [0], [0], [1], [0, 0, 1, 1], [], []>} : vector<1x64xbf16>, vector<64x128xbf16>, vector<1x128xf32> -> vector<1x128xf32>
    %169 = arith.addf %162, %168 : vector<1x128xf32>
    %c0_161 = arith.constant 0 : index
    %c4_162 = arith.constant 4 : index
    %c0_163 = arith.constant 0 : index
    %170 = vector.load %arg15[%c0_161, %c4_162, %c0_163] : memref<1x49x64xf32, #tpu.memory_space<vmem>>, vector<1x1x64xf32>
    %171 = vector.shape_cast %170 : vector<1x1x64xf32> to vector<1x64xf32>
    %172 = arith.truncf %171 : vector<1x64xf32> to vector<1x64xbf16>
    %c4_164 = arith.constant 4 : index
    %c0_165 = arith.constant 0 : index
    %c0_166 = arith.constant 0 : index
    %173 = vector.load %arg8[%c4_164, %c0_165, %c0_166] : memref<49x64x128xbf16, #tpu.memory_space<vmem>>, vector<1x64x128xbf16>
    %174 = vector.shape_cast %173 : vector<1x64x128xbf16> to vector<64x128xbf16>
    %cst_167 = arith.constant dense<0.000000e+00> : vector<1x128xf32>
    %175 = tpu.matmul %172, %174, %cst_167 {dimension_numbers = #tpu.dot_dimension_numbers<[1], [0], [0], [1], [0, 0, 1, 1], [], []>} : vector<1x64xbf16>, vector<64x128xbf16>, vector<1x128xf32> -> vector<1x128xf32>
    %176 = arith.addf %169, %175 : vector<1x128xf32>
    %c0_168 = arith.constant 0 : index
    %c5_169 = arith.constant 5 : index
    %c0_170 = arith.constant 0 : index
    %177 = vector.load %arg15[%c0_168, %c5_169, %c0_170] : memref<1x49x64xf32, #tpu.memory_space<vmem>>, vector<1x1x64xf32>
    %178 = vector.shape_cast %177 : vector<1x1x64xf32> to vector<1x64xf32>
    %179 = arith.truncf %178 : vector<1x64xf32> to vector<1x64xbf16>
    %c5_171 = arith.constant 5 : index
    %c0_172 = arith.constant 0 : index
    %c0_173 = arith.constant 0 : index
    %180 = vector.load %arg8[%c5_171, %c0_172, %c0_173] : memref<49x64x128xbf16, #tpu.memory_space<vmem>>, vector<1x64x128xbf16>
    %181 = vector.shape_cast %180 : vector<1x64x128xbf16> to vector<64x128xbf16>
    %cst_174 = arith.constant dense<0.000000e+00> : vector<1x128xf32>
    %182 = tpu.matmul %179, %181, %cst_174 {dimension_numbers = #tpu.dot_dimension_numbers<[1], [0], [0], [1], [0, 0, 1, 1], [], []>} : vector<1x64xbf16>, vector<64x128xbf16>, vector<1x128xf32> -> vector<1x128xf32>
    %183 = arith.addf %176, %182 : vector<1x128xf32>
    %c0_175 = arith.constant 0 : index
    %c6_176 = arith.constant 6 : index
    %c0_177 = arith.constant 0 : index
    %184 = vector.load %arg15[%c0_175, %c6_176, %c0_177] : memref<1x49x64xf32, #tpu.memory_space<vmem>>, vector<1x1x64xf32>
    %185 = vector.shape_cast %184 : vector<1x1x64xf32> to vector<1x64xf32>
    %186 = arith.truncf %185 : vector<1x64xf32> to vector<1x64xbf16>
    %c6_178 = arith.constant 6 : index
    %c0_179 = arith.constant 0 : index
    %c0_180 = arith.constant 0 : index
    %187 = vector.load %arg8[%c6_178, %c0_179, %c0_180] : memref<49x64x128xbf16, #tpu.memory_space<vmem>>, vector<1x64x128xbf16>
    %188 = vector.shape_cast %187 : vector<1x64x128xbf16> to vector<64x128xbf16>
    %cst_181 = arith.constant dense<0.000000e+00> : vector<1x128xf32>
    %189 = tpu.matmul %186, %188, %cst_181 {dimension_numbers = #tpu.dot_dimension_numbers<[1], [0], [0], [1], [0, 0, 1, 1], [], []>} : vector<1x64xbf16>, vector<64x128xbf16>, vector<1x128xf32> -> vector<1x128xf32>
    %190 = arith.addf %183, %189 : vector<1x128xf32>
    %c0_182 = arith.constant 0 : index
    %c7_183 = arith.constant 7 : index
    %c0_184 = arith.constant 0 : index
    %191 = vector.load %arg15[%c0_182, %c7_183, %c0_184] : memref<1x49x64xf32, #tpu.memory_space<vmem>>, vector<1x1x64xf32>
    %192 = vector.shape_cast %191 : vector<1x1x64xf32> to vector<1x64xf32>
    %193 = arith.truncf %192 : vector<1x64xf32> to vector<1x64xbf16>
    %c7_185 = arith.constant 7 : index
    %c0_186 = arith.constant 0 : index
    %c0_187 = arith.constant 0 : index
    %194 = vector.load %arg8[%c7_185, %c0_186, %c0_187] : memref<49x64x128xbf16, #tpu.memory_space<vmem>>, vector<1x64x128xbf16>
    %195 = vector.shape_cast %194 : vector<1x64x128xbf16> to vector<64x128xbf16>
    %cst_188 = arith.constant dense<0.000000e+00> : vector<1x128xf32>
    %196 = tpu.matmul %193, %195, %cst_188 {dimension_numbers = #tpu.dot_dimension_numbers<[1], [0], [0], [1], [0, 0, 1, 1], [], []>} : vector<1x64xbf16>, vector<64x128xbf16>, vector<1x128xf32> -> vector<1x128xf32>
    %197 = arith.addf %190, %196 : vector<1x128xf32>
    %c0_189 = arith.constant 0 : index
    %c8_190 = arith.constant 8 : index
    %c0_191 = arith.constant 0 : index
    %198 = vector.load %arg15[%c0_189, %c8_190, %c0_191] : memref<1x49x64xf32, #tpu.memory_space<vmem>>, vector<1x1x64xf32>
    %199 = vector.shape_cast %198 : vector<1x1x64xf32> to vector<1x64xf32>
    %200 = arith.truncf %199 : vector<1x64xf32> to vector<1x64xbf16>
    %c8_192 = arith.constant 8 : index
    %c0_193 = arith.constant 0 : index
    %c0_194 = arith.constant 0 : index
    %201 = vector.load %arg8[%c8_192, %c0_193, %c0_194] : memref<49x64x128xbf16, #tpu.memory_space<vmem>>, vector<1x64x128xbf16>
    %202 = vector.shape_cast %201 : vector<1x64x128xbf16> to vector<64x128xbf16>
    %cst_195 = arith.constant dense<0.000000e+00> : vector<1x128xf32>
    %203 = tpu.matmul %200, %202, %cst_195 {dimension_numbers = #tpu.dot_dimension_numbers<[1], [0], [0], [1], [0, 0, 1, 1], [], []>} : vector<1x64xbf16>, vector<64x128xbf16>, vector<1x128xf32> -> vector<1x128xf32>
    %204 = arith.addf %197, %203 : vector<1x128xf32>
    %c0_196 = arith.constant 0 : index
    %c9 = arith.constant 9 : index
    %c0_197 = arith.constant 0 : index
    %205 = vector.load %arg15[%c0_196, %c9, %c0_197] : memref<1x49x64xf32, #tpu.memory_space<vmem>>, vector<1x1x64xf32>
    %206 = vector.shape_cast %205 : vector<1x1x64xf32> to vector<1x64xf32>
    %207 = arith.truncf %206 : vector<1x64xf32> to vector<1x64xbf16>
    %c9_198 = arith.constant 9 : index
    %c0_199 = arith.constant 0 : index
    %c0_200 = arith.constant 0 : index
    %208 = vector.load %arg8[%c9_198, %c0_199, %c0_200] : memref<49x64x128xbf16, #tpu.memory_space<vmem>>, vector<1x64x128xbf16>
    %209 = vector.shape_cast %208 : vector<1x64x128xbf16> to vector<64x128xbf16>
    %cst_201 = arith.constant dense<0.000000e+00> : vector<1x128xf32>
    %210 = tpu.matmul %207, %209, %cst_201 {dimension_numbers = #tpu.dot_dimension_numbers<[1], [0], [0], [1], [0, 0, 1, 1], [], []>} : vector<1x64xbf16>, vector<64x128xbf16>, vector<1x128xf32> -> vector<1x128xf32>
    %211 = arith.addf %204, %210 : vector<1x128xf32>
    %c0_202 = arith.constant 0 : index
    %c10 = arith.constant 10 : index
    %c0_203 = arith.constant 0 : index
    %212 = vector.load %arg15[%c0_202, %c10, %c0_203] : memref<1x49x64xf32, #tpu.memory_space<vmem>>, vector<1x1x64xf32>
    %213 = vector.shape_cast %212 : vector<1x1x64xf32> to vector<1x64xf32>
    %214 = arith.truncf %213 : vector<1x64xf32> to vector<1x64xbf16>
    %c10_204 = arith.constant 10 : index
    %c0_205 = arith.constant 0 : index
    %c0_206 = arith.constant 0 : index
    %215 = vector.load %arg8[%c10_204, %c0_205, %c0_206] : memref<49x64x128xbf16, #tpu.memory_space<vmem>>, vector<1x64x128xbf16>
    %216 = vector.shape_cast %215 : vector<1x64x128xbf16> to vector<64x128xbf16>
    %cst_207 = arith.constant dense<0.000000e+00> : vector<1x128xf32>
    %217 = tpu.matmul %214, %216, %cst_207 {dimension_numbers = #tpu.dot_dimension_numbers<[1], [0], [0], [1], [0, 0, 1, 1], [], []>} : vector<1x64xbf16>, vector<64x128xbf16>, vector<1x128xf32> -> vector<1x128xf32>
    %218 = arith.addf %211, %217 : vector<1x128xf32>
    %c0_208 = arith.constant 0 : index
    %c11 = arith.constant 11 : index
    %c0_209 = arith.constant 0 : index
    %219 = vector.load %arg15[%c0_208, %c11, %c0_209] : memref<1x49x64xf32, #tpu.memory_space<vmem>>, vector<1x1x64xf32>
    %220 = vector.shape_cast %219 : vector<1x1x64xf32> to vector<1x64xf32>
    %221 = arith.truncf %220 : vector<1x64xf32> to vector<1x64xbf16>
    %c11_210 = arith.constant 11 : index
    %c0_211 = arith.constant 0 : index
    %c0_212 = arith.constant 0 : index
    %222 = vector.load %arg8[%c11_210, %c0_211, %c0_212] : memref<49x64x128xbf16, #tpu.memory_space<vmem>>, vector<1x64x128xbf16>
    %223 = vector.shape_cast %222 : vector<1x64x128xbf16> to vector<64x128xbf16>
    %cst_213 = arith.constant dense<0.000000e+00> : vector<1x128xf32>
    %224 = tpu.matmul %221, %223, %cst_213 {dimension_numbers = #tpu.dot_dimension_numbers<[1], [0], [0], [1], [0, 0, 1, 1], [], []>} : vector<1x64xbf16>, vector<64x128xbf16>, vector<1x128xf32> -> vector<1x128xf32>
    %225 = arith.addf %218, %224 : vector<1x128xf32>
    %c0_214 = arith.constant 0 : index
    %c12 = arith.constant 12 : index
    %c0_215 = arith.constant 0 : index
    %226 = vector.load %arg15[%c0_214, %c12, %c0_215] : memref<1x49x64xf32, #tpu.memory_space<vmem>>, vector<1x1x64xf32>
    %227 = vector.shape_cast %226 : vector<1x1x64xf32> to vector<1x64xf32>
    %228 = arith.truncf %227 : vector<1x64xf32> to vector<1x64xbf16>
    %c12_216 = arith.constant 12 : index
    %c0_217 = arith.constant 0 : index
    %c0_218 = arith.constant 0 : index
    %229 = vector.load %arg8[%c12_216, %c0_217, %c0_218] : memref<49x64x128xbf16, #tpu.memory_space<vmem>>, vector<1x64x128xbf16>
    %230 = vector.shape_cast %229 : vector<1x64x128xbf16> to vector<64x128xbf16>
    %cst_219 = arith.constant dense<0.000000e+00> : vector<1x128xf32>
    %231 = tpu.matmul %228, %230, %cst_219 {dimension_numbers = #tpu.dot_dimension_numbers<[1], [0], [0], [1], [0, 0, 1, 1], [], []>} : vector<1x64xbf16>, vector<64x128xbf16>, vector<1x128xf32> -> vector<1x128xf32>
    %232 = arith.addf %225, %231 : vector<1x128xf32>
    %c0_220 = arith.constant 0 : index
    %c13 = arith.constant 13 : index
    %c0_221 = arith.constant 0 : index
    %233 = vector.load %arg15[%c0_220, %c13, %c0_221] : memref<1x49x64xf32, #tpu.memory_space<vmem>>, vector<1x1x64xf32>
    %234 = vector.shape_cast %233 : vector<1x1x64xf32> to vector<1x64xf32>
    %235 = arith.truncf %234 : vector<1x64xf32> to vector<1x64xbf16>
    %c13_222 = arith.constant 13 : index
    %c0_223 = arith.constant 0 : index
    %c0_224 = arith.constant 0 : index
    %236 = vector.load %arg8[%c13_222, %c0_223, %c0_224] : memref<49x64x128xbf16, #tpu.memory_space<vmem>>, vector<1x64x128xbf16>
    %237 = vector.shape_cast %236 : vector<1x64x128xbf16> to vector<64x128xbf16>
    %cst_225 = arith.constant dense<0.000000e+00> : vector<1x128xf32>
    %238 = tpu.matmul %235, %237, %cst_225 {dimension_numbers = #tpu.dot_dimension_numbers<[1], [0], [0], [1], [0, 0, 1, 1], [], []>} : vector<1x64xbf16>, vector<64x128xbf16>, vector<1x128xf32> -> vector<1x128xf32>
    %239 = arith.addf %232, %238 : vector<1x128xf32>
    %c0_226 = arith.constant 0 : index
    %c14_227 = arith.constant 14 : index
    %c0_228 = arith.constant 0 : index
    %240 = vector.load %arg15[%c0_226, %c14_227, %c0_228] : memref<1x49x64xf32, #tpu.memory_space<vmem>>, vector<1x1x64xf32>
    %241 = vector.shape_cast %240 : vector<1x1x64xf32> to vector<1x64xf32>
    %242 = arith.truncf %241 : vector<1x64xf32> to vector<1x64xbf16>
    %c14_229 = arith.constant 14 : index
    %c0_230 = arith.constant 0 : index
    %c0_231 = arith.constant 0 : index
    %243 = vector.load %arg8[%c14_229, %c0_230, %c0_231] : memref<49x64x128xbf16, #tpu.memory_space<vmem>>, vector<1x64x128xbf16>
    %244 = vector.shape_cast %243 : vector<1x64x128xbf16> to vector<64x128xbf16>
    %cst_232 = arith.constant dense<0.000000e+00> : vector<1x128xf32>
    %245 = tpu.matmul %242, %244, %cst_232 {dimension_numbers = #tpu.dot_dimension_numbers<[1], [0], [0], [1], [0, 0, 1, 1], [], []>} : vector<1x64xbf16>, vector<64x128xbf16>, vector<1x128xf32> -> vector<1x128xf32>
    %246 = arith.addf %239, %245 : vector<1x128xf32>
    %c0_233 = arith.constant 0 : index
    %c15_234 = arith.constant 15 : index
    %c0_235 = arith.constant 0 : index
    %247 = vector.load %arg15[%c0_233, %c15_234, %c0_235] : memref<1x49x64xf32, #tpu.memory_space<vmem>>, vector<1x1x64xf32>
    %248 = vector.shape_cast %247 : vector<1x1x64xf32> to vector<1x64xf32>
    %249 = arith.truncf %248 : vector<1x64xf32> to vector<1x64xbf16>
    %c15_236 = arith.constant 15 : index
    %c0_237 = arith.constant 0 : index
    %c0_238 = arith.constant 0 : index
    %250 = vector.load %arg8[%c15_236, %c0_237, %c0_238] : memref<49x64x128xbf16, #tpu.memory_space<vmem>>, vector<1x64x128xbf16>
    %251 = vector.shape_cast %250 : vector<1x64x128xbf16> to vector<64x128xbf16>
    %cst_239 = arith.constant dense<0.000000e+00> : vector<1x128xf32>
    %252 = tpu.matmul %249, %251, %cst_239 {dimension_numbers = #tpu.dot_dimension_numbers<[1], [0], [0], [1], [0, 0, 1, 1], [], []>} : vector<1x64xbf16>, vector<64x128xbf16>, vector<1x128xf32> -> vector<1x128xf32>
    %253 = arith.addf %246, %252 : vector<1x128xf32>
    %c0_240 = arith.constant 0 : index
    %c16_241 = arith.constant 16 : index
    %c0_242 = arith.constant 0 : index
    %254 = vector.load %arg15[%c0_240, %c16_241, %c0_242] : memref<1x49x64xf32, #tpu.memory_space<vmem>>, vector<1x1x64xf32>
    %255 = vector.shape_cast %254 : vector<1x1x64xf32> to vector<1x64xf32>
    %256 = arith.truncf %255 : vector<1x64xf32> to vector<1x64xbf16>
    %c16_243 = arith.constant 16 : index
    %c0_244 = arith.constant 0 : index
    %c0_245 = arith.constant 0 : index
    %257 = vector.load %arg8[%c16_243, %c0_244, %c0_245] : memref<49x64x128xbf16, #tpu.memory_space<vmem>>, vector<1x64x128xbf16>
    %258 = vector.shape_cast %257 : vector<1x64x128xbf16> to vector<64x128xbf16>
    %cst_246 = arith.constant dense<0.000000e+00> : vector<1x128xf32>
    %259 = tpu.matmul %256, %258, %cst_246 {dimension_numbers = #tpu.dot_dimension_numbers<[1], [0], [0], [1], [0, 0, 1, 1], [], []>} : vector<1x64xbf16>, vector<64x128xbf16>, vector<1x128xf32> -> vector<1x128xf32>
    %260 = arith.addf %253, %259 : vector<1x128xf32>
    %c0_247 = arith.constant 0 : index
    %c17_248 = arith.constant 17 : index
    %c0_249 = arith.constant 0 : index
    %261 = vector.load %arg15[%c0_247, %c17_248, %c0_249] : memref<1x49x64xf32, #tpu.memory_space<vmem>>, vector<1x1x64xf32>
    %262 = vector.shape_cast %261 : vector<1x1x64xf32> to vector<1x64xf32>
    %263 = arith.truncf %262 : vector<1x64xf32> to vector<1x64xbf16>
    %c17_250 = arith.constant 17 : index
    %c0_251 = arith.constant 0 : index
    %c0_252 = arith.constant 0 : index
    %264 = vector.load %arg8[%c17_250, %c0_251, %c0_252] : memref<49x64x128xbf16, #tpu.memory_space<vmem>>, vector<1x64x128xbf16>
    %265 = vector.shape_cast %264 : vector<1x64x128xbf16> to vector<64x128xbf16>
    %cst_253 = arith.constant dense<0.000000e+00> : vector<1x128xf32>
    %266 = tpu.matmul %263, %265, %cst_253 {dimension_numbers = #tpu.dot_dimension_numbers<[1], [0], [0], [1], [0, 0, 1, 1], [], []>} : vector<1x64xbf16>, vector<64x128xbf16>, vector<1x128xf32> -> vector<1x128xf32>
    %267 = arith.addf %260, %266 : vector<1x128xf32>
    %c0_254 = arith.constant 0 : index
    %c18 = arith.constant 18 : index
    %c0_255 = arith.constant 0 : index
    %268 = vector.load %arg15[%c0_254, %c18, %c0_255] : memref<1x49x64xf32, #tpu.memory_space<vmem>>, vector<1x1x64xf32>
    %269 = vector.shape_cast %268 : vector<1x1x64xf32> to vector<1x64xf32>
    %270 = arith.truncf %269 : vector<1x64xf32> to vector<1x64xbf16>
    %c18_256 = arith.constant 18 : index
    %c0_257 = arith.constant 0 : index
    %c0_258 = arith.constant 0 : index
    %271 = vector.load %arg8[%c18_256, %c0_257, %c0_258] : memref<49x64x128xbf16, #tpu.memory_space<vmem>>, vector<1x64x128xbf16>
    %272 = vector.shape_cast %271 : vector<1x64x128xbf16> to vector<64x128xbf16>
    %cst_259 = arith.constant dense<0.000000e+00> : vector<1x128xf32>
    %273 = tpu.matmul %270, %272, %cst_259 {dimension_numbers = #tpu.dot_dimension_numbers<[1], [0], [0], [1], [0, 0, 1, 1], [], []>} : vector<1x64xbf16>, vector<64x128xbf16>, vector<1x128xf32> -> vector<1x128xf32>
    %274 = arith.addf %267, %273 : vector<1x128xf32>
    %c0_260 = arith.constant 0 : index
    %c19 = arith.constant 19 : index
    %c0_261 = arith.constant 0 : index
    %275 = vector.load %arg15[%c0_260, %c19, %c0_261] : memref<1x49x64xf32, #tpu.memory_space<vmem>>, vector<1x1x64xf32>
    %276 = vector.shape_cast %275 : vector<1x1x64xf32> to vector<1x64xf32>
    %277 = arith.truncf %276 : vector<1x64xf32> to vector<1x64xbf16>
    %c19_262 = arith.constant 19 : index
    %c0_263 = arith.constant 0 : index
    %c0_264 = arith.constant 0 : index
    %278 = vector.load %arg8[%c19_262, %c0_263, %c0_264] : memref<49x64x128xbf16, #tpu.memory_space<vmem>>, vector<1x64x128xbf16>
    %279 = vector.shape_cast %278 : vector<1x64x128xbf16> to vector<64x128xbf16>
    %cst_265 = arith.constant dense<0.000000e+00> : vector<1x128xf32>
    %280 = tpu.matmul %277, %279, %cst_265 {dimension_numbers = #tpu.dot_dimension_numbers<[1], [0], [0], [1], [0, 0, 1, 1], [], []>} : vector<1x64xbf16>, vector<64x128xbf16>, vector<1x128xf32> -> vector<1x128xf32>
    %281 = arith.addf %274, %280 : vector<1x128xf32>
    %c0_266 = arith.constant 0 : index
    %c20 = arith.constant 20 : index
    %c0_267 = arith.constant 0 : index
    %282 = vector.load %arg15[%c0_266, %c20, %c0_267] : memref<1x49x64xf32, #tpu.memory_space<vmem>>, vector<1x1x64xf32>
    %283 = vector.shape_cast %282 : vector<1x1x64xf32> to vector<1x64xf32>
    %284 = arith.truncf %283 : vector<1x64xf32> to vector<1x64xbf16>
    %c20_268 = arith.constant 20 : index
    %c0_269 = arith.constant 0 : index
    %c0_270 = arith.constant 0 : index
    %285 = vector.load %arg8[%c20_268, %c0_269, %c0_270] : memref<49x64x128xbf16, #tpu.memory_space<vmem>>, vector<1x64x128xbf16>
    %286 = vector.shape_cast %285 : vector<1x64x128xbf16> to vector<64x128xbf16>
    %cst_271 = arith.constant dense<0.000000e+00> : vector<1x128xf32>
    %287 = tpu.matmul %284, %286, %cst_271 {dimension_numbers = #tpu.dot_dimension_numbers<[1], [0], [0], [1], [0, 0, 1, 1], [], []>} : vector<1x64xbf16>, vector<64x128xbf16>, vector<1x128xf32> -> vector<1x128xf32>
    %288 = arith.addf %281, %287 : vector<1x128xf32>
    %c0_272 = arith.constant 0 : index
    %c21 = arith.constant 21 : index
    %c0_273 = arith.constant 0 : index
    %289 = vector.load %arg15[%c0_272, %c21, %c0_273] : memref<1x49x64xf32, #tpu.memory_space<vmem>>, vector<1x1x64xf32>
    %290 = vector.shape_cast %289 : vector<1x1x64xf32> to vector<1x64xf32>
    %291 = arith.truncf %290 : vector<1x64xf32> to vector<1x64xbf16>
    %c21_274 = arith.constant 21 : index
    %c0_275 = arith.constant 0 : index
    %c0_276 = arith.constant 0 : index
    %292 = vector.load %arg8[%c21_274, %c0_275, %c0_276] : memref<49x64x128xbf16, #tpu.memory_space<vmem>>, vector<1x64x128xbf16>
    %293 = vector.shape_cast %292 : vector<1x64x128xbf16> to vector<64x128xbf16>
    %cst_277 = arith.constant dense<0.000000e+00> : vector<1x128xf32>
    %294 = tpu.matmul %291, %293, %cst_277 {dimension_numbers = #tpu.dot_dimension_numbers<[1], [0], [0], [1], [0, 0, 1, 1], [], []>} : vector<1x64xbf16>, vector<64x128xbf16>, vector<1x128xf32> -> vector<1x128xf32>
    %295 = arith.addf %288, %294 : vector<1x128xf32>
    %c0_278 = arith.constant 0 : index
    %c22 = arith.constant 22 : index
    %c0_279 = arith.constant 0 : index
    %296 = vector.load %arg15[%c0_278, %c22, %c0_279] : memref<1x49x64xf32, #tpu.memory_space<vmem>>, vector<1x1x64xf32>
    %297 = vector.shape_cast %296 : vector<1x1x64xf32> to vector<1x64xf32>
    %298 = arith.truncf %297 : vector<1x64xf32> to vector<1x64xbf16>
    %c22_280 = arith.constant 22 : index
    %c0_281 = arith.constant 0 : index
    %c0_282 = arith.constant 0 : index
    %299 = vector.load %arg8[%c22_280, %c0_281, %c0_282] : memref<49x64x128xbf16, #tpu.memory_space<vmem>>, vector<1x64x128xbf16>
    %300 = vector.shape_cast %299 : vector<1x64x128xbf16> to vector<64x128xbf16>
    %cst_283 = arith.constant dense<0.000000e+00> : vector<1x128xf32>
    %301 = tpu.matmul %298, %300, %cst_283 {dimension_numbers = #tpu.dot_dimension_numbers<[1], [0], [0], [1], [0, 0, 1, 1], [], []>} : vector<1x64xbf16>, vector<64x128xbf16>, vector<1x128xf32> -> vector<1x128xf32>
    %302 = arith.addf %295, %301 : vector<1x128xf32>
    %c0_284 = arith.constant 0 : index
    %c23 = arith.constant 23 : index
    %c0_285 = arith.constant 0 : index
    %303 = vector.load %arg15[%c0_284, %c23, %c0_285] : memref<1x49x64xf32, #tpu.memory_space<vmem>>, vector<1x1x64xf32>
    %304 = vector.shape_cast %303 : vector<1x1x64xf32> to vector<1x64xf32>
    %305 = arith.truncf %304 : vector<1x64xf32> to vector<1x64xbf16>
    %c23_286 = arith.constant 23 : index
    %c0_287 = arith.constant 0 : index
    %c0_288 = arith.constant 0 : index
    %306 = vector.load %arg8[%c23_286, %c0_287, %c0_288] : memref<49x64x128xbf16, #tpu.memory_space<vmem>>, vector<1x64x128xbf16>
    %307 = vector.shape_cast %306 : vector<1x64x128xbf16> to vector<64x128xbf16>
    %cst_289 = arith.constant dense<0.000000e+00> : vector<1x128xf32>
    %308 = tpu.matmul %305, %307, %cst_289 {dimension_numbers = #tpu.dot_dimension_numbers<[1], [0], [0], [1], [0, 0, 1, 1], [], []>} : vector<1x64xbf16>, vector<64x128xbf16>, vector<1x128xf32> -> vector<1x128xf32>
    %309 = arith.addf %302, %308 : vector<1x128xf32>
    %c0_290 = arith.constant 0 : index
    %c24 = arith.constant 24 : index
    %c0_291 = arith.constant 0 : index
    %310 = vector.load %arg15[%c0_290, %c24, %c0_291] : memref<1x49x64xf32, #tpu.memory_space<vmem>>, vector<1x1x64xf32>
    %311 = vector.shape_cast %310 : vector<1x1x64xf32> to vector<1x64xf32>
    %312 = arith.truncf %311 : vector<1x64xf32> to vector<1x64xbf16>
    %c24_292 = arith.constant 24 : index
    %c0_293 = arith.constant 0 : index
    %c0_294 = arith.constant 0 : index
    %313 = vector.load %arg8[%c24_292, %c0_293, %c0_294] : memref<49x64x128xbf16, #tpu.memory_space<vmem>>, vector<1x64x128xbf16>
    %314 = vector.shape_cast %313 : vector<1x64x128xbf16> to vector<64x128xbf16>
    %cst_295 = arith.constant dense<0.000000e+00> : vector<1x128xf32>
    %315 = tpu.matmul %312, %314, %cst_295 {dimension_numbers = #tpu.dot_dimension_numbers<[1], [0], [0], [1], [0, 0, 1, 1], [], []>} : vector<1x64xbf16>, vector<64x128xbf16>, vector<1x128xf32> -> vector<1x128xf32>
    %316 = arith.addf %309, %315 : vector<1x128xf32>
    %c0_296 = arith.constant 0 : index
    %c25 = arith.constant 25 : index
    %c0_297 = arith.constant 0 : index
    %317 = vector.load %arg15[%c0_296, %c25, %c0_297] : memref<1x49x64xf32, #tpu.memory_space<vmem>>, vector<1x1x64xf32>
    %318 = vector.shape_cast %317 : vector<1x1x64xf32> to vector<1x64xf32>
    %319 = arith.truncf %318 : vector<1x64xf32> to vector<1x64xbf16>
    %c25_298 = arith.constant 25 : index
    %c0_299 = arith.constant 0 : index
    %c0_300 = arith.constant 0 : index
    %320 = vector.load %arg8[%c25_298, %c0_299, %c0_300] : memref<49x64x128xbf16, #tpu.memory_space<vmem>>, vector<1x64x128xbf16>
    %321 = vector.shape_cast %320 : vector<1x64x128xbf16> to vector<64x128xbf16>
    %cst_301 = arith.constant dense<0.000000e+00> : vector<1x128xf32>
    %322 = tpu.matmul %319, %321, %cst_301 {dimension_numbers = #tpu.dot_dimension_numbers<[1], [0], [0], [1], [0, 0, 1, 1], [], []>} : vector<1x64xbf16>, vector<64x128xbf16>, vector<1x128xf32> -> vector<1x128xf32>
    %323 = arith.addf %316, %322 : vector<1x128xf32>
    %c0_302 = arith.constant 0 : index
    %c26 = arith.constant 26 : index
    %c0_303 = arith.constant 0 : index
    %324 = vector.load %arg15[%c0_302, %c26, %c0_303] : memref<1x49x64xf32, #tpu.memory_space<vmem>>, vector<1x1x64xf32>
    %325 = vector.shape_cast %324 : vector<1x1x64xf32> to vector<1x64xf32>
    %326 = arith.truncf %325 : vector<1x64xf32> to vector<1x64xbf16>
    %c26_304 = arith.constant 26 : index
    %c0_305 = arith.constant 0 : index
    %c0_306 = arith.constant 0 : index
    %327 = vector.load %arg8[%c26_304, %c0_305, %c0_306] : memref<49x64x128xbf16, #tpu.memory_space<vmem>>, vector<1x64x128xbf16>
    %328 = vector.shape_cast %327 : vector<1x64x128xbf16> to vector<64x128xbf16>
    %cst_307 = arith.constant dense<0.000000e+00> : vector<1x128xf32>
    %329 = tpu.matmul %326, %328, %cst_307 {dimension_numbers = #tpu.dot_dimension_numbers<[1], [0], [0], [1], [0, 0, 1, 1], [], []>} : vector<1x64xbf16>, vector<64x128xbf16>, vector<1x128xf32> -> vector<1x128xf32>
    %330 = arith.addf %323, %329 : vector<1x128xf32>
    %c0_308 = arith.constant 0 : index
    %c27 = arith.constant 27 : index
    %c0_309 = arith.constant 0 : index
    %331 = vector.load %arg15[%c0_308, %c27, %c0_309] : memref<1x49x64xf32, #tpu.memory_space<vmem>>, vector<1x1x64xf32>
    %332 = vector.shape_cast %331 : vector<1x1x64xf32> to vector<1x64xf32>
    %333 = arith.truncf %332 : vector<1x64xf32> to vector<1x64xbf16>
    %c27_310 = arith.constant 27 : index
    %c0_311 = arith.constant 0 : index
    %c0_312 = arith.constant 0 : index
    %334 = vector.load %arg8[%c27_310, %c0_311, %c0_312] : memref<49x64x128xbf16, #tpu.memory_space<vmem>>, vector<1x64x128xbf16>
    %335 = vector.shape_cast %334 : vector<1x64x128xbf16> to vector<64x128xbf16>
    %cst_313 = arith.constant dense<0.000000e+00> : vector<1x128xf32>
    %336 = tpu.matmul %333, %335, %cst_313 {dimension_numbers = #tpu.dot_dimension_numbers<[1], [0], [0], [1], [0, 0, 1, 1], [], []>} : vector<1x64xbf16>, vector<64x128xbf16>, vector<1x128xf32> -> vector<1x128xf32>
    %337 = arith.addf %330, %336 : vector<1x128xf32>
    %c0_314 = arith.constant 0 : index
    %c28 = arith.constant 28 : index
    %c0_315 = arith.constant 0 : index
    %338 = vector.load %arg15[%c0_314, %c28, %c0_315] : memref<1x49x64xf32, #tpu.memory_space<vmem>>, vector<1x1x64xf32>
    %339 = vector.shape_cast %338 : vector<1x1x64xf32> to vector<1x64xf32>
    %340 = arith.truncf %339 : vector<1x64xf32> to vector<1x64xbf16>
    %c28_316 = arith.constant 28 : index
    %c0_317 = arith.constant 0 : index
    %c0_318 = arith.constant 0 : index
    %341 = vector.load %arg8[%c28_316, %c0_317, %c0_318] : memref<49x64x128xbf16, #tpu.memory_space<vmem>>, vector<1x64x128xbf16>
    %342 = vector.shape_cast %341 : vector<1x64x128xbf16> to vector<64x128xbf16>
    %cst_319 = arith.constant dense<0.000000e+00> : vector<1x128xf32>
    %343 = tpu.matmul %340, %342, %cst_319 {dimension_numbers = #tpu.dot_dimension_numbers<[1], [0], [0], [1], [0, 0, 1, 1], [], []>} : vector<1x64xbf16>, vector<64x128xbf16>, vector<1x128xf32> -> vector<1x128xf32>
    %344 = arith.addf %337, %343 : vector<1x128xf32>
    %c0_320 = arith.constant 0 : index
    %c29_321 = arith.constant 29 : index
    %c0_322 = arith.constant 0 : index
    %345 = vector.load %arg15[%c0_320, %c29_321, %c0_322] : memref<1x49x64xf32, #tpu.memory_space<vmem>>, vector<1x1x64xf32>
    %346 = vector.shape_cast %345 : vector<1x1x64xf32> to vector<1x64xf32>
    %347 = arith.truncf %346 : vector<1x64xf32> to vector<1x64xbf16>
    %c29_323 = arith.constant 29 : index
    %c0_324 = arith.constant 0 : index
    %c0_325 = arith.constant 0 : index
    %348 = vector.load %arg8[%c29_323, %c0_324, %c0_325] : memref<49x64x128xbf16, #tpu.memory_space<vmem>>, vector<1x64x128xbf16>
    %349 = vector.shape_cast %348 : vector<1x64x128xbf16> to vector<64x128xbf16>
    %cst_326 = arith.constant dense<0.000000e+00> : vector<1x128xf32>
    %350 = tpu.matmul %347, %349, %cst_326 {dimension_numbers = #tpu.dot_dimension_numbers<[1], [0], [0], [1], [0, 0, 1, 1], [], []>} : vector<1x64xbf16>, vector<64x128xbf16>, vector<1x128xf32> -> vector<1x128xf32>
    %351 = arith.addf %344, %350 : vector<1x128xf32>
    %c0_327 = arith.constant 0 : index
    %c30_328 = arith.constant 30 : index
    %c0_329 = arith.constant 0 : index
    %352 = vector.load %arg15[%c0_327, %c30_328, %c0_329] : memref<1x49x64xf32, #tpu.memory_space<vmem>>, vector<1x1x64xf32>
    %353 = vector.shape_cast %352 : vector<1x1x64xf32> to vector<1x64xf32>
    %354 = arith.truncf %353 : vector<1x64xf32> to vector<1x64xbf16>
    %c30_330 = arith.constant 30 : index
    %c0_331 = arith.constant 0 : index
    %c0_332 = arith.constant 0 : index
    %355 = vector.load %arg8[%c30_330, %c0_331, %c0_332] : memref<49x64x128xbf16, #tpu.memory_space<vmem>>, vector<1x64x128xbf16>
    %356 = vector.shape_cast %355 : vector<1x64x128xbf16> to vector<64x128xbf16>
    %cst_333 = arith.constant dense<0.000000e+00> : vector<1x128xf32>
    %357 = tpu.matmul %354, %356, %cst_333 {dimension_numbers = #tpu.dot_dimension_numbers<[1], [0], [0], [1], [0, 0, 1, 1], [], []>} : vector<1x64xbf16>, vector<64x128xbf16>, vector<1x128xf32> -> vector<1x128xf32>
    %358 = arith.addf %351, %357 : vector<1x128xf32>
    %c0_334 = arith.constant 0 : index
    %c31_335 = arith.constant 31 : index
    %c0_336 = arith.constant 0 : index
    %359 = vector.load %arg15[%c0_334, %c31_335, %c0_336] : memref<1x49x64xf32, #tpu.memory_space<vmem>>, vector<1x1x64xf32>
    %360 = vector.shape_cast %359 : vector<1x1x64xf32> to vector<1x64xf32>
    %361 = arith.truncf %360 : vector<1x64xf32> to vector<1x64xbf16>
    %c31_337 = arith.constant 31 : index
    %c0_338 = arith.constant 0 : index
    %c0_339 = arith.constant 0 : index
    %362 = vector.load %arg8[%c31_337, %c0_338, %c0_339] : memref<49x64x128xbf16, #tpu.memory_space<vmem>>, vector<1x64x128xbf16>
    %363 = vector.shape_cast %362 : vector<1x64x128xbf16> to vector<64x128xbf16>
    %cst_340 = arith.constant dense<0.000000e+00> : vector<1x128xf32>
    %364 = tpu.matmul %361, %363, %cst_340 {dimension_numbers = #tpu.dot_dimension_numbers<[1], [0], [0], [1], [0, 0, 1, 1], [], []>} : vector<1x64xbf16>, vector<64x128xbf16>, vector<1x128xf32> -> vector<1x128xf32>
    %365 = arith.addf %358, %364 : vector<1x128xf32>
    %c0_341 = arith.constant 0 : index
    %c32 = arith.constant 32 : index
    %c0_342 = arith.constant 0 : index
    %366 = vector.load %arg15[%c0_341, %c32, %c0_342] : memref<1x49x64xf32, #tpu.memory_space<vmem>>, vector<1x1x64xf32>
    %367 = vector.shape_cast %366 : vector<1x1x64xf32> to vector<1x64xf32>
    %368 = arith.truncf %367 : vector<1x64xf32> to vector<1x64xbf16>
    %c32_343 = arith.constant 32 : index
    %c0_344 = arith.constant 0 : index
    %c0_345 = arith.constant 0 : index
    %369 = vector.load %arg8[%c32_343, %c0_344, %c0_345] : memref<49x64x128xbf16, #tpu.memory_space<vmem>>, vector<1x64x128xbf16>
    %370 = vector.shape_cast %369 : vector<1x64x128xbf16> to vector<64x128xbf16>
    %cst_346 = arith.constant dense<0.000000e+00> : vector<1x128xf32>
    %371 = tpu.matmul %368, %370, %cst_346 {dimension_numbers = #tpu.dot_dimension_numbers<[1], [0], [0], [1], [0, 0, 1, 1], [], []>} : vector<1x64xbf16>, vector<64x128xbf16>, vector<1x128xf32> -> vector<1x128xf32>
    %372 = arith.addf %365, %371 : vector<1x128xf32>
    %c0_347 = arith.constant 0 : index
    %c33 = arith.constant 33 : index
    %c0_348 = arith.constant 0 : index
    %373 = vector.load %arg15[%c0_347, %c33, %c0_348] : memref<1x49x64xf32, #tpu.memory_space<vmem>>, vector<1x1x64xf32>
    %374 = vector.shape_cast %373 : vector<1x1x64xf32> to vector<1x64xf32>
    %375 = arith.truncf %374 : vector<1x64xf32> to vector<1x64xbf16>
    %c33_349 = arith.constant 33 : index
    %c0_350 = arith.constant 0 : index
    %c0_351 = arith.constant 0 : index
    %376 = vector.load %arg8[%c33_349, %c0_350, %c0_351] : memref<49x64x128xbf16, #tpu.memory_space<vmem>>, vector<1x64x128xbf16>
    %377 = vector.shape_cast %376 : vector<1x64x128xbf16> to vector<64x128xbf16>
    %cst_352 = arith.constant dense<0.000000e+00> : vector<1x128xf32>
    %378 = tpu.matmul %375, %377, %cst_352 {dimension_numbers = #tpu.dot_dimension_numbers<[1], [0], [0], [1], [0, 0, 1, 1], [], []>} : vector<1x64xbf16>, vector<64x128xbf16>, vector<1x128xf32> -> vector<1x128xf32>
    %379 = arith.addf %372, %378 : vector<1x128xf32>
    %c0_353 = arith.constant 0 : index
    %c34 = arith.constant 34 : index
    %c0_354 = arith.constant 0 : index
    %380 = vector.load %arg15[%c0_353, %c34, %c0_354] : memref<1x49x64xf32, #tpu.memory_space<vmem>>, vector<1x1x64xf32>
    %381 = vector.shape_cast %380 : vector<1x1x64xf32> to vector<1x64xf32>
    %382 = arith.truncf %381 : vector<1x64xf32> to vector<1x64xbf16>
    %c34_355 = arith.constant 34 : index
    %c0_356 = arith.constant 0 : index
    %c0_357 = arith.constant 0 : index
    %383 = vector.load %arg8[%c34_355, %c0_356, %c0_357] : memref<49x64x128xbf16, #tpu.memory_space<vmem>>, vector<1x64x128xbf16>
    %384 = vector.shape_cast %383 : vector<1x64x128xbf16> to vector<64x128xbf16>
    %cst_358 = arith.constant dense<0.000000e+00> : vector<1x128xf32>
    %385 = tpu.matmul %382, %384, %cst_358 {dimension_numbers = #tpu.dot_dimension_numbers<[1], [0], [0], [1], [0, 0, 1, 1], [], []>} : vector<1x64xbf16>, vector<64x128xbf16>, vector<1x128xf32> -> vector<1x128xf32>
    %386 = arith.addf %379, %385 : vector<1x128xf32>
    %c0_359 = arith.constant 0 : index
    %c35 = arith.constant 35 : index
    %c0_360 = arith.constant 0 : index
    %387 = vector.load %arg15[%c0_359, %c35, %c0_360] : memref<1x49x64xf32, #tpu.memory_space<vmem>>, vector<1x1x64xf32>
    %388 = vector.shape_cast %387 : vector<1x1x64xf32> to vector<1x64xf32>
    %389 = arith.truncf %388 : vector<1x64xf32> to vector<1x64xbf16>
    %c35_361 = arith.constant 35 : index
    %c0_362 = arith.constant 0 : index
    %c0_363 = arith.constant 0 : index
    %390 = vector.load %arg8[%c35_361, %c0_362, %c0_363] : memref<49x64x128xbf16, #tpu.memory_space<vmem>>, vector<1x64x128xbf16>
    %391 = vector.shape_cast %390 : vector<1x64x128xbf16> to vector<64x128xbf16>
    %cst_364 = arith.constant dense<0.000000e+00> : vector<1x128xf32>
    %392 = tpu.matmul %389, %391, %cst_364 {dimension_numbers = #tpu.dot_dimension_numbers<[1], [0], [0], [1], [0, 0, 1, 1], [], []>} : vector<1x64xbf16>, vector<64x128xbf16>, vector<1x128xf32> -> vector<1x128xf32>
    %393 = arith.addf %386, %392 : vector<1x128xf32>
    %c0_365 = arith.constant 0 : index
    %c36 = arith.constant 36 : index
    %c0_366 = arith.constant 0 : index
    %394 = vector.load %arg15[%c0_365, %c36, %c0_366] : memref<1x49x64xf32, #tpu.memory_space<vmem>>, vector<1x1x64xf32>
    %395 = vector.shape_cast %394 : vector<1x1x64xf32> to vector<1x64xf32>
    %396 = arith.truncf %395 : vector<1x64xf32> to vector<1x64xbf16>
    %c36_367 = arith.constant 36 : index
    %c0_368 = arith.constant 0 : index
    %c0_369 = arith.constant 0 : index
    %397 = vector.load %arg8[%c36_367, %c0_368, %c0_369] : memref<49x64x128xbf16, #tpu.memory_space<vmem>>, vector<1x64x128xbf16>
    %398 = vector.shape_cast %397 : vector<1x64x128xbf16> to vector<64x128xbf16>
    %cst_370 = arith.constant dense<0.000000e+00> : vector<1x128xf32>
    %399 = tpu.matmul %396, %398, %cst_370 {dimension_numbers = #tpu.dot_dimension_numbers<[1], [0], [0], [1], [0, 0, 1, 1], [], []>} : vector<1x64xbf16>, vector<64x128xbf16>, vector<1x128xf32> -> vector<1x128xf32>
    %400 = arith.addf %393, %399 : vector<1x128xf32>
    %c0_371 = arith.constant 0 : index
    %c37 = arith.constant 37 : index
    %c0_372 = arith.constant 0 : index
    %401 = vector.load %arg15[%c0_371, %c37, %c0_372] : memref<1x49x64xf32, #tpu.memory_space<vmem>>, vector<1x1x64xf32>
    %402 = vector.shape_cast %401 : vector<1x1x64xf32> to vector<1x64xf32>
    %403 = arith.truncf %402 : vector<1x64xf32> to vector<1x64xbf16>
    %c37_373 = arith.constant 37 : index
    %c0_374 = arith.constant 0 : index
    %c0_375 = arith.constant 0 : index
    %404 = vector.load %arg8[%c37_373, %c0_374, %c0_375] : memref<49x64x128xbf16, #tpu.memory_space<vmem>>, vector<1x64x128xbf16>
    %405 = vector.shape_cast %404 : vector<1x64x128xbf16> to vector<64x128xbf16>
    %cst_376 = arith.constant dense<0.000000e+00> : vector<1x128xf32>
    %406 = tpu.matmul %403, %405, %cst_376 {dimension_numbers = #tpu.dot_dimension_numbers<[1], [0], [0], [1], [0, 0, 1, 1], [], []>} : vector<1x64xbf16>, vector<64x128xbf16>, vector<1x128xf32> -> vector<1x128xf32>
    %407 = arith.addf %400, %406 : vector<1x128xf32>
    %c0_377 = arith.constant 0 : index
    %c38 = arith.constant 38 : index
    %c0_378 = arith.constant 0 : index
    %408 = vector.load %arg15[%c0_377, %c38, %c0_378] : memref<1x49x64xf32, #tpu.memory_space<vmem>>, vector<1x1x64xf32>
    %409 = vector.shape_cast %408 : vector<1x1x64xf32> to vector<1x64xf32>
    %410 = arith.truncf %409 : vector<1x64xf32> to vector<1x64xbf16>
    %c38_379 = arith.constant 38 : index
    %c0_380 = arith.constant 0 : index
    %c0_381 = arith.constant 0 : index
    %411 = vector.load %arg8[%c38_379, %c0_380, %c0_381] : memref<49x64x128xbf16, #tpu.memory_space<vmem>>, vector<1x64x128xbf16>
    %412 = vector.shape_cast %411 : vector<1x64x128xbf16> to vector<64x128xbf16>
    %cst_382 = arith.constant dense<0.000000e+00> : vector<1x128xf32>
    %413 = tpu.matmul %410, %412, %cst_382 {dimension_numbers = #tpu.dot_dimension_numbers<[1], [0], [0], [1], [0, 0, 1, 1], [], []>} : vector<1x64xbf16>, vector<64x128xbf16>, vector<1x128xf32> -> vector<1x128xf32>
    %414 = arith.addf %407, %413 : vector<1x128xf32>
    %c0_383 = arith.constant 0 : index
    %c39 = arith.constant 39 : index
    %c0_384 = arith.constant 0 : index
    %415 = vector.load %arg15[%c0_383, %c39, %c0_384] : memref<1x49x64xf32, #tpu.memory_space<vmem>>, vector<1x1x64xf32>
    %416 = vector.shape_cast %415 : vector<1x1x64xf32> to vector<1x64xf32>
    %417 = arith.truncf %416 : vector<1x64xf32> to vector<1x64xbf16>
    %c39_385 = arith.constant 39 : index
    %c0_386 = arith.constant 0 : index
    %c0_387 = arith.constant 0 : index
    %418 = vector.load %arg8[%c39_385, %c0_386, %c0_387] : memref<49x64x128xbf16, #tpu.memory_space<vmem>>, vector<1x64x128xbf16>
    %419 = vector.shape_cast %418 : vector<1x64x128xbf16> to vector<64x128xbf16>
    %cst_388 = arith.constant dense<0.000000e+00> : vector<1x128xf32>
    %420 = tpu.matmul %417, %419, %cst_388 {dimension_numbers = #tpu.dot_dimension_numbers<[1], [0], [0], [1], [0, 0, 1, 1], [], []>} : vector<1x64xbf16>, vector<64x128xbf16>, vector<1x128xf32> -> vector<1x128xf32>
    %421 = arith.addf %414, %420 : vector<1x128xf32>
    %c0_389 = arith.constant 0 : index
    %c40 = arith.constant 40 : index
    %c0_390 = arith.constant 0 : index
    %422 = vector.load %arg15[%c0_389, %c40, %c0_390] : memref<1x49x64xf32, #tpu.memory_space<vmem>>, vector<1x1x64xf32>
    %423 = vector.shape_cast %422 : vector<1x1x64xf32> to vector<1x64xf32>
    %424 = arith.truncf %423 : vector<1x64xf32> to vector<1x64xbf16>
    %c40_391 = arith.constant 40 : index
    %c0_392 = arith.constant 0 : index
    %c0_393 = arith.constant 0 : index
    %425 = vector.load %arg8[%c40_391, %c0_392, %c0_393] : memref<49x64x128xbf16, #tpu.memory_space<vmem>>, vector<1x64x128xbf16>
    %426 = vector.shape_cast %425 : vector<1x64x128xbf16> to vector<64x128xbf16>
    %cst_394 = arith.constant dense<0.000000e+00> : vector<1x128xf32>
    %427 = tpu.matmul %424, %426, %cst_394 {dimension_numbers = #tpu.dot_dimension_numbers<[1], [0], [0], [1], [0, 0, 1, 1], [], []>} : vector<1x64xbf16>, vector<64x128xbf16>, vector<1x128xf32> -> vector<1x128xf32>
    %428 = arith.addf %421, %427 : vector<1x128xf32>
    %c0_395 = arith.constant 0 : index
    %c41 = arith.constant 41 : index
    %c0_396 = arith.constant 0 : index
    %429 = vector.load %arg15[%c0_395, %c41, %c0_396] : memref<1x49x64xf32, #tpu.memory_space<vmem>>, vector<1x1x64xf32>
    %430 = vector.shape_cast %429 : vector<1x1x64xf32> to vector<1x64xf32>
    %431 = arith.truncf %430 : vector<1x64xf32> to vector<1x64xbf16>
    %c41_397 = arith.constant 41 : index
    %c0_398 = arith.constant 0 : index
    %c0_399 = arith.constant 0 : index
    %432 = vector.load %arg8[%c41_397, %c0_398, %c0_399] : memref<49x64x128xbf16, #tpu.memory_space<vmem>>, vector<1x64x128xbf16>
    %433 = vector.shape_cast %432 : vector<1x64x128xbf16> to vector<64x128xbf16>
    %cst_400 = arith.constant dense<0.000000e+00> : vector<1x128xf32>
    %434 = tpu.matmul %431, %433, %cst_400 {dimension_numbers = #tpu.dot_dimension_numbers<[1], [0], [0], [1], [0, 0, 1, 1], [], []>} : vector<1x64xbf16>, vector<64x128xbf16>, vector<1x128xf32> -> vector<1x128xf32>
    %435 = arith.addf %428, %434 : vector<1x128xf32>
    %c0_401 = arith.constant 0 : index
    %c42 = arith.constant 42 : index
    %c0_402 = arith.constant 0 : index
    %436 = vector.load %arg15[%c0_401, %c42, %c0_402] : memref<1x49x64xf32, #tpu.memory_space<vmem>>, vector<1x1x64xf32>
    %437 = vector.shape_cast %436 : vector<1x1x64xf32> to vector<1x64xf32>
    %438 = arith.truncf %437 : vector<1x64xf32> to vector<1x64xbf16>
    %c42_403 = arith.constant 42 : index
    %c0_404 = arith.constant 0 : index
    %c0_405 = arith.constant 0 : index
    %439 = vector.load %arg8[%c42_403, %c0_404, %c0_405] : memref<49x64x128xbf16, #tpu.memory_space<vmem>>, vector<1x64x128xbf16>
    %440 = vector.shape_cast %439 : vector<1x64x128xbf16> to vector<64x128xbf16>
    %cst_406 = arith.constant dense<0.000000e+00> : vector<1x128xf32>
    %441 = tpu.matmul %438, %440, %cst_406 {dimension_numbers = #tpu.dot_dimension_numbers<[1], [0], [0], [1], [0, 0, 1, 1], [], []>} : vector<1x64xbf16>, vector<64x128xbf16>, vector<1x128xf32> -> vector<1x128xf32>
    %442 = arith.addf %435, %441 : vector<1x128xf32>
    %c0_407 = arith.constant 0 : index
    %c43 = arith.constant 43 : index
    %c0_408 = arith.constant 0 : index
    %443 = vector.load %arg15[%c0_407, %c43, %c0_408] : memref<1x49x64xf32, #tpu.memory_space<vmem>>, vector<1x1x64xf32>
    %444 = vector.shape_cast %443 : vector<1x1x64xf32> to vector<1x64xf32>
    %445 = arith.truncf %444 : vector<1x64xf32> to vector<1x64xbf16>
    %c43_409 = arith.constant 43 : index
    %c0_410 = arith.constant 0 : index
    %c0_411 = arith.constant 0 : index
    %446 = vector.load %arg8[%c43_409, %c0_410, %c0_411] : memref<49x64x128xbf16, #tpu.memory_space<vmem>>, vector<1x64x128xbf16>
    %447 = vector.shape_cast %446 : vector<1x64x128xbf16> to vector<64x128xbf16>
    %cst_412 = arith.constant dense<0.000000e+00> : vector<1x128xf32>
    %448 = tpu.matmul %445, %447, %cst_412 {dimension_numbers = #tpu.dot_dimension_numbers<[1], [0], [0], [1], [0, 0, 1, 1], [], []>} : vector<1x64xbf16>, vector<64x128xbf16>, vector<1x128xf32> -> vector<1x128xf32>
    %449 = arith.addf %442, %448 : vector<1x128xf32>
    %c0_413 = arith.constant 0 : index
    %c44 = arith.constant 44 : index
    %c0_414 = arith.constant 0 : index
    %450 = vector.load %arg15[%c0_413, %c44, %c0_414] : memref<1x49x64xf32, #tpu.memory_space<vmem>>, vector<1x1x64xf32>
    %451 = vector.shape_cast %450 : vector<1x1x64xf32> to vector<1x64xf32>
    %452 = arith.truncf %451 : vector<1x64xf32> to vector<1x64xbf16>
    %c44_415 = arith.constant 44 : index
    %c0_416 = arith.constant 0 : index
    %c0_417 = arith.constant 0 : index
    %453 = vector.load %arg8[%c44_415, %c0_416, %c0_417] : memref<49x64x128xbf16, #tpu.memory_space<vmem>>, vector<1x64x128xbf16>
    %454 = vector.shape_cast %453 : vector<1x64x128xbf16> to vector<64x128xbf16>
    %cst_418 = arith.constant dense<0.000000e+00> : vector<1x128xf32>
    %455 = tpu.matmul %452, %454, %cst_418 {dimension_numbers = #tpu.dot_dimension_numbers<[1], [0], [0], [1], [0, 0, 1, 1], [], []>} : vector<1x64xbf16>, vector<64x128xbf16>, vector<1x128xf32> -> vector<1x128xf32>
    %456 = arith.addf %449, %455 : vector<1x128xf32>
    %c0_419 = arith.constant 0 : index
    %c45 = arith.constant 45 : index
    %c0_420 = arith.constant 0 : index
    %457 = vector.load %arg15[%c0_419, %c45, %c0_420] : memref<1x49x64xf32, #tpu.memory_space<vmem>>, vector<1x1x64xf32>
    %458 = vector.shape_cast %457 : vector<1x1x64xf32> to vector<1x64xf32>
    %459 = arith.truncf %458 : vector<1x64xf32> to vector<1x64xbf16>
    %c45_421 = arith.constant 45 : index
    %c0_422 = arith.constant 0 : index
    %c0_423 = arith.constant 0 : index
    %460 = vector.load %arg8[%c45_421, %c0_422, %c0_423] : memref<49x64x128xbf16, #tpu.memory_space<vmem>>, vector<1x64x128xbf16>
    %461 = vector.shape_cast %460 : vector<1x64x128xbf16> to vector<64x128xbf16>
    %cst_424 = arith.constant dense<0.000000e+00> : vector<1x128xf32>
    %462 = tpu.matmul %459, %461, %cst_424 {dimension_numbers = #tpu.dot_dimension_numbers<[1], [0], [0], [1], [0, 0, 1, 1], [], []>} : vector<1x64xbf16>, vector<64x128xbf16>, vector<1x128xf32> -> vector<1x128xf32>
    %463 = arith.addf %456, %462 : vector<1x128xf32>
    %c0_425 = arith.constant 0 : index
    %c46 = arith.constant 46 : index
    %c0_426 = arith.constant 0 : index
    %464 = vector.load %arg15[%c0_425, %c46, %c0_426] : memref<1x49x64xf32, #tpu.memory_space<vmem>>, vector<1x1x64xf32>
    %465 = vector.shape_cast %464 : vector<1x1x64xf32> to vector<1x64xf32>
    %466 = arith.truncf %465 : vector<1x64xf32> to vector<1x64xbf16>
    %c46_427 = arith.constant 46 : index
    %c0_428 = arith.constant 0 : index
    %c0_429 = arith.constant 0 : index
    %467 = vector.load %arg8[%c46_427, %c0_428, %c0_429] : memref<49x64x128xbf16, #tpu.memory_space<vmem>>, vector<1x64x128xbf16>
    %468 = vector.shape_cast %467 : vector<1x64x128xbf16> to vector<64x128xbf16>
    %cst_430 = arith.constant dense<0.000000e+00> : vector<1x128xf32>
    %469 = tpu.matmul %466, %468, %cst_430 {dimension_numbers = #tpu.dot_dimension_numbers<[1], [0], [0], [1], [0, 0, 1, 1], [], []>} : vector<1x64xbf16>, vector<64x128xbf16>, vector<1x128xf32> -> vector<1x128xf32>
    %470 = arith.addf %463, %469 : vector<1x128xf32>
    %c0_431 = arith.constant 0 : index
    %c47 = arith.constant 47 : index
    %c0_432 = arith.constant 0 : index
    %471 = vector.load %arg15[%c0_431, %c47, %c0_432] : memref<1x49x64xf32, #tpu.memory_space<vmem>>, vector<1x1x64xf32>
    %472 = vector.shape_cast %471 : vector<1x1x64xf32> to vector<1x64xf32>
    %473 = arith.truncf %472 : vector<1x64xf32> to vector<1x64xbf16>
    %c47_433 = arith.constant 47 : index
    %c0_434 = arith.constant 0 : index
    %c0_435 = arith.constant 0 : index
    %474 = vector.load %arg8[%c47_433, %c0_434, %c0_435] : memref<49x64x128xbf16, #tpu.memory_space<vmem>>, vector<1x64x128xbf16>
    %475 = vector.shape_cast %474 : vector<1x64x128xbf16> to vector<64x128xbf16>
    %cst_436 = arith.constant dense<0.000000e+00> : vector<1x128xf32>
    %476 = tpu.matmul %473, %475, %cst_436 {dimension_numbers = #tpu.dot_dimension_numbers<[1], [0], [0], [1], [0, 0, 1, 1], [], []>} : vector<1x64xbf16>, vector<64x128xbf16>, vector<1x128xf32> -> vector<1x128xf32>
    %477 = arith.addf %470, %476 : vector<1x128xf32>
    %c0_437 = arith.constant 0 : index
    %c48 = arith.constant 48 : index
    %c0_438 = arith.constant 0 : index
    %478 = vector.load %arg15[%c0_437, %c48, %c0_438] : memref<1x49x64xf32, #tpu.memory_space<vmem>>, vector<1x1x64xf32>
    %479 = vector.shape_cast %478 : vector<1x1x64xf32> to vector<1x64xf32>
    %480 = arith.truncf %479 : vector<1x64xf32> to vector<1x64xbf16>
    %c48_439 = arith.constant 48 : index
    %c0_440 = arith.constant 0 : index
    %c0_441 = arith.constant 0 : index
    %481 = vector.load %arg8[%c48_439, %c0_440, %c0_441] : memref<49x64x128xbf16, #tpu.memory_space<vmem>>, vector<1x64x128xbf16>
    %482 = vector.shape_cast %481 : vector<1x64x128xbf16> to vector<64x128xbf16>
    %cst_442 = arith.constant dense<0.000000e+00> : vector<1x128xf32>
    %483 = tpu.matmul %480, %482, %cst_442 {dimension_numbers = #tpu.dot_dimension_numbers<[1], [0], [0], [1], [0, 0, 1, 1], [], []>} : vector<1x64xbf16>, vector<64x128xbf16>, vector<1x128xf32> -> vector<1x128xf32>
    %484 = arith.addf %477, %483 : vector<1x128xf32>
    %c0_443 = arith.constant 0 : index
    %c0_444 = arith.constant 0 : index
    %485 = vector.load %arg9[%c0_443, %c0_444] : memref<1x128xf32, #tpu.memory_space<vmem>>, vector<1x128xf32>
    %486 = arith.addf %484, %485 : vector<1x128xf32>
    %cst_445 = arith.constant 0.000000e+00 : f32
    %487 = vector.broadcast %cst_445 : f32 to vector<1x128xf32>
    %488 = arith.maximumf %486, %487 : vector<1x128xf32>
    %c0_446 = arith.constant 0 : index
    %c0_447 = arith.constant 0 : index
    %489 = vector.load %arg10[%c0_446, %c0_447] : memref<128x20xf32, #tpu.memory_space<vmem>>, vector<128x20xf32>
    %cst_448 = arith.constant dense<0.000000e+00> : vector<1x20xf32>
    %490 = tpu.matmul %488, %489, %cst_448 {dimension_numbers = #tpu.dot_dimension_numbers<[1], [0], [0], [1], [0, 0, 1, 1], [], []>} : vector<1x128xf32>, vector<128x20xf32>, vector<1x20xf32> -> vector<1x20xf32>
    %c0_449 = arith.constant 0 : index
    %c0_450 = arith.constant 0 : index
    %491 = vector.load %arg11[%c0_449, %c0_450] : memref<1x20xf32, #tpu.memory_space<vmem>>, vector<1x20xf32>
    %492 = arith.addf %490, %491 : vector<1x20xf32>
    %cst_451 = arith.constant 0.000000e+00 : f32
    %493 = vector.broadcast %cst_451 : f32 to vector<1x20xf32>
    %494 = arith.maximumf %492, %493 : vector<1x20xf32>
    %c0_452 = arith.constant 0 : index
    %c0_453 = arith.constant 0 : index
    %c0_454 = arith.constant 0 : index
    %495 = vector.load %arg12[%c0_452, %c0_453, %c0_454] : memref<1x1x20xf32, #tpu.memory_space<vmem>>, vector<1x1x20xf32>
    %496 = vector.shape_cast %495 : vector<1x1x20xf32> to vector<1x20xf32>
    %497 = vector.shape_cast %494 : vector<1x20xf32> to vector<1x1x20xf32>
    tpu.vector_store %arg12[%c0_452, %c0_453, %c0_454], %497 {strides = array<i32>} : memref<1x1x20xf32, #tpu.memory_space<vmem>>, vector<1x1x20xf32>,
    return
  }
  func.func @transform_0(%arg0: i32) -> (i32, i32, i32, i32) {
    %c0_i32 = arith.constant 0 : i32
    %c0_i32_0 = arith.constant 0 : i32
    %c0_i32_1 = arith.constant 0 : i32
    %c0_i32_2 = arith.constant 0 : i32
    return %arg0, %c0_i32, %c0_i32_0, %c0_i32_1 : i32, i32, i32, i32
  }
  func.func @transform_1(%arg0: i32) -> (i32, i32) {
    %c0_i32 = arith.constant 0 : i32
    %c0_i32_0 = arith.constant 0 : i32
    %c0_i32_1 = arith.constant 0 : i32
    return %c0_i32, %c0_i32_0 : i32, i32
  }
  func.func @transform_2(%arg0: i32) -> (i32, i32) {
    %c0_i32 = arith.constant 0 : i32
    %c0_i32_0 = arith.constant 0 : i32
    %c0_i32_1 = arith.constant 0 : i32
    return %c0_i32, %c0_i32_0 : i32, i32
  }
  func.func @transform_3(%arg0: i32) -> (i32, i32, i32) {
    %c0_i32 = arith.constant 0 : i32
    %c0_i32_0 = arith.constant 0 : i32
    %c0_i32_1 = arith.constant 0 : i32
    %c0_i32_2 = arith.constant 0 : i32
    return %c0_i32, %c0_i32_0, %c0_i32_1 : i32, i32, i32
  }
  func.func @transform_4(%arg0: i32) -> (i32, i32) {
    %c0_i32 = arith.constant 0 : i32
    %c0_i32_0 = arith.constant 0 : i32
    %c0_i32_1 = arith.constant 0 : i32
    return %c0_i32, %c0_i32_0 : i32, i32
  }
  func.func @transform_5(%arg0: i32) -> (i32, i32, i32) {
    %c0_i32 = arith.constant 0 : i32
    %c0_i32_0 = arith.constant 0 : i32
    %c0_i32_1 = arith.constant 0 : i32
    %c0_i32_2 = arith.constant 0 : i32
    return %c0_i32, %c0_i32_0, %c0_i32_1 : i32, i32, i32
  }
  func.func @transform_6(%arg0: i32) -> (i32, i32) {
    %c0_i32 = arith.constant 0 : i32
    %c0_i32_0 = arith.constant 0 : i32
    %c0_i32_1 = arith.constant 0 : i32
    return %c0_i32, %c0_i32_0 : i32, i32
  }
  func.func @transform_7(%arg0: i32) -> (i32, i32, i32) {
    %c0_i32 = arith.constant 0 : i32
    %c0_i32_0 = arith.constant 0 : i32
    %c0_i32_1 = arith.constant 0 : i32
    %c0_i32_2 = arith.constant 0 : i32
    return %c0_i32, %c0_i32_0, %c0_i32_1 : i32, i32, i32
  }
  func.func @transform_8(%arg0: i32) -> (i32, i32) {
    %c0_i32 = arith.constant 0 : i32
    %c0_i32_0 = arith.constant 0 : i32
    %c0_i32_1 = arith.constant 0 : i32
    return %c0_i32, %c0_i32_0 : i32, i32
  }
  func.func @transform_9(%arg0: i32) -> (i32, i32) {
    %c0_i32 = arith.constant 0 : i32
    %c0_i32_0 = arith.constant 0 : i32
    %c0_i32_1 = arith.constant 0 : i32
    return %c0_i32, %c0_i32_0 : i32, i32
  }
  func.func @transform_10(%arg0: i32) -> (i32, i32) {
    %c0_i32 = arith.constant 0 : i32
    %c0_i32_0 = arith.constant 0 : i32
    %c0_i32_1 = arith.constant 0 : i32
    return %c0_i32, %c0_i32_0 : i32, i32
  }
  func.func @transform_11(%arg0: i32) -> (i32, i32, i32) {
    %c0_i32 = arith.constant 0 : i32
    %c0_i32_0 = arith.constant 0 : i32
    %c0_i32_1 = arith.constant 0 : i32
    return %arg0, %c0_i32, %c0_i32_0 : i32, i32, i32
  }
}

</mosaic_0001>

<bundles_post_ra>
// kernel: image_embedder_forward.1
= control target key start
LH: loop header
LB: loop body
LE: loop exit
PB: predicated region body
PF: predicated region fallthrough
CT: control target
= control target key end

     0   :  { %s13241_s0 = inlined_call_operand.vmem [shape: bf16[2,1,196,16], index: 0, kind: input, shape index: {}]   ;;  %s13242_s1 = inlined_call_operand.vmem [shape: bf16[16,128], index: 1, kind: input, shape index: {}]   ;;  %s13243_s2 = inlined_call_operand.vmem [shape: f32[1,32], index: 2, kind: input, shape index: {}]   ;;  %s13244_s3 = inlined_call_operand.vmem [shape: bf16[9,32,64], index: 3, kind: input, shape index: {}]   ;;  %s13245_s4 = inlined_call_operand.vmem [shape: f32[1,64], index: 4, kind: input, shape index: {}]   ;;  %s13246_s5 = inlined_call_operand.vmem [shape: f32[2,196,32], index: 5, kind: input, shape index: {}]   ;;  %s13247_s6 = inlined_call_operand.vmem [shape: bf16[49,196], index: 6, kind: input, shape index: {}]   ;;  %s13248_s7 = inlined_call_operand.vmem [shape: bf16[49,64,128], index: 7, kind: input, shape index: {}]   ;;  %s13249_s8 = inlined_call_operand.vmem [shape: f32[1,128], index: 8, kind: input, shape index: {}]   ;;  %s13250_s9 = inlined_call_operand.vmem [shape: f32[128,20], index: 9, kind: input, shape index: {}]   ;;  %s13251_s10 = inlined_call_operand.vmem [shape: f32[1,20], index: 10, kind: input, shape index: {}]   ;;  %s13252_s11 = inlined_call_operand.hbm [shape: f32[2,1,20], index: 11, kind: output, shape index: {}]  }
   0x1   :  { %13253 = sst [smem:[#allocation8_spill]] %s13241_s0 }
   0x2   :  { %13254 = sst [smem:[#allocation9_spill]] %s13242_s1 }
   0x3   :  { %16 = vsyncpa [#allocation6], 0 }
   0x4   :  { %18 = vsyncpa [#allocation6 + $0x1], 0  ;;  %s10643_s17 = smov 0   ;;  %s10645_s18 = smov 0  }
   0x5   :  { %s10647_s19 = smov 0   ;;  %s10649_s20 = smov 0  }
   0x6 LB: > { %s10664_s21 = sadd.s32 4294967295, %s10575_s20   ;;  %s7764_s22 = sadd.s32 4294967294, %s10575_s20   ;;  %s10575_s20 = sphi %s10649_s20, %s13262_s20   ;;  %s10571_s19 = sphi %s10647_s19, %s13261_s19   ;;  %s10567_s18 = sphi %s10645_s18, %s13260_s18   ;;  %s10563_s17 = sphi %s10643_s17, %s13259_s17  }
   0x7   : > { %s10668_s23 = sadd.s32 1, %s10575_s20   ;;  %s267_s24 = sadd.s32 1, %s10571_s19 }
   0x8   : > { %s264_s25 = ssub.s32 %s10575_s20, %s10668_s23  ;;  %p277_p0 = scmp.ne.s32.totalorder %s10571_s19, %s10567_s18 }
   0x9   : > { %p265_p1 = scmp.eq.s32.totalorder %s264_s25, 0  ;;  %p278_p2 = scmp.eq.s32.totalorder %s10664_s21, 1 }
   0xa   : > { %p283_p3 = scmp.ne.s32.totalorder %s10567_s18, %s10563_s17  ;;  %p284_p4 = scmp.eq.s32.totalorder %s7764_s22, 1 }
   0xb   : > { %s10679_s26 = scalar_select %p265_p1, %s10571_s19, %s267_s24  }
   0xc   : > { %p10681_p5 = por %p278_p2, %p277_p0  ;;  %p10685_p6 = por %p284_p4, %p283_p3 }
   0xd   : > { %p7767_p7 = scmp.ge.s32.totalorder %s10575_s20, 1  ;;  %p340_p8 = scmp.lt.s32.totalorder %s10575_s20, 3 }
   0xf   : > { %p341_p9 = pnand %p7767_p7, %p340_p8 }
  0x10   : > { %s13257_s1 = sld [smem:[#allocation9_spill]] (!%p341_p9)  ;;  %p379_p10 = scmp.lt.s32.totalorder (!%p341_p9), %s10664_s21, 1 }
  0x11   : > { %344 = sbr.rel (%p341_p9) target bundleno = 2273 (0x8e1), region = 64  ;;  %s13258_s0 = sld [smem:[#allocation8_spill]] (!%p341_p9) }
  0x12   : > { %s10579_s22 = smov (!%p341_p9), 96   ;;  %s8631_s29 = sshll.u32 (!%p341_p9), %s10664_s21, 4 }
  0x13   : > { %s10582_s24 = smov (!%p341_p9), [#allocation5]  }
  0x16   : > { %v10275_v0 = vld [vmem:[%s13257_s1] sm:$0xff]   ;;  %v10577_v1 = vmov 0.0   ;;  %vm481_vm0 = vcmask 130048   ;;  %vm10578_vm1 = vmmov 0   ;;  %s380_s12 = scalar_select %p379_p10, %s10664_s21, 1  ;;  %vm1065_vm2 = vcmask 261120  }
  0x17   : > { %9045 = vmatprep.subr.bf16.mxu0 %v10577_v1  ;;  %10226 = vmatprep.subr.bf16.mxu1 %v10577_v1  ;;  %1066 = vst.msk [vmem:[#allocation2] sm:$0xff] %vm1065_vm2, %v10577_v1  ;;  %1067 = vst.msk [vmem:[#allocation2 + $0x8] sm:$0xff] %vm1065_vm2, %v10577_v1  ;;  %v10289_v63 = vld [vmem:[%s13244_s3 + $0x18] sm:$0xff]   ;;  %vm1094_vm3 = vcmask 257024   ;;  %vm3400_vm4 = vcmask 523264   ;;  %vm3639_vm5 = vcmask 556032  }
  0x18   : > { %9046 = vmatpush3.bf16.msra.mxu0 %v10275_v0  ;;  %9047 = vmatprep.mubr.msk.bf16.mxu0 %vm10578_vm1, %v10577_v1  ;;  %s10230_s13 = smul.u32 100, %s380_s12  ;;  %1068 = vst.msk [vmem:[#allocation2 + $0xd4] sm:$0xff] %vm1065_vm2, %v10577_v1  ;;  %1069 = vst.msk [vmem:[#allocation2 + $0xdc] sm:$0xff] %vm1065_vm2, %v10577_v1  ;;  %s10580_s12 = smov 64   ;;  %vm3427_vm6 = vcmask 519168   ;;  %vm3652_vm7 = vcmask 1041408  }
  0x19   : > { %9099 = vmatprep.subr.bf16.mxu0 %v10577_v1  ;;  %9107 = vmatprep.mubr.msk.bf16.mxu1 %vm10578_vm1, %v10577_v1  ;;  %1097 = vst.msk [vmem:[#allocation2 + $0xe8] sm:$0xff] %vm1065_vm2, %v10577_v1  ;;  %1098 = vst.msk [vmem:[#allocation2 + $0xf0] sm:$0xff] %vm1065_vm2, %v10577_v1  ;;  %vm3733_vm8 = vcmask 516096   ;;  %vm7694_vm9 = vcmask 155648   ;;  %s10519_s21 = sshll.u32 %s10582_s24, 4  ;;  %s10520_s21 = int_to_ptr.vmem [resolvable:$false] %s10519_s21 }
  0x1a   : > { %s10706_s16 = scalar_lea.vmem %s13258_s0, %s10230_s13  ;;  %1099 = vst.msk [vmem:[#allocation2 + $0x1bc] sm:$0xff] %vm1065_vm2, %v10577_v1  ;;  %1100 = vst.msk [vmem:[#allocation2 + $0x1c4] sm:$0xff] %vm1065_vm2, %v10577_v1  ;;  %10228 = vmatpush3.bf16.msra.mxu1 %v10289_v63  ;;  %s10521_s25 = scalar_lea.vmem %s10520_s21, 32 }
  0x1b   : > { %v10276_v2 = vld [vmem:[%s10706_s16] sm:$0xff]   ;;  %v10277_v3 = vld [vmem:[%s10706_s16 + $0x8] sm:$0xff]   ;;  %v10278_v4 = vld [vmem:[%s10706_s16 + $0x10] sm:$0xff]   ;;  %1127 = vst.msk [vmem:[#allocation2 + $0x1d0] sm:$0xff] %vm1065_vm2, %v10577_v1  ;;  %10227 = vmatprep.subr.bf16.mxu1 %v10577_v1 }
  0x1c   : > { %9048 = vmatmul.mubr.msk.bf16.vlgmr.msra.gmra.mxu0 %vm481_vm0, %v10276_v2  ;;  %v10279_v5 = vld [vmem:[%s10706_s16 + $0x18] sm:$0xff]   ;;  %v10280_v6 = vld [vmem:[%s10706_s16 + $0x20] sm:$0xff]   ;;  %v10281_v7 = vld [vmem:[%s10706_s16 + $0x28] sm:$0xff]   ;;  %1128 = vst.msk [vmem:[#allocation2 + $0x1d8] sm:$0xff] %vm1065_vm2, %v10577_v1 }
  0x1d   : > { %9051 = vmatprep.mubr.msk.bf16.mxu0 %vm10578_vm1, %v10577_v1  ;;  %v10282_v8 = vld [vmem:[%s10706_s16 + $0x30] sm:$0xff]   ;;  %v10283_v9 = vld [vmem:[%s10706_s16 + $0x38] sm:$0xff]   ;;  %v10284_v10 = vld [vmem:[%s10706_s16 + $0x40] sm:$0xff]   ;;  %1129 = vst.msk [vmem:[#allocation2 + $0x2a4] sm:$0xff] %vm1065_vm2, %v10577_v1  ;;  %9100 = vmatpush3.bf16.msra.mxu0 %v10289_v63 }
  0x1e   : > { %v10285_v11 = vld [vmem:[%s10706_s16 + $0x48] sm:$0xff]   ;;  %v10286_v12 = vld [vmem:[%s10706_s16 + $0x50] sm:$0xff]   ;;  %v10287_v13 = vld [vmem:[%s10706_s16 + $0x58] sm:$0xff]   ;;  %1130 = vst.msk [vmem:[#allocation2 + $0x2ac] sm:$0xff] %vm1065_vm2, %v10577_v1  ;;  %9101 = vmatprep.subr.bf16.mxu0 %v10577_v1 }
  0x1f   : > { %v10288_v14 = vld [vmem:[%s10706_s16 + $0x60] ss:$0 sps:$4 sm:$0x33]   ;;  %3401 = vst.msk [vmem:[#allocation3 + $0xc4] sm:$0xff] %vm3400_vm4, %v10577_v1  ;;  %3402 = vst.msk [vmem:[#allocation3 + $0xcc] sm:$0xff] %vm3400_vm4, %v10577_v1 }
  0x24   : > { %9052 = vmatmul.mubr.msk.bf16.gmra.mxu0 %vm481_vm0, %v10277_v3  ;;  %v10290_v3 = vld [vmem:[%s13244_s3 + $0x10] sm:$0xff]  }
  0x25   : > { %9055 = vmatprep.mubr.msk.bf16.mxu0 %vm10578_vm1, %v10577_v1  ;;  %9102 = vmatpush3.bf16.msra.mxu0 %v10290_v3 }
  0x26   : > { %9155 = vmatprep.subr.bf16.mxu0 %v10577_v1  ;;  %10229 = vmatpush3.bf16.msra.mxu1 %v10290_v3 }
  0x27   : > { %9211 = vmatprep.subr.bf16.mxu1 %v10577_v1 }
  0x2c   : > { %9056 = vmatmul.mubr.msk.bf16.gmra.mxu0 %vm481_vm0, %v10278_v4 }
  0x2d   : > { %9059 = vmatprep.mubr.msk.bf16.mxu0 %vm10578_vm1, %v10577_v1 }
  0x34   : > { %9060 = vmatmul.mubr.msk.bf16.gmra.mxu0 %vm481_vm0, %v10279_v5 }
  0x35   : > { %9063 = vmatprep.mubr.msk.bf16.mxu0 %vm10578_vm1, %v10577_v1 }
  0x3c   : > { %9064 = vmatmul.mubr.msk.bf16.gmra.mxu0 %vm481_vm0, %v10280_v6 }
  0x3d   : > { %9067 = vmatprep.mubr.msk.bf16.mxu0 %vm10578_vm1, %v10577_v1 }
  0x44   : > { %9068 = vmatmul.mubr.msk.bf16.gmra.mxu0 %vm481_vm0, %v10281_v7 }
  0x45   : > { %9071 = vmatprep.mubr.msk.bf16.mxu0 %vm10578_vm1, %v10577_v1 }
  0x4c   : > { %9072 = vmatmul.mubr.msk.bf16.gmra.mxu0 %vm481_vm0, %v10282_v8 }
  0x4d   : > { %9075 = vmatprep.mubr.msk.bf16.mxu0 %vm10578_vm1, %v10577_v1 }
  0x54   : > { %9076 = vmatmul.mubr.msk.bf16.gmra.mxu0 %vm481_vm0, %v10283_v9 }
  0x55   : > { %9079 = vmatprep.mubr.msk.bf16.mxu0 %vm10578_vm1, %v10577_v1 }
  0x5c   : > { %9080 = vmatmul.mubr.msk.bf16.gmra.mxu0 %vm481_vm0, %v10284_v10 }
  0x5d   : > { %9083 = vmatprep.mubr.msk.bf16.mxu0 %vm10578_vm1, %v10577_v1 }
  0x64   : > { %9084 = vmatmul.mubr.msk.bf16.gmra.mxu0 %vm481_vm0, %v10285_v11 }
  0x65   : > { %9087 = vmatprep.mubr.msk.bf16.mxu0 %vm10578_vm1, %v10577_v1 }
  0x6c   : > { %9088 = vmatmul.mubr.msk.bf16.gmra.mxu0 %vm481_vm0, %v10286_v12 }
  0x6d   : > { %9091 = vmatprep.mubr.msk.bf16.mxu0 %vm10578_vm1, %v10577_v1 }
  0x74   : > { %9092 = vmatmul.mubr.msk.bf16.gmra.mxu0 %vm481_vm0, %v10287_v13 }
  0x75   : > { %9095 = vmatprep.mubr.msk.bf16.mxu0 %vm10578_vm1, %v10577_v1 }
  0x7c   : > { %9096 = vmatmul.mubr.msk.bf16.gmra.mxu0 %vm481_vm0, %v10288_v14 }
  0x7d   : > { %9103 = vmatprep.mubr.msk.bf16.mxu0 %vm10578_vm1, %v10577_v1 }
  0xdc   : > { %v10760_v15 = vpop.f32.mrf.mxu0 }
  0xdd   : > { %682 = vrot.lane.b32.xlu0 %v10760_v15, %s10579_s22 }
  0xde   : > { %v9049_v16 = vpop.f32.mrf.mxu0 }
  0xe0   : > { %v10764_v17 = vpop.f32.mrf.mxu0 }
  0xe1   : > { %684 = vrot.lane.b32.xlu0 %v10764_v17, %s10579_s22 }
  0xe2   : > { %v9050_v18 = vpop.f32.mrf.mxu0 }
  0xe4   : > { %v10768_v19 = vpop.f32.mrf.mxu0 }
  0xe5   : > { %686 = vrot.lane.b32.xlu1 %v10768_v19, %s10579_s22 }
  0xe6   : > { %v9053_v20 = vpop.f32.mrf.mxu0 }
  0xe8   : > { %v10772_v21 = vpop.f32.mrf.mxu0 }
  0xe9   : > { %688 = vrot.lane.b32.xlu1 %v10772_v21, %s10579_s22 }
  0xea   : > { %v9054_v22 = vpop.f32.mrf.mxu0 }
  0xec   : > { %v10776_v23 = vpop.f32.mrf.mxu0 }
  0xed   : > { %690 = vrot.lane.b32.xlu0 %v10776_v23, %s10579_s22 }
  0xee   : > { %v9057_v24 = vpop.f32.mrf.mxu0 }
  0xf0   : > { %v10780_v25 = vpop.f32.mrf.mxu0 }
  0xf1   : > { %692 = vrot.lane.b32.xlu1 %v10780_v25, %s10579_s22 }
  0xf2   : > { %v9058_v26 = vpop.f32.mrf.mxu0 }
  0xf4   : > { %v10784_v27 = vpop.f32.mrf.mxu0 }
  0xf5   : > { %694 = vrot.lane.b32.xlu0 %v10784_v27, %s10579_s22 }
  0xf6   : > { %v9061_v28 = vpop.f32.mrf.mxu0 }
  0xf8   : > { %v10788_v29 = vpop.f32.mrf.mxu0 }
  0xf9   : > { %696 = vrot.lane.b32.xlu1 %v10788_v29, %s10579_s22 }
  0xfa   : > { %v9062_v30 = vpop.f32.mrf.mxu0 }
  0xfc   : > { %v10792_v31 = vpop.f32.mrf.mxu0 }
  0xfd   : > { %698 = vrot.lane.b32.xlu0 %v10792_v31, %s10579_s22 }
  0xfe   : > { %v9065_v32 = vpop.f32.mrf.mxu0 }
 0x100   : > { %v10796_v33 = vpop.f32.mrf.mxu0 }
 0x101   : > { %700 = vrot.lane.b32.xlu1 %v10796_v33, %s10579_s22 }
 0x102   : > { %v9066_v34 = vpop.f32.mrf.mxu0 }
 0x104   : > { %v10800_v35 = vpop.f32.mrf.mxu0 }
 0x105   : > { %702 = vrot.lane.b32.xlu0 %v10800_v35, %s10579_s22 }
 0x106   : > { %v9069_v36 = vpop.f32.mrf.mxu0 }
 0x108   : > { %v10804_v37 = vpop.f32.mrf.mxu0 }
 0x109   : > { %704 = vrot.lane.b32.xlu1 %v10804_v37, %s10579_s22 }
 0x10a   : > { %v9070_v38 = vpop.f32.mrf.mxu0 }
 0x10c   : > { %v10808_v39 = vpop.f32.mrf.mxu0 }
 0x10d   : > { %706 = vrot.lane.b32.xlu0 %v10808_v39, %s10579_s22 }
 0x10e   : > { %v9073_v40 = vpop.f32.mrf.mxu0 }
 0x10f   : > { %v10978_v40 = vld [vmem:[%s13243_s2] ss:$0 sm:$0xff] }
 0x110   : > { %v10812_v41 = vpop.f32.mrf.mxu0 }
 0x111   : > { %708 = vrot.lane.b32.xlu1 %v10812_v41, %s10579_s22 }
 0x112   : > { %v9074_v42 = vpop.f32.mrf.mxu0 }
 0x114   : > { %v10840_v43 = vpop.f32.mrf.mxu0 }
 0x115   : > { %710 = vrot.lane.b32.xlu0 %v10840_v43, %s10579_s22 }
 0x116   : > { %v9077_v44 = vpop.f32.mrf.mxu0 }
 0x117   : > { %v964_v44 = vld [vmem:[%s13246_s5] sm:$0xff] }
 0x118   : > { %v10844_v45 = vpop.f32.mrf.mxu0 }
 0x119   : > { %712 = vrot.lane.b32.xlu1 %v10844_v45, %s10579_s22 }
 0x11a   : > { %v9078_v46 = vpop.f32.mrf.mxu0 }
 0x11c   : > { %v10848_v47 = vpop.f32.mrf.mxu0 }
 0x11d   : > { %714 = vrot.lane.b32.xlu0 %v10848_v47, %s10579_s22 }
 0x11e   : > { %v9081_v48 = vpop.f32.mrf.mxu0 }
 0x120   : > { %v10852_v49 = vpop.f32.mrf.mxu0 }
 0x122   : > { %v9082_v50 = vpop.f32.mrf.mxu0 }
 0x124   : > { %v10854_v51 = vpop.f32.mrf.mxu0 }
 0x126   : > { %v9085_v52 = vpop.f32.mrf.mxu0 }
 0x128   : > { %v10856_v53 = vpop.f32.mrf.mxu0 }
 0x12a   : > { %v9086_v54 = vpop.f32.mrf.mxu0 }
 0x12c   : > { %v10858_v55 = vpop.f32.mrf.mxu0 }
 0x12e   : > { %v9089_v56 = vpop.f32.mrf.mxu0 }
 0x12f   : > { %v965_v56 = vld [vmem:[%s13246_s5 + $0x8] sm:$0xff] }
 0x130   : > { %v10860_v57 = vpop.f32.mrf.mxu0 }
 0x132   : > { %v9090_v58 = vpop.f32.mrf.mxu0 }
 0x133   : > { %v7798_v58 = vld [vmem:[%s13246_s5 + $0xd0] sm:$0xff] }
 0x134   : > { %v10862_v59 = vpop.f32.mrf.mxu0 }
 0x136   : > { %v9093_v60 = vpop.f32.mrf.mxu0 }
 0x138   : > { %v10864_v61 = vpop.f32.mrf.mxu0 }
 0x13a   : > { %v9094_v62 = vpop.f32.mrf.mxu0 }
 0x14f   : > { %v683_v0 = vpop.permute.xlu0 %682 }
 0x150   : > { %v10872_v2 = vmax.f32 %v10760_v15, %v683_v0  ;;  %v10914_v15 = vpop.f32.mrf.mxu0 }
 0x152   : > { %807 = vrot.lane.b32.xlu1 %v10872_v2, %s10580_s12 }
 0x153   : > { %v685_v4 = vpop.permute.xlu0 %684 }
 0x154   : > { %v10881_v5 = vmax.f32 %v10764_v17, %v685_v4  ;;  %v9097_v17 = vpop.f32.mrf.mxu0 }
 0x156   : > { %809 = vrot.lane.b32.xlu0 %v10881_v5, %s10580_s12 }
 0x157   : > { %v687_v6 = vpop.permute.xlu1 %686 }
 0x158   : > { %v10887_v7 = vmax.f32 %v10768_v19, %v687_v6  ;;  %v654_v19 = vpop.f32.mrf.mxu0  ;;  %v966_v6 = vld [vmem:[%s13246_s5 + $0x10] sm:$0xff] }
 0x159   : > { %v10291_v19 = vld [vmem:[%s13244_s3 + $0x8] sm:$0xff]  }
 0x15a   : > { %811 = vrot.lane.b32.xlu1 %v10887_v7, %s10580_s12  ;;  %716 = vrot.lane.b32.xlu0 %v10852_v49, %s10579_s22 }
 0x15b   : > { %v689_v8 = vpop.permute.xlu1 %688 }
 0x15c   : > { %v10894_v9 = vmax.f32 %v10772_v21, %v689_v8  ;;  %v9098_v21 = vpop.f32.mrf.mxu0 }
 0x15e   : > { %813 = vrot.lane.b32.xlu0 %v10894_v9, %s10580_s12  ;;  %718 = vrot.lane.b32.xlu1 %v10854_v51, %s10579_s22 }
 0x15f   : > { %v691_v10 = vpop.permute.xlu0 %690 }
 0x160   : > { %v10901_v11 = vmax.f32 %v10776_v23, %v691_v10  ;;  %v1198_v10 = vld [vmem:[#allocation2 + $0xea] sm:$0xff] }
 0x162   : > { %815 = vrot.lane.b32.xlu1 %v10901_v11, %s10580_s12  ;;  %720 = vrot.lane.b32.xlu0 %v10856_v53, %s10579_s22 }
 0x163   : > { %v693_v12 = vpop.permute.xlu1 %692 }
 0x164   : > { %v10908_v13 = vmax.f32 %v10780_v25, %v693_v12 }
 0x166   : > { %817 = vrot.lane.b32.xlu0 %v10908_v13, %s10580_s12  ;;  %722 = vrot.lane.b32.xlu1 %v10858_v55, %s10579_s22 }
 0x167   : > { %v695_v14 = vpop.permute.xlu0 %694 }
 0x168   : > { %v10917_v16 = vmax.f32 %v10784_v27, %v695_v14 }
 0x16a   : > { %819 = vrot.lane.b32.xlu1 %v10917_v16, %s10580_s12  ;;  %724 = vrot.lane.b32.xlu0 %v10860_v57, %s10579_s22 }
 0x16b   : > { %v697_v18 = vpop.permute.xlu1 %696 }
 0x16c   : > { %v10924_v20 = vmax.f32 %v10788_v29, %v697_v18 }
 0x16e   : > { %821 = vrot.lane.b32.xlu0 %v10924_v20, %s10580_s12  ;;  %726 = vrot.lane.b32.xlu1 %v10862_v59, %s10579_s22 }
 0x16f   : > { %v699_v22 = vpop.permute.xlu0 %698 }
 0x170   : > { %v10931_v23 = vmax.f32 %v10792_v31, %v699_v22 }
 0x172   : > { %823 = vrot.lane.b32.xlu1 %v10931_v23, %s10580_s12 }
 0x173   : > { %v701_v24 = vpop.permute.xlu1 %700 }
 0x174   : > { %v10936_v25 = vmax.f32 %v10796_v33, %v701_v24 }
 0x176   : > { %825 = vrot.lane.b32.xlu0 %v10936_v25, %s10580_s12 }
 0x177   : > { %v703_v26 = vpop.permute.xlu0 %702 }
 0x178   : > { %v10941_v27 = vmax.f32 %v10800_v35, %v703_v26 }
 0x17a   : > { %827 = vrot.lane.b32.xlu1 %v10941_v27, %s10580_s12 }
 0x17b   : > { %v705_v28 = vpop.permute.xlu1 %704 }
 0x17c   : > { %v10946_v29 = vmax.f32 %v10804_v37, %v705_v28 }
 0x17e   : > { %829 = vrot.lane.b32.xlu0 %v10946_v29, %s10580_s12 }
 0x17f   : > { %v707_v30 = vpop.permute.xlu0 %706 }
 0x180   : > { %v10951_v31 = vmax.f32 %v10808_v39, %v707_v30 }
 0x182   : > { %831 = vrot.lane.b32.xlu1 %v10951_v31, %s10580_s12 }
 0x183   : > { %v709_v32 = vpop.permute.xlu1 %708 }
 0x184   : > { %v10956_v33 = vmax.f32 %v10812_v41, %v709_v32 }
 0x186   : > { %833 = vrot.lane.b32.xlu0 %v10956_v33, %s10580_s12 }
 0x187   : > { %v711_v34 = vpop.permute.xlu0 %710 }
 0x188   : > { %v10961_v35 = vmax.f32 %v10840_v43, %v711_v34 }
 0x18a   : > { %835 = vrot.lane.b32.xlu1 %v10961_v35, %s10580_s12 }
 0x18b   : > { %v713_v36 = vpop.permute.xlu1 %712 }
 0x18c   : > { %v10966_v37 = vmax.f32 %v10844_v45, %v713_v36  ;;  %v7797_v45 = vld [vmem:[%s13246_s5 + $0xc8] sm:$0xff] }
 0x18e   : > { %837 = vrot.lane.b32.xlu0 %v10966_v37, %s10580_s12 }
 0x18f   : > { %v715_v38 = vpop.permute.xlu0 %714 }
 0x190   : > { %v10971_v39 = vmax.f32 %v10848_v47, %v715_v38  ;;  %v10292_v38 = vld [vmem:[%s13244_s3] sm:$0xff]  }
 0x192   : > { %839 = vrot.lane.b32.xlu1 %v10971_v39, %s10580_s12 }
 0x1c4   : > { %v808_v41 = vpop.permute.xlu1 %807 }
 0x1c5   : > { %v882_v42 = vmax.f32 %v10872_v2, %v808_v41 }
 0x1c7   : > { %v914_v43 = vadd.f32 %v10978_v40, %v882_v42 }
 0x1c8   : > { %v810_v46 = vpop.permute.xlu0 %809 }
 0x1c9   : > { %v939_v47 = vmax.f32 %v914_v43, 0.0  ;;  %v883_v48 = vmax.f32 %v10881_v5, %v810_v46 }
 0x1cb   : > { %v989_v50 = vmul.f32 %v964_v44, %v939_v47  ;;  %v1040_v52 = vmul.f32 %v7797_v45, %v939_v47  ;;  %1101 = vst.msk [vmem:[#allocation2 + $0xf8] sm:$0xff] %vm1065_vm2, %v939_v47  ;;  %v915_v54 = vadd.f32 %v10978_v40, %v883_v48  ;;  %v968_v44 = vld [vmem:[%s13246_s5 + $0x20] sm:$0xff]  ;;  %v7801_v45 = vld [vmem:[%s13246_s5 + $0xe8] sm:$0xff] }
 0x1cc   : > { %v812_v60 = vpop.permute.xlu1 %811  ;;  %v717_v62 = vpop.permute.xlu0 %716 }
 0x1cd   : > { %1070 = vst.msk [vmem:[#allocation2 + $0x10] sm:$0xff] %vm1065_vm2, %v989_v50  ;;  %1131 = vst.msk [vmem:[#allocation2 + $0x1e0] sm:$0xff] %vm1065_vm2, %v1040_v52  ;;  %v940_v63 = vmax.f32 %v915_v54, 0.0  ;;  %v884_v0 = vmax.f32 %v10887_v7, %v812_v60  ;;  %v11001_v2 = vmax.f32 %v10852_v49, %v717_v62  ;;  %v7799_v7 = vld [vmem:[%s13246_s5 + $0xd8] sm:$0xff] }
 0x1cf   : > { %v990_v3 = vmul.f32 %v965_v56, %v940_v63  ;;  %v1041_v4 = vmul.f32 %v7798_v58, %v940_v63  ;;  %1102 = vst.msk [vmem:[#allocation2 + $0x100] sm:$0xff] %vm1065_vm2, %v940_v63  ;;  %v916_v5 = vadd.f32 %v10978_v40, %v884_v0  ;;  %841 = vrot.lane.b32.xlu0 %v11001_v2, %s10580_s12 }
 0x1d0   : > { %v814_v8 = vpop.permute.xlu0 %813  ;;  %v719_v49 = vpop.permute.xlu1 %718 }
 0x1d1   : > { %1071 = vst.msk [vmem:[#allocation2 + $0x18] sm:$0xff] %vm1065_vm2, %v990_v3  ;;  %1132 = vst.msk [vmem:[#allocation2 + $0x1e8] sm:$0xff] %vm1065_vm2, %v1041_v4  ;;  %v941_v12 = vmax.f32 %v916_v5, 0.0  ;;  %v885_v14 = vmax.f32 %v10894_v9, %v814_v8  ;;  %v11017_v17 = vmax.f32 %v10854_v51, %v719_v49  ;;  %v967_v51 = vld [vmem:[%s13246_s5 + $0x18] sm:$0xff]  ;;  %v7800_v9 = vld [vmem:[%s13246_s5 + $0xe0] sm:$0xff] }
 0x1d2   : > { %v1199_v18 = vld [vmem:[#allocation2 + $0xf2] sm:$0xff] }
 0x1d3   : > { %v991_v21 = vmul.f32 %v966_v6, %v941_v12  ;;  %v1042_v22 = vmul.f32 %v7799_v7, %v941_v12  ;;  %1103 = vst.msk [vmem:[#allocation2 + $0x108] sm:$0xff] %vm1065_vm2, %v941_v12  ;;  %v917_v24 = vadd.f32 %v10978_v40, %v885_v14  ;;  %843 = vrot.lane.b32.xlu1 %v11017_v17, %s10580_s12  ;;  %v7802_v3 = vld [vmem:[%s13246_s5 + $0xf0] sm:$0xff]  ;;  %v7803_v14 = vld [vmem:[%s13246_s5 + $0xf8] sm:$0xff] }
 0x1d4   : > { %v1223_v26 = vpack.c.bf16 %v1199_v18, %v1198_v10  ;;  %v816_v28 = vpop.permute.xlu1 %815  ;;  %v721_v30 = vpop.permute.xlu0 %720 }
 0x1d5   : > { %1072 = vst.msk [vmem:[#allocation2 + $0x20] sm:$0xff] %vm1065_vm2, %v991_v21  ;;  %1133 = vst.msk [vmem:[#allocation2 + $0x1f0] sm:$0xff] %vm1065_vm2, %v1042_v22  ;;  %v942_v32 = vmax.f32 %v917_v24, 0.0  ;;  %v886_v34 = vmax.f32 %v10901_v11, %v816_v28  ;;  %v11036_v36 = vmax.f32 %v10856_v53, %v721_v30  ;;  %v1156_v53 = vld [vmem:[#allocation2 + $0x1] sm:$0xff]  ;;  %v1157_v11 = vld [vmem:[#allocation2 + $0x9] sm:$0xff] }
 0x1d6   : > { %9104 = vmatmul.mubr.msk.bf16.vlgmr.msra.gmra.mxu0 %vm1065_vm2, %v1223_v26  ;;  %v1200_v54 = vld [vmem:[#allocation2 + $0xfa] sm:$0xff]  ;;  %v1181_v58 = vpack.c.bf16 %v1157_v11, %v1156_v53 }
 0x1d7   : > { %9156 = vmatpush3.bf16.msra.mxu0 %v10291_v19  ;;  %9159 = vmatprep.mubr.msk.bf16.mxu0 %vm10578_vm1, %v10577_v1  ;;  %v992_v41 = vmul.f32 %v967_v51, %v942_v32  ;;  %v1043_v42 = vmul.f32 %v7800_v9, %v942_v32  ;;  %1104 = vst.msk [vmem:[#allocation2 + $0x110] sm:$0xff] %vm1065_vm2, %v942_v32 }
 0x1d8   : > { %v918_v43 = vadd.f32 %v10978_v40, %v886_v34  ;;  %845 = vrot.lane.b32.xlu0 %v11036_v36, %s10580_s12  ;;  %9157 = vmatprep.subr.bf16.mxu0 %v10577_v1  ;;  %v818_v46 = vpop.permute.xlu0 %817  ;;  %v723_v47 = vpop.permute.xlu1 %722  ;;  %v1158_v26 = vld [vmem:[#allocation2 + $0x11] sm:$0xff] }
 0x1d9   : > { %1073 = vst.msk [vmem:[#allocation2 + $0x28] sm:$0xff] %vm1065_vm2, %v992_v41  ;;  %1134 = vst.msk [vmem:[#allocation2 + $0x1f8] sm:$0xff] %vm1065_vm2, %v1043_v42  ;;  %v887_v50 = vmax.f32 %v10908_v13, %v818_v46  ;;  %v11059_v52 = vmax.f32 %v10858_v55, %v723_v47  ;;  %v10293_v13 = vld [vmem:[%s13244_s3 + $0x28] sm:$0xff]  }
 0x1da   : > { %v943_v48 = vmax.f32 %v918_v43, 0.0  ;;  %v1201_v56 = vld [vmem:[#allocation2 + $0x102] sm:$0xff] }
 0x1db   : > { %9158 = vmatpush3.bf16.msra.mxu0 %v10292_v38  ;;  %v919_v63 = vadd.f32 %v10978_v40, %v887_v50  ;;  %847 = vrot.lane.b32.xlu1 %v11059_v52, %s10580_s12  ;;  %v1224_v0 = vpack.c.bf16 %v1201_v56, %v1200_v54  ;;  %v969_v55 = vld [vmem:[%s13246_s5 + $0x28] sm:$0xff] }
 0x1dc   : > { %v993_v60 = vmul.f32 %v968_v44, %v943_v48  ;;  %v1044_v62 = vmul.f32 %v7801_v45, %v943_v48  ;;  %1105 = vst.msk [vmem:[#allocation2 + $0x118] sm:$0xff] %vm1065_vm2, %v943_v48  ;;  %v820_v4 = vpop.permute.xlu1 %819  ;;  %v725_v5 = vpop.permute.xlu0 %724  ;;  %9267 = vmatprep.subr.bf16.mxu0 %v10577_v1  ;;  %v972_v45 = vld [vmem:[%s13246_s5 + $0x40] sm:$0xff]  ;;  %v7805_v46 = vld [vmem:[%s13246_s5 + $0x108] sm:$0xff] }
 0x1dd   : > { %v944_v6 = vmax.f32 %v919_v63, 0.0  ;;  %v888_v7 = vmax.f32 %v10917_v16, %v820_v4  ;;  %v11079_v8 = vmax.f32 %v10860_v57, %v725_v5  ;;  %9108 = vmatmul.mubr.msk.bf16.vlgmr.msra.gmra.mxu1 %vm1065_vm2, %v1224_v0  ;;  %v1159_v57 = vld [vmem:[#allocation2 + $0x19] sm:$0xff]  ;;  %v970_v16 = vld [vmem:[%s13246_s5 + $0x30] sm:$0xff] }
 0x1de   : > { %1074 = vst.msk [vmem:[#allocation2 + $0x30] sm:$0xff] %vm1065_vm2, %v993_v60  ;;  %1135 = vst.msk [vmem:[#allocation2 + $0x200] sm:$0xff] %vm1065_vm2, %v1044_v62  ;;  %9160 = vmatmul.mubr.msk.bf16.vlgmr.msra.gmra.mxu0 %vm1065_vm2, %v1181_v58  ;;  %9111 = vmatprep.mubr.msk.bf16.mxu1 %vm10578_vm1, %v10577_v1  ;;  %v1182_v9 = vpack.c.bf16 %v1159_v57, %v1158_v26  ;;  %v1202_v34 = vld [vmem:[#allocation2 + $0x10a] sm:$0xff] }
 0x1df   : > { %9163 = vmatprep.mubr.msk.bf16.mxu0 %vm10578_vm1, %v10577_v1  ;;  %v994_v49 = vmul.f32 %v969_v55, %v944_v6  ;;  %v1045_v10 = vmul.f32 %v7802_v3, %v944_v6  ;;  %1106 = vst.msk [vmem:[#allocation2 + $0x120] sm:$0xff] %vm1065_vm2, %v944_v6  ;;  %v920_v12 = vadd.f32 %v10978_v40, %v888_v7  ;;  %v973_v55 = vld [vmem:[%s13246_s5 + $0x48] sm:$0xff]  ;;  %v7806_v3 = vld [vmem:[%s13246_s5 + $0x110] sm:$0xff] }
 0x1e0   : > { %849 = vrot.lane.b32.xlu0 %v11079_v8, %s10580_s12  ;;  %9212 = vmatpush3.bf16.msra.mxu1 %v10293_v13  ;;  %v822_v18 = vpop.permute.xlu0 %821  ;;  %v727_v19 = vpop.permute.xlu1 %726  ;;  %v1160_v54 = vld [vmem:[#allocation2 + $0x21] sm:$0xff] }
 0x1e1   : > { %9213 = vmatprep.subr.bf16.mxu1 %v10577_v1  ;;  %1075 = vst.msk [vmem:[#allocation2 + $0x38] sm:$0xff] %vm1065_vm2, %v994_v49  ;;  %1136 = vst.msk [vmem:[#allocation2 + $0x208] sm:$0xff] %vm1065_vm2, %v1045_v10  ;;  %v945_v21 = vmax.f32 %v920_v12, 0.0  ;;  %v889_v22 = vmax.f32 %v10924_v20, %v822_v18  ;;  %v11102_v24 = vmax.f32 %v10862_v59, %v727_v19  ;;  %v971_v59 = vld [vmem:[%s13246_s5 + $0x38] sm:$0xff]  ;;  %v7804_v20 = vld [vmem:[%s13246_s5 + $0x100] sm:$0xff] }
 0x1e2   : > { %v974_v49 = vld [vmem:[%s13246_s5 + $0x50] sm:$0xff]  ;;  %v7807_v12 = vld [vmem:[%s13246_s5 + $0x118] sm:$0xff] }
 0x1e3   : > { %v1203_v51 = vld [vmem:[#allocation2 + $0x112] sm:$0xff]  ;;  %v995_v28 = vmul.f32 %v970_v16, %v945_v21  ;;  %v1046_v30 = vmul.f32 %v7803_v14, %v945_v21  ;;  %1107 = vst.msk [vmem:[#allocation2 + $0x128] sm:$0xff] %vm1065_vm2, %v945_v21  ;;  %v921_v32 = vadd.f32 %v10978_v40, %v889_v22  ;;  %851 = vrot.lane.b32.xlu1 %v11102_v24, %s10580_s12  ;;  %v10295_v14 = vld [vmem:[%s13244_s3 + $0x20] sm:$0xff]  }
 0x1e4   : > { %728 = vrot.lane.b32.xlu0 %v10864_v61, %s10579_s22  ;;  %v824_v38 = vpop.permute.xlu1 %823  ;;  %v1225_v41 = vpack.c.bf16 %v1203_v51, %v1202_v34  ;;  %v10294_v16 = vld [vmem:[%s13244_s3 + $0x38] sm:$0xff]   ;;  %9214 = vmatpush3.bf16.msra.mxu1 %v10295_v14  ;;  %v10296_v34 = vld [vmem:[%s13244_s3 + $0x30] sm:$0xff]  }
 0x1e5   : > { %1076 = vst.msk [vmem:[#allocation2 + $0x40] sm:$0xff] %vm1065_vm2, %v995_v28  ;;  %1137 = vst.msk [vmem:[#allocation2 + $0x210] sm:$0xff] %vm1065_vm2, %v1046_v30  ;;  %v946_v42 = vmax.f32 %v921_v32, 0.0  ;;  %v890_v43 = vmax.f32 %v10931_v23, %v824_v38  ;;  %v1161_v23 = vld [vmem:[#allocation2 + $0x29] sm:$0xff]  ;;  %9268 = vmatpush3.bf16.msra.mxu0 %v10294_v16  ;;  %9323 = vmatprep.subr.bf16.mxu1 %v10577_v1 }
 0x1e6   : > { %9164 = vmatmul.mubr.msk.bf16.gmra.mxu0 %vm1065_vm2, %v1182_v9  ;;  %9112 = vmatmul.mubr.msk.bf16.gmra.mxu1 %vm1065_vm2, %v1225_v41  ;;  %v1204_v56 = vld [vmem:[#allocation2 + $0x11a] sm:$0xff]  ;;  %v1183_v60 = vpack.c.bf16 %v1161_v23, %v1160_v54 }
 0x1e7   : > { %9167 = vmatprep.mubr.msk.bf16.mxu0 %vm10578_vm1, %v10577_v1  ;;  %v996_v53 = vmul.f32 %v971_v59, %v946_v42  ;;  %v1047_v11 = vmul.f32 %v7804_v20, %v946_v42  ;;  %1108 = vst.msk [vmem:[#allocation2 + $0x130] sm:$0xff] %vm1065_vm2, %v946_v42  ;;  %v922_v44 = vadd.f32 %v10978_v40, %v890_v43  ;;  %v7808_v59 = vld [vmem:[%s13246_s5 + $0x120] sm:$0xff] }
 0x1e8   : > { %730 = vrot.lane.b32.xlu1 %v10914_v15, %s10579_s22  ;;  %9115 = vmatprep.mubr.msk.bf16.mxu1 %vm10578_vm1, %v10577_v1  ;;  %v826_v47 = vpop.permute.xlu0 %825  ;;  %v1162_v21 = vld [vmem:[#allocation2 + $0x31] sm:$0xff]  ;;  %s377_s22 = sand.u32 1, %s10567_s18  }
 0x1e9   : > { %1077 = vst.msk [vmem:[#allocation2 + $0x48] sm:$0xff] %vm1065_vm2, %v996_v53  ;;  %1138 = vst.msk [vmem:[#allocation2 + $0x218] sm:$0xff] %vm1065_vm2, %v1047_v11  ;;  %v947_v48 = vmax.f32 %v922_v44, 0.0  ;;  %v891_v50 = vmax.f32 %v10936_v25, %v826_v47  ;;  %9269 = vmatprep.subr.bf16.mxu0 %v10577_v1  ;;  %v7809_v44 = vld [vmem:[%s13246_s5 + $0x128] sm:$0xff]  ;;  %s378_s30 = scalar_lea.vmem [#allocation5], %s377_s22  ;;  %s7697_s16 = scalar_lea.sflag [#allocation6], %s377_s22 }
 0x1ea   : > { %v1205_v58 = vld [vmem:[#allocation2 + $0x122] sm:$0xff]  ;;  %9270 = vmatpush3.bf16.msra.mxu0 %v10296_v34  ;;  %s7709_s13 = sshll.u32 %s378_s30, 4  ;;  %s7710_s13 = int_to_ptr.vmem [resolvable:$true] %s7709_s13 }
 0x1eb   : > { %v997_v62 = vmul.f32 %v972_v45, %v947_v48  ;;  %v1048_v63 = vmul.f32 %v7805_v46, %v947_v48  ;;  %1109 = vst.msk [vmem:[#allocation2 + $0x138] sm:$0xff] %vm1065_vm2, %v947_v48  ;;  %v923_v0 = vadd.f32 %v10978_v40, %v891_v50  ;;  %v1226_v13 = vpack.c.bf16 %v1205_v58, %v1204_v56  ;;  %v7813_v34 = vld [vmem:[%s13246_s5 + $0x148] sm:$0xff]  ;;  %s10515_s0 = scalar_lea.vmem %s7710_s13, 16  ;;  %p10522_p0 = scmp.lt.s32.totalorder %s7710_s13, %s10520_s21 }
 0x1ec   : > { %v828_v25 = vpop.permute.xlu1 %827  ;;  %9379 = vmatprep.subr.bf16.mxu0 %v10577_v1  ;;  %p10516_p11 = scmp.ne.s32.totalorder %s7710_s13, %s10515_s0  ;;  %p10523_p1 = scmp.lt.s32.totalorder %s10521_s25, %s10515_s0 }
 0x1ed   : > { %1078 = vst.msk [vmem:[#allocation2 + $0x50] sm:$0xff] %vm1065_vm2, %v997_v62  ;;  %1139 = vst.msk [vmem:[#allocation2 + $0x220] sm:$0xff] %vm1065_vm2, %v1048_v63  ;;  %v948_v4 = vmax.f32 %v923_v0, 0.0  ;;  %v892_v5 = vmax.f32 %v10941_v27, %v828_v25  ;;  %v1163_v27 = vld [vmem:[#allocation2 + $0x39] sm:$0xff]  ;;  %v977_v63 = vld [vmem:[%s13246_s5 + $0x68] sm:$0xff] }
 0x1ee   : > { %9168 = vmatmul.mubr.msk.bf16.gmra.mxu0 %vm1065_vm2, %v1183_v60  ;;  %9116 = vmatmul.mubr.msk.bf16.gmra.mxu1 %vm1065_vm2, %v1226_v13  ;;  %v1206_v22 = vld [vmem:[#allocation2 + $0x12a] sm:$0xff]  ;;  %v1184_v51 = vpack.c.bf16 %v1163_v27, %v1162_v21  ;;  %p10517_p12 = pnand %p10516_p11, %p10681_p5  ;;  %p10524_p2 = por %p10523_p1, %p10522_p0 }
 0x1ef   : > { %9171 = vmatprep.mubr.msk.bf16.mxu0 %vm10578_vm1, %v10577_v1  ;;  %v998_v6 = vmul.f32 %v973_v55, %v948_v4  ;;  %v1049_v7 = vmul.f32 %v7806_v3, %v948_v4  ;;  %1110 = vst.msk [vmem:[#allocation2 + $0x140] sm:$0xff] %vm1065_vm2, %v948_v4  ;;  %v924_v10 = vadd.f32 %v10978_v40, %v892_v5  ;;  %v7810_v0 = vld [vmem:[%s13246_s5 + $0x130] sm:$0xff] }
 0x1f0   : > { %9119 = vmatprep.mubr.msk.bf16.mxu1 %vm10578_vm1, %v10577_v1  ;;  %v830_v57 = vpop.permute.xlu0 %829  ;;  %v1164_v47 = vld [vmem:[#allocation2 + $0x41] sm:$0xff]  ;;  %p10518_p13 = pneg %p10517_p12 }
 0x1f1   : > { %1079 = vst.msk [vmem:[#allocation2 + $0x58] sm:$0xff] %vm1065_vm2, %v998_v6  ;;  %1140 = vst.msk [vmem:[#allocation2 + $0x228] sm:$0xff] %vm1065_vm2, %v1049_v7  ;;  %v949_v18 = vmax.f32 %v924_v10, 0.0  ;;  %v893_v19 = vmax.f32 %v10946_v29, %v830_v57  ;;  %v975_v29 = vld [vmem:[%s13246_s5 + $0x58] sm:$0xff] }
 0x1f2   : > { %v1207_v26 = vld [vmem:[#allocation2 + $0x132] sm:$0xff]  ;;  %p10525_p3 = pnand %p10524_p2, %p10518_p13 }
 0x1f3   : > { %v999_v9 = vmul.f32 %v974_v49, %v949_v18  ;;  %v1050_v28 = vmul.f32 %v7807_v12, %v949_v18  ;;  %1111 = vst.msk [vmem:[#allocation2 + $0x148] sm:$0xff] %vm1065_vm2, %v949_v18  ;;  %v925_v30 = vadd.f32 %v10978_v40, %v893_v19  ;;  %v1227_v32 = vpack.c.bf16 %v1207_v26, %v1206_v22  ;;  %v7811_v6 = vld [vmem:[%s13246_s5 + $0x138] sm:$0xff]  ;;  %v7812_v26 = vld [vmem:[%s13246_s5 + $0x140] sm:$0xff] }
 0x1f4   : > { %v832_v20 = vpop.permute.xlu1 %831  ;;  %v1165_v11 = vld [vmem:[#allocation2 + $0x49] sm:$0xff]  ;;  %v979_v22 = vld [vmem:[%s13246_s5 + $0x78] sm:$0xff] }
 0x1f5   : > { %1080 = vst.msk [vmem:[#allocation2 + $0x60] sm:$0xff] %vm1065_vm2, %v999_v9  ;;  %1141 = vst.msk [vmem:[#allocation2 + $0x230] sm:$0xff] %vm1065_vm2, %v1050_v28  ;;  %v950_v38 = vmax.f32 %v925_v30, 0.0  ;;  %v894_v41 = vmax.f32 %v10951_v31, %v832_v20  ;;  %v976_v31 = vld [vmem:[%s13246_s5 + $0x60] sm:$0xff]  ;;  %v1185_v54 = vpack.c.bf16 %v1165_v11, %v1164_v47 }
 0x1f6   : > { %9172 = vmatmul.mubr.msk.bf16.gmra.mxu0 %vm1065_vm2, %v1184_v51  ;;  %9120 = vmatmul.mubr.msk.bf16.gmra.mxu1 %vm1065_vm2, %v1227_v32  ;;  %v1208_v48 = vld [vmem:[#allocation2 + $0x13a] sm:$0xff] }
 0x1f7   : > { %9175 = vmatprep.mubr.msk.bf16.mxu0 %vm10578_vm1, %v10577_v1  ;;  %v1000_v42 = vmul.f32 %v975_v29, %v950_v38  ;;  %v1051_v43 = vmul.f32 %v7808_v59, %v950_v38  ;;  %1112 = vst.msk [vmem:[#allocation2 + $0x150] sm:$0xff] %vm1065_vm2, %v950_v38  ;;  %v926_v53 = vadd.f32 %v10978_v40, %v894_v41 }
 0x1f8   : > { %9123 = vmatprep.mubr.msk.bf16.mxu1 %vm10578_vm1, %v10577_v1  ;;  %v834_v23 = vpop.permute.xlu0 %833  ;;  %v1166_v27 = vld [vmem:[#allocation2 + $0x51] sm:$0xff] }
 0x1f9   : > { %1081 = vst.msk [vmem:[#allocation2 + $0x68] sm:$0xff] %vm1065_vm2, %v1000_v42  ;;  %1142 = vst.msk [vmem:[#allocation2 + $0x238] sm:$0xff] %vm1065_vm2, %v1051_v43  ;;  %v951_v45 = vmax.f32 %v926_v53, 0.0  ;;  %v895_v46 = vmax.f32 %v10956_v33, %v834_v23 }
 0x1fa   : > { %v1209_v50 = vld [vmem:[#allocation2 + $0x142] sm:$0xff] }
 0x1fb   : > { %v1001_v56 = vmul.f32 %v976_v31, %v951_v45  ;;  %v1052_v58 = vmul.f32 %v7809_v44, %v951_v45  ;;  %1113 = vst.msk [vmem:[#allocation2 + $0x158] sm:$0xff] %vm1065_vm2, %v951_v45  ;;  %v927_v60 = vadd.f32 %v10978_v40, %v895_v46  ;;  %v1228_v62 = vpack.c.bf16 %v1209_v50, %v1208_v48 }
 0x1fc   : > { %v836_v33 = vpop.permute.xlu1 %835  ;;  %v1167_v5 = vld [vmem:[#allocation2 + $0x59] sm:$0xff] }
 0x1fd   : > { %1082 = vst.msk [vmem:[#allocation2 + $0x70] sm:$0xff] %vm1065_vm2, %v1001_v56  ;;  %1143 = vst.msk [vmem:[#allocation2 + $0x240] sm:$0xff] %vm1065_vm2, %v1052_v58  ;;  %v952_v13 = vmax.f32 %v927_v60, 0.0  ;;  %v896_v55 = vmax.f32 %v10961_v35, %v836_v33  ;;  %v978_v35 = vld [vmem:[%s13246_s5 + $0x70] sm:$0xff]  ;;  %v1186_v16 = vpack.c.bf16 %v1167_v5, %v1166_v27  ;;  %v7816_v27 = vld [vmem:[%s13246_s5 + $0x160] sm:$0xff] }
 0x1fe   : > { %9176 = vmatmul.mubr.msk.bf16.gmra.mxu0 %vm1065_vm2, %v1185_v54  ;;  %9124 = vmatmul.mubr.msk.bf16.gmra.mxu1 %vm1065_vm2, %v1228_v62  ;;  %v1210_v12 = vld [vmem:[#allocation2 + $0x14a] sm:$0xff] }
 0x1ff   : > { %9179 = vmatprep.mubr.msk.bf16.mxu0 %vm10578_vm1, %v10577_v1  ;;  %v1002_v3 = vmul.f32 %v977_v63, %v952_v13  ;;  %v1053_v25 = vmul.f32 %v7810_v0, %v952_v13  ;;  %1114 = vst.msk [vmem:[#allocation2 + $0x160] sm:$0xff] %vm1065_vm2, %v952_v13  ;;  %v928_v4 = vadd.f32 %v10978_v40, %v896_v55  ;;  %v981_v62 = vld [vmem:[%s13246_s5 + $0x88] sm:$0xff]  ;;  %v7814_v63 = vld [vmem:[%s13246_s5 + $0x150] sm:$0xff] }
 0x200   : > { %9127 = vmatprep.mubr.msk.bf16.mxu1 %vm10578_vm1, %v10577_v1  ;;  %v838_v7 = vpop.permute.xlu0 %837  ;;  %v1168_v41 = vld [vmem:[#allocation2 + $0x61] sm:$0xff] }
 0x201   : > { %1083 = vst.msk [vmem:[#allocation2 + $0x78] sm:$0xff] %vm1065_vm2, %v1002_v3  ;;  %1144 = vst.msk [vmem:[#allocation2 + $0x248] sm:$0xff] %vm1065_vm2, %v1053_v25  ;;  %v953_v49 = vmax.f32 %v928_v4, 0.0  ;;  %v897_v10 = vmax.f32 %v10966_v37, %v838_v7  ;;  %v982_v25 = vld [vmem:[%s13246_s5 + $0x90] sm:$0xff]  ;;  %v7815_v4 = vld [vmem:[%s13246_s5 + $0x158] sm:$0xff] }
 0x202   : > { %v1211_v57 = vld [vmem:[#allocation2 + $0x152] sm:$0xff] }
 0x203   : > { %v1003_v14 = vmul.f32 %v978_v35, %v953_v49  ;;  %v1054_v18 = vmul.f32 %v7811_v6, %v953_v49  ;;  %1115 = vst.msk [vmem:[#allocation2 + $0x168] sm:$0xff] %vm1065_vm2, %v953_v49  ;;  %v929_v19 = vadd.f32 %v10978_v40, %v897_v10  ;;  %v1229_v21 = vpack.c.bf16 %v1211_v57, %v1210_v12  ;;  %v983_v10 = vld [vmem:[%s13246_s5 + $0x98] sm:$0xff] }
 0x204   : > { %v840_v37 = vpop.permute.xlu1 %839  ;;  %v1169_v29 = vld [vmem:[#allocation2 + $0x69] sm:$0xff] }
 0x205   : > { %1084 = vst.msk [vmem:[#allocation2 + $0x80] sm:$0xff] %vm1065_vm2, %v1003_v14  ;;  %1145 = vst.msk [vmem:[#allocation2 + $0x250] sm:$0xff] %vm1065_vm2, %v1054_v18  ;;  %v954_v51 = vmax.f32 %v929_v19, 0.0  ;;  %v898_v9 = vmax.f32 %v10971_v39, %v840_v37  ;;  %v980_v39 = vld [vmem:[%s13246_s5 + $0x80] sm:$0xff]  ;;  %v1187_v11 = vpack.c.bf16 %v1169_v29, %v1168_v41 }
 0x206   : > { %9180 = vmatmul.mubr.msk.bf16.gmra.mxu0 %vm1065_vm2, %v1186_v16  ;;  %9128 = vmatmul.mubr.msk.bf16.gmra.mxu1 %vm1065_vm2, %v1229_v21  ;;  %v1212_v20 = vld [vmem:[#allocation2 + $0x15a] sm:$0xff]  ;;  %v7817_v21 = vld [vmem:[%s13246_s5 + $0x168] sm:$0xff] }
 0x207   : > { %9183 = vmatprep.mubr.msk.bf16.mxu0 %vm10578_vm1, %v10577_v1  ;;  %v1004_v28 = vmul.f32 %v979_v22, %v954_v51  ;;  %v1055_v30 = vmul.f32 %v7812_v26, %v954_v51  ;;  %1116 = vst.msk [vmem:[#allocation2 + $0x170] sm:$0xff] %vm1065_vm2, %v954_v51  ;;  %v930_v32 = vadd.f32 %v10978_v40, %v898_v9  ;;  %v984_v19 = vld [vmem:[%s13246_s5 + $0xa0] sm:$0xff] }
 0x208   : > { %9131 = vmatprep.mubr.msk.bf16.mxu1 %vm10578_vm1, %v10577_v1  ;;  %v1170_v45 = vld [vmem:[#allocation2 + $0x71] sm:$0xff] }
 0x209   : > { %1085 = vst.msk [vmem:[#allocation2 + $0x88] sm:$0xff] %vm1065_vm2, %v1004_v28  ;;  %1146 = vst.msk [vmem:[#allocation2 + $0x258] sm:$0xff] %vm1065_vm2, %v1055_v30  ;;  %v955_v59 = vmax.f32 %v930_v32, 0.0  ;;  %v985_v30 = vld [vmem:[%s13246_s5 + $0xa8] sm:$0xff] }
 0x20a   : > { %v1213_v38 = vld [vmem:[#allocation2 + $0x162] sm:$0xff] }
 0x20b   : > { %v1005_v42 = vmul.f32 %v980_v39, %v955_v59  ;;  %v1056_v43 = vmul.f32 %v7813_v34, %v955_v59  ;;  %1117 = vst.msk [vmem:[#allocation2 + $0x178] sm:$0xff] %vm1065_vm2, %v955_v59  ;;  %v1230_v53 = vpack.c.bf16 %v1213_v38, %v1212_v20  ;;  %v7818_v34 = vld [vmem:[%s13246_s5 + $0x170] sm:$0xff] }
 0x20c   : > { %v1171_v31 = vld [vmem:[#allocation2 + $0x79] sm:$0xff] }
 0x20d   : > { %1086 = vst.msk [vmem:[#allocation2 + $0x90] sm:$0xff] %vm1065_vm2, %v1005_v42  ;;  %1147 = vst.msk [vmem:[#allocation2 + $0x260] sm:$0xff] %vm1065_vm2, %v1056_v43  ;;  %v1188_v47 = vpack.c.bf16 %v1171_v31, %v1170_v45 }
 0x20e   : > { %9184 = vmatmul.mubr.msk.bf16.gmra.mxu0 %vm1065_vm2, %v1187_v11  ;;  %9132 = vmatmul.mubr.msk.bf16.gmra.mxu1 %vm1065_vm2, %v1230_v53  ;;  %v1214_v44 = vld [vmem:[#allocation2 + $0x16a] sm:$0xff] }
 0x20f   : > { %9187 = vmatprep.mubr.msk.bf16.mxu0 %vm10578_vm1, %v10577_v1  ;;  %9135 = vmatprep.mubr.msk.bf16.mxu1 %vm10578_vm1, %v10577_v1 }
 0x210   : > { %v1172_v50 = vld [vmem:[#allocation2 + $0x81] sm:$0xff] }
 0x212   : > { %v1215_v23 = vld [vmem:[#allocation2 + $0x172] sm:$0xff] }
 0x213   : > { %v1231_v46 = vpack.c.bf16 %v1215_v23, %v1214_v44 }
 0x214   : > { %v1173_v48 = vld [vmem:[#allocation2 + $0x89] sm:$0xff] }
 0x215   : > { %v1189_v54 = vpack.c.bf16 %v1173_v48, %v1172_v50 }
 0x216   : > { %9188 = vmatmul.mubr.msk.bf16.gmra.mxu0 %vm1065_vm2, %v1188_v47  ;;  %9136 = vmatmul.mubr.msk.bf16.gmra.mxu1 %vm1065_vm2, %v1231_v46 }
 0x217   : > { %9191 = vmatprep.mubr.msk.bf16.mxu0 %vm10578_vm1, %v10577_v1  ;;  %9139 = vmatprep.mubr.msk.bf16.mxu1 %vm10578_vm1, %v10577_v1 }
 0x21e   : > { %9192 = vmatmul.mubr.msk.bf16.gmra.mxu0 %vm1065_vm2, %v1189_v54 }
 0x21f   : > { %9195 = vmatprep.mubr.msk.bf16.mxu0 %vm10578_vm1, %v10577_v1 }
 0x241   : > { %v842_v56 = vpop.permute.xlu0 %841 }
 0x242   : > { %v899_v58 = vmax.f32 %v11001_v2, %v842_v56 }
 0x244   : > { %v931_v60 = vadd.f32 %v10978_v40, %v899_v58 }
 0x245   : > { %v844_v0 = vpop.permute.xlu1 %843 }
 0x246   : > { %v956_v33 = vmax.f32 %v931_v60, 0.0  ;;  %v900_v13 = vmax.f32 %v11017_v17, %v844_v0 }
 0x248   : > { %v1006_v55 = vmul.f32 %v981_v62, %v956_v33  ;;  %v1057_v3 = vmul.f32 %v7814_v63, %v956_v33  ;;  %1118 = vst.msk [vmem:[#allocation2 + $0x180] sm:$0xff] %vm1065_vm2, %v956_v33  ;;  %v932_v2 = vadd.f32 %v10978_v40, %v900_v13 }
 0x24a   : > { %v846_v5 = vpop.permute.xlu0 %845  ;;  %1087 = vst.msk [vmem:[#allocation2 + $0x98] sm:$0xff] %vm1065_vm2, %v1006_v55  ;;  %1148 = vst.msk [vmem:[#allocation2 + $0x268] sm:$0xff] %vm1065_vm2, %v1057_v3  ;;  %v957_v17 = vmax.f32 %v932_v2, 0.0 }
 0x24b   : > { %v901_v35 = vmax.f32 %v11036_v36, %v846_v5  ;;  %v1871_v5 = vld [vmem:[#allocation2 + $0x17] sm:$0xff] }
 0x24c   : > { %v1007_v6 = vmul.f32 %v982_v25, %v957_v17  ;;  %v1058_v7 = vmul.f32 %v7815_v4, %v957_v17  ;;  %1119 = vst.msk [vmem:[#allocation2 + $0x188] sm:$0xff] %vm1065_vm2, %v957_v17  ;;  %v1615_v25 = vld [vmem:[#allocation2 + $0x1d3] sm:$0xff]  ;;  %v1616_v4 = vld [vmem:[#allocation2 + $0x1db] sm:$0xff]  ;;  %v10297_v17 = vld [vmem:[%s13244_s3 + $0x48] sm:$0xff]  }
 0x24d   : > { %v933_v49 = vadd.f32 %v10978_v40, %v901_v35  ;;  %v848_v12 = vpop.permute.xlu1 %847  ;;  %v1640_v35 = vpack.c.bf16 %v1616_v4, %v1615_v25 }
 0x24e   : > { %1088 = vst.msk [vmem:[#allocation2 + $0xa0] sm:$0xff] %vm1065_vm2, %v1007_v6  ;;  %1149 = vst.msk [vmem:[#allocation2 + $0x270] sm:$0xff] %vm1065_vm2, %v1058_v7  ;;  %v902_v57 = vmax.f32 %v11059_v52, %v848_v12  ;;  %v1870_v6 = vld [vmem:[#allocation2 + $0xf] sm:$0xff]  ;;  %v10299_v7 = vld [vmem:[%s13244_s3 + $0x58] sm:$0xff]  }
 0x24f   : > { %v958_v36 = vmax.f32 %v933_v49, 0.0  ;;  %v1216_v37 = vld [vmem:[#allocation2 + $0x17a] sm:$0xff]  ;;  %v1895_v49 = vpack.c.bf16 %v1871_v5, %v1870_v6  ;;  %v10300_v12 = vld [vmem:[%s13244_s3 + $0x50] sm:$0xff]  }
 0x250   : > { %v934_v18 = vadd.f32 %v10978_v40, %v902_v57  ;;  %v1873_v57 = vld [vmem:[#allocation2 + $0x27] sm:$0xff] }
 0x251   : > { %v1008_v16 = vmul.f32 %v983_v10, %v958_v36  ;;  %v1059_v14 = vmul.f32 %v7816_v27, %v958_v36  ;;  %1120 = vst.msk [vmem:[#allocation2 + $0x190] sm:$0xff] %vm1065_vm2, %v958_v36  ;;  %v10298_v10 = vld [vmem:[%s13244_s3 + $0x40] sm:$0xff]   ;;  %v1618_v27 = vld [vmem:[#allocation2 + $0x1eb] sm:$0xff] }
 0x252   : > { %v850_v22 = vpop.permute.xlu0 %849  ;;  %v959_v52 = vmax.f32 %v934_v18, 0.0  ;;  %v1617_v36 = vld [vmem:[#allocation2 + $0x1e3] sm:$0xff]  ;;  %v1630_v6 = vld [vmem:[#allocation2 + $0x24b] sm:$0xff] }
 0x253   : > { %1089 = vst.msk [vmem:[#allocation2 + $0xa8] sm:$0xff] %vm1065_vm2, %v1008_v16  ;;  %1150 = vst.msk [vmem:[#allocation2 + $0x278] sm:$0xff] %vm1065_vm2, %v1059_v14  ;;  %v903_v26 = vmax.f32 %v11079_v8, %v850_v22  ;;  %v1217_v51 = vld [vmem:[#allocation2 + $0x182] sm:$0xff]  ;;  %v1174_v8 = vld [vmem:[#allocation2 + $0x91] sm:$0xff]  ;;  %v1641_v16 = vpack.c.bf16 %v1618_v27, %v1617_v36 }
 0x254   : > { %v1009_v9 = vmul.f32 %v984_v19, %v959_v52  ;;  %v1060_v28 = vmul.f32 %v7817_v21, %v959_v52  ;;  %1121 = vst.msk [vmem:[#allocation2 + $0x198] sm:$0xff] %vm1065_vm2, %v959_v52  ;;  %v1232_v39 = vpack.c.bf16 %v1217_v51, %v1216_v37  ;;  %v1872_v14 = vld [vmem:[#allocation2 + $0x1f] sm:$0xff]  ;;  %v1619_v21 = vld [vmem:[#allocation2 + $0x1f3] sm:$0xff]  ;;  %v1622_v51 = vld [vmem:[#allocation2 + $0x20b] sm:$0xff] }
 0x255   : > { %v935_v32 = vadd.f32 %v10978_v40, %v903_v26  ;;  %v852_v29 = vpop.permute.xlu1 %851  ;;  %v1175_v20 = vld [vmem:[#allocation2 + $0x99] sm:$0xff]  ;;  %v1896_v18 = vpack.c.bf16 %v1873_v57, %v1872_v14  ;;  %v1874_v26 = vld [vmem:[#allocation2 + $0x2f] sm:$0xff]  ;;  %v1629_v27 = vld [vmem:[#allocation2 + $0x243] sm:$0xff] }
 0x256   : > { %v729_v59 = vpop.permute.xlu0 %728  ;;  %1090 = vst.msk [vmem:[#allocation2 + $0xb0] sm:$0xff] %vm1065_vm2, %v1009_v9  ;;  %1151 = vst.msk [vmem:[#allocation2 + $0x280] sm:$0xff] %vm1065_vm2, %v1060_v28  ;;  %v904_v41 = vmax.f32 %v11102_v24, %v852_v29  ;;  %9140 = vmatmul.mubr.msk.bf16.gmra.mxu1 %vm1065_vm2, %v1232_v39  ;;  %v1190_v43 = vpack.c.bf16 %v1175_v20, %v1174_v8  ;;  %v7819_v24 = vld [vmem:[%s13246_s5 + $0x178] sm:$0xff]  ;;  %v1621_v9 = vld [vmem:[#allocation2 + $0x203] sm:$0xff]  ;;  %v1647_v57 = vpack.c.bf16 %v1630_v6, %v1629_v27 }
 0x257   : > { %v960_v38 = vmax.f32 %v935_v32, 0.0  ;;  %v11333_v42 = vmax.f32 %v10864_v61, %v729_v59  ;;  %9143 = vmatprep.mubr.msk.bf16.mxu1 %vm10578_vm1, %v10577_v1  ;;  %v986_v61 = vld [vmem:[%s13246_s5 + $0xb0] sm:$0xff]  ;;  %v1620_v19 = vld [vmem:[#allocation2 + $0x1fb] sm:$0xff]  ;;  %v1877_v28 = vld [vmem:[#allocation2 + $0x47] sm:$0xff] }
 0x258   : > { %v936_v31 = vadd.f32 %v10978_v40, %v904_v41  ;;  %9196 = vmatmul.mubr.msk.bf16.gmra.mxu0 %vm1065_vm2, %v1190_v43  ;;  %v1218_v45 = vld [vmem:[#allocation2 + $0x18a] sm:$0xff]  ;;  %v1875_v22 = vld [vmem:[#allocation2 + $0x37] sm:$0xff]  ;;  %v1642_v52 = vpack.c.bf16 %v1620_v19, %v1619_v21  ;;  %v1876_v32 = vld [vmem:[#allocation2 + $0x3f] sm:$0xff] }
 0x259   : > { %v1010_v53 = vmul.f32 %v985_v30, %v960_v38  ;;  %v1061_v11 = vmul.f32 %v7818_v34, %v960_v38  ;;  %1122 = vst.msk [vmem:[#allocation2 + $0x1a0] sm:$0xff] %vm1065_vm2, %v960_v38  ;;  %853 = vrot.lane.b32.xlu0 %v11333_v42, %s10580_s12  ;;  %9199 = vmatprep.mubr.msk.bf16.mxu0 %vm10578_vm1, %v10577_v1  ;;  %v1624_v34 = vld [vmem:[#allocation2 + $0x21b] sm:$0xff]  ;;  %v1623_v29 = vld [vmem:[#allocation2 + $0x213] sm:$0xff] }
 0x25a   : > { %v731_v44 = vpop.permute.xlu1 %730  ;;  %v961_v40 = vmax.f32 %v936_v31, 0.0  ;;  %v1176_v54 = vld [vmem:[#allocation2 + $0xa1] sm:$0xff]  ;;  %v1897_v37 = vpack.c.bf16 %v1875_v22, %v1874_v26  ;;  %v1643_v30 = vpack.c.bf16 %v1622_v51, %v1621_v9  ;;  %v1898_v39 = vpack.c.bf16 %v1877_v28, %v1876_v32  ;;  %v1879_v59 = vld [vmem:[#allocation2 + $0x57] sm:$0xff]  ;;  %v1878_v38 = vld [vmem:[#allocation2 + $0x4f] sm:$0xff] }
 0x25b   : > { %1091 = vst.msk [vmem:[#allocation2 + $0xb8] sm:$0xff] %vm1065_vm2, %v1010_v53  ;;  %1152 = vst.msk [vmem:[#allocation2 + $0x288] sm:$0xff] %vm1065_vm2, %v1061_v11  ;;  %v11354_v23 = vmax.f32 %v10914_v15, %v731_v44  ;;  %v1219_v46 = vld [vmem:[#allocation2 + $0x192] sm:$0xff]  ;;  %v1644_v8 = vpack.c.bf16 %v1624_v34, %v1623_v29  ;;  %v1899_v41 = vpack.c.bf16 %v1879_v59, %v1878_v38  ;;  %v1884_v14 = vld [vmem:[#allocation2 + $0x7f] sm:$0xff] }
 0x25c   : > { %v1011_v47 = vmul.f32 %v986_v61, %v961_v40  ;;  %v1062_v48 = vmul.f32 %v7819_v24, %v961_v40  ;;  %1123 = vst.msk [vmem:[#allocation2 + $0x1a8] sm:$0xff] %vm1065_vm2, %v961_v40  ;;  %v1233_v50 = vpack.c.bf16 %v1219_v46, %v1218_v45  ;;  %v1626_v11 = vld [vmem:[#allocation2 + $0x22b] sm:$0xff]  ;;  %v1625_v61 = vld [vmem:[#allocation2 + $0x223] sm:$0xff]  ;;  %v1887_v32 = vld [vmem:[#allocation2 + $0x97] sm:$0xff] }
 0x25d   : > { %855 = vrot.lane.b32.xlu1 %v11354_v23, %s10580_s12  ;;  %v1177_v56 = vld [vmem:[#allocation2 + $0xa9] sm:$0xff]  ;;  %v1645_v44 = vpack.c.bf16 %v1626_v11, %v1625_v61  ;;  %v1880_v46 = vld [vmem:[#allocation2 + $0x5f] sm:$0xff]  ;;  %s7707_s12 = scalar_lea.hbm %s13252_s11, %s8631_s29 }
 0x25e   : > { %1092 = vst.msk [vmem:[#allocation2 + $0xc0] sm:$0xff] %vm1065_vm2, %v1011_v47  ;;  %1153 = vst.msk [vmem:[#allocation2 + $0x290] sm:$0xff] %vm1065_vm2, %v1062_v48  ;;  %9144 = vmatmul.mubr.msk.bf16.gmra.mxu1 %vm1065_vm2, %v1233_v50  ;;  %v1191_v15 = vpack.c.bf16 %v1177_v56, %v1176_v54  ;;  %v1881_v24 = vld [vmem:[#allocation2 + $0x67] sm:$0xff]  ;;  %v1886_v59 = vld [vmem:[#allocation2 + $0x8f] sm:$0xff] }
 0x25f   : > { %9147 = vmatprep.mubr.msk.bf16.mxu1 %vm10578_vm1, %v10577_v1  ;;  %v1900_v48 = vpack.c.bf16 %v1881_v24, %v1880_v46  ;;  %v1903_v38 = vpack.c.bf16 %v1887_v32, %v1886_v59  ;;  %v1634_v11 = vld [vmem:[#allocation2 + $0x26b] sm:$0xff]  ;;  %v987_v32 = vld [vmem:[%s13246_s5 + $0xb8] sm:$0xff] }
 0x260   : > { %9200 = vmatmul.mubr.msk.bf16.gmra.mxu0 %vm1065_vm2, %v1191_v15  ;;  %v1220_v58 = vld [vmem:[#allocation2 + $0x19a] sm:$0xff] }
 0x261   : > { %9203 = vmatprep.mubr.msk.bf16.mxu0 %vm10578_vm1, %v10577_v1 }
 0x262   : > { %v1178_v63 = vld [vmem:[#allocation2 + $0xb1] sm:$0xff] }
 0x263   : > { %v1221_v60 = vld [vmem:[#allocation2 + $0x1a2] sm:$0xff]  ;;  %v1222_v13 = vld [vmem:[#allocation2 + $0x1aa] sm:$0xf] }
 0x264   : > { %v1234_v62 = vpack.c.bf16 %v1221_v60, %v1220_v58  ;;  %v1235_v3 = vpack.c.bf16 %v1222_v13, %v1222_v13  ;;  %v1628_v58 = vld [vmem:[#allocation2 + $0x23b] sm:$0xff] }
 0x265   : > { %v1179_v0 = vld [vmem:[#allocation2 + $0xb9] sm:$0xff]  ;;  %v1180_v55 = vld [vmem:[#allocation2 + $0xc1] sm:$0xf] }
 0x266   : > { %9148 = vmatmul.mubr.msk.bf16.gmra.mxu1 %vm1065_vm2, %v1234_v62  ;;  %v1192_v33 = vpack.c.bf16 %v1179_v0, %v1178_v63  ;;  %v1193_v2 = vpack.c.bf16 %v1180_v55, %v1180_v55  ;;  %v1627_v0 = vld [vmem:[#allocation2 + $0x233] sm:$0xff] }
 0x267   : > { %9151 = vmatprep.mubr.msk.bf16.mxu1 %vm10578_vm1, %v10577_v1  ;;  %v1646_v13 = vpack.c.bf16 %v1628_v58, %v1627_v0  ;;  %v1636_v0 = vld [vmem:[#allocation2 + $0x27b] sm:$0xff] }
 0x268   : > { %9204 = vmatmul.mubr.msk.bf16.gmra.mxu0 %vm1065_vm2, %v1192_v33  ;;  %v1883_v33 = vld [vmem:[#allocation2 + $0x77] sm:$0xff] }
 0x269   : > { %9207 = vmatprep.mubr.msk.bf16.mxu0 %vm10578_vm1, %v10577_v1 }
 0x26e   : > { %9152 = vmatmul.mubr.msk.bf16.gmra.mxu1 %vm1065_vm2, %v1235_v3  ;;  %v1882_v3 = vld [vmem:[#allocation2 + $0x6f] sm:$0xff] }
 0x26f   : > { %9215 = vmatprep.mubr.msk.bf16.mxu1 %vm10578_vm1, %v10577_v1  ;;  %v1901_v4 = vpack.c.bf16 %v1883_v33, %v1882_v3  ;;  %v1635_v3 = vld [vmem:[#allocation2 + $0x273] sm:$0xff] }
 0x270   : > { %9208 = vmatmul.mubr.msk.bf16.gmra.mxu0 %vm1065_vm2, %v1193_v2 }
 0x271   : > { %9271 = vmatprep.mubr.msk.bf16.mxu0 %vm10578_vm1, %v10577_v1 }
 0x276   : > { %9216 = vmatmul.mubr.msk.bf16.vlgmr.msra.gmra.mxu1 %vm1065_vm2, %v1640_v35 }
 0x277   : > { %9219 = vmatprep.mubr.msk.bf16.mxu1 %vm10578_vm1, %v10577_v1  ;;  %9324 = vmatpush3.bf16.msra.mxu1 %v10297_v17 }
 0x278   : > { %9272 = vmatmul.mubr.msk.bf16.vlgmr.msra.gmra.mxu0 %vm1065_vm2, %v1895_v49  ;;  %9325 = vmatprep.subr.bf16.mxu1 %v10577_v1 }
 0x279   : > { %9275 = vmatprep.mubr.msk.bf16.mxu0 %vm10578_vm1, %v10577_v1  ;;  %9380 = vmatpush3.bf16.msra.mxu0 %v10299_v7 }
 0x27a   : > { %9381 = vmatprep.subr.bf16.mxu0 %v10577_v1 }
 0x27b   : > { %9326 = vmatpush3.bf16.msra.mxu1 %v10298_v10 }
 0x27c   : > { %9435 = vmatprep.subr.bf16.mxu1 %v10577_v1 }
 0x27d   : > { %9382 = vmatpush3.bf16.msra.mxu0 %v10300_v12  ;;  %v1885_v12 = vld [vmem:[#allocation2 + $0x87] sm:$0xff] }
 0x27e   : > { %9220 = vmatmul.mubr.msk.bf16.gmra.mxu1 %vm1065_vm2, %v1641_v16  ;;  %9491 = vmatprep.subr.bf16.mxu0 %v10577_v1  ;;  %v1902_v21 = vpack.c.bf16 %v1885_v12, %v1884_v14 }
 0x27f   : > { %9223 = vmatprep.mubr.msk.bf16.mxu1 %vm10578_vm1, %v10577_v1 }
 0x280   : > { %9276 = vmatmul.mubr.msk.bf16.gmra.mxu0 %vm1065_vm2, %v1896_v18 }
 0x281   : > { %9279 = vmatprep.mubr.msk.bf16.mxu0 %vm10578_vm1, %v10577_v1 }
 0x286   : > { %9224 = vmatmul.mubr.msk.bf16.gmra.mxu1 %vm1065_vm2, %v1642_v52 }
 0x287   : > { %9227 = vmatprep.mubr.msk.bf16.mxu1 %vm10578_vm1, %v10577_v1 }
 0x288   : > { %9280 = vmatmul.mubr.msk.bf16.gmra.mxu0 %vm1065_vm2, %v1897_v37  ;;  %v1632_v37 = vld [vmem:[#allocation2 + $0x25b] sm:$0xff] }
 0x289   : > { %9283 = vmatprep.mubr.msk.bf16.mxu0 %vm10578_vm1, %v10577_v1 }
 0x28e   : > { %9228 = vmatmul.mubr.msk.bf16.gmra.mxu1 %vm1065_vm2, %v1643_v30  ;;  %v1631_v30 = vld [vmem:[#allocation2 + $0x253] sm:$0xff] }
 0x28f   : > { %9231 = vmatprep.mubr.msk.bf16.mxu1 %vm10578_vm1, %v10577_v1  ;;  %v1648_v34 = vpack.c.bf16 %v1632_v37, %v1631_v30 }
 0x290   : > { %9284 = vmatmul.mubr.msk.bf16.gmra.mxu0 %vm1065_vm2, %v1898_v39 }
 0x291   : > { %9287 = vmatprep.mubr.msk.bf16.mxu0 %vm10578_vm1, %v10577_v1 }
 0x296   : > { %v1326_v20 = vpop.f32.mrf.mxu0  ;;  %9232 = vmatmul.mubr.msk.bf16.gmra.mxu1 %vm1065_vm2, %v1644_v8 }
 0x297   : > { %9235 = vmatprep.mubr.msk.bf16.mxu1 %vm10578_vm1, %v10577_v1 }
 0x298   : > { %v9105_v43 = vpop.f32.mrf.mxu0  ;;  %9288 = vmatmul.mubr.msk.bf16.gmra.mxu0 %vm1065_vm2, %v1899_v41 }
 0x299   : > { %9291 = vmatprep.mubr.msk.bf16.mxu0 %vm10578_vm1, %v10577_v1 }
 0x29a   : > { %v1329_v53 = vpop.f32.mrf.mxu0 }
 0x29c   : > { %v9106_v31 = vpop.f32.mrf.mxu0 }
 0x29d   : > { %v1334_v40 = vpop.f32.mrf.mxu1 }
 0x29e   : > { %v1513_v45 = vpop.f32.mrf.mxu0  ;;  %9236 = vmatmul.mubr.msk.bf16.gmra.mxu1 %vm1065_vm2, %v1645_v44  ;;  %v1633_v44 = vld [vmem:[#allocation2 + $0x263] sm:$0xff] }
 0x29f   : > { %v11425_v47 = vadd.f32 %v1513_v45, %v1326_v20  ;;  %v9109_v50 = vpop.f32.mrf.mxu1  ;;  %9239 = vmatprep.mubr.msk.bf16.mxu1 %vm10578_vm1, %v10577_v1  ;;  %v1649_v46 = vpack.c.bf16 %v1634_v11, %v1633_v44  ;;  %v988_v44 = vld [vmem:[%s13246_s5 + $0xc0] sm:$0xf] }
 0x2a0   : > { %v9161_v54 = vpop.f32.mrf.mxu0  ;;  %9292 = vmatmul.mubr.msk.bf16.gmra.mxu0 %vm1065_vm2, %v1900_v48  ;;  %v1888_v50 = vld [vmem:[#allocation2 + $0x9f] sm:$0xff] }
 0x2a1   : > { %v1337_v56 = vpop.f32.mrf.mxu1  ;;  %9295 = vmatprep.mubr.msk.bf16.mxu0 %vm10578_vm1, %v10577_v1 }
 0x2a2   : > { %v1516_v15 = vpop.f32.mrf.mxu0 }
 0x2a3   : > { %v11433_v60 = vadd.f32 %v1516_v15, %v1329_v53  ;;  %v9110_v62 = vpop.f32.mrf.mxu1 }
 0x2a4   : > { %v9162_v63 = vpop.f32.mrf.mxu0 }
 0x2a6   : > { %v1521_v55 = vpop.f32.mrf.mxu0  ;;  %v1342_v2 = vpop.f32.mrf.mxu1  ;;  %9240 = vmatmul.mubr.msk.bf16.gmra.mxu1 %vm1065_vm2, %v1646_v13 }
 0x2a7   : > { %v11435_v25 = vadd.f32 %v1521_v55, %v1334_v40  ;;  %9243 = vmatprep.mubr.msk.bf16.mxu1 %vm10578_vm1, %v10577_v1  ;;  %v1889_v40 = vld [vmem:[#allocation2 + $0xa7] sm:$0xff] }
 0x2a8   : > { %v9165_v5 = vpop.f32.mrf.mxu0  ;;  %v9113_v17 = vpop.f32.mrf.mxu1  ;;  %9296 = vmatmul.mubr.msk.bf16.gmra.mxu0 %vm1065_vm2, %v1901_v4  ;;  %v1904_v15 = vpack.c.bf16 %v1889_v40, %v1888_v50 }
 0x2a9   : > { %9299 = vmatprep.mubr.msk.bf16.mxu0 %vm10578_vm1, %v10577_v1  ;;  %v1650_v5 = vpack.c.bf16 %v1636_v0, %v1635_v3 }
 0x2aa   : > { %v1524_v35 = vpop.f32.mrf.mxu0  ;;  %v1345_v7 = vpop.f32.mrf.mxu1 }
 0x2ab   : > { %v11443_v49 = vadd.f32 %v1524_v35, %v1337_v56  ;;  %v1890_v35 = vld [vmem:[#allocation2 + $0xaf] sm:$0xff] }
 0x2ac   : > { %v9166_v10 = vpop.f32.mrf.mxu0  ;;  %v9114_v36 = vpop.f32.mrf.mxu1 }
 0x2ae   : > { %v1529_v16 = vpop.f32.mrf.mxu0  ;;  %v1350_v18 = vpop.f32.mrf.mxu1  ;;  %9244 = vmatmul.mubr.msk.bf16.gmra.mxu1 %vm1065_vm2, %v1647_v57  ;;  %v1638_v57 = vld [vmem:[#allocation2 + $0x28b] sm:$0xff] }
 0x2af   : > { %v11445_v19 = vadd.f32 %v1529_v16, %v1342_v2  ;;  %9247 = vmatprep.mubr.msk.bf16.mxu1 %vm10578_vm1, %v10577_v1  ;;  %v1891_v2 = vld [vmem:[#allocation2 + $0xb7] sm:$0xff] }
 0x2b0   : > { %v9169_v22 = vpop.f32.mrf.mxu0  ;;  %v9117_v52 = vpop.f32.mrf.mxu1  ;;  %9300 = vmatmul.mubr.msk.bf16.gmra.mxu0 %vm1065_vm2, %v1902_v21  ;;  %v1905_v10 = vpack.c.bf16 %v1891_v2, %v1890_v35  ;;  %v2126_v2 = vld [vmem:[#allocation2 + $0x100] sm:$0xff] }
 0x2b1   : > { %9303 = vmatprep.mubr.msk.bf16.mxu0 %vm10578_vm1, %v10577_v1  ;;  %v1637_v52 = vld [vmem:[#allocation2 + $0x283] sm:$0xff] }
 0x2b2   : > { %v1532_v26 = vpop.f32.mrf.mxu0  ;;  %v1353_v51 = vpop.f32.mrf.mxu1  ;;  %v1651_v37 = vpack.c.bf16 %v1638_v57, %v1637_v52 }
 0x2b3   : > { %v11453_v9 = vadd.f32 %v1532_v26, %v1345_v7 }
 0x2b4   : > { %v9170_v28 = vpop.f32.mrf.mxu0  ;;  %v9118_v39 = vpop.f32.mrf.mxu1 }
 0x2b5   : > { %v7820_v39 = vld [vmem:[%s13246_s5 + $0x180] sm:$0xff] }
 0x2b6   : > { %v1537_v29 = vpop.f32.mrf.mxu0  ;;  %v1358_v8 = vpop.f32.mrf.mxu1  ;;  %9248 = vmatmul.mubr.msk.bf16.gmra.mxu1 %vm1065_vm2, %v1648_v34 }
 0x2b7   : > { %v11455_v20 = vadd.f32 %v1537_v29, %v1350_v18  ;;  %9251 = vmatprep.mubr.msk.bf16.mxu1 %vm10578_vm1, %v10577_v1 }
 0x2b8   : > { %v9173_v41 = vpop.f32.mrf.mxu0  ;;  %v9121_v43 = vpop.f32.mrf.mxu1  ;;  %9304 = vmatmul.mubr.msk.bf16.gmra.mxu0 %vm1065_vm2, %v1903_v38 }
 0x2b9   : > { %9307 = vmatprep.mubr.msk.bf16.mxu0 %vm10578_vm1, %v10577_v1 }
 0x2ba   : > { %v1540_v53 = vpop.f32.mrf.mxu0  ;;  %v1361_v31 = vpop.f32.mrf.mxu1 }
 0x2bb   : > { %v11463_v61 = vadd.f32 %v1540_v53, %v1353_v51  ;;  %v10514_v51 = vld [vmem:[%s13243_s2] ss:$0 sm:$0xff] }
 0x2bc   : > { %v9174_v24 = vpop.f32.mrf.mxu0  ;;  %v9122_v45 = vpop.f32.mrf.mxu1 }
 0x2bd   : > { %v1639_v24 = vld [vmem:[#allocation2 + $0x293] sm:$0xf] }
 0x2be   : > { %v1545_v48 = vpop.f32.mrf.mxu0  ;;  %v1366_v54 = vpop.f32.mrf.mxu1  ;;  %9252 = vmatmul.mubr.msk.bf16.gmra.mxu1 %vm1065_vm2, %v1649_v46 }
 0x2bf   : > { %v11465_v56 = vadd.f32 %v1545_v48, %v1358_v8  ;;  %9255 = vmatprep.mubr.msk.bf16.mxu1 %vm10578_vm1, %v10577_v1 }
 0x2c0   : > { %v9177_v58 = vpop.f32.mrf.mxu0  ;;  %v9125_v62 = vpop.f32.mrf.mxu1  ;;  %9308 = vmatmul.mubr.msk.bf16.gmra.mxu0 %vm1065_vm2, %v1904_v15 }
 0x2c1   : > { %9311 = vmatprep.mubr.msk.bf16.mxu0 %vm10578_vm1, %v10577_v1 }
 0x2c2   : > { %v1548_v63 = vpop.f32.mrf.mxu0  ;;  %v1369_v33 = vpop.f32.mrf.mxu1 }
 0x2c3   : > { %v11473_v13 = vadd.f32 %v1548_v63, %v1361_v31 }
 0x2c4   : > { %v9178_v55 = vpop.f32.mrf.mxu0  ;;  %v9126_v4 = vpop.f32.mrf.mxu1 }
 0x2c6   : > { %v1553_v17 = vpop.f32.mrf.mxu0  ;;  %v1374_v6 = vpop.f32.mrf.mxu1  ;;  %9256 = vmatmul.mubr.msk.bf16.gmra.mxu1 %vm1065_vm2, %v1650_v5 }
 0x2c7   : > { %v11475_v7 = vadd.f32 %v1553_v17, %v1366_v54  ;;  %9259 = vmatprep.mubr.msk.bf16.mxu1 %vm10578_vm1, %v10577_v1  ;;  %v1652_v54 = vpack.c.bf16 %v1639_v24, %v1639_v24  ;;  %v1892_v17 = vld [vmem:[#allocation2 + $0xbf] sm:$0xff]  ;;  %v2382_v24 = vld [vmem:[#allocation2 + $0x1f1] sm:$0xff] }
 0x2c8   : > { %v9181_v27 = vpop.f32.mrf.mxu0  ;;  %v9129_v12 = vpop.f32.mrf.mxu1  ;;  %9312 = vmatmul.mubr.msk.bf16.gmra.mxu0 %vm1065_vm2, %v1905_v10 }
 0x2c9   : > { %9315 = vmatprep.mubr.msk.bf16.mxu0 %vm10578_vm1, %v10577_v1  ;;  %v2125_v27 = vld [vmem:[#allocation2 + $0xf8] sm:$0xff]  ;;  %v10301_v12 = vld [vmem:[%s13244_s3 + $0x68] sm:$0xff]  }
 0x2ca   : > { %v1556_v36 = vpop.f32.mrf.mxu0  ;;  %v1377_v16 = vpop.f32.mrf.mxu1  ;;  %v2150_v57 = vpack.c.bf16 %v2126_v2, %v2125_v27 }
 0x2cb   : > { %v11483_v14 = vadd.f32 %v1556_v36, %v1369_v33  ;;  %v854_v18 = vpop.permute.xlu0 %853 }
 0x2cc   : > { %v905_v21 = vmax.f32 %v11333_v42, %v854_v18  ;;  %v9182_v22 = vpop.f32.mrf.mxu0  ;;  %v9130_v26 = vpop.f32.mrf.mxu1 }
 0x2cd   : > { %v10302_v22 = vld [vmem:[%s13244_s3 + $0x60] sm:$0xff]  }
 0x2ce   : > { %v937_v28 = vadd.f32 %v10514_v51, %v905_v21  ;;  %v1561_v30 = vpop.f32.mrf.mxu0  ;;  %v1382_v34 = vpop.f32.mrf.mxu1  ;;  %9260 = vmatmul.mubr.msk.bf16.gmra.mxu1 %vm1065_vm2, %v1651_v37  ;;  %v2128_v37 = vld [vmem:[#allocation2 + $0x110] sm:$0xff] }
 0x2cf   : > { %v11495_v42 = vadd.f32 %v1561_v30, %v1374_v6  ;;  %v856_v29 = vpop.permute.xlu1 %855  ;;  %9263 = vmatprep.mubr.msk.bf16.mxu1 %vm10578_vm1, %v10577_v1 }
 0x2d0   : > { %v962_v59 = vmax.f32 %v937_v28, 0.0  ;;  %v906_v8 = vmax.f32 %v11354_v23, %v856_v29  ;;  %v9185_v38 = vpop.f32.mrf.mxu0  ;;  %v9133_v41 = vpop.f32.mrf.mxu1  ;;  %v7821_v23 = vld [vmem:[%s13246_s5 + $0x188] sm:$0xf]  ;;  %v2130_v29 = vld [vmem:[#allocation2 + $0x120] sm:$0xff] }
 0x2d1   : > { %v2129_v38 = vld [vmem:[#allocation2 + $0x118] sm:$0xff] }
 0x2d2   : > { %v1012_v43 = vmul.f32 %v987_v32, %v962_v59  ;;  %v1063_v53 = vmul.f32 %v7820_v39, %v962_v59  ;;  %1124 = vst.msk [vmem:[#allocation2 + $0x1b0] sm:$0xff] %vm1065_vm2, %v962_v59  ;;  %v938_v11 = vadd.f32 %v10514_v51, %v906_v8  ;;  %v1564_v31 = vpop.f32.mrf.mxu0  ;;  %v1385_v40 = vpop.f32.mrf.mxu1  ;;  %v2127_v32 = vld [vmem:[#allocation2 + $0x108] sm:$0xff]  ;;  %v10303_v41 = vld [vmem:[%s13244_s3 + $0x78] sm:$0xff]  }
 0x2d3   : > { %v11508_v45 = vadd.f32 %v1564_v31, %v1377_v16  ;;  %v2151_v39 = vpack.c.bf16 %v2128_v37, %v2127_v32  ;;  %v2380_v59 = vld [vmem:[#allocation2 + $0x1e1] sm:$0xff]  ;;  %v2132_v31 = vld [vmem:[#allocation2 + $0x130] sm:$0xff] }
 0x2d4   : > { %1093 = vst.msk [vmem:[#allocation2 + $0xc8] sm:$0xff] %vm1065_vm2, %v1012_v43  ;;  %1154 = vst.msk [vmem:[#allocation2 + $0x298] sm:$0xff] %vm1065_vm2, %v1063_v53  ;;  %v963_v46 = vmax.f32 %v938_v11, 0.0  ;;  %v9186_v48 = vpop.f32.mrf.mxu0  ;;  %v9134_v50 = vpop.f32.mrf.mxu1  ;;  %v2152_v43 = vpack.c.bf16 %v2130_v29, %v2129_v38  ;;  %v10304_v53 = vld [vmem:[%s13244_s3 + $0x70] sm:$0xff]   ;;  %v2383_v11 = vld [vmem:[#allocation2 + $0x1f9] sm:$0xff] }
 0x2d5   : > { %v2134_v48 = vld [vmem:[#allocation2 + $0x140] sm:$0xff] }
 0x2d6   : > { %v1013_v15 = vmul.f32 %v988_v44, %v963_v46  ;;  %v1064_v58 = vmul.f32 %v7821_v23, %v963_v46  ;;  %1125 = vst.msk [vmem:[#allocation2 + $0x1b8] sm:$0xf] %vm1094_vm3, %v963_v46  ;;  %v1569_v62 = vpop.f32.mrf.mxu0  ;;  %v1390_v63 = vpop.f32.mrf.mxu1  ;;  %9264 = vmatmul.mubr.msk.bf16.gmra.mxu1 %vm1065_vm2, %v1652_v54  ;;  %v2406_v44 = vpack.c.bf16 %v2383_v11, %v2382_v24  ;;  %v2131_v23 = vld [vmem:[#allocation2 + $0x128] sm:$0xff]  ;;  %v2142_v32 = vld [vmem:[#allocation2 + $0x180] sm:$0xff] }
 0x2d7   : > { %v11513_v0 = vadd.f32 %v1569_v62, %v1382_v34  ;;  %9327 = vmatprep.mubr.msk.bf16.mxu1 %vm10578_vm1, %v10577_v1  ;;  %v2381_v34 = vld [vmem:[#allocation2 + $0x1e9] sm:$0xff]  ;;  %v2384_v50 = vld [vmem:[#allocation2 + $0x201] sm:$0xff]  ;;  %v2387_v62 = vld [vmem:[#allocation2 + $0x219] sm:$0xff] }
 0x2d8   : > { %1095 = vst.msk [vmem:[#allocation2 + $0xd0] sm:$0xf] %vm1094_vm3, %v1013_v15  ;;  %1155 = vst.msk [vmem:[#allocation2 + $0x2a0] sm:$0xf] %vm1094_vm3, %v1064_v58  ;;  %v9189_v33 = vpop.f32.mrf.mxu0  ;;  %v9137_v55 = vpop.f32.mrf.mxu1  ;;  %v2405_v8 = vpack.c.bf16 %v2381_v34, %v2380_v59  ;;  %v2385_v46 = vld [vmem:[#allocation2 + $0x209] sm:$0xff]  ;;  %v2133_v15 = vld [vmem:[#allocation2 + $0x138] sm:$0xff] }
 0x2d9   : > { %v2407_v54 = vpack.c.bf16 %v2385_v46, %v2384_v50  ;;  %v2154_v58 = vpack.c.bf16 %v2134_v48, %v2133_v15  ;;  %v2386_v33 = vld [vmem:[#allocation2 + $0x211] sm:$0xff]  ;;  %v2392_v29 = vld [vmem:[#allocation2 + $0x241] sm:$0xff] }
 0x2da   : > { %v1572_v3 = vpop.f32.mrf.mxu0  ;;  %v1393_v4 = vpop.f32.mrf.mxu1  ;;  %v2408_v55 = vpack.c.bf16 %v2387_v62, %v2386_v33  ;;  %v2144_v46 = vld [vmem:[#allocation2 + $0x190] sm:$0xff] }
 0x2db   : > { %v11520_v5 = vadd.f32 %v1572_v3, %v1385_v40  ;;  %v1893_v35 = vld [vmem:[#allocation2 + $0xc7] sm:$0xff]  ;;  %v2153_v40 = vpack.c.bf16 %v2132_v31, %v2131_v23  ;;  %v2395_v23 = vld [vmem:[#allocation2 + $0x259] sm:$0xff] }
 0x2dc   : > { %v9190_v6 = vpop.f32.mrf.mxu0  ;;  %v1906_v10 = vpack.c.bf16 %v1893_v35, %v1892_v17  ;;  %v9138_v36 = vpop.f32.mrf.mxu1  ;;  %v2135_v3 = vld [vmem:[#allocation2 + $0x148] sm:$0xff]  ;;  %v2138_v17 = vld [vmem:[#allocation2 + $0x160] sm:$0xff] }
 0x2dd   : > { %v2388_v35 = vld [vmem:[#allocation2 + $0x221] sm:$0xff]  ;;  %v2140_v36 = vld [vmem:[#allocation2 + $0x170] sm:$0xff] }
 0x2de   : > { %v1577_v16 = vpop.f32.mrf.mxu0  ;;  %9316 = vmatmul.mubr.msk.bf16.gmra.mxu0 %vm1065_vm2, %v1906_v10  ;;  %9328 = vmatmul.mubr.msk.bf16.vlgmr.msra.gmra.mxu1 %vm1065_vm2, %v2150_v57  ;;  %v2137_v10 = vld [vmem:[#allocation2 + $0x158] sm:$0xff] }
 0x2df   : > { %v11526_v18 = vadd.f32 %v1577_v16, %v1390_v63  ;;  %9319 = vmatprep.mubr.msk.bf16.mxu0 %vm10578_vm1, %v10577_v1  ;;  %9331 = vmatprep.mubr.msk.bf16.mxu1 %vm10578_vm1, %v10577_v1  ;;  %v1894_v52 = vld [vmem:[#allocation2 + $0xcf] sm:$0xf]  ;;  %v2156_v27 = vpack.c.bf16 %v2138_v17, %v2137_v10  ;;  %v2146_v10 = vld [vmem:[#allocation2 + $0x1a0] sm:$0xff] }
 0x2e0   : > { %v9193_v21 = vpop.f32.mrf.mxu0  ;;  %9436 = vmatpush3.bf16.msra.mxu1 %v10301_v12  ;;  %v1907_v30 = vpack.c.bf16 %v1894_v52, %v1894_v52  ;;  %v2136_v63 = vld [vmem:[#allocation2 + $0x150] sm:$0xff]  ;;  %v2391_v12 = vld [vmem:[#allocation2 + $0x239] sm:$0xff] }
 0x2e1   : > { %9437 = vmatprep.subr.bf16.mxu1 %v10577_v1  ;;  %v2155_v2 = vpack.c.bf16 %v2136_v63, %v2135_v3  ;;  %v2390_v57 = vld [vmem:[#allocation2 + $0x231] sm:$0xff]  ;;  %v2139_v21 = vld [vmem:[#allocation2 + $0x168] sm:$0xff] }
 0x2e2   : > { %v1580_v26 = vpop.f32.mrf.mxu0  ;;  %v2410_v16 = vpack.c.bf16 %v2391_v12, %v2390_v57 }
 0x2e3   : > { %v11537_v51 = vadd.f32 %v1580_v26, %v1393_v4  ;;  %v2389_v4 = vld [vmem:[#allocation2 + $0x229] sm:$0xff] }
 0x2e4   : > { %v9194_v28 = vpop.f32.mrf.mxu0  ;;  %9438 = vmatpush3.bf16.msra.mxu1 %v10302_v22  ;;  %v2409_v6 = vpack.c.bf16 %v2389_v4, %v2388_v35  ;;  %v2157_v22 = vpack.c.bf16 %v2140_v36, %v2139_v21  ;;  %v2397_v35 = vld [vmem:[#allocation2 + $0x269] sm:$0xff]  ;;  %v2396_v36 = vld [vmem:[#allocation2 + $0x261] sm:$0xff] }
 0x2e5   : > { %9547 = vmatprep.subr.bf16.mxu1 %v10577_v1  ;;  %v2393_v28 = vld [vmem:[#allocation2 + $0x249] sm:$0xff]  ;;  %v2413_v57 = vpack.c.bf16 %v2397_v35, %v2396_v36 }
 0x2e6   : > { %9320 = vmatmul.mubr.msk.bf16.gmra.mxu0 %vm1065_vm2, %v1907_v30  ;;  %9332 = vmatmul.mubr.msk.bf16.gmra.mxu1 %vm1065_vm2, %v2151_v39  ;;  %v2411_v59 = vpack.c.bf16 %v2393_v28, %v2392_v29 }
 0x2e7   : > { %9383 = vmatprep.mubr.msk.bf16.mxu0 %vm10578_vm1, %v10577_v1  ;;  %9335 = vmatprep.mubr.msk.bf16.mxu1 %vm10578_vm1, %v10577_v1 }
 0x2ee   : > { %9384 = vmatmul.mubr.msk.bf16.vlgmr.msra.gmra.mxu0 %vm1065_vm2, %v2405_v8  ;;  %9336 = vmatmul.mubr.msk.bf16.gmra.mxu1 %vm1065_vm2, %v2152_v43  ;;  %v2141_v8 = vld [vmem:[#allocation2 + $0x178] sm:$0xff] }
 0x2ef   : > { %9387 = vmatprep.mubr.msk.bf16.mxu0 %vm10578_vm1, %v10577_v1  ;;  %9339 = vmatprep.mubr.msk.bf16.mxu1 %vm10578_vm1, %v10577_v1  ;;  %v2158_v43 = vpack.c.bf16 %v2142_v32, %v2141_v8 }
 0x2f0   : > { %9492 = vmatpush3.bf16.msra.mxu0 %v10303_v41 }
 0x2f1   : > { %9493 = vmatprep.subr.bf16.mxu0 %v10577_v1 }
 0x2f4   : > { %9494 = vmatpush3.bf16.msra.mxu0 %v10304_v53 }
 0x2f6   : > { %9388 = vmatmul.mubr.msk.bf16.gmra.mxu0 %vm1065_vm2, %v2406_v44  ;;  %9340 = vmatmul.mubr.msk.bf16.gmra.mxu1 %vm1065_vm2, %v2153_v40 }
 0x2f7   : > { %9391 = vmatprep.mubr.msk.bf16.mxu0 %vm10578_vm1, %v10577_v1  ;;  %9343 = vmatprep.mubr.msk.bf16.mxu1 %vm10578_vm1, %v10577_v1 }
 0x2fe   : > { %9392 = vmatmul.mubr.msk.bf16.gmra.mxu0 %vm1065_vm2, %v2407_v54  ;;  %9344 = vmatmul.mubr.msk.bf16.gmra.mxu1 %vm1065_vm2, %v2154_v58  ;;  %v2394_v54 = vld [vmem:[#allocation2 + $0x251] sm:$0xff]  ;;  %v2143_v58 = vld [vmem:[#allocation2 + $0x188] sm:$0xff] }
 0x2ff   : > { %9395 = vmatprep.mubr.msk.bf16.mxu0 %vm10578_vm1, %v10577_v1  ;;  %9347 = vmatprep.mubr.msk.bf16.mxu1 %vm10578_vm1, %v10577_v1  ;;  %v2412_v15 = vpack.c.bf16 %v2395_v23, %v2394_v54  ;;  %v2159_v33 = vpack.c.bf16 %v2144_v46, %v2143_v58 }
 0x306   : > { %9396 = vmatmul.mubr.msk.bf16.gmra.mxu0 %vm1065_vm2, %v2408_v55  ;;  %9348 = vmatmul.mubr.msk.bf16.gmra.mxu1 %vm1065_vm2, %v2155_v2 }
 0x307   : > { %9399 = vmatprep.mubr.msk.bf16.mxu0 %vm10578_vm1, %v10577_v1  ;;  %9351 = vmatprep.mubr.msk.bf16.mxu1 %vm10578_vm1, %v10577_v1 }
 0x30e   : > { %9400 = vmatmul.mubr.msk.bf16.gmra.mxu0 %vm1065_vm2, %v2409_v6  ;;  %9352 = vmatmul.mubr.msk.bf16.gmra.mxu1 %vm1065_vm2, %v2156_v27 }
 0x30f   : > { %9403 = vmatprep.mubr.msk.bf16.mxu0 %vm10578_vm1, %v10577_v1  ;;  %9355 = vmatprep.mubr.msk.bf16.mxu1 %vm10578_vm1, %v10577_v1 }
 0x316   : > { %9404 = vmatmul.mubr.msk.bf16.gmra.mxu0 %vm1065_vm2, %v2410_v16  ;;  %v1398_v52 = vpop.f32.mrf.mxu1  ;;  %9356 = vmatmul.mubr.msk.bf16.gmra.mxu1 %vm1065_vm2, %v2157_v22  ;;  %v2145_v16 = vld [vmem:[#allocation2 + $0x198] sm:$0xff] }
 0x317   : > { %9407 = vmatprep.mubr.msk.bf16.mxu0 %vm10578_vm1, %v10577_v1  ;;  %9359 = vmatprep.mubr.msk.bf16.mxu1 %vm10578_vm1, %v10577_v1 }
 0x318   : > { %v9141_v26 = vpop.f32.mrf.mxu1  ;;  %v1585_v37 = vpop.f32.mrf.mxu0 }
 0x319   : > { %v11589_v30 = vadd.f32 %v1585_v37, %v1398_v52  ;;  %v2160_v52 = vpack.c.bf16 %v2146_v10, %v2145_v16  ;;  %v2403_v16 = vld [vmem:[#allocation2 + $0x299] sm:$0xff] }
 0x31a   : > { %v1401_v39 = vpop.f32.mrf.mxu1  ;;  %v9197_v34 = vpop.f32.mrf.mxu0 }
 0x31b   : > { %v2399_v34 = vld [vmem:[#allocation2 + $0x279] sm:$0xff] }
 0x31c   : > { %v9142_v38 = vpop.f32.mrf.mxu1  ;;  %v1588_v41 = vpop.f32.mrf.mxu0 }
 0x31d   : > { %v11591_v53 = vadd.f32 %v1588_v41, %v1401_v39  ;;  %v2398_v41 = vld [vmem:[#allocation2 + $0x271] sm:$0xff] }
 0x31e   : > { %9408 = vmatmul.mubr.msk.bf16.gmra.mxu0 %vm1065_vm2, %v2411_v59  ;;  %v1406_v11 = vpop.f32.mrf.mxu1  ;;  %v9198_v31 = vpop.f32.mrf.mxu0  ;;  %9360 = vmatmul.mubr.msk.bf16.gmra.mxu1 %vm1065_vm2, %v2158_v43  ;;  %v2148_v59 = vld [vmem:[#allocation2 + $0x1b0] sm:$0xff]  ;;  %v2414_v43 = vpack.c.bf16 %v2399_v34, %v2398_v41  ;;  %v2635_v34 = vld [vmem:[#allocation2 + $0x1d] sm:$0xff] }
 0x31f   : > { %9411 = vmatprep.mubr.msk.bf16.mxu0 %vm10578_vm1, %v10577_v1  ;;  %9363 = vmatprep.mubr.msk.bf16.mxu1 %vm10578_vm1, %v10577_v1 }
 0x320   : > { %v9145_v24 = vpop.f32.mrf.mxu1  ;;  %v1593_v44 = vpop.f32.mrf.mxu0 }
 0x321   : > { %v11599_v40 = vadd.f32 %v1593_v44, %v1406_v11  ;;  %v2147_v11 = vld [vmem:[#allocation2 + $0x1a8] sm:$0xff] }
 0x322   : > { %v1409_v48 = vpop.f32.mrf.mxu1  ;;  %v9201_v50 = vpop.f32.mrf.mxu0  ;;  %v2161_v44 = vpack.c.bf16 %v2148_v59, %v2147_v11 }
 0x324   : > { %v9146_v62 = vpop.f32.mrf.mxu1  ;;  %v1596_v63 = vpop.f32.mrf.mxu0 }
 0x325   : > { %v11601_v55 = vadd.f32 %v1596_v63, %v1409_v48  ;;  %v2149_v62 = vld [vmem:[#allocation2 + $0x1b8] sm:$0xf] }
 0x326   : > { %9412 = vmatmul.mubr.msk.bf16.gmra.mxu0 %vm1065_vm2, %v2412_v15  ;;  %v1414_v3 = vpop.f32.mrf.mxu1  ;;  %v9202_v2 = vpop.f32.mrf.mxu0  ;;  %9364 = vmatmul.mubr.msk.bf16.gmra.mxu1 %vm1065_vm2, %v2159_v33  ;;  %v2401_v15 = vld [vmem:[#allocation2 + $0x289] sm:$0xff]  ;;  %v2162_v10 = vpack.c.bf16 %v2149_v62, %v2149_v62 }
 0x327   : > { %9415 = vmatprep.mubr.msk.bf16.mxu0 %vm10578_vm1, %v10577_v1  ;;  %9367 = vmatprep.mubr.msk.bf16.mxu1 %vm10578_vm1, %v10577_v1  ;;  %v2637_v62 = vld [vmem:[#allocation2 + $0x2d] sm:$0xff] }
 0x328   : > { %v9149_v4 = vpop.f32.mrf.mxu1  ;;  %v1601_v17 = vpop.f32.mrf.mxu0 }
 0x329   : > { %v11609_v6 = vadd.f32 %v1601_v17, %v1414_v3  ;;  %v2400_v3 = vld [vmem:[#allocation2 + $0x281] sm:$0xff] }
 0x32a   : > { %v1417_v27 = vpop.f32.mrf.mxu1  ;;  %v9205_v12 = vpop.f32.mrf.mxu0  ;;  %v2415_v4 = vpack.c.bf16 %v2401_v15, %v2400_v3 }
 0x32c   : > { %v9150_v21 = vpop.f32.mrf.mxu1  ;;  %v1604_v22 = vpop.f32.mrf.mxu0 }
 0x32d   : > { %v11611_v26 = vadd.f32 %v1604_v22, %v1417_v27  ;;  %v2636_v22 = vld [vmem:[#allocation2 + $0x25] sm:$0xff] }
 0x32e   : > { %9416 = vmatmul.mubr.msk.bf16.gmra.mxu0 %vm1065_vm2, %v2413_v57  ;;  %v1422_v37 = vpop.f32.mrf.mxu1  ;;  %v9206_v28 = vpop.f32.mrf.mxu0  ;;  %9368 = vmatmul.mubr.msk.bf16.gmra.mxu1 %vm1065_vm2, %v2160_v52 }
 0x32f   : > { %9419 = vmatprep.mubr.msk.bf16.mxu0 %vm10578_vm1, %v10577_v1  ;;  %9371 = vmatprep.mubr.msk.bf16.mxu1 %vm10578_vm1, %v10577_v1  ;;  %v2402_v28 = vld [vmem:[#allocation2 + $0x291] sm:$0xff] }
 0x330   : > { %v9153_v32 = vpop.f32.mrf.mxu1  ;;  %v1609_v39 = vpop.f32.mrf.mxu0 }
 0x331   : > { %v11619_v29 = vadd.f32 %v1609_v39, %v1422_v37  ;;  %v2416_v39 = vpack.c.bf16 %v2403_v16, %v2402_v28  ;;  %v2890_v16 = vld [vmem:[#allocation2 + $0x106] sm:$0xff] }
 0x332   : > { %v1425_v8 = vpop.f32.mrf.mxu1  ;;  %v9209_v38 = vpop.f32.mrf.mxu0 }
 0x333   : > { %v2660_v38 = vpack.c.bf16 %v2636_v22, %v2635_v34 }
 0x334   : > { %v9154_v31 = vpop.f32.mrf.mxu1  ;;  %v1612_v24 = vpop.f32.mrf.mxu0 }
 0x335   : > { %v10306_v31 = vld [vmem:[%s13244_s3 + $0x80] sm:$0xff]  }
 0x336   : > { %9420 = vmatmul.mubr.msk.bf16.gmra.mxu0 %vm1065_vm2, %v2414_v43  ;;  %v9210_v23 = vpop.f32.mrf.mxu0  ;;  %v1743_v46 = vpop.f32.mrf.mxu1  ;;  %9372 = vmatmul.mubr.msk.bf16.gmra.mxu1 %vm1065_vm2, %v2161_v44 }
 0x337   : > { %9423 = vmatprep.mubr.msk.bf16.mxu0 %vm10578_vm1, %v10577_v1  ;;  %v1845_v48 = vadd.f32 %v1743_v46, %v11425_v47  ;;  %9375 = vmatprep.mubr.msk.bf16.mxu1 %vm10578_vm1, %v10577_v1  ;;  %v2404_v23 = vld [vmem:[#allocation2 + $0x2a1] sm:$0xf] }
 0x338   : > { %v9217_v50 = vpop.f32.mrf.mxu1  ;;  %v1998_v54 = vpop.f32.mrf.mxu0  ;;  %v2417_v15 = vpack.c.bf16 %v2404_v23, %v2404_v23 }
 0x339   : > { %v11628_v58 = vadd.f32 %v1998_v54, %v1845_v48  ;;  %v2638_v48 = vld [vmem:[#allocation2 + $0x35] sm:$0xff] }
 0x33a   : > { %v1746_v63 = vpop.f32.mrf.mxu1  ;;  %v9273_v33 = vpop.f32.mrf.mxu0  ;;  %v2661_v3 = vpack.c.bf16 %v2638_v48, %v2637_v62  ;;  %v2641_v48 = vld [vmem:[#allocation2 + $0x4d] sm:$0xff] }
 0x33b   : > { %v1846_v2 = vadd.f32 %v1746_v63, %v11433_v60 }
 0x33c   : > { %v9218_v17 = vpop.f32.mrf.mxu1  ;;  %v2001_v35 = vpop.f32.mrf.mxu0 }
 0x33d   : > { %v11631_v27 = vadd.f32 %v2001_v35, %v1846_v2 }
 0x33e   : > { %9424 = vmatmul.mubr.msk.bf16.gmra.mxu0 %vm1065_vm2, %v2415_v4  ;;  %v1751_v47 = vpop.f32.mrf.mxu1  ;;  %v9274_v12 = vpop.f32.mrf.mxu0  ;;  %9376 = vmatmul.mubr.msk.bf16.gmra.mxu1 %vm1065_vm2, %v2162_v10 }
 0x33f   : > { %9427 = vmatprep.mubr.msk.bf16.mxu0 %vm10578_vm1, %v10577_v1  ;;  %v1847_v36 = vadd.f32 %v1751_v47, %v11435_v25  ;;  %9439 = vmatprep.mubr.msk.bf16.mxu1 %vm10578_vm1, %v10577_v1  ;;  %v10305_v25 = vld [vmem:[%s13244_s3 + $0x88] sm:$0xff]  }
 0x340   : > { %v9221_v60 = vpop.f32.mrf.mxu1  ;;  %v2006_v57 = vpop.f32.mrf.mxu0  ;;  %v2891_v47 = vld [vmem:[#allocation2 + $0x10e] sm:$0xff] }
 0x341   : > { %v11640_v21 = vadd.f32 %v2006_v57, %v1847_v36  ;;  %v2640_v36 = vld [vmem:[#allocation2 + $0x45] sm:$0xff] }
 0x342   : > { %v1754_v52 = vpop.f32.mrf.mxu1  ;;  %v9277_v37 = vpop.f32.mrf.mxu0 }
 0x343   : > { %v1848_v32 = vadd.f32 %v1754_v52, %v11443_v49  ;;  %v2915_v52 = vpack.c.bf16 %v2891_v47, %v2890_v16  ;;  %v2639_v37 = vld [vmem:[#allocation2 + $0x3d] sm:$0xff] }
 0x344   : > { %v9222_v59 = vpop.f32.mrf.mxu1  ;;  %v2009_v8 = vpop.f32.mrf.mxu0 }
 0x345   : > { %v11646_v41 = vadd.f32 %v2009_v8, %v1848_v32 }
 0x346   : > { %9428 = vmatmul.mubr.msk.bf16.gmra.mxu0 %vm1065_vm2, %v2416_v39  ;;  %v1759_v43 = vpop.f32.mrf.mxu1  ;;  %v9278_v11 = vpop.f32.mrf.mxu0  ;;  %9440 = vmatmul.mubr.msk.bf16.vlgmr.msra.gmra.mxu1 %vm1065_vm2, %v2660_v38  ;;  %v2662_v39 = vpack.c.bf16 %v2640_v36, %v2639_v37  ;;  %v2893_v38 = vld [vmem:[#allocation2 + $0x11e] sm:$0xff] }
 0x347   : > { %9431 = vmatprep.mubr.msk.bf16.mxu0 %vm10578_vm1, %v10577_v1  ;;  %v1849_v49 = vadd.f32 %v1759_v43, %v11445_v19  ;;  %9443 = vmatprep.mubr.msk.bf16.mxu1 %vm10578_vm1, %v10577_v1  ;;  %v2642_v11 = vld [vmem:[#allocation2 + $0x55] sm:$0xff] }
 0x348   : > { %9548 = vmatpush3.bf16.msra.mxu1 %v10305_v25  ;;  %v9225_v24 = vpop.f32.mrf.mxu1  ;;  %v2014_v44 = vpop.f32.mrf.mxu0 }
 0x349   : > { %9549 = vmatprep.subr.bf16.mxu1 %v10577_v1  ;;  %v11659_v46 = vadd.f32 %v2014_v44, %v1849_v49  ;;  %v2892_v24 = vld [vmem:[#allocation2 + $0x116] sm:$0xff] }
 0x34a   : > { %v1762_v50 = vpop.f32.mrf.mxu1  ;;  %v9281_v54 = vpop.f32.mrf.mxu0  ;;  %v2916_v23 = vpack.c.bf16 %v2893_v38, %v2892_v24 }
 0x34b   : > { %v1850_v19 = vadd.f32 %v1762_v50, %v11453_v9 }
 0x34c   : > { %9550 = vmatpush3.bf16.msra.mxu1 %v10306_v31  ;;  %v9226_v63 = vpop.f32.mrf.mxu1  ;;  %v2017_v33 = vpop.f32.mrf.mxu0 }
 0x34d   : > { %9603 = vmatprep.subr.bf16.mxu1 %v10577_v1  ;;  %v11663_v2 = vadd.f32 %v2017_v33, %v1850_v19  ;;  %v2663_v19 = vpack.c.bf16 %v2642_v11, %v2641_v48 }
 0x34e   : > { %9432 = vmatmul.mubr.msk.bf16.gmra.mxu0 %vm1065_vm2, %v2417_v15  ;;  %v1767_v4 = vpop.f32.mrf.mxu1  ;;  %v9282_v17 = vpop.f32.mrf.mxu0  ;;  %9444 = vmatmul.mubr.msk.bf16.gmra.mxu1 %vm1065_vm2, %v2661_v3  ;;  %v2895_v3 = vld [vmem:[#allocation2 + $0x12e] sm:$0xff] }
 0x34f   : > { %9495 = vmatprep.mubr.msk.bf16.mxu0 %vm10578_vm1, %v10577_v1  ;;  %v1851_v9 = vadd.f32 %v1767_v4, %v11455_v20  ;;  %9447 = vmatprep.mubr.msk.bf16.mxu1 %vm10578_vm1, %v10577_v1  ;;  %v2644_v17 = vld [vmem:[#allocation2 + $0x65] sm:$0xff] }
 0x350   : > { %v9229_v35 = vpop.f32.mrf.mxu1  ;;  %v2022_v10 = vpop.f32.mrf.mxu0 }
 0x351   : > { %v11672_v12 = vadd.f32 %v2022_v10, %v1851_v9  ;;  %v2894_v10 = vld [vmem:[#allocation2 + $0x126] sm:$0xff] }
 0x352   : > { %v1770_v60 = vpop.f32.mrf.mxu1  ;;  %v9285_v57 = vpop.f32.mrf.mxu0  ;;  %v2917_v36 = vpack.c.bf16 %v2895_v3, %v2894_v10 }
 0x353   : > { %v1852_v22 = vadd.f32 %v1770_v60, %v11463_v61  ;;  %v2643_v60 = vld [vmem:[#allocation2 + $0x5d] sm:$0xff] }
 0x354   : > { %v9230_v28 = vpop.f32.mrf.mxu1  ;;  %v2025_v32 = vpop.f32.mrf.mxu0 }
 0x355   : > { %v11675_v20 = vadd.f32 %v2025_v32, %v1852_v22  ;;  %v2664_v22 = vpack.c.bf16 %v2644_v17, %v2643_v60 }
 0x356   : > { %9496 = vmatmul.mubr.msk.bf16.vlgmr.msra.gmra.mxu0 %vm1065_vm2, %v2915_v52  ;;  %v1775_v34 = vpop.f32.mrf.mxu1  ;;  %v9286_v25 = vpop.f32.mrf.mxu0  ;;  %9448 = vmatmul.mubr.msk.bf16.gmra.mxu1 %vm1065_vm2, %v2662_v39  ;;  %v2897_v39 = vld [vmem:[#allocation2 + $0x13e] sm:$0xff] }
 0x357   : > { %9499 = vmatprep.mubr.msk.bf16.mxu0 %vm10578_vm1, %v10577_v1  ;;  %v1853_v59 = vadd.f32 %v1775_v34, %v11465_v56  ;;  %9451 = vmatprep.mubr.msk.bf16.mxu1 %vm10578_vm1, %v10577_v1  ;;  %v2646_v25 = vld [vmem:[#allocation2 + $0x75] sm:$0xff] }
 0x358   : > { %v9233_v61 = vpop.f32.mrf.mxu1  ;;  %v2030_v8 = vpop.f32.mrf.mxu0 }
 0x359   : > { %v11684_v43 = vadd.f32 %v2030_v8, %v1853_v59  ;;  %v2896_v8 = vld [vmem:[#allocation2 + $0x136] sm:$0xff] }
 0x35a   : > { %v1778_v49 = vpop.f32.mrf.mxu1  ;;  %v9289_v31 = vpop.f32.mrf.mxu0  ;;  %v2918_v11 = vpack.c.bf16 %v2897_v39, %v2896_v8 }
 0x35b   : > { %v1854_v44 = vadd.f32 %v1778_v49, %v11473_v13  ;;  %v2645_v49 = vld [vmem:[#allocation2 + $0x6d] sm:$0xff] }
 0x35c   : > { %v9234_v50 = vpop.f32.mrf.mxu1  ;;  %v2033_v54 = vpop.f32.mrf.mxu0 }
 0x35d   : > { %v11687_v56 = vadd.f32 %v2033_v54, %v1854_v44  ;;  %v2665_v44 = vpack.c.bf16 %v2646_v25, %v2645_v49 }
 0x35e   : > { %9500 = vmatmul.mubr.msk.bf16.gmra.mxu0 %vm1065_vm2, %v2916_v23  ;;  %v1783_v15 = vpop.f32.mrf.mxu1  ;;  %v9290_v62 = vpop.f32.mrf.mxu0  ;;  %9452 = vmatmul.mubr.msk.bf16.gmra.mxu1 %vm1065_vm2, %v2663_v19  ;;  %v2899_v19 = vld [vmem:[#allocation2 + $0x14e] sm:$0xff] }
 0x35f   : > { %9503 = vmatprep.mubr.msk.bf16.mxu0 %vm10578_vm1, %v10577_v1  ;;  %v1855_v63 = vadd.f32 %v1783_v15, %v11475_v7  ;;  %9455 = vmatprep.mubr.msk.bf16.mxu1 %vm10578_vm1, %v10577_v1  ;;  %v2648_v62 = vld [vmem:[#allocation2 + $0x85] sm:$0xff] }
 0x360   : > { %v9237_v13 = vpop.f32.mrf.mxu1  ;;  %v2038_v33 = vpop.f32.mrf.mxu0 }
 0x361   : > { %v11696_v4 = vadd.f32 %v2038_v33, %v1855_v63  ;;  %v2898_v33 = vld [vmem:[#allocation2 + $0x146] sm:$0xff] }
 0x362   : > { %v1786_v9 = vpop.f32.mrf.mxu1  ;;  %v9293_v35 = vpop.f32.mrf.mxu0  ;;  %v2919_v17 = vpack.c.bf16 %v2899_v19, %v2898_v33 }
 0x363   : > { %v1856_v47 = vadd.f32 %v1786_v9, %v11483_v14  ;;  %v2647_v9 = vld [vmem:[#allocation2 + $0x7d] sm:$0xff] }
 0x364   : > { %v9238_v57 = vpop.f32.mrf.mxu1  ;;  %v2041_v16 = vpop.f32.mrf.mxu0 }
 0x365   : > { %v11699_v7 = vadd.f32 %v2041_v16, %v1856_v47  ;;  %v2666_v47 = vpack.c.bf16 %v2648_v62, %v2647_v9 }
 0x366   : > { %9504 = vmatmul.mubr.msk.bf16.gmra.mxu0 %vm1065_vm2, %v2917_v36  ;;  %v1791_v52 = vpop.f32.mrf.mxu1  ;;  %v9294_v37 = vpop.f32.mrf.mxu0  ;;  %9456 = vmatmul.mubr.msk.bf16.gmra.mxu1 %vm1065_vm2, %v2664_v22  ;;  %v2901_v22 = vld [vmem:[#allocation2 + $0x15e] sm:$0xff] }
 0x367   : > { %9507 = vmatprep.mubr.msk.bf16.mxu0 %vm10578_vm1, %v10577_v1  ;;  %v1857_v28 = vadd.f32 %v1791_v52, %v11495_v42  ;;  %9459 = vmatprep.mubr.msk.bf16.mxu1 %vm10578_vm1, %v10577_v1  ;;  %v2650_v37 = vld [vmem:[#allocation2 + $0x95] sm:$0xff] }
 0x368   : > { %v9241_v14 = vpop.f32.mrf.mxu1  ;;  %v2046_v32 = vpop.f32.mrf.mxu0 }
 0x369   : > { %v11708_v34 = vadd.f32 %v2046_v32, %v1857_v28  ;;  %v2900_v32 = vld [vmem:[#allocation2 + $0x156] sm:$0xff] }
 0x36a   : > { %v1794_v59 = vpop.f32.mrf.mxu1  ;;  %v9297_v61 = vpop.f32.mrf.mxu0  ;;  %v2920_v25 = vpack.c.bf16 %v2901_v22, %v2900_v32 }
 0x36b   : > { %v1858_v38 = vadd.f32 %v1794_v59, %v11508_v45  ;;  %v2649_v59 = vld [vmem:[#allocation2 + $0x8d] sm:$0xff] }
 0x36c   : > { %v9242_v31 = vpop.f32.mrf.mxu1  ;;  %v2049_v24 = vpop.f32.mrf.mxu0 }
 0x36d   : > { %v11711_v42 = vadd.f32 %v2049_v24, %v1858_v38  ;;  %v2667_v38 = vpack.c.bf16 %v2650_v37, %v2649_v59 }
 0x36e   : > { %9508 = vmatmul.mubr.msk.bf16.gmra.mxu0 %vm1065_vm2, %v2918_v11  ;;  %v1799_v23 = vpop.f32.mrf.mxu1  ;;  %v9298_v48 = vpop.f32.mrf.mxu0  ;;  %9460 = vmatmul.mubr.msk.bf16.gmra.mxu1 %vm1065_vm2, %v2665_v44  ;;  %v2903_v44 = vld [vmem:[#allocation2 + $0x16e] sm:$0xff] }
 0x36f   : > { %9511 = vmatprep.mubr.msk.bf16.mxu0 %vm10578_vm1, %v10577_v1  ;;  %v1859_v50 = vadd.f32 %v1799_v23, %v11513_v0  ;;  %9463 = vmatprep.mubr.msk.bf16.mxu1 %vm10578_vm1, %v10577_v1  ;;  %v2652_v48 = vld [vmem:[#allocation2 + $0xa5] sm:$0xff] }
 0x370   : > { %v9245_v45 = vpop.f32.mrf.mxu1  ;;  %v2054_v54 = vpop.f32.mrf.mxu0 }
 0x371   : > { %v11720_v15 = vadd.f32 %v2054_v54, %v1859_v50  ;;  %v2902_v54 = vld [vmem:[#allocation2 + $0x166] sm:$0xff] }
 0x372   : > { %v1802_v63 = vpop.f32.mrf.mxu1  ;;  %v9301_v13 = vpop.f32.mrf.mxu0  ;;  %v2921_v62 = vpack.c.bf16 %v2903_v44, %v2902_v54  ;;  %v2909_v54 = vld [vmem:[#allocation2 + $0x19e] sm:$0xff] }
 0x373   : > { %v1860_v3 = vadd.f32 %v1802_v63, %v11520_v5  ;;  %v2651_v63 = vld [vmem:[#allocation2 + $0x9d] sm:$0xff] }
 0x374   : > { %v9246_v35 = vpop.f32.mrf.mxu1  ;;  %v2057_v10 = vpop.f32.mrf.mxu0 }
 0x375   : > { %v11723_v0 = vadd.f32 %v2057_v10, %v1860_v3  ;;  %v2668_v3 = vpack.c.bf16 %v2652_v48, %v2651_v63  ;;  %v2908_v63 = vld [vmem:[#allocation2 + $0x196] sm:$0xff] }
 0x376   : > { %9512 = vmatmul.mubr.msk.bf16.gmra.mxu0 %vm1065_vm2, %v2919_v17  ;;  %v1807_v36 = vpop.f32.mrf.mxu1  ;;  %v9302_v60 = vpop.f32.mrf.mxu0  ;;  %9464 = vmatmul.mubr.msk.bf16.gmra.mxu1 %vm1065_vm2, %v2666_v47  ;;  %v2905_v47 = vld [vmem:[#allocation2 + $0x17e] sm:$0xff] }
 0x377   : > { %9515 = vmatprep.mubr.msk.bf16.mxu0 %vm10578_vm1, %v10577_v1  ;;  %v1861_v57 = vadd.f32 %v1807_v36, %v11526_v18  ;;  %9467 = vmatprep.mubr.msk.bf16.mxu1 %vm10578_vm1, %v10577_v1  ;;  %v2654_v60 = vld [vmem:[#allocation2 + $0xb5] sm:$0xff] }
 0x378   : > { %v9249_v5 = vpop.f32.mrf.mxu1  ;;  %v2062_v16 = vpop.f32.mrf.mxu0 }
 0x379   : > { %v11732_v52 = vadd.f32 %v2062_v16, %v1861_v57  ;;  %v2904_v16 = vld [vmem:[#allocation2 + $0x176] sm:$0xff] }
 0x37a   : > { %v1810_v28 = vpop.f32.mrf.mxu1  ;;  %v9305_v14 = vpop.f32.mrf.mxu0  ;;  %v2922_v37 = vpack.c.bf16 %v2905_v47, %v2904_v16 }
 0x37b   : > { %v1862_v39 = vadd.f32 %v1810_v28, %v11537_v51  ;;  %v2653_v28 = vld [vmem:[#allocation2 + $0xad] sm:$0xff] }
 0x37c   : > { %v9250_v61 = vpop.f32.mrf.mxu1  ;;  %v2065_v8 = vpop.f32.mrf.mxu0 }
 0x37d   : > { %v11735_v18 = vadd.f32 %v2065_v8, %v1862_v39  ;;  %v2669_v39 = vpack.c.bf16 %v2654_v60, %v2653_v28  ;;  %v2907_v8 = vld [vmem:[#allocation2 + $0x18e] sm:$0xff] }
 0x37e   : > { %9516 = vmatmul.mubr.msk.bf16.gmra.mxu0 %vm1065_vm2, %v2920_v25  ;;  %v1815_v11 = vpop.f32.mrf.mxu1  ;;  %v9306_v49 = vpop.f32.mrf.mxu0  ;;  %9468 = vmatmul.mubr.msk.bf16.gmra.mxu1 %vm1065_vm2, %v2667_v38  ;;  %v2656_v38 = vld [vmem:[#allocation2 + $0xc5] sm:$0xff]  ;;  %v2911_v60 = vld [vmem:[#allocation2 + $0x1ae] sm:$0xff] }
 0x37f   : > { %9519 = vmatprep.mubr.msk.bf16.mxu0 %vm10578_vm1, %v10577_v1  ;;  %v1863_v31 = vadd.f32 %v1815_v11, %v11589_v30  ;;  %9471 = vmatprep.mubr.msk.bf16.mxu1 %vm10578_vm1, %v10577_v1  ;;  %v2906_v49 = vld [vmem:[#allocation2 + $0x186] sm:$0xff] }
 0x380   : > { %v9253_v51 = vpop.f32.mrf.mxu1  ;;  %v2070_v24 = vpop.f32.mrf.mxu0 }
 0x381   : > { %v11744_v23 = vadd.f32 %v2070_v24, %v1863_v31  ;;  %v2923_v51 = vpack.c.bf16 %v2907_v8, %v2906_v49  ;;  %v2655_v24 = vld [vmem:[#allocation2 + $0xbd] sm:$0xff] }
 0x382   : > { %v1818_v50 = vpop.f32.mrf.mxu1  ;;  %v9309_v45 = vpop.f32.mrf.mxu0  ;;  %v2670_v48 = vpack.c.bf16 %v2656_v38, %v2655_v24  ;;  %v2912_v8 = vld [vmem:[#allocation2 + $0x1b6] sm:$0xff]  ;;  %v2913_v38 = vld [vmem:[#allocation2 + $0x1be] sm:$0xff] }
 0x383   : > { %v1864_v19 = vadd.f32 %v1818_v50, %v11591_v53  ;;  %v3146_v49 = vld [vmem:[#allocation2 + $0x1f7] sm:$0xff] }
 0x384   : > { %v9254_v13 = vpop.f32.mrf.mxu1  ;;  %v2073_v33 = vpop.f32.mrf.mxu0 }
 0x385   : > { %v11747_v30 = vadd.f32 %v2073_v33, %v1864_v19  ;;  %v2658_v19 = vld [vmem:[#allocation2 + $0xd5] sm:$0xff]  ;;  %v2924_v13 = vpack.c.bf16 %v2909_v54, %v2908_v63 }
 0x386   : > { %9520 = vmatmul.mubr.msk.bf16.gmra.mxu0 %vm1065_vm2, %v2921_v62  ;;  %v1823_v17 = vpop.f32.mrf.mxu1  ;;  %v9310_v9 = vpop.f32.mrf.mxu0  ;;  %9472 = vmatmul.mubr.msk.bf16.gmra.mxu1 %vm1065_vm2, %v2668_v3 }
 0x387   : > { %9523 = vmatprep.mubr.msk.bf16.mxu0 %vm10578_vm1, %v10577_v1  ;;  %v1865_v35 = vadd.f32 %v1823_v17, %v11599_v40  ;;  %9475 = vmatprep.mubr.msk.bf16.mxu1 %vm10578_vm1, %v10577_v1 }
 0x388   : > { %v9257_v53 = vpop.f32.mrf.mxu1  ;;  %v2078_v10 = vpop.f32.mrf.mxu0 }
 0x389   : > { %v11756_v36 = vadd.f32 %v2078_v10, %v1865_v35  ;;  %v2659_v10 = vld [vmem:[#allocation2 + $0xdd] sm:$0xf] }
 0x38a   : > { %v1826_v57 = vpop.f32.mrf.mxu1  ;;  %v9313_v5 = vpop.f32.mrf.mxu0 }
 0x38b   : > { %v1866_v22 = vadd.f32 %v1826_v57, %v11601_v55 }
 0x38c   : > { %v9258_v14 = vpop.f32.mrf.mxu1  ;;  %v2081_v32 = vpop.f32.mrf.mxu0 }
 0x38d   : > { %v11759_v40 = vadd.f32 %v2081_v32, %v1866_v22  ;;  %v2910_v22 = vld [vmem:[#allocation2 + $0x1a6] sm:$0xff] }
 0x38e   : > { %9524 = vmatmul.mubr.msk.bf16.gmra.mxu0 %vm1065_vm2, %v2922_v37  ;;  %v1831_v25 = vpop.f32.mrf.mxu1  ;;  %v9314_v59 = vpop.f32.mrf.mxu0  ;;  %9476 = vmatmul.mubr.msk.bf16.gmra.mxu1 %vm1065_vm2, %v2669_v39  ;;  %v2672_v37 = vpack.c.bf16 %v2659_v10, %v2659_v10  ;;  %v2925_v32 = vpack.c.bf16 %v2911_v60, %v2910_v22 }
 0x38f   : > { %9527 = vmatprep.mubr.msk.bf16.mxu0 %vm10578_vm1, %v10577_v1  ;;  %v1867_v61 = vadd.f32 %v1831_v25, %v11609_v6  ;;  %9479 = vmatprep.mubr.msk.bf16.mxu1 %vm10578_vm1, %v10577_v1 }
 0x390   : > { %v9261_v55 = vpop.f32.mrf.mxu1 }
 0x392   : > { %v1834_v11 = vpop.f32.mrf.mxu1 }
 0x393   : > { %v1868_v31 = vadd.f32 %v1834_v11, %v11611_v26  ;;  %v2657_v26 = vld [vmem:[#allocation2 + $0xcd] sm:$0xff] }
 0x394   : > { %v9262_v44 = vpop.f32.mrf.mxu1  ;;  %v2671_v3 = vpack.c.bf16 %v2658_v19, %v2657_v26  ;;  %v2914_v26 = vld [vmem:[#allocation2 + $0x1c6] sm:$0xf] }
 0x395   : > { %v2926_v44 = vpack.c.bf16 %v2913_v38, %v2912_v8 }
 0x396   : > { %9528 = vmatmul.mubr.msk.bf16.gmra.mxu0 %vm1065_vm2, %v2923_v51  ;;  %v1839_v50 = vpop.f32.mrf.mxu1  ;;  %9480 = vmatmul.mubr.msk.bf16.gmra.mxu1 %vm1065_vm2, %v2670_v48  ;;  %v3145_v48 = vld [vmem:[#allocation2 + $0x1ef] sm:$0xff] }
 0x397   : > { %9531 = vmatprep.mubr.msk.bf16.mxu0 %vm10578_vm1, %v10577_v1  ;;  %v1869_v6 = vadd.f32 %v1839_v50, %v11619_v29  ;;  %9483 = vmatprep.mubr.msk.bf16.mxu1 %vm10578_vm1, %v10577_v1 }
 0x398   : > { %v9265_v45 = vpop.f32.mrf.mxu1 }
 0x39a   : > { %v1842_v62 = vpop.f32.mrf.mxu1 }
 0x39c   : > { %v9266_v33 = vpop.f32.mrf.mxu1 }
 0x39d   : > { %v3148_v33 = vld [vmem:[#allocation2 + $0x207] sm:$0xff] }
 0x39e   : > { %v2086_v17 = vpop.f32.mrf.mxu0  ;;  %9532 = vmatmul.mubr.msk.bf16.gmra.mxu0 %vm1065_vm2, %v2924_v13  ;;  %v2253_v35 = vpop.f32.mrf.mxu1  ;;  %9484 = vmatmul.mubr.msk.bf16.gmra.mxu1 %vm1065_vm2, %v2671_v3  ;;  %v2927_v13 = vpack.c.bf16 %v2914_v26, %v2914_v26 }
 0x39f   : > { %v11777_v9 = vadd.f32 %v2086_v17, %v1867_v61  ;;  %9535 = vmatprep.mubr.msk.bf16.mxu0 %vm10578_vm1, %v10577_v1  ;;  %v2355_v29 = vadd.f32 %v2253_v35, %v11628_v58  ;;  %9487 = vmatprep.mubr.msk.bf16.mxu1 %vm10578_vm1, %v10577_v1 }
 0x3a0   : > { %v9317_v53 = vpop.f32.mrf.mxu0  ;;  %v9329_v47 = vpop.f32.mrf.mxu1 }
 0x3a1   : > { %v3147_v53 = vld [vmem:[#allocation2 + $0x1ff] sm:$0xff] }
 0x3a2   : > { %v2089_v57 = vpop.f32.mrf.mxu0  ;;  %v2256_v16 = vpop.f32.mrf.mxu1  ;;  %v3171_v47 = vpack.c.bf16 %v3148_v33, %v3147_v53 }
 0x3a3   : > { %v11785_v5 = vadd.f32 %v2089_v57, %v1868_v31  ;;  %v2356_v28 = vadd.f32 %v2256_v16, %v11631_v27 }
 0x3a4   : > { %v9318_v14 = vpop.f32.mrf.mxu0  ;;  %v9330_v39 = vpop.f32.mrf.mxu1 }
 0x3a6   : > { %v2094_v25 = vpop.f32.mrf.mxu0  ;;  %9536 = vmatmul.mubr.msk.bf16.gmra.mxu0 %vm1065_vm2, %v2925_v32  ;;  %v2261_v59 = vpop.f32.mrf.mxu1  ;;  %9488 = vmatmul.mubr.msk.bf16.gmra.mxu1 %vm1065_vm2, %v2672_v37 }
 0x3a7   : > { %v11789_v58 = vadd.f32 %v2094_v25, %v1869_v6  ;;  %9539 = vmatprep.mubr.msk.bf16.mxu0 %vm10578_vm1, %v10577_v1  ;;  %v2357_v61 = vadd.f32 %v2261_v59, %v11640_v21  ;;  %9551 = vmatprep.mubr.msk.bf16.mxu1 %vm10578_vm1, %v10577_v1  ;;  %v3170_v6 = vpack.c.bf16 %v3146_v49, %v3145_v48  ;;  %v3149_v59 = vld [vmem:[#allocation2 + $0x20f] sm:$0xff] }
 0x3a8   : > { %v9321_v55 = vpop.f32.mrf.mxu0  ;;  %v9333_v27 = vpop.f32.mrf.mxu1 }
 0x3aa   : > { %v2097_v11 = vpop.f32.mrf.mxu0  ;;  %v2264_v31 = vpop.f32.mrf.mxu1 }
 0x3ab   : > { %v2358_v51 = vadd.f32 %v2264_v31, %v11646_v41 }
 0x3ac   : > { %v9322_v24 = vpop.f32.mrf.mxu0  ;;  %v9334_v50 = vpop.f32.mrf.mxu1 }
 0x3ad   : > { %v3151_v50 = vld [vmem:[#allocation2 + $0x21f] sm:$0xff] }
 0x3ae   : > { %v2508_v45 = vpop.f32.mrf.mxu0  ;;  %9540 = vmatmul.mubr.msk.bf16.gmra.mxu0 %vm1065_vm2, %v2926_v44  ;;  %v2269_v54 = vpop.f32.mrf.mxu1  ;;  %9552 = vmatmul.mubr.msk.bf16.vlgmr.msra.gmra.mxu1 %vm1065_vm2, %v3170_v6 }
 0x3af   : > { %v11799_v21 = vadd.f32 %v2508_v45, %v2355_v29  ;;  %9543 = vmatprep.mubr.msk.bf16.mxu0 %vm10578_vm1, %v10577_v1  ;;  %v2359_v19 = vadd.f32 %v2269_v54, %v11659_v46  ;;  %9555 = vmatprep.mubr.msk.bf16.mxu1 %vm10578_vm1, %v10577_v1 }
 0x3b0   : > { %v9385_v41 = vpop.f32.mrf.mxu0  ;;  %v9337_v62 = vpop.f32.mrf.mxu1 }
 0x3b2   : > { %v2511_v63 = vpop.f32.mrf.mxu0  ;;  %v2272_v17 = vpop.f32.mrf.mxu1 }
 0x3b3   : > { %v11807_v3 = vadd.f32 %v2511_v63, %v2356_v28  ;;  %v2360_v35 = vadd.f32 %v2272_v17, %v11663_v2  ;;  %v3150_v28 = vld [vmem:[#allocation2 + $0x217] sm:$0xff] }
 0x3b4   : > { %v9386_v29 = vpop.f32.mrf.mxu0  ;;  %v9338_v10 = vpop.f32.mrf.mxu1  ;;  %v3172_v55 = vpack.c.bf16 %v3150_v28, %v3149_v59 }
 0x3b5   : > { %v3153_v29 = vld [vmem:[#allocation2 + $0x22f] sm:$0xff] }
 0x3b6   : > { %v2516_v60 = vpop.f32.mrf.mxu0  ;;  %9544 = vmatmul.mubr.msk.bf16.gmra.mxu0 %vm1065_vm2, %v2927_v13  ;;  %v2277_v57 = vpop.f32.mrf.mxu1  ;;  %9556 = vmatmul.mubr.msk.bf16.gmra.mxu1 %vm1065_vm2, %v3171_v47  ;;  %v3154_v13 = vld [vmem:[#allocation2 + $0x237] sm:$0xff] }
 0x3b7   : > { %v11811_v46 = vadd.f32 %v2516_v60, %v2357_v61  ;;  %v2361_v16 = vadd.f32 %v2277_v57, %v11672_v12  ;;  %9559 = vmatprep.mubr.msk.bf16.mxu1 %vm10578_vm1, %v10577_v1  ;;  %v3174_v10 = vpack.c.bf16 %v3154_v13, %v3153_v29 }
 0x3b8   : > { %v9389_v22 = vpop.f32.mrf.mxu0  ;;  %v9341_v37 = vpop.f32.mrf.mxu1 }
 0x3ba   : > { %v2519_v2 = vpop.f32.mrf.mxu0  ;;  %v2280_v32 = vpop.f32.mrf.mxu1 }
 0x3bb   : > { %v11817_v14 = vadd.f32 %v2519_v2, %v2358_v51  ;;  %v2362_v39 = vadd.f32 %v2280_v32, %v11675_v20  ;;  %v3152_v51 = vld [vmem:[#allocation2 + $0x227] sm:$0xff] }
 0x3bc   : > { %v9390_v25 = vpop.f32.mrf.mxu0  ;;  %v9342_v61 = vpop.f32.mrf.mxu1  ;;  %v3173_v45 = vpack.c.bf16 %v3152_v51, %v3151_v50  ;;  %v3156_v2 = vld [vmem:[#allocation2 + $0x247] sm:$0xff] }
 0x3bd   : > { %v3155_v25 = vld [vmem:[#allocation2 + $0x23f] sm:$0xff] }
 0x3be   : > { %v2524_v27 = vpop.f32.mrf.mxu0  ;;  %v2285_v12 = vpop.f32.mrf.mxu1  ;;  %9560 = vmatmul.mubr.msk.bf16.gmra.mxu1 %vm1065_vm2, %v3172_v55  ;;  %v3175_v61 = vpack.c.bf16 %v3156_v2, %v3155_v25 }
 0x3bf   : > { %v11820_v8 = vadd.f32 %v2524_v27, %v2359_v19  ;;  %v2363_v38 = vadd.f32 %v2285_v12, %v11684_v43  ;;  %9563 = vmatprep.mubr.msk.bf16.mxu1 %vm10578_vm1, %v10577_v1 }
 0x3c0   : > { %v9393_v11 = vpop.f32.mrf.mxu0  ;;  %v9345_v49 = vpop.f32.mrf.mxu1 }
 0x3c2   : > { %v2527_v31 = vpop.f32.mrf.mxu0  ;;  %v2288_v24 = vpop.f32.mrf.mxu1 }
 0x3c3   : > { %v11826_v20 = vadd.f32 %v2527_v31, %v2360_v35  ;;  %v2364_v44 = vadd.f32 %v2288_v24, %v11687_v56  ;;  %v3158_v31 = vld [vmem:[#allocation2 + $0x257] sm:$0xff] }
 0x3c4   : > { %v9394_v48 = vpop.f32.mrf.mxu0  ;;  %v9346_v6 = vpop.f32.mrf.mxu1 }
 0x3c5   : > { %v3157_v48 = vld [vmem:[#allocation2 + $0x24f] sm:$0xff] }
 0x3c6   : > { %v2532_v54 = vpop.f32.mrf.mxu0  ;;  %v2293_v43 = vpop.f32.mrf.mxu1  ;;  %9564 = vmatmul.mubr.msk.bf16.gmra.mxu1 %vm1065_vm2, %v3173_v45  ;;  %v3176_v6 = vpack.c.bf16 %v3158_v31, %v3157_v48 }
 0x3c7   : > { %v11829_v26 = vadd.f32 %v2532_v54, %v2361_v16  ;;  %v2365_v19 = vadd.f32 %v2293_v43, %v11696_v4  ;;  %9567 = vmatprep.mubr.msk.bf16.mxu1 %vm10578_vm1, %v10577_v1 }
 0x3c8   : > { %v9397_v41 = vpop.f32.mrf.mxu0  ;;  %v9349_v62 = vpop.f32.mrf.mxu1 }
 0x3ca   : > { %v2535_v63 = vpop.f32.mrf.mxu0  ;;  %v2296_v33 = vpop.f32.mrf.mxu1 }
 0x3cb   : > { %v11835_v56 = vadd.f32 %v2535_v63, %v2362_v39  ;;  %v2366_v17 = vadd.f32 %v2296_v33, %v11699_v7  ;;  %v3160_v63 = vld [vmem:[#allocation2 + $0x267] sm:$0xff] }
 0x3cc   : > { %v9398_v35 = vpop.f32.mrf.mxu0  ;;  %v9350_v53 = vpop.f32.mrf.mxu1 }
 0x3cd   : > { %v3159_v35 = vld [vmem:[#allocation2 + $0x25f] sm:$0xff] }
 0x3ce   : > { %v2540_v47 = vpop.f32.mrf.mxu0  ;;  %v2301_v4 = vpop.f32.mrf.mxu1  ;;  %9568 = vmatmul.mubr.msk.bf16.gmra.mxu1 %vm1065_vm2, %v3174_v10  ;;  %v3177_v53 = vpack.c.bf16 %v3160_v63, %v3159_v35 }
 0x3cf   : > { %v11838_v60 = vadd.f32 %v2540_v47, %v2363_v38  ;;  %v2367_v57 = vadd.f32 %v2301_v4, %v11708_v34  ;;  %9571 = vmatprep.mubr.msk.bf16.mxu1 %vm10578_vm1, %v10577_v1 }
 0x3d0   : > { %v9401_v16 = vpop.f32.mrf.mxu0  ;;  %v9353_v22 = vpop.f32.mrf.mxu1 }
 0x3d2   : > { %v2543_v37 = vpop.f32.mrf.mxu0  ;;  %v2304_v28 = vpop.f32.mrf.mxu1 }
 0x3d3   : > { %v11844_v7 = vadd.f32 %v2543_v37, %v2364_v44  ;;  %v2368_v32 = vadd.f32 %v2304_v28, %v11711_v42  ;;  %v3162_v37 = vld [vmem:[#allocation2 + $0x277] sm:$0xff] }
 0x3d4   : > { %v9402_v39 = vpop.f32.mrf.mxu0  ;;  %v9354_v59 = vpop.f32.mrf.mxu1 }
 0x3d5   : > { %v3161_v39 = vld [vmem:[#allocation2 + $0x26f] sm:$0xff] }
 0x3d6   : > { %v2548_v55 = vpop.f32.mrf.mxu0  ;;  %v2309_v34 = vpop.f32.mrf.mxu1  ;;  %9572 = vmatmul.mubr.msk.bf16.gmra.mxu1 %vm1065_vm2, %v3175_v61  ;;  %v3178_v59 = vpack.c.bf16 %v3162_v37, %v3161_v39 }
 0x3d7   : > { %v11847_v27 = vadd.f32 %v2548_v55, %v2365_v19  ;;  %v2369_v12 = vadd.f32 %v2309_v34, %v11720_v15  ;;  %9575 = vmatprep.mubr.msk.bf16.mxu1 %vm10578_vm1, %v10577_v1 }
 0x3d8   : > { %v9405_v38 = vpop.f32.mrf.mxu0  ;;  %v9357_v11 = vpop.f32.mrf.mxu1 }
 0x3d9   : > { %v3164_v11 = vld [vmem:[#allocation2 + $0x287] sm:$0xff] }
 0x3da   : > { %v2551_v49 = vpop.f32.mrf.mxu0  ;;  %v2312_v51 = vpop.f32.mrf.mxu1 }
 0x3db   : > { %v11853_v42 = vadd.f32 %v2551_v49, %v2366_v17  ;;  %v2370_v24 = vadd.f32 %v2312_v51, %v11723_v0 }
 0x3dc   : > { %v9406_v44 = vpop.f32.mrf.mxu0  ;;  %v9358_v50 = vpop.f32.mrf.mxu1 }
 0x3de   : > { %v2556_v45 = vpop.f32.mrf.mxu0  ;;  %v2317_v15 = vpop.f32.mrf.mxu1  ;;  %9576 = vmatmul.mubr.msk.bf16.gmra.mxu1 %vm1065_vm2, %v3176_v6 }
 0x3df   : > { %v11856_v54 = vadd.f32 %v2556_v45, %v2367_v57  ;;  %v2371_v43 = vadd.f32 %v2317_v15, %v11732_v52  ;;  %9579 = vmatprep.mubr.msk.bf16.mxu1 %vm10578_vm1, %v10577_v1 }
 0x3e0   : > { %v9409_v19 = vpop.f32.mrf.mxu0  ;;  %v9361_v41 = vpop.f32.mrf.mxu1 }
 0x3e2   : > { %v2559_v62 = vpop.f32.mrf.mxu0  ;;  %v2320_v13 = vpop.f32.mrf.mxu1 }
 0x3e3   : > { %v11862_v0 = vadd.f32 %v2559_v62, %v2368_v32  ;;  %v2372_v33 = vadd.f32 %v2320_v13, %v11735_v18  ;;  %v3166_v62 = vld [vmem:[#allocation2 + $0x297] sm:$0xff] }
 0x3e4   : > { %v9410_v17 = vpop.f32.mrf.mxu0  ;;  %v9362_v29 = vpop.f32.mrf.mxu1 }
 0x3e5   : > { %v3165_v17 = vld [vmem:[#allocation2 + $0x28f] sm:$0xff] }
 0x3e6   : > { %v2564_v10 = vpop.f32.mrf.mxu0  ;;  %v2325_v52 = vpop.f32.mrf.mxu1  ;;  %9580 = vmatmul.mubr.msk.bf16.gmra.mxu1 %vm1065_vm2, %v3177_v53  ;;  %v3180_v29 = vpack.c.bf16 %v3166_v62, %v3165_v17 }
 0x3e7   : > { %v11865_v47 = vadd.f32 %v2564_v10, %v2369_v12  ;;  %v2373_v4 = vadd.f32 %v2325_v52, %v11744_v23  ;;  %9583 = vmatprep.mubr.msk.bf16.mxu1 %vm10578_vm1, %v10577_v1 }
 0x3e8   : > { %v9413_v57 = vpop.f32.mrf.mxu0  ;;  %v9365_v16 = vpop.f32.mrf.mxu1 }
 0x3ea   : > { %v2567_v22 = vpop.f32.mrf.mxu0  ;;  %v2328_v2 = vpop.f32.mrf.mxu1 }
 0x3eb   : > { %v11871_v18 = vadd.f32 %v2567_v22, %v2370_v24  ;;  %v2374_v28 = vadd.f32 %v2328_v2, %v11747_v30  ;;  %v3163_v24 = vld [vmem:[#allocation2 + $0x27f] sm:$0xff] }
 0x3ec   : > { %v9414_v32 = vpop.f32.mrf.mxu0  ;;  %v9366_v25 = vpop.f32.mrf.mxu1  ;;  %v3179_v48 = vpack.c.bf16 %v3164_v11, %v3163_v24  ;;  %v3167_v22 = vld [vmem:[#allocation2 + $0x29f] sm:$0xff] }
 0x3ee   : > { %v2572_v61 = vpop.f32.mrf.mxu0  ;;  %v2333_v23 = vpop.f32.mrf.mxu1  ;;  %9584 = vmatmul.mubr.msk.bf16.gmra.mxu1 %vm1065_vm2, %v3178_v59 }
 0x3ef   : > { %v11874_v55 = vadd.f32 %v2572_v61, %v2371_v43  ;;  %v2375_v34 = vadd.f32 %v2333_v23, %v11756_v36  ;;  %9587 = vmatprep.mubr.msk.bf16.mxu1 %vm10578_vm1, %v10577_v1 }
 0x3f0   : > { %v9417_v12 = vpop.f32.mrf.mxu0  ;;  %v9369_v38 = vpop.f32.mrf.mxu1 }
 0x3f2   : > { %v2575_v30 = vpop.f32.mrf.mxu0  ;;  %v2336_v31 = vpop.f32.mrf.mxu1 }
 0x3f3   : > { %v11884_v49 = vadd.f32 %v2575_v30, %v2372_v33  ;;  %v2376_v51 = vadd.f32 %v2336_v31, %v11759_v40 }
 0x3f4   : > { %v9418_v36 = vpop.f32.mrf.mxu0  ;;  %v9370_v44 = vpop.f32.mrf.mxu1 }
 0x3f6   : > { %v2580_v50 = vpop.f32.mrf.mxu0  ;;  %v2341_v45 = vpop.f32.mrf.mxu1  ;;  %9588 = vmatmul.mubr.msk.bf16.gmra.mxu1 %vm1065_vm2, %v3179_v48 }
 0x3f7   : > { %v11887_v6 = vadd.f32 %v2580_v50, %v2373_v4  ;;  %v2377_v15 = vadd.f32 %v2341_v45, %v11777_v9  ;;  %9591 = vmatprep.mubr.msk.bf16.mxu1 %vm10578_vm1, %v10577_v1 }
 0x3f8   : > { %v9421_v43 = vpop.f32.mrf.mxu0  ;;  %v9373_v19 = vpop.f32.mrf.mxu1 }
 0x3fa   : > { %v2583_v41 = vpop.f32.mrf.mxu0  ;;  %v2344_v63 = vpop.f32.mrf.mxu1 }
 0x3fb   : > { %v11893_v40 = vadd.f32 %v2583_v41, %v2374_v28  ;;  %v2378_v13 = vadd.f32 %v2344_v63, %v11785_v5  ;;  %v3168_v5 = vld [vmem:[#allocation2 + $0x2a7] sm:$0xff] }
 0x3fc   : > { %v9422_v33 = vpop.f32.mrf.mxu0  ;;  %v9374_v35 = vpop.f32.mrf.mxu1  ;;  %v3181_v39 = vpack.c.bf16 %v3168_v5, %v3167_v22 }
 0x3fe   : > { %v2588_v53 = vpop.f32.mrf.mxu0  ;;  %v2349_v9 = vpop.f32.mrf.mxu1  ;;  %9592 = vmatmul.mubr.msk.bf16.gmra.mxu1 %vm1065_vm2, %v3180_v29 }
 0x3ff   : > { %v11896_v10 = vadd.f32 %v2588_v53, %v2375_v34  ;;  %v2379_v52 = vadd.f32 %v2349_v9, %v11789_v58  ;;  %9595 = vmatprep.mubr.msk.bf16.mxu1 %vm10578_vm1, %v10577_v1  ;;  %v3169_v34 = vld [vmem:[#allocation2 + $0x2af] sm:$0xf] }
 0x400   : > { %v9425_v4 = vpop.f32.mrf.mxu0  ;;  %v9377_v57 = vpop.f32.mrf.mxu1  ;;  %v3182_v31 = vpack.c.bf16 %v3169_v34, %v3169_v34 }
 0x402   : > { %v2591_v16 = vpop.f32.mrf.mxu0  ;;  %v2352_v2 = vpop.f32.mrf.mxu1 }
 0x403   : > { %v11902_v37 = vadd.f32 %v2591_v16, %v2376_v51 }
 0x404   : > { %v9426_v28 = vpop.f32.mrf.mxu0  ;;  %v9378_v32 = vpop.f32.mrf.mxu1 }
 0x406   : > { %v2596_v25 = vpop.f32.mrf.mxu0  ;;  %v2763_v61 = vpop.f32.mrf.mxu1  ;;  %9596 = vmatmul.mubr.msk.bf16.gmra.mxu1 %vm1065_vm2, %v3181_v39 }
 0x407   : > { %v11904_v59 = vadd.f32 %v2596_v25, %v2377_v15  ;;  %v2865_v58 = vadd.f32 %v2763_v61, %v11799_v21  ;;  %9599 = vmatprep.mubr.msk.bf16.mxu1 %vm10578_vm1, %v10577_v1 }
 0x408   : > { %v9429_v23 = vpop.f32.mrf.mxu0  ;;  %v9441_v12 = vpop.f32.mrf.mxu1 }
 0x40a   : > { %v2599_v38 = vpop.f32.mrf.mxu0  ;;  %v2766_v11 = vpop.f32.mrf.mxu1 }
 0x40b   : > { %v11910_v30 = vadd.f32 %v2599_v38, %v2378_v13  ;;  %v2866_v51 = vadd.f32 %v2766_v11, %v11807_v3 }
 0x40c   : > { %v9430_v36 = vpop.f32.mrf.mxu0  ;;  %v9442_v24 = vpop.f32.mrf.mxu1 }
 0x40e   : > { %v2604_v44 = vpop.f32.mrf.mxu0  ;;  %v2771_v50 = vpop.f32.mrf.mxu1  ;;  %9600 = vmatmul.mubr.msk.bf16.gmra.mxu1 %vm1065_vm2, %v3182_v31 }
 0x40f   : > { %v11913_v48 = vadd.f32 %v2604_v44, %v2379_v52  ;;  %v2867_v21 = vadd.f32 %v2771_v50, %v11811_v46  ;;  %9611 = vmatprep.mubr.msk.bf16.mxu1 %vm10578_vm1, %v10577_v1 }
 0x410   : > { %v9433_v45 = vpop.f32.mrf.mxu0  ;;  %v9445_v15 = vpop.f32.mrf.mxu1 }
 0x412   : > { %v2607_v43 = vpop.f32.mrf.mxu0  ;;  %v2774_v19 = vpop.f32.mrf.mxu1 }
 0x413   : > { %v2868_v41 = vadd.f32 %v2774_v19, %v11817_v14 }
 0x414   : > { %v9434_v3 = vpop.f32.mrf.mxu0  ;;  %v9446_v62 = vpop.f32.mrf.mxu1 }
 0x416   : > { %v3018_v63 = vpop.f32.mrf.mxu0  ;;  %v2779_v33 = vpop.f32.mrf.mxu1 }
 0x417   : > { %v11920_v13 = vadd.f32 %v3018_v63, %v2865_v58  ;;  %v2869_v17 = vadd.f32 %v2779_v33, %v11820_v8 }
 0x418   : > { %v9497_v35 = vpop.f32.mrf.mxu0  ;;  %v9449_v29 = vpop.f32.mrf.mxu1 }
 0x41a   : > { %v3021_v46 = vpop.f32.mrf.mxu0  ;;  %v2782_v9 = vpop.f32.mrf.mxu1 }
 0x41b   : > { %v11923_v53 = vadd.f32 %v3021_v46, %v2866_v51  ;;  %v2870_v52 = vadd.f32 %v2782_v9, %v11826_v20 }
 0x41c   : > { %v9498_v4 = vpop.f32.mrf.mxu0  ;;  %v9450_v57 = vpop.f32.mrf.mxu1 }
 0x41e   : > { %v3026_v16 = vpop.f32.mrf.mxu0  ;;  %v2787_v22 = vpop.f32.mrf.mxu1 }
 0x41f   : > { %v11926_v14 = vadd.f32 %v3026_v16, %v2867_v21  ;;  %v2871_v5 = vadd.f32 %v2787_v22, %v11829_v26 }
 0x420   : > { %v9501_v2 = vpop.f32.mrf.mxu0  ;;  %v9453_v28 = vpop.f32.mrf.mxu1 }
 0x422   : > { %v3029_v32 = vpop.f32.mrf.mxu0  ;;  %v2790_v39 = vpop.f32.mrf.mxu1 }
 0x423   : > { %v11929_v8 = vadd.f32 %v3029_v32, %v2868_v41  ;;  %v2872_v25 = vadd.f32 %v2790_v39, %v11835_v56 }
 0x424   : > { %v9502_v61 = vpop.f32.mrf.mxu0  ;;  %v9454_v58 = vpop.f32.mrf.mxu1 }
 0x426   : > { %v3034_v23 = vpop.f32.mrf.mxu0  ;;  %v2795_v34 = vpop.f32.mrf.mxu1 }
 0x427   : > { %v11932_v20 = vadd.f32 %v3034_v23, %v2869_v17  ;;  %v2873_v12 = vadd.f32 %v2795_v34, %v11838_v60 }
 0x428   : > { %v9505_v38 = vpop.f32.mrf.mxu0  ;;  %v9457_v11 = vpop.f32.mrf.mxu1 }
 0x42a   : > { %v3037_v31 = vpop.f32.mrf.mxu0  ;;  %v2798_v51 = vpop.f32.mrf.mxu1 }
 0x42b   : > { %v11935_v26 = vadd.f32 %v3037_v31, %v2870_v52  ;;  %v2874_v36 = vadd.f32 %v2798_v51, %v11844_v7 }
 0x42c   : > { %v9506_v24 = vpop.f32.mrf.mxu0  ;;  %v9458_v44 = vpop.f32.mrf.mxu1 }
 0x42e   : > { %v3042_v50 = vpop.f32.mrf.mxu0  ;;  %v2803_v21 = vpop.f32.mrf.mxu1 }
 0x42f   : > { %v11938_v56 = vadd.f32 %v3042_v50, %v2871_v5  ;;  %v2875_v45 = vadd.f32 %v2803_v21, %v11847_v27 }
 0x430   : > { %v9509_v15 = vpop.f32.mrf.mxu0  ;;  %v9461_v43 = vpop.f32.mrf.mxu1 }
 0x432   : > { %v3045_v19 = vpop.f32.mrf.mxu0  ;;  %v2806_v41 = vpop.f32.mrf.mxu1 }
 0x433   : > { %v11941_v60 = vadd.f32 %v3045_v19, %v2872_v25  ;;  %v2876_v3 = vadd.f32 %v2806_v41, %v11853_v42 }
 0x434   : > { %v9510_v62 = vpop.f32.mrf.mxu0  ;;  %v9462_v63 = vpop.f32.mrf.mxu1 }
 0x436   : > { %v3050_v33 = vpop.f32.mrf.mxu0  ;;  %v2811_v17 = vpop.f32.mrf.mxu1 }
 0x437   : > { %v11944_v7 = vadd.f32 %v3050_v33, %v2873_v12  ;;  %v2877_v35 = vadd.f32 %v2811_v17, %v11856_v54 }
 0x438   : > { %v9513_v29 = vpop.f32.mrf.mxu0  ;;  %v9465_v46 = vpop.f32.mrf.mxu1 }
 0x43a   : > { %v3053_v9 = vpop.f32.mrf.mxu0  ;;  %v2814_v52 = vpop.f32.mrf.mxu1 }
 0x43b   : > { %v11947_v27 = vadd.f32 %v3053_v9, %v2874_v36  ;;  %v2878_v4 = vadd.f32 %v2814_v52, %v11862_v0  ;;  %v10581_v0 = vmov 0  }
 0x43c   : > { %v9514_v57 = vpop.f32.mrf.mxu0  ;;  %v9466_v16 = vpop.f32.mrf.mxu1  ;;  %3656 = vmatprep.subr.bf16.mxu0 %v10581_v0 }
 0x43e   : > { %v3058_v22 = vpop.f32.mrf.mxu0  ;;  %v2819_v5 = vpop.f32.mrf.mxu1 }
 0x43f   : > { %v11950_v42 = vadd.f32 %v3058_v22, %v2875_v45  ;;  %v2879_v2 = vadd.f32 %v2819_v5, %v11865_v47 }
 0x440   : > { %v9517_v28 = vpop.f32.mrf.mxu0  ;;  %v9469_v32 = vpop.f32.mrf.mxu1 }
 0x442   : > { %v3061_v39 = vpop.f32.mrf.mxu0  ;;  %v2822_v25 = vpop.f32.mrf.mxu1 }
 0x443   : > { %v11953_v54 = vadd.f32 %v3061_v39, %v2876_v3  ;;  %v2880_v61 = vadd.f32 %v2822_v25, %v11871_v18 }
 0x444   : > { %v9518_v58 = vpop.f32.mrf.mxu0  ;;  %v9470_v23 = vpop.f32.mrf.mxu1 }
 0x446   : > { %v3066_v34 = vpop.f32.mrf.mxu0  ;;  %v2827_v38 = vpop.f32.mrf.mxu1 }
 0x447   : > { %v11957_v12 = vadd.f32 %v3066_v34, %v2877_v35  ;;  %v2881_v11 = vadd.f32 %v2827_v38, %v11874_v55 }
 0x448   : > { %v9521_v47 = vpop.f32.mrf.mxu0  ;;  %v9473_v31 = vpop.f32.mrf.mxu1 }
 0x44a   : > { %v3069_v51 = vpop.f32.mrf.mxu0  ;;  %v2830_v24 = vpop.f32.mrf.mxu1 }
 0x44b   : > { %v11960_v36 = vadd.f32 %v3069_v51, %v2878_v4  ;;  %v2882_v44 = vadd.f32 %v2830_v24, %v11884_v49 }
 0x44c   : > { %v9522_v18 = vpop.f32.mrf.mxu0  ;;  %v9474_v50 = vpop.f32.mrf.mxu1 }
 0x44e   : > { %v3074_v21 = vpop.f32.mrf.mxu0  ;;  %v2835_v15 = vpop.f32.mrf.mxu1 }
 0x44f   : > { %v11963_v45 = vadd.f32 %v3074_v21, %v2879_v2  ;;  %v2883_v43 = vadd.f32 %v2835_v15, %v11887_v6 }
 0x450   : > { %v9525_v19 = vpop.f32.mrf.mxu0  ;;  %v9477_v41 = vpop.f32.mrf.mxu1 }
 0x452   : > { %v3077_v3 = vpop.f32.mrf.mxu0  ;;  %v2838_v62 = vpop.f32.mrf.mxu1 }
 0x453   : > { %v11966_v55 = vadd.f32 %v3077_v3, %v2880_v61  ;;  %v2884_v63 = vadd.f32 %v2838_v62, %v11893_v40 }
 0x454   : > { %v9526_v33 = vpop.f32.mrf.mxu0  ;;  %v9478_v17 = vpop.f32.mrf.mxu1 }
 0x456   : > { %v3082_v35 = vpop.f32.mrf.mxu0  ;;  %v2843_v29 = vpop.f32.mrf.mxu1 }
 0x457   : > { %v11969_v49 = vadd.f32 %v3082_v35, %v2881_v11  ;;  %v2885_v46 = vadd.f32 %v2843_v29, %v11896_v10  ;;  %v10309_v35 = vld [vmem:[%s13247_s6 + $0x4] ss:$8 sps:$4 sm:$0xff]  }
 0x458   : > { %v9529_v9 = vpop.f32.mrf.mxu0  ;;  %v9481_v52 = vpop.f32.mrf.mxu1  ;;  %7998 = vmatprep.mubr.msk.bf16.mxu0 %vm3639_vm5, %v10309_v35 }
 0x45a   : > { %v3085_v4 = vpop.f32.mrf.mxu0  ;;  %v2846_v57 = vpop.f32.mrf.mxu1 }
 0x45b   : > { %v11972_v6 = vadd.f32 %v3085_v4, %v2882_v44  ;;  %v2886_v16 = vadd.f32 %v2846_v57, %v11902_v37 }
 0x45c   : > { %v9530_v22 = vpop.f32.mrf.mxu0  ;;  %v9482_v5 = vpop.f32.mrf.mxu1 }
 0x45e   : > { %v3090_v2 = vpop.f32.mrf.mxu0  ;;  %v2851_v28 = vpop.f32.mrf.mxu1 }
 0x45f   : > { %v11975_v40 = vadd.f32 %v3090_v2, %v2883_v43  ;;  %v2887_v32 = vadd.f32 %v2851_v28, %v11904_v59 }
 0x460   : > { %v9533_v39 = vpop.f32.mrf.mxu0  ;;  %v9485_v25 = vpop.f32.mrf.mxu1 }
 0x462   : > { %v3093_v61 = vpop.f32.mrf.mxu0  ;;  %v2854_v58 = vpop.f32.mrf.mxu1 }
 0x463   : > { %v11978_v10 = vadd.f32 %v3093_v61, %v2884_v63  ;;  %v2888_v23 = vadd.f32 %v2854_v58, %v11910_v30 }
 0x464   : > { %v9534_v34 = vpop.f32.mrf.mxu0  ;;  %v9486_v38 = vpop.f32.mrf.mxu1 }
 0x466   : > { %v3098_v11 = vpop.f32.mrf.mxu0  ;;  %v2859_v47 = vpop.f32.mrf.mxu1 }
 0x467   : > { %v11981_v37 = vadd.f32 %v3098_v11, %v2885_v46  ;;  %v2889_v31 = vadd.f32 %v2859_v47, %v11913_v48 }
 0x468   : > { %v9537_v51 = vpop.f32.mrf.mxu0  ;;  %v9489_v24 = vpop.f32.mrf.mxu1 }
 0x46a   : > { %v3101_v44 = vpop.f32.mrf.mxu0  ;;  %v2862_v18 = vpop.f32.mrf.mxu1 }
 0x46b   : > { %v11984_v59 = vadd.f32 %v3101_v44, %v2886_v16 }
 0x46c   : > { %v9538_v50 = vpop.f32.mrf.mxu0  ;;  %v9490_v21 = vpop.f32.mrf.mxu1 }
 0x46e   : > { %v3106_v15 = vpop.f32.mrf.mxu0  ;;  %v3273_v30 = vpop.f32.mrf.mxu1 }
 0x46f   : > { %v11986_v43 = vadd.f32 %v3106_v15, %v2887_v32  ;;  %v3375_v19 = vadd.f32 %v3273_v30, %v11920_v13  ;;  %v10313_v32 = vld [vmem:[%s13248_s7 + $0x38] sm:$0xff]  }
 0x470   : > { %v9541_v41 = vpop.f32.mrf.mxu0  ;;  %v9553_v3 = vpop.f32.mrf.mxu1  ;;  %9604 = vmatpush3.bf16.msra.mxu1 %v10313_v32 }
 0x471   : > { %3403 = vst.msk [vmem:[#allocation3] sm:$0xff] %vm3400_vm4, %v3375_v19  ;;  %9605 = vmatprep.subr.bf16.mxu1 %v10577_v1 }
 0x472   : > { %v3109_v62 = vpop.f32.mrf.mxu0  ;;  %v3276_v63 = vpop.f32.mrf.mxu1 }
 0x473   : > { %v11990_v48 = vadd.f32 %v3109_v62, %v2888_v23  ;;  %v3376_v33 = vadd.f32 %v3276_v63, %v11923_v53 }
 0x474   : > { %v9542_v17 = vpop.f32.mrf.mxu0  ;;  %v9554_v29 = vpop.f32.mrf.mxu1 }
 0x475   : > { %3404 = vst.msk [vmem:[#allocation3 + $0x8] sm:$0xff] %vm3400_vm4, %v3376_v33 }
 0x476   : > { %v3114_v13 = vpop.f32.mrf.mxu0  ;;  %v3281_v9 = vpop.f32.mrf.mxu1 }
 0x477   : > { %v11998_v46 = vadd.f32 %v3114_v13, %v2889_v31  ;;  %v3377_v52 = vadd.f32 %v3281_v9, %v11926_v14 }
 0x478   : > { %v9545_v4 = vpop.f32.mrf.mxu0  ;;  %v9557_v57 = vpop.f32.mrf.mxu1 }
 0x479   : > { %3405 = vst.msk [vmem:[#allocation3 + $0x10] sm:$0xff] %vm3400_vm4, %v3377_v52 }
 0x47a   : > { %v3117_v53 = vpop.f32.mrf.mxu0  ;;  %v3284_v16 = vpop.f32.mrf.mxu1 }
 0x47b   : > { %v3378_v22 = vadd.f32 %v3284_v16, %v11929_v8  ;;  %v10314_v8 = vld [vmem:[%s13248_s7 + $0x30] sm:$0xff]  }
 0x47c   : > { %v9546_v5 = vpop.f32.mrf.mxu0  ;;  %v9558_v2 = vpop.f32.mrf.mxu1  ;;  %v3429_v23 = vld [vmem:[#allocation3 + $0x1] sm:$0xff]  ;;  %9606 = vmatpush3.bf16.msra.mxu1 %v10314_v8 }
 0x47d   : > { %3406 = vst.msk [vmem:[#allocation3 + $0x18] sm:$0xff] %vm3400_vm4, %v3378_v22  ;;  %v3454_v51 = vmax.f32 %v3375_v19, %v3429_v23  ;;  %9607 = vmatprep.subr.bf16.mxu1 %v10577_v1 }
 0x47e   : > { %v3289_v28 = vpop.f32.mrf.mxu1 }
 0x47f   : > { %v12008_v39 = vadd.f32 %v3289_v28, %v11932_v20 }
 0x480   : > { %v9561_v14 = vpop.f32.mrf.mxu1  ;;  %v3479_v25 = vld [vmem:[#allocation3 + $0xe] sm:$0xff] }
 0x481   : > { %v3504_v61 = vld [vmem:[#allocation3 + $0xf] sm:$0xff]  ;;  %3407 = vst.msk [vmem:[#allocation3 + $0x20] sm:$0xff] %vm3400_vm4, %v12008_v39 }
 0x482   : > { %v3292_v58 = vpop.f32.mrf.mxu1  ;;  %v3430_v34 = vld [vmem:[#allocation3 + $0x9] sm:$0xff]  ;;  %v3529_v20 = vmax.f32 %v3479_v25, %v3504_v61 }
 0x483   : > { %v3380_v38 = vadd.f32 %v3292_v58, %v11935_v26  ;;  %v3455_v24 = vmax.f32 %v3376_v33, %v3430_v34 }
 0x484   : > { %v9562_v11 = vpop.f32.mrf.mxu1  ;;  %v3480_v47 = vld [vmem:[#allocation3 + $0x16] sm:$0xff]  ;;  %v12022_v21 = vmax.f32 %v3454_v51, %v3529_v20 }
 0x485   : > { %v3505_v31 = vld [vmem:[#allocation3 + $0x17] sm:$0xff]  ;;  %3408 = vst.msk [vmem:[#allocation3 + $0x28] sm:$0xff] %vm3400_vm4, %v3380_v38 }
 0x486   : > { %v3530_v44 = vmax.f32 %v3480_v47, %v3505_v31  ;;  %v3297_v18 = vpop.f32.mrf.mxu1  ;;  %v3431_v62 = vld [vmem:[#allocation3 + $0x11] sm:$0xff] }
 0x487   : > { %v12020_v50 = vadd.f32 %v3297_v18, %v11938_v56  ;;  %v3456_v13 = vmax.f32 %v3377_v52, %v3431_v62 }
 0x488   : > { %v12024_v15 = vmax.f32 %v3455_v24, %v3530_v44  ;;  %v9565_v26 = vpop.f32.mrf.mxu1  ;;  %v3481_v30 = vld [vmem:[#allocation3 + $0x1e] sm:$0xff] }
 0x489   : > { %v3506_v41 = vld [vmem:[#allocation3 + $0x1f] sm:$0xff]  ;;  %3409 = vst.msk [vmem:[#allocation3 + $0x30] sm:$0xff] %vm3400_vm4, %v12020_v50 }
 0x48a   : > { %v3586_v19 = vpack.c.bf16 %v12024_v15, %v12022_v21  ;;  %v3300_v3 = vpop.f32.mrf.mxu1  ;;  %v3432_v63 = vld [vmem:[#allocation3 + $0x19] sm:$0xff]  ;;  %v3531_v56 = vmax.f32 %v3481_v30, %v3506_v41  ;;  %v10307_v21 = vld [vmem:[%s13247_s6] ss:$8 sps:$4 sm:$0xff]  }
 0x48b   : > { %v3382_v33 = vadd.f32 %v3300_v3, %v11941_v60  ;;  %v3457_v9 = vmax.f32 %v3378_v22, %v3432_v63  ;;  %v10310_v15 = vld [vmem:[%s13247_s6 + $0x14] ss:$8 sps:$4 sm:$0xff]  }
 0x48c   : > { %v9566_v17 = vpop.f32.mrf.mxu1  ;;  %v3482_v35 = vld [vmem:[#allocation3 + $0x26] sm:$0xff]  ;;  %v12035_v16 = vmax.f32 %v3456_v13, %v3531_v56 }
 0x48d   : > { %v3507_v29 = vld [vmem:[#allocation3 + $0x27] sm:$0xff]  ;;  %3410 = vst.msk [vmem:[#allocation3 + $0x38] sm:$0xff] %vm3400_vm4, %v3382_v33 }
 0x48e   : > { %v3532_v4 = vmax.f32 %v3482_v35, %v3507_v29  ;;  %v3305_v57 = vpop.f32.mrf.mxu1  ;;  %v3433_v22 = vld [vmem:[#allocation3 + $0x21] sm:$0xff] }
 0x48f   : > { %v12033_v53 = vadd.f32 %v3305_v57, %v11944_v7  ;;  %v3458_v23 = vmax.f32 %v12008_v39, %v3433_v22 }
 0x490   : > { %v12037_v5 = vmax.f32 %v3457_v9, %v3532_v4  ;;  %v9569_v2 = vpop.f32.mrf.mxu1  ;;  %v3483_v28 = vld [vmem:[#allocation3 + $0x2e] sm:$0xff] }
 0x491   : > { %v3508_v60 = vld [vmem:[#allocation3 + $0x2f] sm:$0xff]  ;;  %3411 = vst.msk [vmem:[#allocation3 + $0x40] sm:$0xff] %vm3400_vm4, %v12033_v53 }
 0x492   : > { %v3587_v32 = vpack.c.bf16 %v12037_v5, %v12035_v16  ;;  %v3308_v52 = vpop.f32.mrf.mxu1  ;;  %v3434_v14 = vld [vmem:[#allocation3 + $0x29] sm:$0xff]  ;;  %v3533_v7 = vmax.f32 %v3483_v28, %v3508_v60 }
 0x493   : > { %v3384_v25 = vadd.f32 %v3308_v52, %v11947_v27  ;;  %v3459_v34 = vmax.f32 %v3380_v38, %v3434_v14  ;;  %v10315_v16 = vld [vmem:[%s13247_s6 + $0x24] ss:$8 sps:$4 sm:$0xff]   ;;  %v10317_v5 = vld [vmem:[%s13247_s6 + $0x20] ss:$8 sps:$4 sm:$0xff]  }
 0x494   : > { %v9570_v61 = vpop.f32.mrf.mxu1  ;;  %v3484_v8 = vld [vmem:[#allocation3 + $0x36] sm:$0xff]  ;;  %v12049_v31 = vmax.f32 %v3458_v23, %v3533_v7 }
 0x495   : > { %v3509_v58 = vld [vmem:[#allocation3 + $0x37] sm:$0xff]  ;;  %3412 = vst.msk [vmem:[#allocation3 + $0x48] sm:$0xff] %vm3400_vm4, %v3384_v25 }
 0x496   : > { %v3534_v20 = vmax.f32 %v3484_v8, %v3509_v58  ;;  %v3313_v11 = vpop.f32.mrf.mxu1  ;;  %v3435_v38 = vld [vmem:[#allocation3 + $0x31] sm:$0xff] }
 0x497   : > { %v12047_v47 = vadd.f32 %v3313_v11, %v11950_v42  ;;  %v3460_v63 = vmax.f32 %v12020_v50, %v3435_v38 }
 0x498   : > { %v12051_v51 = vmax.f32 %v3459_v34, %v3534_v20  ;;  %v9573_v24 = vpop.f32.mrf.mxu1  ;;  %v3485_v27 = vld [vmem:[#allocation3 + $0x3e] sm:$0xff] }
 0x499   : > { %v3510_v44 = vld [vmem:[#allocation3 + $0x3f] sm:$0xff]  ;;  %3413 = vst.msk [vmem:[#allocation3 + $0x50] sm:$0xff] %vm3400_vm4, %v12047_v47 }
 0x49a   : > { %v3588_v18 = vpack.c.bf16 %v12051_v51, %v12049_v31  ;;  %v3316_v39 = vpop.f32.mrf.mxu1  ;;  %v3436_v26 = vld [vmem:[#allocation3 + $0x39] sm:$0xff]  ;;  %v3535_v42 = vmax.f32 %v3485_v27, %v3510_v44 }
 0x49b   : > { %v3386_v30 = vadd.f32 %v3316_v39, %v11953_v54  ;;  %v3461_v56 = vmax.f32 %v3382_v33, %v3436_v26 }
 0x49c   : > { %v9574_v41 = vpop.f32.mrf.mxu1  ;;  %v3486_v3 = vld [vmem:[#allocation3 + $0x46] sm:$0xff]  ;;  %v12063_v13 = vmax.f32 %v3460_v63, %v3535_v42 }
 0x49d   : > { %v3511_v62 = vld [vmem:[#allocation3 + $0x47] sm:$0xff]  ;;  %3414 = vst.msk [vmem:[#allocation3 + $0x58] sm:$0xff] %vm3400_vm4, %v3386_v30 }
 0x49e   : > { %v3536_v17 = vmax.f32 %v3486_v3, %v3511_v62  ;;  %v3321_v35 = vpop.f32.mrf.mxu1  ;;  %v3437_v33 = vld [vmem:[#allocation3 + $0x41] sm:$0xff] }
 0x49f   : > { %v12061_v29 = vadd.f32 %v3321_v35, %v11957_v12  ;;  %v3462_v7 = vmax.f32 %v12033_v53, %v3437_v33 }
 0x4a0   : > { %v12065_v9 = vmax.f32 %v3461_v56, %v3536_v17  ;;  %v9577_v4 = vpop.f32.mrf.mxu1  ;;  %v3487_v54 = vld [vmem:[#allocation3 + $0x4e] sm:$0xff] }
 0x4a1   : > { %v3512_v57 = vld [vmem:[#allocation3 + $0x4f] sm:$0xff]  ;;  %3415 = vst.msk [vmem:[#allocation3 + $0x60] sm:$0xff] %vm3400_vm4, %v12061_v29 }
 0x4a2   : > { %v3589_v2 = vpack.c.bf16 %v12065_v9, %v12063_v13  ;;  %v3324_v50 = vpop.f32.mrf.mxu1  ;;  %v3438_v28 = vld [vmem:[#allocation3 + $0x49] sm:$0xff]  ;;  %v3537_v12 = vmax.f32 %v3487_v54, %v3512_v57 }
 0x4a3   : > { %v3388_v60 = vadd.f32 %v3324_v50, %v11960_v36  ;;  %v3463_v61 = vmax.f32 %v3384_v25, %v3438_v28 }
 0x4a4   : > { %v9578_v52 = vpop.f32.mrf.mxu1  ;;  %v3488_v22 = vld [vmem:[#allocation3 + $0x56] sm:$0xff]  ;;  %v12077_v34 = vmax.f32 %v3462_v7, %v3537_v12 }
 0x4a5   : > { %v3513_v14 = vld [vmem:[#allocation3 + $0x57] sm:$0xff]  ;;  %3416 = vst.msk [vmem:[#allocation3 + $0x68] sm:$0xff] %vm3400_vm4, %v3388_v60 }
 0x4a6   : > { %v3538_v8 = vmax.f32 %v3488_v22, %v3513_v14  ;;  %v3329_v58 = vpop.f32.mrf.mxu1  ;;  %v3439_v25 = vld [vmem:[#allocation3 + $0x51] sm:$0xff] }
 0x4a7   : > { %v12075_v23 = vadd.f32 %v3329_v58, %v11963_v45  ;;  %v3464_v41 = vmax.f32 %v12047_v47, %v3439_v25 }
 0x4a8   : > { %v12079_v20 = vmax.f32 %v3463_v61, %v3538_v8  ;;  %v9581_v11 = vpop.f32.mrf.mxu1  ;;  %v3489_v36 = vld [vmem:[#allocation3 + $0x5e] sm:$0xff] }
 0x4a9   : > { %v3514_v24 = vld [vmem:[#allocation3 + $0x5f] sm:$0xff]  ;;  %3417 = vst.msk [vmem:[#allocation3 + $0x70] sm:$0xff] %vm3400_vm4, %v12075_v23 }
 0x4aa   : > { %v3590_v27 = vpack.c.bf16 %v12079_v20, %v12077_v34  ;;  %v3332_v53 = vpop.f32.mrf.mxu1  ;;  %v3440_v44 = vld [vmem:[#allocation3 + $0x59] sm:$0xff]  ;;  %v3539_v45 = vmax.f32 %v3489_v36, %v3514_v24  ;;  %v3527_v20 = vld [vmem:[#allocation3 + $0xc7] sm:$0xff] }
 0x4ab   : > { %v3390_v39 = vadd.f32 %v3332_v53, %v11966_v55  ;;  %v3465_v3 = vmax.f32 %v3386_v30, %v3440_v44 }
 0x4ac   : > { %v9582_v38 = vpop.f32.mrf.mxu1  ;;  %v3490_v26 = vld [vmem:[#allocation3 + $0x66] sm:$0xff]  ;;  %v12091_v17 = vmax.f32 %v3464_v41, %v3539_v45 }
 0x4ad   : > { %v3515_v42 = vld [vmem:[#allocation3 + $0x67] sm:$0xff]  ;;  %3418 = vst.msk [vmem:[#allocation3 + $0x78] sm:$0xff] %vm3400_vm4, %v3390_v39 }
 0x4ae   : > { %v3540_v62 = vmax.f32 %v3490_v26, %v3515_v42  ;;  %v3337_v63 = vpop.f32.mrf.mxu1  ;;  %v3441_v30 = vld [vmem:[#allocation3 + $0x61] sm:$0xff] }
 0x4af   : > { %v12089_v56 = vadd.f32 %v3337_v63, %v11969_v49  ;;  %v3466_v22 = vmax.f32 %v12061_v29, %v3441_v30 }
 0x4b0   : > { %v12093_v35 = vmax.f32 %v3465_v3, %v3540_v62  ;;  %v9585_v4 = vpop.f32.mrf.mxu1  ;;  %v3491_v55 = vld [vmem:[#allocation3 + $0x6e] sm:$0xff] }
 0x4b1   : > { %v3516_v54 = vld [vmem:[#allocation3 + $0x6f] sm:$0xff]  ;;  %3419 = vst.msk [vmem:[#allocation3 + $0x80] sm:$0xff] %vm3400_vm4, %v12089_v56 }
 0x4b2   : > { %v3591_v57 = vpack.c.bf16 %v12093_v35, %v12091_v17  ;;  %v3340_v47 = vpop.f32.mrf.mxu1  ;;  %v3442_v50 = vld [vmem:[#allocation3 + $0x69] sm:$0xff]  ;;  %v3541_v49 = vmax.f32 %v3491_v55, %v3516_v54 }
 0x4b3   : > { %v3392_v33 = vadd.f32 %v3340_v47, %v11972_v6  ;;  %v3467_v14 = vmax.f32 %v3388_v60, %v3442_v50 }
 0x4b4   : > { %v9586_v28 = vpop.f32.mrf.mxu1  ;;  %v3492_v12 = vld [vmem:[#allocation3 + $0x76] sm:$0xff]  ;;  %v3566_v58 = vmax.f32 %v3466_v22, %v3541_v49 }
 0x4b5   : > { %v3517_v52 = vld [vmem:[#allocation3 + $0x77] sm:$0xff]  ;;  %3420 = vst.msk [vmem:[#allocation3 + $0x88] sm:$0xff] %vm3400_vm4, %v3392_v33 }
 0x4b6   : > { %v3542_v7 = vmax.f32 %v3492_v12, %v3517_v52  ;;  %v3345_v61 = vpop.f32.mrf.mxu1  ;;  %v3443_v44 = vld [vmem:[#allocation3 + $0x71] sm:$0xff] }
 0x4b7   : > { %v12103_v8 = vadd.f32 %v3345_v61, %v11975_v40  ;;  %v3468_v42 = vmax.f32 %v12075_v23, %v3443_v44 }
 0x4b8   : > { %v3567_v11 = vmax.f32 %v3467_v14, %v3542_v7  ;;  %v9589_v36 = vpop.f32.mrf.mxu1  ;;  %v3493_v24 = vld [vmem:[#allocation3 + $0x7e] sm:$0xff] }
 0x4b9   : > { %v3518_v53 = vld [vmem:[#allocation3 + $0x7f] sm:$0xff]  ;;  %3421 = vst.msk [vmem:[#allocation3 + $0x90] sm:$0xff] %vm3400_vm4, %v12103_v8 }
 0x4ba   : > { %v3592_v6 = vpack.c.bf16 %v3567_v11, %v3566_v58  ;;  %v3348_v25 = vpop.f32.mrf.mxu1  ;;  %v3444_v45 = vld [vmem:[#allocation3 + $0x79] sm:$0xff]  ;;  %v3543_v60 = vmax.f32 %v3493_v24, %v3518_v53 }
 0x4bb   : > { %v12108_v29 = vadd.f32 %v3348_v25, %v11978_v10  ;;  %v3469_v41 = vmax.f32 %v3390_v39, %v3444_v45 }
 0x4bc   : > { %v9590_v38 = vpop.f32.mrf.mxu1  ;;  %v3494_v26 = vld [vmem:[#allocation3 + $0x86] sm:$0xff]  ;;  %v3568_v4 = vmax.f32 %v3468_v42, %v3543_v60 }
 0x4bd   : > { %v3519_v40 = vld [vmem:[#allocation3 + $0x87] sm:$0xff]  ;;  %3422 = vst.msk [vmem:[#allocation3 + $0x98] sm:$0xff] %vm3400_vm4, %v12108_v29 }
 0x4be   : > { %v3544_v3 = vmax.f32 %v3494_v26, %v3519_v40  ;;  %v3353_v62 = vpop.f32.mrf.mxu1  ;;  %v3445_v49 = vld [vmem:[#allocation3 + $0x81] sm:$0xff] }
 0x4bf   : > { %v12114_v63 = vadd.f32 %v3353_v62, %v11981_v37  ;;  %v3470_v22 = vmax.f32 %v12089_v56, %v3445_v49 }
 0x4c0   : > { %v3569_v55 = vmax.f32 %v3469_v41, %v3544_v3  ;;  %v9593_v54 = vpop.f32.mrf.mxu1  ;;  %v3495_v10 = vld [vmem:[#allocation3 + $0x8e] sm:$0xff] }
 0x4c1   : > { %v3520_v47 = vld [vmem:[#allocation3 + $0x8f] sm:$0xff]  ;;  %3423 = vst.msk [vmem:[#allocation3 + $0xa0] sm:$0xff] %vm3400_vm4, %v12114_v63 }
 0x4c2   : > { %v3593_v30 = vpack.c.bf16 %v3569_v55, %v3568_v4  ;;  %v3356_v50 = vpop.f32.mrf.mxu1  ;;  %v3446_v28 = vld [vmem:[#allocation3 + $0x89] sm:$0xff]  ;;  %v3545_v39 = vmax.f32 %v3495_v10, %v3520_v47 }
 0x4c3   : > { %v12119_v23 = vadd.f32 %v3356_v50, %v11984_v59  ;;  %v3471_v14 = vmax.f32 %v3392_v33, %v3446_v28  ;;  %v3503_v54 = vld [vmem:[#allocation3 + $0xce] sm:$0xf] }
 0x4c4   : > { %3657 = vmatpush1.bf16.msra.mxu0 %v3593_v30  ;;  %v9594_v12 = vpop.f32.mrf.mxu1  ;;  %v3496_v37 = vld [vmem:[#allocation3 + $0x96] sm:$0xff]  ;;  %v12128_v59 = vmax.f32 %v3470_v22, %v3545_v39  ;;  %v3528_v10 = vld [vmem:[#allocation3 + $0xcf] sm:$0xf] }
 0x4c5   : > { %3658 = vmatprep.subr.bf16.mxu0 %v10581_v0  ;;  %v3521_v52 = vld [vmem:[#allocation3 + $0x97] sm:$0xff]  ;;  %3424 = vst.msk [vmem:[#allocation3 + $0xa8] sm:$0xff] %vm3400_vm4, %v12119_v23  ;;  %v3553_v39 = vmax.f32 %v3503_v54, %v3528_v10 }
 0x4c6   : > { %v3546_v7 = vmax.f32 %v3496_v37, %v3521_v52  ;;  %v3361_v61 = vpop.f32.mrf.mxu1  ;;  %v3447_v25 = vld [vmem:[#allocation3 + $0x91] sm:$0xff] }
 0x4c7   : > { %v12126_v58 = vadd.f32 %v3361_v61, %v11986_v43  ;;  %v3472_v26 = vmax.f32 %v12103_v8, %v3447_v25  ;;  %v10323_v25 = vld [vmem:[%s13248_s7 + $0x48] sm:$0xff]  }
 0x4c8   : > { %3659 = vmatpush1.bf16.msra.mxu0 %v3592_v6  ;;  %v12130_v11 = vmax.f32 %v3471_v14, %v3546_v7  ;;  %v9597_v36 = vpop.f32.mrf.mxu1  ;;  %v3497_v24 = vld [vmem:[#allocation3 + $0x9e] sm:$0xff] }
 0x4c9   : > { %3660 = vmatprep.subr.bf16.mxu0 %v10581_v0  ;;  %v3522_v53 = vld [vmem:[#allocation3 + $0x9f] sm:$0xff]  ;;  %3425 = vst.msk [vmem:[#allocation3 + $0xb0] sm:$0xff] %vm3400_vm4, %v12126_v58 }
 0x4ca   : > { %v3594_v56 = vpack.c.bf16 %v12130_v11, %v12128_v59  ;;  %v3364_v33 = vpop.f32.mrf.mxu1  ;;  %v3448_v43 = vld [vmem:[#allocation3 + $0x99] sm:$0xff]  ;;  %v3547_v44 = vmax.f32 %v3497_v24, %v3522_v53  ;;  %v10322_v11 = vld [vmem:[%s13248_s7 + $0x28] sm:$0xff]  }
 0x4cb   : > { %v3398_v6 = vadd.f32 %v3364_v33, %v11990_v48  ;;  %v3473_v40 = vmax.f32 %v12108_v29, %v3448_v43  ;;  %v3585_v59 = vld [vmem:[%s13247_s6 + $0x30] sm:$0x11]  ;;  %9608 = vmatpush3.bf16.msra.mxu1 %v10322_v11  ;;  %v10324_v43 = vld [vmem:[%s13248_s7 + $0x20] sm:$0xff]  }
 0x4cc   : > { %3661 = vmatpush1.bf16.msra.mxu0 %v3591_v57  ;;  %v9598_v45 = vpop.f32.mrf.mxu1  ;;  %v3498_v60 = vld [vmem:[#allocation3 + $0xa6] sm:$0xff]  ;;  %v3572_v17 = vmax.f32 %v3472_v26, %v3547_v44  ;;  %v7996_v33 = vcombine.low %v3585_v59, %v3585_v59  ;;  %9609 = vmatprep.subr.bf16.mxu1 %v10577_v1 }
 0x4cd   : > { %3662 = vmatprep.subr.bf16.mxu0 %v10581_v0  ;;  %v3523_v38 = vld [vmem:[#allocation3 + $0xa7] sm:$0xff]  ;;  %3426 = vst.msk [vmem:[#allocation3 + $0xb8] sm:$0xff] %vm3400_vm4, %v3398_v6 }
 0x4ce   : > { %v3548_v42 = vmax.f32 %v3498_v60, %v3523_v38  ;;  %v3369_v41 = vpop.f32.mrf.mxu1  ;;  %v3449_v4 = vld [vmem:[#allocation3 + $0xa1] sm:$0xff] }
 0x4cf   : > { %v3399_v48 = vadd.f32 %v3369_v41, %v11998_v46  ;;  %v3502_v46 = vld [vmem:[#allocation3 + $0xc6] sm:$0xff]  ;;  %v3474_v50 = vmax.f32 %v12114_v63, %v3449_v4  ;;  %9610 = vmatpush3.bf16.msra.mxu1 %v10324_v43 }
 0x4d0   : > { %3663 = vmatpush1.bf16.msra.mxu0 %v3590_v27  ;;  %v3573_v35 = vmax.f32 %v3473_v40, %v3548_v42  ;;  %v3499_v57 = vld [vmem:[#allocation3 + $0xae] sm:$0xff]  ;;  %v9601_v62 = vpop.f32.mrf.mxu1  ;;  %v3552_v9 = vmax.f32 %v3502_v46, %v3527_v20  ;;  %9615 = vmatprep.subr.bf16.mxu1 %v10577_v1  ;;  %v12227_v44 = vld [vmem:[%s13245_s4] ss:$0 sm:$0xff] }
 0x4d1   : > { %3664 = vmatprep.subr.bf16.mxu0 %v10581_v0  ;;  %v3524_v3 = vld [vmem:[#allocation3 + $0xaf] sm:$0xff]  ;;  %3428 = vst.msk [vmem:[#allocation3 + $0xc0] sm:$0xf] %vm3427_vm6, %v3399_v48 }
 0x4d2   : > { %v3595_v8 = vpack.c.bf16 %v3573_v35, %v3572_v17  ;;  %v3450_v29 = vld [vmem:[#allocation3 + $0xa9] sm:$0xff]  ;;  %v3372_v55 = vpop.f32.mrf.mxu1  ;;  %v3549_v34 = vmax.f32 %v3499_v57, %v3524_v3  ;;  %v10326_v3 = vld [vmem:[%s13248_s7 + $0x18] sm:$0xff]  }
 0x4d3   : > { %v3475_v49 = vmax.f32 %v12119_v23, %v3450_v29  ;;  %v10327_v29 = vld [vmem:[%s13248_s7 + $0x98] sm:$0xff]  }
 0x4d4   : > { %3665 = vmatpush1.bf16.msra.mxu0 %v3589_v2  ;;  %v3500_v27 = vld [vmem:[#allocation3 + $0xb6] sm:$0xff]  ;;  %v9602_v30 = vpop.f32.mrf.mxu1  ;;  %v3574_v2 = vmax.f32 %v3474_v50, %v3549_v34 }
 0x4d5   : > { %3666 = vmatprep.subr.bf16.mxu0 %v10581_v0  ;;  %v3525_v47 = vld [vmem:[#allocation3 + $0xb7] sm:$0xff] }
 0x4d6   : > { %v3550_v28 = vmax.f32 %v3500_v27, %v3525_v47  ;;  %v3451_v13 = vld [vmem:[#allocation3 + $0xb1] sm:$0xff] }
 0x4d7   : > { %v3476_v23 = vmax.f32 %v12126_v58, %v3451_v13  ;;  %v10328_v27 = vld [vmem:[%s13248_s7 + $0x10] sm:$0xff]   ;;  %v10330_v30 = vld [vmem:[%s13248_s7 + $0x8] sm:$0xff]  }
 0x4d8   : > { %3667 = vmatpush1.bf16.msra.mxu0 %v3588_v18  ;;  %v3575_v12 = vmax.f32 %v3475_v49, %v3550_v28  ;;  %v3453_v37 = vld [vmem:[#allocation3 + $0xc1] sm:$0xf]  ;;  %v3452_v52 = vld [vmem:[#allocation3 + $0xb9] sm:$0xff]  ;;  %v10331_v50 = vld [vmem:[%s13248_s7 + $0x88] sm:$0xff]  }
 0x4d9   : > { %3668 = vmatprep.subr.bf16.mxu0 %v10581_v0  ;;  %v3501_v22 = vld [vmem:[#allocation3 + $0xbe] sm:$0xff]  ;;  %v3478_v14 = vmax.f32 %v3399_v48, %v3453_v37  ;;  %v3477_v7 = vmax.f32 %v3398_v6, %v3452_v52  ;;  %v10325_v6 = vld [vmem:[%s13248_s7 + $0x40] sm:$0xff]  }
 0x4da   : > { %v3526_v63 = vld [vmem:[#allocation3 + $0xbf] sm:$0xff]  ;;  %v3596_v61 = vpack.c.bf16 %v3575_v12, %v3574_v2  ;;  %v10332_v49 = vld [vmem:[%s13248_s7] sm:$0xff]  }
 0x4db   : > { %v3551_v36 = vmax.f32 %v3501_v22, %v3526_v63  ;;  %v3578_v24 = vmax.f32 %v3478_v14, %v3553_v39  ;;  %v3577_v31 = vmax.f32 %v3477_v7, %v3552_v9  ;;  %v10329_v47 = vld [vmem:[%s13248_s7 + $0x90] sm:$0xff]   ;;  %v10333_v28 = vld [vmem:[%s13248_s7 + $0x80] sm:$0xff]   ;;  %v10334_v9 = vld [vmem:[%s13248_s7 + $0x78] sm:$0xff]  }
 0x4dc   : > { %3669 = vmatpush1.bf16.msra.mxu0 %v3587_v32  ;;  %v10319_v32 = vld [vmem:[%s13248_s7 + $0x50] sm:$0xff]   ;;  %v10335_v2 = vld [vmem:[%s13248_s7 + $0xd8] sm:$0xff]   ;;  %v10338_v14 = vld [vmem:[%s13248_s7 + $0x68] sm:$0xff]  }
 0x4dd   : > { %3670 = vmatprep.subr.bf16.mxu0 %v10581_v0  ;;  %v3576_v51 = vmax.f32 %v3476_v23, %v3551_v36  ;;  %v3598_v18 = vpack.c.bf16 %v3578_v24, %v3578_v24  ;;  %v10336_v52 = vld [vmem:[%s13248_s7 + $0x70] sm:$0xff]   ;;  %v10339_v7 = vld [vmem:[%s13248_s7 + $0xc8] sm:$0xff]   ;;  %v10340_v63 = vld [vmem:[%s13248_s7 + $0x60] sm:$0xff]  }
 0x4de   : > { %v10337_v22 = vld [vmem:[%s13248_s7 + $0xd0] sm:$0xff]   ;;  %v10342_v24 = vld [vmem:[%s13248_s7 + $0xb8] sm:$0xff]  }
 0x4df   : > { %v3597_v53 = vpack.c.bf16 %v3577_v31, %v3576_v51  ;;  %v3654_v58 = vsel %vm3652_vm7, %v3598_v18, 0  ;;  %v10343_v31 = vld [vmem:[%s13248_s7 + $0x118] sm:$0xff]  }
 0x4e0   : > { %3671 = vmatpush1.bf16.msra.mxu0 %v3586_v19  ;;  %v10318_v19 = vld [vmem:[%s13248_s7 + $0x58] sm:$0xff]  }
 0x4e1   : > { %3678 = vmatprep.subr.bf16.mxu0 %v10581_v0 }
 0x4e4   : > { %3679 = vmatpush2.bf16.msra.mxu0 %v3654_v58  ;;  %v10345_v58 = vld [vmem:[%s13248_s7 + $0x110] sm:$0xff]  }
 0x4e5   : > { %3680 = vmatprep.subr.bf16.mxu0 %v10581_v0 }
 0x4e8   : > { %3681 = vmatpush2.bf16.msra.mxu0 %v3597_v53  ;;  %v10344_v53 = vld [vmem:[%s13248_s7 + $0xb0] sm:$0xff]  }
 0x4e9   : > { %3682 = vmatprep.subr.bf16.mxu0 %v10581_v0 }
 0x4ec   : > { %3683 = vmatpush2.bf16.msra.mxu0 %v3596_v61  ;;  %v10341_v61 = vld [vmem:[%s13248_s7 + $0xc0] sm:$0xff]  }
 0x4ed   : > { %3684 = vmatprep.subr.bf16.mxu0 %v10581_v0 }
 0x4f0   : > { %3685 = vmatpush2.bf16.msra.mxu0 %v3595_v8 }
 0x4f1   : > { %3686 = vmatprep.subr.bf16.mxu0 %v10581_v0  ;;  %v10312_v0 = vld [vmem:[%s13247_s6 + $0x10] ss:$8 sps:$4 sm:$0xff]  }
 0x4f4   : > { %3687 = vmatpush2.bf16.msra.mxu0 %v3594_v56  ;;  %v7997_v56 = vcombine.high %v3585_v59, %v3585_v59  ;;  %v10351_v59 = vld [vmem:[%s13248_s7 + $0x158] sm:$0xff]  }
 0x4f5   : > { %9627 = vmatprep.subr.bf16.mxu0 %v10577_v1 }
 0x4f7   : > { %3689 = vmatmul.mubr.bf16.vlgmr.msra.gmra.mxu0 %v10307_v21  ;;  %v10346_v21 = vld [vmem:[%s13248_s7 + $0xa8] sm:$0xff]  }
 0x4f8   : > { %7999 = vmatprep.mubr.msk.bf16.mxu0 %vm3639_vm5, %v10310_v15  ;;  %9628 = vmatpush3.bf16.msra.mxu0 %v10318_v19  ;;  %v10347_v15 = vld [vmem:[%s13248_s7 + $0x108] sm:$0xff]   ;;  %v10348_v19 = vld [vmem:[%s13248_s7 + $0xa0] sm:$0xff]  }
 0x4f9   : > { %9629 = vmatprep.subr.bf16.mxu0 %v10577_v1 }
 0x4fc   : > { %9630 = vmatpush3.bf16.msra.mxu0 %v10319_v32  ;;  %v10350_v32 = vld [vmem:[%s13248_s7 + $0xf8] sm:$0xff]  }
 0x4fd   : > { %9631 = vmatprep.subr.bf16.mxu0 %v10577_v1 }
 0x4ff   : > { %3697 = vmatmul.mubr.bf16.gmra.mxu0 %v10312_v0  ;;  %v10349_v0 = vld [vmem:[%s13248_s7 + $0x100] sm:$0xff]  }
 0x500   : > { %8000 = vmatprep.mubr.msk.bf16.mxu0 %vm3639_vm5, %v10315_v16  ;;  %9632 = vmatpush3.bf16.msra.mxu0 %v10323_v25  ;;  %v10353_v25 = vld [vmem:[%s13248_s7 + $0x150] sm:$0xff]  }
 0x501   : > { %9633 = vmatprep.subr.bf16.mxu0 %v10577_v1 }
 0x504   : > { %9634 = vmatpush3.bf16.msra.mxu0 %v10325_v6  ;;  %v10354_v6 = vld [vmem:[%s13248_s7 + $0xe8] sm:$0xff]  }
 0x505   : > { %9651 = vmatprep.subr.bf16.mxu0 %v10577_v1 }
 0x507   : > { %3705 = vmatmul.mubr.bf16.gmra.mxu0 %v10317_v5 }
 0x508   : > { %8001 = vmatprep.mubr.msk.bf16.mxu0 %vm3639_vm5, %v7997_v56 }
 0x50f   : > { %3713 = vmatmul.mubr.bf16.gmra.mxu0 %v7996_v33  ;;  %v10352_v33 = vld [vmem:[%s13248_s7 + $0xf0] sm:$0xff]  }
 0x510   : > { %9635 = vmatprep.mubr.msk.bf16.mxu0 %vm10578_vm1, %v10577_v1 }
 0x5b7   : > { %v3690_v45 = vpop.f32.mrf.mxu0 }
 0x5b8   : > { %v3691_v60 = vadd.f32 %v12227_v44, %v3690_v45  ;;  %v10355_v45 = vld [vmem:[%s13248_s7 + $0x148] sm:$0xff]  }
 0x5b9   : > { %v3692_v38 = vpop.f32.mrf.mxu0 }
 0x5ba   : > { %v3720_v26 = vmax.f32 %v3691_v60, 0.0 }
 0x5bb   : > { %v3693_v40 = vpop.f32.mrf.mxu0 }
 0x5bc   : > { %3727 = vst.msk [vmem:[#allocation4] sm:$0xff] %vm3400_vm4, %v3720_v26  ;;  %v3694_v42 = vadd.f32 %v12227_v44, %v3693_v40  ;;  %v10356_v26 = vld [vmem:[%s13248_s7 + $0xe0] sm:$0xff]  }
 0x5bd   : > { %v3695_v41 = vpop.f32.mrf.mxu0  ;;  %v10357_v40 = vld [vmem:[%s13248_s7 + $0x140] sm:$0xff]  }
 0x5be   : > { %v3721_v48 = vmax.f32 %v3694_v42, 0.0 }
 0x5bf   : > { %v3698_v17 = vpop.f32.mrf.mxu0 }
 0x5c0   : > { %3728 = vst.msk [vmem:[#allocation4 + $0x8] sm:$0xff] %vm3400_vm4, %v3721_v48  ;;  %v3699_v35 = vadd.f32 %v12227_v44, %v3698_v17 }
 0x5c1   : > { %v3700_v57 = vpop.f32.mrf.mxu0 }
 0x5c2   : > { %v3722_v62 = vmax.f32 %v3699_v35, 0.0  ;;  %v10358_v35 = vld [vmem:[%s13248_s7 + $0x138] sm:$0xff]  }
 0x5c3   : > { %v3745_v8 = vld [vmem:[#allocation4 + $0x1] sm:$0x1]  ;;  %v3890_v4 = vld [vmem:[#allocation4 + $0x2] sm:$0x1]  ;;  %v3701_v55 = vpop.f32.mrf.mxu0  ;;  %v3735_v39 = vld [vmem:[#allocation4] sm:$0x1] }
 0x5c4   : > { %v3746_v54 = vpack.c.bf16 %v3745_v8, %v3745_v8  ;;  %v3891_v10 = vpack.c.bf16 %v3890_v4, %v3890_v4  ;;  %3729 = vst.msk [vmem:[#allocation4 + $0x10] sm:$0xff] %vm3400_vm4, %v3722_v62  ;;  %v3702_v46 = vadd.f32 %v12227_v44, %v3701_v55  ;;  %v4048_v13 = vld [vmem:[#allocation4 + $0x4] sm:$0x1]  ;;  %v3736_v12 = vpack.c.bf16 %v3735_v39, %v3735_v39  ;;  %v3969_v23 = vld [vmem:[#allocation4 + $0x3] sm:$0x1]  ;;  %v10359_v57 = vld [vmem:[%s13248_s7 + $0x198] sm:$0xff]  }
 0x5c5   : > { %v3703_v34 = vpop.f32.mrf.mxu0  ;;  %v4049_v37 = vpack.c.bf16 %v4048_v13, %v4048_v13  ;;  %v4206_v36 = vld [vmem:[#allocation4 + $0x6] sm:$0x1]  ;;  %v3970_v51 = vpack.c.bf16 %v3969_v23, %v3969_v23  ;;  %v4127_v16 = vld [vmem:[#allocation4 + $0x5] sm:$0x1]  ;;  %v4285_v41 = vld [vmem:[#allocation4 + $0x7] sm:$0x1] }
 0x5c6   : > { %9612 = vmatmul.mubr.msk.bf16.vlgmr.msra.gmra.mxu1 %vm3400_vm4, %v3746_v54  ;;  %9636 = vmatmul.mubr.msk.bf16.vlgmr.msra.gmra.mxu0 %vm3400_vm4, %v3891_v10  ;;  %v3723_v20 = vmax.f32 %v3702_v46, 0.0  ;;  %v4207_v18 = vpack.c.bf16 %v4206_v36, %v4206_v36  ;;  %v4128_v11 = vpack.c.bf16 %v4127_v16, %v4127_v16  ;;  %v4286_v62 = vpack.c.bf16 %v4285_v41, %v4285_v41  ;;  %v10361_v55 = vld [vmem:[%s13248_s7 + $0x190] sm:$0xff]   ;;  %v10362_v10 = vld [vmem:[%s13248_s7 + $0x128] sm:$0xff]   ;;  %v10366_v39 = vld [vmem:[%s13248_s7 + $0x178] sm:$0xff]  }
 0x5c7   : > { %9616 = vmatpush3.bf16.msra.mxu1 %v10326_v3  ;;  %9652 = vmatpush3.bf16.msra.mxu0 %v10327_v29  ;;  %v4364_v5 = vld [vmem:[#allocation4 + $0x8] sm:$0x1]  ;;  %v3706_v43 = vpop.f32.mrf.mxu0  ;;  %v4522_v48 = vld [vmem:[#allocation4 + $0xa] sm:$0x1]  ;;  %v10360_v29 = vld [vmem:[%s13248_s7 + $0x130] sm:$0xff]  }
 0x5c8   : > { %9617 = vmatprep.subr.bf16.mxu1 %v10577_v1  ;;  %9653 = vmatprep.subr.bf16.mxu0 %v10577_v1  ;;  %3730 = vst.msk [vmem:[#allocation4 + $0x18] sm:$0xff] %vm3400_vm4, %v3723_v20  ;;  %v4365_v56 = vpack.c.bf16 %v4364_v5, %v4364_v5  ;;  %v4523_v8 = vpack.c.bf16 %v4522_v48, %v4522_v48  ;;  %v10363_v46 = vld [vmem:[%s13248_s7 + $0x188] sm:$0xff]   ;;  %v10367_v13 = vld [vmem:[%s13248_s7 + $0x1d8] sm:$0xff]   ;;  %v10392_v48 = vld [vmem:[%s13248_s7 + $0x230] sm:$0xff]  }
 0x5c9   : > { %9623 = vmatprep.mubr.msk.bf16.mxu1 %vm10578_vm1, %v10577_v1  ;;  %9659 = vmatprep.mubr.msk.bf16.mxu0 %vm10578_vm1, %v10577_v1  ;;  %v3708_v60 = vpop.f32.mrf.mxu0  ;;  %v3707_v34 = vadd.f32 %v12227_v44, %v3706_v43  ;;  %v4838_v23 = vld [vmem:[#allocation4 + $0xe] sm:$0x1]  ;;  %v4759_v16 = vld [vmem:[#allocation4 + $0xd] sm:$0x1]  ;;  %v10387_v43 = vld [vmem:[%s13248_s7 + $0x248] sm:$0xff]  }
 0x5ca   : > { %v10374_v36 = vld [vmem:[%s13248_s7 + $0x1b8] sm:$0xff]  }
 0x5cb   : > { %9618 = vmatpush3.bf16.msra.mxu1 %v10328_v27  ;;  %9654 = vmatpush3.bf16.msra.mxu0 %v10329_v47  ;;  %v3709_v38 = vpop.f32.mrf.mxu0  ;;  %v3724_v27 = vmax.f32 %v3707_v34, 0.0  ;;  %v5154_v60 = vld [vmem:[#allocation4 + $0x12] sm:$0x1]  ;;  %v10401_v34 = vld [vmem:[%s13248_s7 + $0x2d0] sm:$0xff]  }
 0x5cc   : > { %9619 = vmatprep.subr.bf16.mxu1 %v10577_v1  ;;  %9655 = vmatprep.subr.bf16.mxu0 %v10577_v1  ;;  %v3710_v20 = vadd.f32 %v12227_v44, %v3709_v38  ;;  %v4917_v38 = vld [vmem:[#allocation4 + $0xf] sm:$0x1] }
 0x5cd   : > { %v3711_v42 = vpop.f32.mrf.mxu0  ;;  %3731 = vst.msk [vmem:[#allocation4 + $0x20] sm:$0xff] %vm3400_vm4, %v3724_v27  ;;  %v4918_v41 = vpack.c.bf16 %v4917_v38, %v4917_v38  ;;  %v10403_v27 = vld [vmem:[%s13248_s7 + $0x2c8] sm:$0xff]  }
 0x5ce   : > { %v3725_v47 = vmax.f32 %v3710_v20, 0.0  ;;  %v10391_v42 = vld [vmem:[%s13248_s7 + $0x298] sm:$0xff]   ;;  %v10402_v20 = vld [vmem:[%s13248_s7 + $0x268] sm:$0xff]  }
 0x5cf   : > { %9620 = vmatpush3.bf16.msra.mxu1 %v10330_v30  ;;  %9656 = vmatpush3.bf16.msra.mxu0 %v10331_v50  ;;  %v3714_v17 = vpop.f32.mrf.mxu0  ;;  %v10364_v30 = vld [vmem:[%s13248_s7 + $0x120] sm:$0xff]  }
 0x5d0   : > { %9621 = vmatprep.subr.bf16.mxu1 %v10577_v1  ;;  %9657 = vmatprep.subr.bf16.mxu0 %v10577_v1  ;;  %v10365_v50 = vld [vmem:[%s13248_s7 + $0x180] sm:$0xff]   ;;  %3732 = vst.msk [vmem:[#allocation4 + $0x28] sm:$0xff] %vm3400_vm4, %v3725_v47 }
 0x5d1   : > { %v3716_v3 = vpop.f32.mrf.mxu0  ;;  %v10404_v47 = vld [vmem:[%s13248_s7 + $0x260] sm:$0xff]  }
 0x5d2   : > { %v10396_v3 = vld [vmem:[%s13248_s7 + $0x220] sm:$0xff]  }
 0x5d3   : > { %9622 = vmatpush3.bf16.msra.mxu1 %v10332_v49  ;;  %9658 = vmatpush3.bf16.msra.mxu0 %v10333_v28  ;;  %v3717_v4 = vpop.f32.mrf.mxu0  ;;  %v4443_v49 = vld [vmem:[#allocation4 + $0x9] sm:$0x1]  ;;  %v4680_v28 = vld [vmem:[#allocation4 + $0xc] sm:$0x1] }
 0x5d4   : > { %9639 = vmatprep.subr.bf16.mxu1 %v10577_v1  ;;  %9675 = vmatprep.subr.bf16.mxu0 %v10577_v1  ;;  %v5312_v4 = vld [vmem:[#allocation4 + $0x14] sm:$0x1] }
 0x5d5   : > { %v3718_v54 = vpop.f32.mrf.mxu0 }
 0x5d6   : > { %9624 = vmatmul.mubr.msk.bf16.vlgmr.msra.gmra.mxu1 %vm3400_vm4, %v3736_v12  ;;  %9660 = vmatmul.mubr.msk.bf16.vlgmr.msra.gmra.mxu0 %vm3400_vm4, %v4049_v37  ;;  %v4681_v12 = vpack.c.bf16 %v4680_v28, %v4680_v28  ;;  %v10406_v28 = vld [vmem:[%s13248_s7 + $0x2b8] sm:$0xff]  }
 0x5d7   : > { %9640 = vmatpush3.bf16.msra.mxu1 %v10334_v9  ;;  %9676 = vmatpush3.bf16.msra.mxu0 %v10335_v2  ;;  %v3715_v9 = vadd.f32 %v12227_v44, %v3714_v17  ;;  %v4444_v2 = vpack.c.bf16 %v4443_v49, %v4443_v49  ;;  %v10369_v44 = vld [vmem:[%s13248_s7 + $0x1d0] sm:$0xff]   ;;  %v5470_v49 = vld [vmem:[#allocation4 + $0x16] sm:$0x1] }
 0x5d8   : > { %9641 = vmatprep.subr.bf16.mxu1 %v10577_v1  ;;  %9677 = vmatprep.subr.bf16.mxu0 %v10577_v1  ;;  %v10393_v17 = vld [vmem:[%s13248_s7 + $0x290] sm:$0xff]  }
 0x5d9   : > { %9647 = vmatprep.mubr.msk.bf16.mxu1 %vm10578_vm1, %v10577_v1  ;;  %9683 = vmatprep.mubr.msk.bf16.mxu0 %vm10578_vm1, %v10577_v1  ;;  %v3726_v37 = vmax.f32 %v3715_v9, 0.0  ;;  %v5471_v9 = vpack.c.bf16 %v5470_v49, %v5470_v49  ;;  %v10436_v49 = vld [vmem:[%s13248_s7 + $0x360] sm:$0xff]  }
 0x5db   : > { %9642 = vmatpush3.bf16.msra.mxu1 %v10336_v52  ;;  %9678 = vmatpush3.bf16.msra.mxu0 %v10337_v22  ;;  %v10368_v52 = vld [vmem:[%s13248_s7 + $0x170] sm:$0xff]   ;;  %3734 = vst.msk [vmem:[#allocation4 + $0x30] sm:$0x1] %vm3733_vm8, %v3726_v37  ;;  %v10370_v22 = vld [vmem:[%s13248_s7 + $0x168] sm:$0xff]  }
 0x5dc   : > { %9643 = vmatprep.subr.bf16.mxu1 %v10577_v1  ;;  %9679 = vmatprep.subr.bf16.mxu0 %v10577_v1  ;;  %v10410_v37 = vld [vmem:[%s13248_s7 + $0x2a8] sm:$0xff]  }
 0x5df   : > { %9644 = vmatpush3.bf16.msra.mxu1 %v10338_v14  ;;  %9680 = vmatpush3.bf16.msra.mxu0 %v10339_v7  ;;  %v10371_v14 = vld [vmem:[%s13248_s7 + $0x1c8] sm:$0xff]   ;;  %v10372_v7 = vld [vmem:[%s13248_s7 + $0x160] sm:$0xff]  }
 0x5e0   : > { %9645 = vmatprep.subr.bf16.mxu1 %v10577_v1  ;;  %9681 = vmatprep.subr.bf16.mxu0 %v10577_v1 }
 0x5e3   : > { %9646 = vmatpush3.bf16.msra.mxu1 %v10340_v63  ;;  %9682 = vmatpush3.bf16.msra.mxu0 %v10341_v61  ;;  %v10373_v63 = vld [vmem:[%s13248_s7 + $0x1c0] sm:$0xff]   ;;  %v4601_v61 = vld [vmem:[#allocation4 + $0xb] sm:$0x1] }
 0x5e4   : > { %9663 = vmatprep.subr.bf16.mxu1 %v10577_v1  ;;  %9699 = vmatprep.subr.bf16.mxu0 %v10577_v1 }
 0x5e6   : > { %9648 = vmatmul.mubr.msk.bf16.vlgmr.msra.gmra.mxu1 %vm3400_vm4, %v3970_v51  ;;  %9684 = vmatmul.mubr.msk.bf16.vlgmr.msra.gmra.mxu0 %vm3400_vm4, %v4207_v18  ;;  %v4839_v51 = vpack.c.bf16 %v4838_v23, %v4838_v23  ;;  %v10376_v18 = vld [vmem:[%s13248_s7 + $0x1b0] sm:$0xff]  }
 0x5e7   : > { %9664 = vmatpush3.bf16.msra.mxu1 %v10342_v24  ;;  %9700 = vmatpush3.bf16.msra.mxu0 %v10343_v31  ;;  %v10375_v24 = vld [vmem:[%s13248_s7 + $0x218] sm:$0xff]   ;;  %v4602_v31 = vpack.c.bf16 %v4601_v61, %v4601_v61 }
 0x5e8   : > { %9665 = vmatprep.subr.bf16.mxu1 %v10577_v1  ;;  %9701 = vmatprep.subr.bf16.mxu0 %v10577_v1  ;;  %v10415_v61 = vld [vmem:[%s13248_s7 + $0x358] sm:$0xff]  }
 0x5e9   : > { %9671 = vmatprep.mubr.msk.bf16.mxu1 %vm10578_vm1, %v10577_v1  ;;  %9707 = vmatprep.mubr.msk.bf16.mxu0 %vm10578_vm1, %v10577_v1 }
 0x5eb   : > { %9666 = vmatpush3.bf16.msra.mxu1 %v10344_v53  ;;  %9702 = vmatpush3.bf16.msra.mxu0 %v10345_v58  ;;  %v10377_v53 = vld [vmem:[%s13248_s7 + $0x210] sm:$0xff]   ;;  %v10378_v58 = vld [vmem:[%s13248_s7 + $0x1a8] sm:$0xff]  }
 0x5ec   : > { %9667 = vmatprep.subr.bf16.mxu1 %v10577_v1  ;;  %9703 = vmatprep.subr.bf16.mxu0 %v10577_v1 }
 0x5ef   : > { %9668 = vmatpush3.bf16.msra.mxu1 %v10346_v21  ;;  %9704 = vmatpush3.bf16.msra.mxu0 %v10347_v15  ;;  %v10379_v21 = vld [vmem:[%s13248_s7 + $0x208] sm:$0xff]   ;;  %v10380_v15 = vld [vmem:[%s13248_s7 + $0x1a0] sm:$0xff]  }
 0x5f0   : > { %9669 = vmatprep.subr.bf16.mxu1 %v10577_v1  ;;  %9705 = vmatprep.subr.bf16.mxu0 %v10577_v1 }
 0x5f3   : > { %9670 = vmatpush3.bf16.msra.mxu1 %v10348_v19  ;;  %9706 = vmatpush3.bf16.msra.mxu0 %v10349_v0  ;;  %v10381_v19 = vld [vmem:[%s13248_s7 + $0x200] sm:$0xff]  }
 0x5f4   : > { %9687 = vmatprep.subr.bf16.mxu1 %v10577_v1  ;;  %9723 = vmatprep.subr.bf16.mxu0 %v10577_v1  ;;  %v4996_v0 = vld [vmem:[#allocation4 + $0x10] sm:$0x1] }
 0x5f5   : > { %v4997_v5 = vpack.c.bf16 %v4996_v0, %v4996_v0  ;;  %v10423_v0 = vld [vmem:[%s13248_s7 + $0x398] sm:$0xff]  }
 0x5f6   : > { %9672 = vmatmul.mubr.msk.bf16.vlgmr.msra.gmra.mxu1 %vm3400_vm4, %v4128_v11  ;;  %9708 = vmatmul.mubr.msk.bf16.vlgmr.msra.gmra.mxu0 %vm3400_vm4, %v4365_v56  ;;  %v4760_v11 = vpack.c.bf16 %v4759_v16, %v4759_v16  ;;  %v10384_v56 = vld [vmem:[%s13248_s7 + $0x1f0] sm:$0xff]  }
 0x5f7   : > { %9688 = vmatpush3.bf16.msra.mxu1 %v10350_v32  ;;  %9724 = vmatpush3.bf16.msra.mxu0 %v10351_v59  ;;  %v10382_v32 = vld [vmem:[%s13248_s7 + $0x1f8] sm:$0xff]  }
 0x5f8   : > { %9689 = vmatprep.subr.bf16.mxu1 %v10577_v1  ;;  %9725 = vmatprep.subr.bf16.mxu0 %v10577_v1  ;;  %v10383_v59 = vld [vmem:[%s13248_s7 + $0x258] sm:$0xff]  }
 0x5f9   : > { %9695 = vmatprep.mubr.msk.bf16.mxu1 %vm10578_vm1, %v10577_v1  ;;  %9731 = vmatprep.mubr.msk.bf16.mxu0 %vm10578_vm1, %v10577_v1 }
 0x5fb   : > { %9690 = vmatpush3.bf16.msra.mxu1 %v10352_v33  ;;  %9726 = vmatpush3.bf16.msra.mxu0 %v10353_v25  ;;  %v10385_v33 = vld [vmem:[%s13248_s7 + $0x250] sm:$0xff]   ;;  %v10386_v25 = vld [vmem:[%s13248_s7 + $0x1e8] sm:$0xff]  }
 0x5fc   : > { %9691 = vmatprep.subr.bf16.mxu1 %v10577_v1  ;;  %9727 = vmatprep.subr.bf16.mxu0 %v10577_v1 }
 0x5ff   : > { %9692 = vmatpush3.bf16.msra.mxu1 %v10354_v6  ;;  %9728 = vmatpush3.bf16.msra.mxu0 %v10355_v45  ;;  %v10388_v6 = vld [vmem:[%s13248_s7 + $0x1e0] sm:$0xff]  }
 0x600   : > { %9693 = vmatprep.subr.bf16.mxu1 %v10577_v1  ;;  %9729 = vmatprep.subr.bf16.mxu0 %v10577_v1  ;;  %v10389_v45 = vld [vmem:[%s13248_s7 + $0x240] sm:$0xff]  }
 0x603   : > { %9694 = vmatpush3.bf16.msra.mxu1 %v10356_v26  ;;  %9730 = vmatpush3.bf16.msra.mxu0 %v10357_v40  ;;  %v5155_v26 = vpack.c.bf16 %v5154_v60, %v5154_v60  ;;  %v10390_v40 = vld [vmem:[%s13248_s7 + $0x238] sm:$0xff]   ;;  %v10427_v60 = vld [vmem:[%s13248_s7 + $0x388] sm:$0xff]  }
 0x604   : > { %9711 = vmatprep.subr.bf16.mxu1 %v10577_v1  ;;  %9747 = vmatprep.subr.bf16.mxu0 %v10577_v1 }
 0x606   : > { %9696 = vmatmul.mubr.msk.bf16.vlgmr.msra.gmra.mxu1 %vm3400_vm4, %v4286_v62  ;;  %9732 = vmatmul.mubr.msk.bf16.vlgmr.msra.gmra.mxu0 %vm3400_vm4, %v4523_v8  ;;  %v10397_v62 = vld [vmem:[%s13248_s7 + $0x280] sm:$0xff]  }
 0x607   : > { %9712 = vmatpush3.bf16.msra.mxu1 %v10358_v35  ;;  %9748 = vmatpush3.bf16.msra.mxu0 %v10359_v57  ;;  %v10394_v35 = vld [vmem:[%s13248_s7 + $0x228] sm:$0xff]   ;;  %v5075_v8 = vld [vmem:[#allocation4 + $0x11] sm:$0x1] }
 0x608   : > { %9713 = vmatprep.subr.bf16.mxu1 %v10577_v1  ;;  %9749 = vmatprep.subr.bf16.mxu0 %v10577_v1  ;;  %v10395_v57 = vld [vmem:[%s13248_s7 + $0x288] sm:$0xff]   ;;  %v5076_v54 = vpack.c.bf16 %v5075_v8, %v5075_v8 }
 0x609   : > { %9719 = vmatprep.mubr.msk.bf16.mxu1 %vm10578_vm1, %v10577_v1  ;;  %9755 = vmatprep.mubr.msk.bf16.mxu0 %vm10578_vm1, %v10577_v1 }
 0x60b   : > { %9714 = vmatpush3.bf16.msra.mxu1 %v10360_v29  ;;  %9750 = vmatpush3.bf16.msra.mxu0 %v10361_v55  ;;  %v10398_v29 = vld [vmem:[%s13248_s7 + $0x278] sm:$0xff]  }
 0x60c   : > { %9715 = vmatprep.subr.bf16.mxu1 %v10577_v1  ;;  %9751 = vmatprep.subr.bf16.mxu0 %v10577_v1  ;;  %v10399_v55 = vld [vmem:[%s13248_s7 + $0x2d8] sm:$0xff]  }
 0x60f   : > { %9716 = vmatpush3.bf16.msra.mxu1 %v10362_v10  ;;  %9752 = vmatpush3.bf16.msra.mxu0 %v10363_v46  ;;  %v5313_v10 = vpack.c.bf16 %v5312_v4, %v5312_v4  ;;  %v10400_v46 = vld [vmem:[%s13248_s7 + $0x270] sm:$0xff]  }
 0x610   : > { %9717 = vmatprep.subr.bf16.mxu1 %v10577_v1  ;;  %9753 = vmatprep.subr.bf16.mxu0 %v10577_v1  ;;  %v10432_v4 = vld [vmem:[%s13248_s7 + $0x370] sm:$0xff]  }
 0x613   : > { %9718 = vmatpush3.bf16.msra.mxu1 %v10364_v30  ;;  %9754 = vmatpush3.bf16.msra.mxu0 %v10365_v50  ;;  %v10405_v30 = vld [vmem:[%s13248_s7 + $0x2c0] sm:$0xff]  }
 0x614   : > { %9735 = vmatprep.subr.bf16.mxu1 %v10577_v1  ;;  %9771 = vmatprep.subr.bf16.mxu0 %v10577_v1  ;;  %v5233_v50 = vld [vmem:[#allocation4 + $0x13] sm:$0x1] }
 0x616   : > { %9720 = vmatmul.mubr.msk.bf16.vlgmr.msra.gmra.mxu1 %vm3400_vm4, %v4444_v2  ;;  %9756 = vmatmul.mubr.msk.bf16.vlgmr.msra.gmra.mxu0 %vm3400_vm4, %v4681_v12  ;;  %v10408_v2 = vld [vmem:[%s13248_s7 + $0x2b0] sm:$0xff]  }
 0x617   : > { %9736 = vmatpush3.bf16.msra.mxu1 %v10366_v39  ;;  %9772 = vmatpush3.bf16.msra.mxu0 %v10367_v13  ;;  %v10407_v39 = vld [vmem:[%s13248_s7 + $0x318] sm:$0xff]   ;;  %v5234_v13 = vpack.c.bf16 %v5233_v50, %v5233_v50  ;;  %v10409_v12 = vld [vmem:[%s13248_s7 + $0x310] sm:$0xff]  }
 0x618   : > { %9737 = vmatprep.subr.bf16.mxu1 %v10577_v1  ;;  %9773 = vmatprep.subr.bf16.mxu0 %v10577_v1 }
 0x619   : > { %9743 = vmatprep.mubr.msk.bf16.mxu1 %vm10578_vm1, %v10577_v1  ;;  %9779 = vmatprep.mubr.msk.bf16.mxu0 %vm10578_vm1, %v10577_v1 }
 0x61b   : > { %9738 = vmatpush3.bf16.msra.mxu1 %v10368_v52  ;;  %9774 = vmatpush3.bf16.msra.mxu0 %v10369_v44  ;;  %v10411_v52 = vld [vmem:[%s13248_s7 + $0x308] sm:$0xff]   ;;  %v10412_v44 = vld [vmem:[%s13248_s7 + $0x2a0] sm:$0xff]  }
 0x61c   : > { %9739 = vmatprep.subr.bf16.mxu1 %v10577_v1  ;;  %9775 = vmatprep.subr.bf16.mxu0 %v10577_v1 }
 0x61f   : > { %9740 = vmatpush3.bf16.msra.mxu1 %v10370_v22  ;;  %9776 = vmatpush3.bf16.msra.mxu0 %v10371_v14  ;;  %v10413_v22 = vld [vmem:[%s13248_s7 + $0x300] sm:$0xff]  }
 0x620   : > { %9741 = vmatprep.subr.bf16.mxu1 %v10577_v1  ;;  %9777 = vmatprep.subr.bf16.mxu0 %v10577_v1  ;;  %v5391_v14 = vld [vmem:[#allocation4 + $0x15] sm:$0x1] }
 0x621   : > { %v5392_v23 = vpack.c.bf16 %v5391_v14, %v5391_v14  ;;  %v10441_v14 = vld [vmem:[%s13248_s7 + $0x410] sm:$0xff]  }
 0x623   : > { %9742 = vmatpush3.bf16.msra.mxu1 %v10372_v7  ;;  %9778 = vmatpush3.bf16.msra.mxu0 %v10373_v63  ;;  %v5628_v7 = vld [vmem:[#allocation4 + $0x18] sm:$0x1]  ;;  %v10414_v63 = vld [vmem:[%s13248_s7 + $0x2f8] sm:$0xff]  }
 0x624   : > { %9759 = vmatprep.subr.bf16.mxu1 %v10577_v1  ;;  %9795 = vmatprep.subr.bf16.mxu0 %v10577_v1 }
 0x626   : > { %9744 = vmatmul.mubr.msk.bf16.vlgmr.msra.gmra.mxu1 %vm3400_vm4, %v4602_v31  ;;  %9780 = vmatmul.mubr.msk.bf16.vlgmr.msra.gmra.mxu0 %vm3400_vm4, %v4839_v51  ;;  %v10417_v31 = vld [vmem:[%s13248_s7 + $0x350] sm:$0xff]   ;;  %v10418_v51 = vld [vmem:[%s13248_s7 + $0x2e8] sm:$0xff]  }
 0x627   : > { %9760 = vmatpush3.bf16.msra.mxu1 %v10374_v36  ;;  %9796 = vmatpush3.bf16.msra.mxu0 %v10375_v24  ;;  %v5629_v36 = vpack.c.bf16 %v5628_v7, %v5628_v7  ;;  %v10416_v24 = vld [vmem:[%s13248_s7 + $0x2f0] sm:$0xff]  }
 0x628   : > { %9761 = vmatprep.subr.bf16.mxu1 %v10577_v1  ;;  %9797 = vmatprep.subr.bf16.mxu0 %v10577_v1 }
 0x629   : > { %9767 = vmatprep.mubr.msk.bf16.mxu1 %vm10578_vm1, %v10577_v1  ;;  %9803 = vmatprep.mubr.msk.bf16.mxu0 %vm10578_vm1, %v10577_v1 }
 0x62b   : > { %9762 = vmatpush3.bf16.msra.mxu1 %v10376_v18  ;;  %9798 = vmatpush3.bf16.msra.mxu0 %v10377_v53  ;;  %v10419_v18 = vld [vmem:[%s13248_s7 + $0x348] sm:$0xff]   ;;  %v10420_v53 = vld [vmem:[%s13248_s7 + $0x2e0] sm:$0xff]  }
 0x62c   : > { %9763 = vmatprep.subr.bf16.mxu1 %v10577_v1  ;;  %9799 = vmatprep.subr.bf16.mxu0 %v10577_v1 }
 0x62f   : > { %9764 = vmatpush3.bf16.msra.mxu1 %v10378_v58  ;;  %9800 = vmatpush3.bf16.msra.mxu0 %v10379_v21  ;;  %v10421_v58 = vld [vmem:[%s13248_s7 + $0x340] sm:$0xff]  }
 0x630   : > { %9765 = vmatprep.subr.bf16.mxu1 %v10577_v1  ;;  %9801 = vmatprep.subr.bf16.mxu0 %v10577_v1  ;;  %v5549_v21 = vld [vmem:[#allocation4 + $0x17] sm:$0x1] }
 0x631   : > { %v5550_v16 = vpack.c.bf16 %v5549_v21, %v5549_v21  ;;  %v10445_v21 = vld [vmem:[%s13248_s7 + $0x400] sm:$0xff]  }
 0x633   : > { %9766 = vmatpush3.bf16.msra.mxu1 %v10380_v15  ;;  %9802 = vmatpush3.bf16.msra.mxu0 %v10381_v19  ;;  %v5786_v15 = vld [vmem:[#allocation4 + $0x1a] sm:$0x1]  ;;  %v10422_v19 = vld [vmem:[%s13248_s7 + $0x338] sm:$0xff]  }
 0x634   : > { %9783 = vmatprep.subr.bf16.mxu1 %v10577_v1  ;;  %9819 = vmatprep.subr.bf16.mxu0 %v10577_v1 }
 0x636   : > { %9768 = vmatmul.mubr.msk.bf16.vlgmr.msra.gmra.mxu1 %vm3400_vm4, %v4760_v11  ;;  %9804 = vmatmul.mubr.msk.bf16.vlgmr.msra.gmra.mxu0 %vm3400_vm4, %v4997_v5  ;;  %v5787_v5 = vpack.c.bf16 %v5786_v15, %v5786_v15  ;;  %v10424_v11 = vld [vmem:[%s13248_s7 + $0x330] sm:$0xff]   ;;  %v6023_v15 = vld [vmem:[#allocation4 + $0x1d] sm:$0x1] }
 0x637   : > { %9784 = vmatpush3.bf16.msra.mxu1 %v10382_v32  ;;  %9820 = vmatpush3.bf16.msra.mxu0 %v10383_v59 }
 0x638   : > { %9785 = vmatprep.subr.bf16.mxu1 %v10577_v1  ;;  %9821 = vmatprep.subr.bf16.mxu0 %v10577_v1 }
 0x639   : > { %9791 = vmatprep.mubr.msk.bf16.mxu1 %vm10578_vm1, %v10577_v1  ;;  %9827 = vmatprep.mubr.msk.bf16.mxu0 %vm10578_vm1, %v10577_v1 }
 0x63b   : > { %9786 = vmatpush3.bf16.msra.mxu1 %v10384_v56  ;;  %9822 = vmatpush3.bf16.msra.mxu0 %v10385_v33  ;;  %v10425_v56 = vld [vmem:[%s13248_s7 + $0x390] sm:$0xff]  }
 0x63c   : > { %9787 = vmatprep.subr.bf16.mxu1 %v10577_v1  ;;  %9823 = vmatprep.subr.bf16.mxu0 %v10577_v1 }
 0x63f   : > { %9788 = vmatpush3.bf16.msra.mxu1 %v10386_v25  ;;  %9824 = vmatpush3.bf16.msra.mxu0 %v10387_v43 }
 0x640   : > { %9789 = vmatprep.subr.bf16.mxu1 %v10577_v1  ;;  %9825 = vmatprep.subr.bf16.mxu0 %v10577_v1 }
 0x643   : > { %9790 = vmatpush3.bf16.msra.mxu1 %v10388_v6  ;;  %9826 = vmatpush3.bf16.msra.mxu0 %v10389_v45  ;;  %v10426_v45 = vld [vmem:[%s13248_s7 + $0x328] sm:$0xff]  }
 0x644   : > { %9807 = vmatprep.subr.bf16.mxu1 %v10577_v1  ;;  %9843 = vmatprep.subr.bf16.mxu0 %v10577_v1 }
 0x646   : > { %9792 = vmatmul.mubr.msk.bf16.vlgmr.msra.gmra.mxu1 %vm3400_vm4, %v4918_v41  ;;  %9828 = vmatmul.mubr.msk.bf16.vlgmr.msra.gmra.mxu0 %vm3400_vm4, %v5155_v26  ;;  %v5707_v41 = vld [vmem:[#allocation4 + $0x19] sm:$0x1] }
 0x647   : > { %9808 = vmatpush3.bf16.msra.mxu1 %v10390_v40  ;;  %9844 = vmatpush3.bf16.msra.mxu0 %v10391_v42  ;;  %v10428_v40 = vld [vmem:[%s13248_s7 + $0x320] sm:$0xff]  }
 0x648   : > { %9809 = vmatprep.subr.bf16.mxu1 %v10577_v1  ;;  %9845 = vmatprep.subr.bf16.mxu0 %v10577_v1  ;;  %v10429_v42 = vld [vmem:[%s13248_s7 + $0x380] sm:$0xff]  }
 0x649   : > { %9815 = vmatprep.mubr.msk.bf16.mxu1 %vm10578_vm1, %v10577_v1  ;;  %9851 = vmatprep.mubr.msk.bf16.mxu0 %vm10578_vm1, %v10577_v1 }
 0x64b   : > { %9810 = vmatpush3.bf16.msra.mxu1 %v10392_v48  ;;  %9846 = vmatpush3.bf16.msra.mxu0 %v10393_v17  ;;  %v5944_v48 = vld [vmem:[#allocation4 + $0x1c] sm:$0x1]  ;;  %v10430_v17 = vld [vmem:[%s13248_s7 + $0x378] sm:$0xff]  }
 0x64c   : > { %9811 = vmatprep.subr.bf16.mxu1 %v10577_v1  ;;  %9847 = vmatprep.subr.bf16.mxu0 %v10577_v1 }
 0x64f   : > { %9812 = vmatpush3.bf16.msra.mxu1 %v10394_v35  ;;  %9848 = vmatpush3.bf16.msra.mxu0 %v10395_v57  ;;  %v10431_v35 = vld [vmem:[%s13248_s7 + $0x3d8] sm:$0xff]   ;;  %v5708_v57 = vpack.c.bf16 %v5707_v41, %v5707_v41 }
 0x650   : > { %9813 = vmatprep.subr.bf16.mxu1 %v10577_v1  ;;  %9849 = vmatprep.subr.bf16.mxu0 %v10577_v1 }
 0x653   : > { %9814 = vmatpush3.bf16.msra.mxu1 %v10396_v3  ;;  %9850 = vmatpush3.bf16.msra.mxu0 %v10397_v62  ;;  %v5945_v3 = vpack.c.bf16 %v5944_v48, %v5944_v48  ;;  %v10452_v48 = vld [vmem:[%s13248_s7 + $0x3e0] sm:$0xff]  }
 0x654   : > { %9831 = vmatprep.subr.bf16.mxu1 %v10577_v1  ;;  %9867 = vmatprep.subr.bf16.mxu0 %v10577_v1 }
 0x656   : > { %9816 = vmatmul.mubr.msk.bf16.vlgmr.msra.gmra.mxu1 %vm3400_vm4, %v5076_v54  ;;  %9852 = vmatmul.mubr.msk.bf16.vlgmr.msra.gmra.mxu0 %vm3400_vm4, %v5313_v10 }
 0x657   : > { %9832 = vmatpush3.bf16.msra.mxu1 %v10398_v29  ;;  %9868 = vmatpush3.bf16.msra.mxu0 %v10399_v55  ;;  %v10433_v29 = vld [vmem:[%s13248_s7 + $0x3d0] sm:$0xff]  }
 0x658   : > { %9833 = vmatprep.subr.bf16.mxu1 %v10577_v1  ;;  %9869 = vmatprep.subr.bf16.mxu0 %v10577_v1 }
 0x659   : > { %9839 = vmatprep.mubr.msk.bf16.mxu1 %vm10578_vm1, %v10577_v1  ;;  %9875 = vmatprep.mubr.msk.bf16.mxu0 %vm10578_vm1, %v10577_v1 }
 0x65b   : > { %9834 = vmatpush3.bf16.msra.mxu1 %v10400_v46  ;;  %9870 = vmatpush3.bf16.msra.mxu0 %v10401_v34 }
 0x65c   : > { %9835 = vmatprep.subr.bf16.mxu1 %v10577_v1  ;;  %9871 = vmatprep.subr.bf16.mxu0 %v10577_v1 }
 0x65f   : > { %9836 = vmatpush3.bf16.msra.mxu1 %v10402_v20  ;;  %9872 = vmatpush3.bf16.msra.mxu0 %v10403_v27  ;;  %v10434_v27 = vld [vmem:[%s13248_s7 + $0x368] sm:$0xff]  }
 0x660   : > { %9837 = vmatprep.subr.bf16.mxu1 %v10577_v1  ;;  %9873 = vmatprep.subr.bf16.mxu0 %v10577_v1 }
 0x663   : > { %9838 = vmatpush3.bf16.msra.mxu1 %v10404_v47  ;;  %9874 = vmatpush3.bf16.msra.mxu0 %v10405_v30  ;;  %v10435_v47 = vld [vmem:[%s13248_s7 + $0x3c8] sm:$0xff]  }
 0x664   : > { %9855 = vmatprep.subr.bf16.mxu1 %v10577_v1  ;;  %9891 = vmatprep.subr.bf16.mxu0 %v10577_v1 }
 0x666   : > { %9840 = vmatmul.mubr.msk.bf16.vlgmr.msra.gmra.mxu1 %vm3400_vm4, %v5234_v13  ;;  %9876 = vmatmul.mubr.msk.bf16.vlgmr.msra.gmra.mxu0 %vm3400_vm4, %v5471_v9  ;;  %v6102_v13 = vld [vmem:[#allocation4 + $0x1e] sm:$0x1]  ;;  %v10438_v9 = vld [vmem:[%s13248_s7 + $0x3b8] sm:$0xff]  }
 0x667   : > { %9856 = vmatpush3.bf16.msra.mxu1 %v10406_v28  ;;  %9892 = vmatpush3.bf16.msra.mxu0 %v10407_v39  ;;  %v10437_v28 = vld [vmem:[%s13248_s7 + $0x3c0] sm:$0xff]   ;;  %v5865_v39 = vld [vmem:[#allocation4 + $0x1b] sm:$0x1] }
 0x668   : > { %9857 = vmatprep.subr.bf16.mxu1 %v10577_v1  ;;  %9893 = vmatprep.subr.bf16.mxu0 %v10577_v1 }
 0x669   : > { %9863 = vmatprep.mubr.msk.bf16.mxu1 %vm10578_vm1, %v10577_v1  ;;  %9899 = vmatprep.mubr.msk.bf16.mxu0 %vm10578_vm1, %v10577_v1 }
 0x66b   : > { %9858 = vmatpush3.bf16.msra.mxu1 %v10408_v2  ;;  %9894 = vmatpush3.bf16.msra.mxu0 %v10409_v12  ;;  %v10439_v2 = vld [vmem:[%s13248_s7 + $0x418] sm:$0xff]   ;;  %v5866_v12 = vpack.c.bf16 %v5865_v39, %v5865_v39 }
 0x66c   : > { %9859 = vmatprep.subr.bf16.mxu1 %v10577_v1  ;;  %9895 = vmatprep.subr.bf16.mxu0 %v10577_v1 }
 0x66f   : > { %9860 = vmatpush3.bf16.msra.mxu1 %v10410_v37  ;;  %9896 = vmatpush3.bf16.msra.mxu0 %v10411_v52  ;;  %v6103_v37 = vpack.c.bf16 %v6102_v13, %v6102_v13  ;;  %v10460_v13 = vld [vmem:[%s13248_s7 + $0x420] sm:$0xff]  }
 0x670   : > { %9861 = vmatprep.subr.bf16.mxu1 %v10577_v1  ;;  %9897 = vmatprep.subr.bf16.mxu0 %v10577_v1 }
 0x673   : > { %9862 = vmatpush3.bf16.msra.mxu1 %v10412_v44  ;;  %9898 = vmatpush3.bf16.msra.mxu0 %v10413_v22  ;;  %v10440_v22 = vld [vmem:[%s13248_s7 + $0x3b0] sm:$0xff]  }
 0x674   : > { %9879 = vmatprep.subr.bf16.mxu1 %v10577_v1  ;;  %9915 = vmatprep.subr.bf16.mxu0 %v10577_v1 }
 0x676   : > { %9864 = vmatmul.mubr.msk.bf16.vlgmr.msra.gmra.mxu1 %vm3400_vm4, %v5392_v23  ;;  %9900 = vmatmul.mubr.msk.bf16.vlgmr.msra.gmra.mxu0 %vm3400_vm4, %v5629_v36 }
 0x677   : > { %9880 = vmatpush3.bf16.msra.mxu1 %v10414_v63  ;;  %9916 = vmatpush3.bf16.msra.mxu0 %v10415_v61 }
 0x678   : > { %9881 = vmatprep.subr.bf16.mxu1 %v10577_v1  ;;  %9917 = vmatprep.subr.bf16.mxu0 %v10577_v1 }
 0x679   : > { %9887 = vmatprep.mubr.msk.bf16.mxu1 %vm10578_vm1, %v10577_v1  ;;  %9923 = vmatprep.mubr.msk.bf16.mxu0 %vm10578_vm1, %v10577_v1 }
 0x67b   : > { %9882 = vmatpush3.bf16.msra.mxu1 %v10416_v24  ;;  %9918 = vmatpush3.bf16.msra.mxu0 %v10417_v31  ;;  %v10442_v31 = vld [vmem:[%s13248_s7 + $0x3a8] sm:$0xff]  }
 0x67c   : > { %9883 = vmatprep.subr.bf16.mxu1 %v10577_v1  ;;  %9919 = vmatprep.subr.bf16.mxu0 %v10577_v1 }
 0x67f   : > { %9884 = vmatpush3.bf16.msra.mxu1 %v10418_v51  ;;  %9920 = vmatpush3.bf16.msra.mxu0 %v10419_v18  ;;  %v10443_v51 = vld [vmem:[%s13248_s7 + $0x408] sm:$0xff]  }
 0x680   : > { %9885 = vmatprep.subr.bf16.mxu1 %v10577_v1  ;;  %9921 = vmatprep.subr.bf16.mxu0 %v10577_v1 }
 0x683   : > { %9886 = vmatpush3.bf16.msra.mxu1 %v10420_v53  ;;  %9922 = vmatpush3.bf16.msra.mxu0 %v10421_v58  ;;  %v10444_v58 = vld [vmem:[%s13248_s7 + $0x3a0] sm:$0xff]  }
 0x684   : > { %9903 = vmatprep.subr.bf16.mxu1 %v10577_v1  ;;  %9939 = vmatprep.subr.bf16.mxu0 %v10577_v1 }
 0x686   : > { %9888 = vmatmul.mubr.msk.bf16.vlgmr.msra.gmra.mxu1 %vm3400_vm4, %v5550_v16  ;;  %9924 = vmatmul.mubr.msk.bf16.vlgmr.msra.gmra.mxu0 %vm3400_vm4, %v5787_v5  ;;  %v3817_v32 = vpop.f32.mrf.mxu1  ;;  %v3962_v59 = vpop.f32.mrf.mxu0  ;;  %v10447_v16 = vld [vmem:[%s13248_s7 + $0x458] sm:$0xff]   ;;  %v6024_v5 = vpack.c.bf16 %v6023_v15, %v6023_v15 }
 0x687   : > { %9904 = vmatpush3.bf16.msra.mxu1 %v10422_v19  ;;  %9940 = vmatpush3.bf16.msra.mxu0 %v10423_v0  ;;  %v6260_v19 = vld [vmem:[#allocation4 + $0x20] sm:$0x1]  ;;  %v10446_v0 = vld [vmem:[%s13248_s7 + $0x3f8] sm:$0xff]  }
 0x688   : > { %9905 = vmatprep.subr.bf16.mxu1 %v10577_v1  ;;  %9941 = vmatprep.subr.bf16.mxu0 %v10577_v1  ;;  %v9613_v33 = vpop.f32.mrf.mxu1  ;;  %v9637_v25 = vpop.f32.mrf.mxu0 }
 0x689   : > { %9911 = vmatprep.mubr.msk.bf16.mxu1 %vm10578_vm1, %v10577_v1  ;;  %9947 = vmatprep.mubr.msk.bf16.mxu0 %vm10578_vm1, %v10577_v1  ;;  %v10448_v33 = vld [vmem:[%s13248_s7 + $0x3f0] sm:$0xff]  }
 0x68a   : > { %v3820_v43 = vpop.f32.mrf.mxu1  ;;  %v3965_v6 = vpop.f32.mrf.mxu0  ;;  %v10449_v25 = vld [vmem:[%s13248_s7 + $0x450] sm:$0xff]  }
 0x68b   : > { %9906 = vmatpush3.bf16.msra.mxu1 %v10424_v11  ;;  %9942 = vmatpush3.bf16.msra.mxu0 %v10425_v56 }
 0x68c   : > { %9907 = vmatprep.subr.bf16.mxu1 %v10577_v1  ;;  %9943 = vmatprep.subr.bf16.mxu0 %v10577_v1  ;;  %v9614_v38 = vpop.f32.mrf.mxu1  ;;  %v9638_v26 = vpop.f32.mrf.mxu0 }
 0x68d   : > { %v10450_v26 = vld [vmem:[%s13248_s7 + $0x3e8] sm:$0xff]  }
 0x68f   : > { %9908 = vmatpush3.bf16.msra.mxu1 %v10426_v45  ;;  %9944 = vmatpush3.bf16.msra.mxu0 %v10427_v60 }
 0x690   : > { %9909 = vmatprep.subr.bf16.mxu1 %v10577_v1  ;;  %9945 = vmatprep.subr.bf16.mxu0 %v10577_v1 }
 0x693   : > { %9910 = vmatpush3.bf16.msra.mxu1 %v10428_v40  ;;  %9946 = vmatpush3.bf16.msra.mxu0 %v10429_v42  ;;  %v10451_v40 = vld [vmem:[%s13248_s7 + $0x448] sm:$0xff]  }
 0x694   : > { %9927 = vmatprep.subr.bf16.mxu1 %v10577_v1  ;;  %9963 = vmatprep.subr.bf16.mxu0 %v10577_v1 }
 0x696   : > { %9912 = vmatmul.mubr.msk.bf16.vlgmr.msra.gmra.mxu1 %vm3400_vm4, %v5708_v57  ;;  %9948 = vmatmul.mubr.msk.bf16.vlgmr.msra.gmra.mxu0 %vm3400_vm4, %v5945_v3  ;;  %v3884_v62 = vpop.f32.mrf.mxu1  ;;  %v4120_v8 = vpop.f32.mrf.mxu0  ;;  %v6418_v57 = vld [vmem:[#allocation4 + $0x22] sm:$0x1]  ;;  %v10454_v3 = vld [vmem:[%s13248_s7 + $0x438] sm:$0xff]  }
 0x697   : > { %9928 = vmatpush3.bf16.msra.mxu1 %v10430_v17  ;;  %9964 = vmatpush3.bf16.msra.mxu0 %v10431_v35  ;;  %v3885_v55 = vadd.f32 %v3884_v62, %v3817_v32  ;;  %v6261_v32 = vpack.c.bf16 %v6260_v19, %v6260_v19  ;;  %v10453_v17 = vld [vmem:[%s13248_s7 + $0x440] sm:$0xff]   ;;  %v6181_v35 = vld [vmem:[#allocation4 + $0x1f] sm:$0x1]  ;;  %v10455_v62 = vld [vmem:[%s13248_s7 + $0x498] sm:$0xff]  }
 0x698   : > { %9929 = vmatprep.subr.bf16.mxu1 %v10577_v1  ;;  %9965 = vmatprep.subr.bf16.mxu0 %v10577_v1  ;;  %v9625_v54 = vpop.f32.mrf.mxu1  ;;  %v9661_v10 = vpop.f32.mrf.mxu0  ;;  %v10468_v19 = vld [vmem:[%s13248_s7 + $0x460] sm:$0xff]  }
 0x699   : > { %9935 = vmatprep.mubr.msk.bf16.mxu1 %vm10578_vm1, %v10577_v1  ;;  %9971 = vmatprep.mubr.msk.bf16.mxu0 %vm10578_vm1, %v10577_v1  ;;  %v3968_v46 = vadd.f32 %v3962_v59, %v3885_v55  ;;  %v10456_v10 = vld [vmem:[%s13248_s7 + $0x430] sm:$0xff]  }
 0x69a   : > { %v3887_v34 = vpop.f32.mrf.mxu1  ;;  %v4123_v20 = vpop.f32.mrf.mxu0 }
 0x69b   : > { %9930 = vmatpush3.bf16.msra.mxu1 %v10432_v4  ;;  %9966 = vmatpush3.bf16.msra.mxu0 %v10433_v29  ;;  %v6419_v4 = vpack.c.bf16 %v6418_v57, %v6418_v57  ;;  %v10476_v57 = vld [vmem:[%s13248_s7 + $0x4a0] sm:$0xff]  }
 0x69c   : > { %9931 = vmatprep.subr.bf16.mxu1 %v10577_v1  ;;  %9967 = vmatprep.subr.bf16.mxu0 %v10577_v1  ;;  %v9626_v30 = vpop.f32.mrf.mxu1  ;;  %v9662_v50 = vpop.f32.mrf.mxu0 }
 0x69d   : > { %v10458_v50 = vld [vmem:[%s13248_s7 + $0x428] sm:$0xff]  }
 0x69f   : > { %9932 = vmatpush3.bf16.msra.mxu1 %v10434_v27  ;;  %9968 = vmatpush3.bf16.msra.mxu0 %v10435_v47 }
 0x6a0   : > { %9933 = vmatprep.subr.bf16.mxu1 %v10577_v1  ;;  %9969 = vmatprep.subr.bf16.mxu0 %v10577_v1 }
 0x6a3   : > { %9934 = vmatpush3.bf16.msra.mxu1 %v10436_v49  ;;  %9970 = vmatpush3.bf16.msra.mxu0 %v10437_v28  ;;  %v10459_v49 = vld [vmem:[%s13248_s7 + $0x488] sm:$0xff]  }
 0x6a4   : > { %9951 = vmatprep.subr.bf16.mxu1 %v10577_v1  ;;  %9987 = vmatprep.subr.bf16.mxu0 %v10577_v1 }
 0x6a6   : > { %9936 = vmatmul.mubr.msk.bf16.vlgmr.msra.gmra.mxu1 %vm3400_vm4, %v5866_v12  ;;  %9972 = vmatmul.mubr.msk.bf16.vlgmr.msra.gmra.mxu0 %vm3400_vm4, %v6103_v37  ;;  %v4041_v52 = vpop.f32.mrf.mxu1  ;;  %v4278_v44 = vpop.f32.mrf.mxu0  ;;  %v6576_v12 = vld [vmem:[#allocation4 + $0x24] sm:$0x1]  ;;  %v10462_v37 = vld [vmem:[%s13248_s7 + $0x478] sm:$0xff]  }
 0x6a7   : > { %9952 = vmatpush3.bf16.msra.mxu1 %v10438_v9  ;;  %9988 = vmatpush3.bf16.msra.mxu0 %v10439_v2  ;;  %v4047_v7 = vadd.f32 %v4041_v52, %v3968_v46  ;;  %v10457_v46 = vld [vmem:[%s13248_s7 + $0x490] sm:$0xff]   ;;  %v10461_v9 = vld [vmem:[%s13248_s7 + $0x480] sm:$0xff]   ;;  %v10463_v52 = vld [vmem:[%s13248_s7 + $0x4d8] sm:$0xff]  }
 0x6a8   : > { %9953 = vmatprep.subr.bf16.mxu1 %v10577_v1  ;;  %9989 = vmatprep.subr.bf16.mxu0 %v10577_v1  ;;  %v9649_v63 = vpop.f32.mrf.mxu1  ;;  %v9685_v61 = vpop.f32.mrf.mxu0  ;;  %v6339_v2 = vld [vmem:[#allocation4 + $0x21] sm:$0x1] }
 0x6a9   : > { %9959 = vmatprep.mubr.msk.bf16.mxu1 %vm10578_vm1, %v10577_v1  ;;  %v4126_v23 = vadd.f32 %v4120_v8, %v4047_v7  ;;  %9995 = vmatprep.mubr.msk.bf16.mxu0 %vm10578_vm1, %v10577_v1  ;;  %v6182_v8 = vpack.c.bf16 %v6181_v35, %v6181_v35  ;;  %v10464_v61 = vld [vmem:[%s13248_s7 + $0x470] sm:$0xff]  }
 0x6aa   : > { %v4044_v36 = vpop.f32.mrf.mxu1  ;;  %v4281_v24 = vpop.f32.mrf.mxu0 }
 0x6ab   : > { %9954 = vmatpush3.bf16.msra.mxu1 %v10440_v22  ;;  %9990 = vmatpush3.bf16.msra.mxu0 %v10441_v14  ;;  %v6577_v22 = vpack.c.bf16 %v6576_v12, %v6576_v12  ;;  %v10484_v12 = vld [vmem:[%s13248_s7 + $0x4e0] sm:$0xff]  }
 0x6ac   : > { %9955 = vmatprep.subr.bf16.mxu1 %v10577_v1  ;;  %9991 = vmatprep.subr.bf16.mxu0 %v10577_v1  ;;  %v9650_v18 = vpop.f32.mrf.mxu1  ;;  %v9686_v53 = vpop.f32.mrf.mxu0 }
 0x6ad   : > { %v10466_v53 = vld [vmem:[%s13248_s7 + $0x468] sm:$0xff]  }
 0x6af   : > { %9956 = vmatpush3.bf16.msra.mxu1 %v10442_v31  ;;  %9992 = vmatpush3.bf16.msra.mxu0 %v10443_v51 }
 0x6b0   : > { %9957 = vmatprep.subr.bf16.mxu1 %v10577_v1  ;;  %9993 = vmatprep.subr.bf16.mxu0 %v10577_v1 }
 0x6b3   : > { %9958 = vmatpush3.bf16.msra.mxu1 %v10444_v58  ;;  %9994 = vmatpush3.bf16.msra.mxu0 %v10445_v21  ;;  %v10467_v58 = vld [vmem:[%s13248_s7 + $0x4c8] sm:$0xff]  }
 0x6b4   : > { %9975 = vmatprep.subr.bf16.mxu1 %v10577_v1  ;;  %10011 = vmatprep.subr.bf16.mxu0 %v10577_v1 }
 0x6b6   : > { %v4199_v59 = vpop.f32.mrf.mxu1  ;;  %v4436_v11 = vpop.f32.mrf.mxu0  ;;  %9960 = vmatmul.mubr.msk.bf16.vlgmr.msra.gmra.mxu1 %vm3400_vm4, %v6024_v5  ;;  %9996 = vmatmul.mubr.msk.bf16.vlgmr.msra.gmra.mxu0 %vm3400_vm4, %v6261_v32  ;;  %v6734_v5 = vld [vmem:[#allocation4 + $0x26] sm:$0x1]  ;;  %v10470_v32 = vld [vmem:[%s13248_s7 + $0x4b8] sm:$0xff]  }
 0x6b7   : > { %v4205_v56 = vadd.f32 %v4199_v59, %v4126_v23  ;;  %9976 = vmatpush3.bf16.msra.mxu1 %v10446_v0  ;;  %10012 = vmatpush3.bf16.msra.mxu0 %v10447_v16  ;;  %v10465_v23 = vld [vmem:[%s13248_s7 + $0x4d0] sm:$0xff]   ;;  %v10469_v0 = vld [vmem:[%s13248_s7 + $0x4c0] sm:$0xff]   ;;  %v10471_v59 = vld [vmem:[%s13248_s7 + $0x518] sm:$0xff]  }
 0x6b8   : > { %v9673_v43 = vpop.f32.mrf.mxu1  ;;  %v9709_v6 = vpop.f32.mrf.mxu0  ;;  %9977 = vmatprep.subr.bf16.mxu1 %v10577_v1  ;;  %10013 = vmatprep.subr.bf16.mxu0 %v10577_v1  ;;  %v6497_v16 = vld [vmem:[#allocation4 + $0x23] sm:$0x1] }
 0x6b9   : > { %9983 = vmatprep.mubr.msk.bf16.mxu1 %vm10578_vm1, %v10577_v1  ;;  %v4284_v45 = vadd.f32 %v4278_v44, %v4205_v56  ;;  %10019 = vmatprep.mubr.msk.bf16.mxu0 %vm10578_vm1, %v10577_v1  ;;  %v6340_v44 = vpack.c.bf16 %v6339_v2, %v6339_v2  ;;  %v6735_v56 = vpack.c.bf16 %v6734_v5, %v6734_v5  ;;  %v10472_v6 = vld [vmem:[%s13248_s7 + $0x4b0] sm:$0xff]   ;;  %v10492_v5 = vld [vmem:[%s13248_s7 + $0x520] sm:$0xff]  }
 0x6ba   : > { %v4202_v60 = vpop.f32.mrf.mxu1  ;;  %v4439_v38 = vpop.f32.mrf.mxu0 }
 0x6bb   : > { %9978 = vmatpush3.bf16.msra.mxu1 %v10448_v33  ;;  %10014 = vmatpush3.bf16.msra.mxu0 %v10449_v25 }
 0x6bc   : > { %v9674_v42 = vpop.f32.mrf.mxu1  ;;  %v9710_v41 = vpop.f32.mrf.mxu0  ;;  %9979 = vmatprep.subr.bf16.mxu1 %v10577_v1  ;;  %10015 = vmatprep.subr.bf16.mxu0 %v10577_v1 }
 0x6bd   : > { %v10474_v41 = vld [vmem:[%s13248_s7 + $0x4a8] sm:$0xff]  }
 0x6bf   : > { %9980 = vmatpush3.bf16.msra.mxu1 %v10450_v26  ;;  %10016 = vmatpush3.bf16.msra.mxu0 %v10451_v40 }
 0x6c0   : > { %9981 = vmatprep.subr.bf16.mxu1 %v10577_v1  ;;  %10017 = vmatprep.subr.bf16.mxu0 %v10577_v1 }
 0x6c3   : > { %9982 = vmatpush3.bf16.msra.mxu1 %v10452_v48  ;;  %10018 = vmatpush3.bf16.msra.mxu0 %v10453_v17  ;;  %v10475_v48 = vld [vmem:[%s13248_s7 + $0x508] sm:$0xff]  }
 0x6c4   : > { %9999 = vmatprep.subr.bf16.mxu1 %v10577_v1  ;;  %10035 = vmatprep.subr.bf16.mxu0 %v10577_v1 }
 0x6c6   : > { %v4357_v29 = vpop.f32.mrf.mxu1  ;;  %v4594_v55 = vpop.f32.mrf.mxu0  ;;  %9984 = vmatmul.mubr.msk.bf16.vlgmr.msra.gmra.mxu1 %vm3400_vm4, %v6182_v8  ;;  %10020 = vmatmul.mubr.msk.bf16.vlgmr.msra.gmra.mxu0 %vm3400_vm4, %v6419_v4  ;;  %v6892_v8 = vld [vmem:[#allocation4 + $0x28] sm:$0x1] }
 0x6c7   : > { %v4363_v54 = vadd.f32 %v4357_v29, %v4284_v45  ;;  %10000 = vmatpush3.bf16.msra.mxu1 %v10454_v3  ;;  %10036 = vmatpush3.bf16.msra.mxu0 %v10455_v62  ;;  %v10473_v45 = vld [vmem:[%s13248_s7 + $0x510] sm:$0xff]   ;;  %v10477_v3 = vld [vmem:[%s13248_s7 + $0x500] sm:$0xff]   ;;  %v10478_v4 = vld [vmem:[%s13248_s7 + $0x4f8] sm:$0xff]  }
 0x6c8   : > { %v9697_v34 = vpop.f32.mrf.mxu1  ;;  %v9733_v20 = vpop.f32.mrf.mxu0  ;;  %10001 = vmatprep.subr.bf16.mxu1 %v10577_v1  ;;  %10037 = vmatprep.subr.bf16.mxu0 %v10577_v1  ;;  %v6655_v62 = vld [vmem:[#allocation4 + $0x25] sm:$0x1]  ;;  %v10479_v29 = vld [vmem:[%s13248_s7 + $0x558] sm:$0xff]  }
 0x6c9   : > { %10007 = vmatprep.mubr.msk.bf16.mxu1 %vm10578_vm1, %v10577_v1  ;;  %10043 = vmatprep.mubr.msk.bf16.mxu0 %vm10578_vm1, %v10577_v1  ;;  %v4442_v27 = vadd.f32 %v4436_v11, %v4363_v54  ;;  %v6498_v11 = vpack.c.bf16 %v6497_v16, %v6497_v16  ;;  %v6893_v54 = vpack.c.bf16 %v6892_v8, %v6892_v8  ;;  %v10480_v20 = vld [vmem:[%s13248_s7 + $0x4f0] sm:$0xff]   ;;  %v10500_v8 = vld [vmem:[%s13248_s7 + $0x560] sm:$0xff]  }
 0x6ca   : > { %v4360_v47 = vpop.f32.mrf.mxu1  ;;  %v4597_v30 = vpop.f32.mrf.mxu0 }
 0x6cb   : > { %10002 = vmatpush3.bf16.msra.mxu1 %v10456_v10  ;;  %10038 = vmatpush3.bf16.msra.mxu0 %v10457_v46 }
 0x6cc   : > { %v9698_v28 = vpop.f32.mrf.mxu1  ;;  %v9734_v39 = vpop.f32.mrf.mxu0  ;;  %10003 = vmatprep.subr.bf16.mxu1 %v10577_v1  ;;  %10039 = vmatprep.subr.bf16.mxu0 %v10577_v1 }
 0x6cd   : > { %v10482_v39 = vld [vmem:[%s13248_s7 + $0x4e8] sm:$0xff]  }
 0x6cf   : > { %10004 = vmatpush3.bf16.msra.mxu1 %v10458_v50  ;;  %10040 = vmatpush3.bf16.msra.mxu0 %v10459_v49 }
 0x6d0   : > { %10005 = vmatprep.subr.bf16.mxu1 %v10577_v1  ;;  %10041 = vmatprep.subr.bf16.mxu0 %v10577_v1 }
 0x6d3   : > { %10006 = vmatpush3.bf16.msra.mxu1 %v10460_v13  ;;  %10042 = vmatpush3.bf16.msra.mxu0 %v10461_v9  ;;  %v10483_v13 = vld [vmem:[%s13248_s7 + $0x548] sm:$0xff]  }
 0x6d4   : > { %10023 = vmatprep.subr.bf16.mxu1 %v10577_v1  ;;  %10059 = vmatprep.subr.bf16.mxu0 %v10577_v1 }
 0x6d6   : > { %v4515_v14 = vpop.f32.mrf.mxu1  ;;  %v4752_v7 = vpop.f32.mrf.mxu0  ;;  %10008 = vmatmul.mubr.msk.bf16.vlgmr.msra.gmra.mxu1 %vm3400_vm4, %v6340_v44  ;;  %10044 = vmatmul.mubr.msk.bf16.vlgmr.msra.gmra.mxu0 %vm3400_vm4, %v6577_v22  ;;  %v7050_v44 = vld [vmem:[#allocation4 + $0x2a] sm:$0x1] }
 0x6d7   : > { %v4521_v63 = vadd.f32 %v4515_v14, %v4442_v27  ;;  %10024 = vmatpush3.bf16.msra.mxu1 %v10462_v37  ;;  %10060 = vmatpush3.bf16.msra.mxu0 %v10463_v52  ;;  %v10481_v27 = vld [vmem:[%s13248_s7 + $0x550] sm:$0xff]   ;;  %v10485_v37 = vld [vmem:[%s13248_s7 + $0x540] sm:$0xff]   ;;  %v10486_v22 = vld [vmem:[%s13248_s7 + $0x538] sm:$0xff]  }
 0x6d8   : > { %v9721_v36 = vpop.f32.mrf.mxu1  ;;  %v9757_v24 = vpop.f32.mrf.mxu0  ;;  %10025 = vmatprep.subr.bf16.mxu1 %v10577_v1  ;;  %10061 = vmatprep.subr.bf16.mxu0 %v10577_v1  ;;  %v6813_v52 = vld [vmem:[#allocation4 + $0x27] sm:$0x1]  ;;  %v10487_v14 = vld [vmem:[%s13248_s7 + $0x598] sm:$0xff]  }
 0x6d9   : > { %10031 = vmatprep.mubr.msk.bf16.mxu1 %vm10578_vm1, %v10577_v1  ;;  %10067 = vmatprep.mubr.msk.bf16.mxu0 %vm10578_vm1, %v10577_v1  ;;  %v4600_v31 = vadd.f32 %v4594_v55, %v4521_v63  ;;  %v6656_v55 = vpack.c.bf16 %v6655_v62, %v6655_v62  ;;  %v7051_v63 = vpack.c.bf16 %v7050_v44, %v7050_v44  ;;  %v10488_v24 = vld [vmem:[%s13248_s7 + $0x530] sm:$0xff]   ;;  %v10508_v44 = vld [vmem:[%s13248_s7 + $0x5a0] sm:$0xff]  }
 0x6da   : > { %v4518_v51 = vpop.f32.mrf.mxu1  ;;  %v4755_v18 = vpop.f32.mrf.mxu0 }
 0x6db   : > { %10026 = vmatpush3.bf16.msra.mxu1 %v10464_v61  ;;  %10062 = vmatpush3.bf16.msra.mxu0 %v10465_v23 }
 0x6dc   : > { %v9722_v21 = vpop.f32.mrf.mxu1  ;;  %v9758_v15 = vpop.f32.mrf.mxu0  ;;  %10027 = vmatprep.subr.bf16.mxu1 %v10577_v1  ;;  %10063 = vmatprep.subr.bf16.mxu0 %v10577_v1 }
 0x6dd   : > { %v10490_v15 = vld [vmem:[%s13248_s7 + $0x528] sm:$0xff]  }
 0x6df   : > { %10028 = vmatpush3.bf16.msra.mxu1 %v10466_v53  ;;  %10064 = vmatpush3.bf16.msra.mxu0 %v10467_v58 }
 0x6e0   : > { %10029 = vmatprep.subr.bf16.mxu1 %v10577_v1  ;;  %10065 = vmatprep.subr.bf16.mxu0 %v10577_v1 }
 0x6e3   : > { %10030 = vmatpush3.bf16.msra.mxu1 %v10468_v19  ;;  %10066 = vmatpush3.bf16.msra.mxu0 %v10469_v0  ;;  %v10491_v19 = vld [vmem:[%s13248_s7 + $0x588] sm:$0xff]  }
 0x6e4   : > { %10047 = vmatprep.subr.bf16.mxu1 %v10577_v1  ;;  %10083 = vmatprep.subr.bf16.mxu0 %v10577_v1 }
 0x6e6   : > { %v4673_v33 = vpop.f32.mrf.mxu1  ;;  %v4910_v25 = vpop.f32.mrf.mxu0  ;;  %10032 = vmatmul.mubr.msk.bf16.vlgmr.msra.gmra.mxu1 %vm3400_vm4, %v6498_v11  ;;  %10068 = vmatmul.mubr.msk.bf16.vlgmr.msra.gmra.mxu0 %vm3400_vm4, %v6735_v56  ;;  %v7208_v11 = vld [vmem:[#allocation4 + $0x2c] sm:$0x1] }
 0x6e7   : > { %v4679_v43 = vadd.f32 %v4673_v33, %v4600_v31  ;;  %10048 = vmatpush3.bf16.msra.mxu1 %v10470_v32  ;;  %10084 = vmatpush3.bf16.msra.mxu0 %v10471_v59  ;;  %v10489_v31 = vld [vmem:[%s13248_s7 + $0x590] sm:$0xff]   ;;  %v10493_v32 = vld [vmem:[%s13248_s7 + $0x580] sm:$0xff]   ;;  %v6971_v59 = vld [vmem:[#allocation4 + $0x29] sm:$0x1] }
 0x6e8   : > { %v9745_v60 = vpop.f32.mrf.mxu1  ;;  %v9781_v38 = vpop.f32.mrf.mxu0  ;;  %10049 = vmatprep.subr.bf16.mxu1 %v10577_v1  ;;  %10085 = vmatprep.subr.bf16.mxu0 %v10577_v1  ;;  %v10494_v56 = vld [vmem:[%s13248_s7 + $0x578] sm:$0xff]  }
 0x6e9   : > { %10055 = vmatprep.mubr.msk.bf16.mxu1 %vm10578_vm1, %v10577_v1  ;;  %10091 = vmatprep.mubr.msk.bf16.mxu0 %vm10578_vm1, %v10577_v1  ;;  %v4758_v26 = vadd.f32 %v4752_v7, %v4679_v43  ;;  %v6814_v7 = vpack.c.bf16 %v6813_v52, %v6813_v52  ;;  %v10495_v33 = vld [vmem:[%s13248_s7 + $0x5d8] sm:$0xff]   ;;  %v7209_v43 = vpack.c.bf16 %v7208_v11, %v7208_v11  ;;  %v10496_v38 = vld [vmem:[%s13248_s7 + $0x570] sm:$0xff]  }
 0x6ea   : > { %v4676_v40 = vpop.f32.mrf.mxu1  ;;  %v4913_v42 = vpop.f32.mrf.mxu0 }
 0x6eb   : > { %10050 = vmatpush3.bf16.msra.mxu1 %v10472_v6  ;;  %10086 = vmatpush3.bf16.msra.mxu0 %v10473_v45 }
 0x6ec   : > { %v9746_v17 = vpop.f32.mrf.mxu1  ;;  %v9782_v35 = vpop.f32.mrf.mxu0  ;;  %10051 = vmatprep.subr.bf16.mxu1 %v10577_v1  ;;  %10087 = vmatprep.subr.bf16.mxu0 %v10577_v1 }
 0x6ed   : > { %v10498_v35 = vld [vmem:[%s13248_s7 + $0x568] sm:$0xff]  }
 0x6ef   : > { %10052 = vmatpush3.bf16.msra.mxu1 %v10474_v41  ;;  %10088 = vmatpush3.bf16.msra.mxu0 %v10475_v48 }
 0x6f0   : > { %10053 = vmatprep.subr.bf16.mxu1 %v10577_v1  ;;  %10089 = vmatprep.subr.bf16.mxu0 %v10577_v1 }
 0x6f3   : > { %10054 = vmatpush3.bf16.msra.mxu1 %v10476_v57  ;;  %10090 = vmatpush3.bf16.msra.mxu0 %v10477_v3  ;;  %v10499_v57 = vld [vmem:[%s13248_s7 + $0x5c8] sm:$0xff]  }
 0x6f4   : > { %10071 = vmatprep.subr.bf16.mxu1 %v10577_v1  ;;  %10107 = vmatprep.subr.bf16.mxu0 %v10577_v1 }
 0x6f6   : > { %v4831_v10 = vpop.f32.mrf.mxu1  ;;  %10056 = vmatmul.mubr.msk.bf16.vlgmr.msra.gmra.mxu1 %vm3400_vm4, %v6656_v55  ;;  %10092 = vmatmul.mubr.msk.bf16.vlgmr.msra.gmra.mxu0 %vm3400_vm4, %v6893_v54  ;;  %v5068_v46 = vpop.f32.mrf.mxu0  ;;  %v7366_v55 = vld [vmem:[#allocation4 + $0x2e] sm:$0x1] }
 0x6f7   : > { %v4837_v34 = vadd.f32 %v4831_v10, %v4758_v26  ;;  %10072 = vmatpush3.bf16.msra.mxu1 %v10478_v4  ;;  %10108 = vmatpush3.bf16.msra.mxu0 %v10479_v29  ;;  %v10497_v26 = vld [vmem:[%s13248_s7 + $0x5d0] sm:$0xff]   ;;  %v10501_v4 = vld [vmem:[%s13248_s7 + $0x5c0] sm:$0xff]   ;;  %v7129_v29 = vld [vmem:[#allocation4 + $0x2b] sm:$0x1] }
 0x6f8   : > { %v9769_v47 = vpop.f32.mrf.mxu1  ;;  %10073 = vmatprep.subr.bf16.mxu1 %v10577_v1  ;;  %10109 = vmatprep.subr.bf16.mxu0 %v10577_v1  ;;  %v9805_v30 = vpop.f32.mrf.mxu0  ;;  %v10502_v54 = vld [vmem:[%s13248_s7 + $0x5b8] sm:$0xff]  }
 0x6f9   : > { %10079 = vmatprep.mubr.msk.bf16.mxu1 %vm10578_vm1, %v10577_v1  ;;  %10115 = vmatprep.mubr.msk.bf16.mxu0 %vm10578_vm1, %v10577_v1  ;;  %v4916_v50 = vadd.f32 %v4910_v25, %v4837_v34  ;;  %v6972_v25 = vpack.c.bf16 %v6971_v59, %v6971_v59  ;;  %v10503_v10 = vld [vmem:[%s13248_s7 + $0x618] sm:$0xff]   ;;  %v7367_v34 = vpack.c.bf16 %v7366_v55, %v7366_v55  ;;  %v10504_v30 = vld [vmem:[%s13248_s7 + $0x5b0] sm:$0xff]  }
 0x6fa   : > { %v4834_v49 = vpop.f32.mrf.mxu1  ;;  %v5071_v28 = vpop.f32.mrf.mxu0 }
 0x6fb   : > { %10074 = vmatpush3.bf16.msra.mxu1 %v10480_v20  ;;  %10110 = vmatpush3.bf16.msra.mxu0 %v10481_v27 }
 0x6fc   : > { %v9770_v9 = vpop.f32.mrf.mxu1  ;;  %10075 = vmatprep.subr.bf16.mxu1 %v10577_v1  ;;  %10111 = vmatprep.subr.bf16.mxu0 %v10577_v1  ;;  %v9806_v2 = vpop.f32.mrf.mxu0 }
 0x6fd   : > { %v10506_v2 = vld [vmem:[%s13248_s7 + $0x5a8] sm:$0xff]  }
 0x6ff   : > { %10076 = vmatpush3.bf16.msra.mxu1 %v10482_v39  ;;  %10112 = vmatpush3.bf16.msra.mxu0 %v10483_v13 }
 0x700   : > { %10077 = vmatprep.subr.bf16.mxu1 %v10577_v1  ;;  %10113 = vmatprep.subr.bf16.mxu0 %v10577_v1 }
 0x703   : > { %10078 = vmatpush3.bf16.msra.mxu1 %v10484_v12  ;;  %10114 = vmatpush3.bf16.msra.mxu0 %v10485_v37  ;;  %v10507_v12 = vld [vmem:[%s13248_s7 + $0x608] sm:$0xff]  }
 0x704   : > { %10095 = vmatprep.subr.bf16.mxu1 %v10577_v1  ;;  %10131 = vmatprep.subr.bf16.mxu0 %v10577_v1 }
 0x706   : > { %v4989_v61 = vpop.f32.mrf.mxu1  ;;  %10080 = vmatmul.mubr.msk.bf16.vlgmr.msra.gmra.mxu1 %vm3400_vm4, %v6814_v7  ;;  %10116 = vmatmul.mubr.msk.bf16.vlgmr.msra.gmra.mxu0 %vm3400_vm4, %v7051_v63  ;;  %v5226_v23 = vpop.f32.mrf.mxu0  ;;  %v7524_v7 = vld [vmem:[#allocation4 + $0x30] sm:$0x1]  ;;  %v10510_v63 = vld [vmem:[%s13248_s7 + $0x5f8] sm:$0xff]  }
 0x707   : > { %v4995_v36 = vadd.f32 %v4989_v61, %v4916_v50  ;;  %10096 = vmatpush3.bf16.msra.mxu1 %v10486_v22  ;;  %10132 = vmatpush3.bf16.msra.mxu0 %v10487_v14  ;;  %v10505_v50 = vld [vmem:[%s13248_s7 + $0x610] sm:$0xff]   ;;  %v10509_v22 = vld [vmem:[%s13248_s7 + $0x600] sm:$0xff]   ;;  %v7287_v14 = vld [vmem:[#allocation4 + $0x2d] sm:$0x1] }
 0x708   : > { %v9793_v51 = vpop.f32.mrf.mxu1  ;;  %10097 = vmatprep.subr.bf16.mxu1 %v10577_v1  ;;  %10133 = vmatprep.subr.bf16.mxu0 %v10577_v1  ;;  %v9829_v18 = vpop.f32.mrf.mxu0  ;;  %v7288_v61 = vpack.c.bf16 %v7287_v14, %v7287_v14  ;;  %v7616_v14 = vld [vmem:[%s13250_s9 + $0x50] sm:$0xff] }
 0x709   : > { %v5074_v53 = vadd.f32 %v5068_v46, %v4995_v36  ;;  %10103 = vmatprep.mubr.msk.bf16.mxu1 %vm10578_vm1, %v10577_v1  ;;  %10139 = vmatprep.mubr.msk.bf16.mxu0 %vm10578_vm1, %v10577_v1  ;;  %v7130_v46 = vpack.c.bf16 %v7129_v29, %v7129_v29  ;;  %v10511_v51 = vld [vmem:[%s13248_s7 + $0x5f0] sm:$0xff]  }
 0x70a   : > { %v4992_v58 = vpop.f32.mrf.mxu1  ;;  %v5229_v21 = vpop.f32.mrf.mxu0 }
 0x70b   : > { %10098 = vmatpush3.bf16.msra.mxu1 %v10488_v24  ;;  %10134 = vmatpush3.bf16.msra.mxu0 %v10489_v31 }
 0x70c   : > { %v9794_v0 = vpop.f32.mrf.mxu1  ;;  %10099 = vmatprep.subr.bf16.mxu1 %v10577_v1  ;;  %10135 = vmatprep.subr.bf16.mxu0 %v10577_v1  ;;  %v9830_v16 = vpop.f32.mrf.mxu0 }
 0x70f   : > { %10100 = vmatpush3.bf16.msra.mxu1 %v10490_v15  ;;  %10136 = vmatpush3.bf16.msra.mxu0 %v10491_v19  ;;  %v10512_v19 = vld [vmem:[%s13248_s7 + $0x5e8] sm:$0xff]  }
 0x710   : > { %10101 = vmatprep.subr.bf16.mxu1 %v10577_v1  ;;  %10137 = vmatprep.subr.bf16.mxu0 %v10577_v1 }
 0x713   : > { %10102 = vmatpush3.bf16.msra.mxu1 %v10492_v5  ;;  %10138 = vmatpush3.bf16.msra.mxu0 %v10493_v32  ;;  %v10513_v5 = vld [vmem:[%s13248_s7 + $0x5e0] sm:$0xff]   ;;  %v7445_v32 = vld [vmem:[#allocation4 + $0x2f] sm:$0x1] }
 0x714   : > { %10119 = vmatprep.subr.bf16.mxu1 %v10577_v1  ;;  %10155 = vmatprep.subr.bf16.mxu0 %v10577_v1  ;;  %v7446_v59 = vpack.c.bf16 %v7445_v32, %v7445_v32  ;;  %v7608_v32 = vld [vmem:[%s13250_s9 + $0x10] sm:$0xff] }
 0x716   : > { %v5147_v6 = vpop.f32.mrf.mxu1  ;;  %10104 = vmatmul.mubr.msk.bf16.vlgmr.msra.gmra.mxu1 %vm3400_vm4, %v6972_v25  ;;  %10140 = vmatmul.mubr.msk.bf16.vlgmr.msra.gmra.mxu0 %vm3400_vm4, %v7209_v43  ;;  %v5384_v45 = vpop.f32.mrf.mxu0 }
 0x717   : > { %v5153_v60 = vadd.f32 %v5147_v6, %v5074_v53  ;;  %10120 = vmatpush3.bf16.msra.mxu1 %v10494_v56  ;;  %10156 = vmatpush3.bf16.msra.mxu0 %v10495_v33 }
 0x718   : > { %10121 = vmatprep.subr.bf16.mxu1 %v10577_v1  ;;  %10157 = vmatprep.subr.bf16.mxu0 %v10577_v1  ;;  %v9817_v40 = vpop.f32.mrf.mxu1  ;;  %v9853_v42 = vpop.f32.mrf.mxu0 }
 0x719   : > { %v5232_v41 = vadd.f32 %v5226_v23, %v5153_v60  ;;  %10127 = vmatprep.mubr.msk.bf16.mxu1 %vm10578_vm1, %v10577_v1  ;;  %10163 = vmatprep.mubr.msk.bf16.mxu0 %vm10578_vm1, %v10577_v1  ;;  %v7525_v23 = vpack.c.bf16 %v7524_v7, %v7524_v7 }
 0x71a   : > { %v5150_v48 = vpop.f32.mrf.mxu1  ;;  %v5387_v17 = vpop.f32.mrf.mxu0 }
 0x71b   : > { %10122 = vmatpush3.bf16.msra.mxu1 %v10496_v38  ;;  %10158 = vmatpush3.bf16.msra.mxu0 %v10497_v26 }
 0x71c   : > { %10123 = vmatprep.subr.bf16.mxu1 %v10577_v1  ;;  %10159 = vmatprep.subr.bf16.mxu0 %v10577_v1  ;;  %v9818_v3 = vpop.f32.mrf.mxu1  ;;  %v9854_v62 = vpop.f32.mrf.mxu0 }
 0x71f   : > { %10124 = vmatpush3.bf16.msra.mxu1 %v10498_v35  ;;  %10160 = vmatpush3.bf16.msra.mxu0 %v10499_v57 }
 0x720   : > { %10125 = vmatprep.subr.bf16.mxu1 %v10577_v1  ;;  %10161 = vmatprep.subr.bf16.mxu0 %v10577_v1 }
 0x723   : > { %10126 = vmatpush3.bf16.msra.mxu1 %v10500_v8  ;;  %10162 = vmatpush3.bf16.msra.mxu0 %v10501_v4 }
 0x724   : > { %10143 = vmatprep.subr.bf16.mxu1 %v10577_v1  ;;  %10179 = vmatprep.subr.bf16.mxu0 %v10577_v1 }
 0x726   : > { %v5305_v20 = vpop.f32.mrf.mxu1  ;;  %10128 = vmatmul.mubr.msk.bf16.vlgmr.msra.gmra.mxu1 %vm3400_vm4, %v7130_v46  ;;  %10164 = vmatmul.mubr.msk.bf16.vlgmr.msra.gmra.mxu0 %vm3400_vm4, %v7367_v34  ;;  %v5542_v27 = vpop.f32.mrf.mxu0 }
 0x727   : > { %v5311_v47 = vadd.f32 %v5305_v20, %v5232_v41  ;;  %10144 = vmatpush3.bf16.msra.mxu1 %v10502_v54  ;;  %10180 = vmatpush3.bf16.msra.mxu0 %v10503_v10 }
 0x728   : > { %10145 = vmatprep.subr.bf16.mxu1 %v10577_v1  ;;  %10181 = vmatprep.subr.bf16.mxu0 %v10577_v1  ;;  %v9841_v49 = vpop.f32.mrf.mxu1  ;;  %v9877_v28 = vpop.f32.mrf.mxu0 }
 0x729   : > { %v5390_v39 = vadd.f32 %v5384_v45, %v5311_v47  ;;  %10151 = vmatprep.mubr.msk.bf16.mxu1 %vm10578_vm1, %v10577_v1  ;;  %10187 = vmatprep.mubr.msk.bf16.mxu0 %vm10578_vm1, %v10577_v1  ;;  %v7619_v49 = vld [vmem:[%s13250_s9 + $0x68] sm:$0xff] }
 0x72a   : > { %v5308_v13 = vpop.f32.mrf.mxu1  ;;  %v5545_v9 = vpop.f32.mrf.mxu0 }
 0x72b   : > { %10146 = vmatpush3.bf16.msra.mxu1 %v10504_v30  ;;  %10182 = vmatpush3.bf16.msra.mxu0 %v10505_v50  ;;  %v7621_v30 = vld [vmem:[%s13250_s9 + $0x78] sm:$0xff]  ;;  %v7620_v50 = vld [vmem:[%s13250_s9 + $0x70] sm:$0xff]  ;;  %v7618_v9 = vld [vmem:[%s13250_s9 + $0x60] sm:$0xff] }
 0x72c   : > { %10147 = vmatprep.subr.bf16.mxu1 %v10577_v1  ;;  %10183 = vmatprep.subr.bf16.mxu0 %v10577_v1  ;;  %v9842_v37 = vpop.f32.mrf.mxu1  ;;  %v9878_v52 = vpop.f32.mrf.mxu0 }
 0x72d   : > { %v7617_v37 = vld [vmem:[%s13250_s9 + $0x58] sm:$0xff] }
 0x72f   : > { %10148 = vmatpush3.bf16.msra.mxu1 %v10506_v2  ;;  %10184 = vmatpush3.bf16.msra.mxu0 %v10507_v12 }
 0x730   : > { %10149 = vmatprep.subr.bf16.mxu1 %v10577_v1  ;;  %10185 = vmatprep.subr.bf16.mxu0 %v10577_v1 }
 0x733   : > { %10150 = vmatpush3.bf16.msra.mxu1 %v10508_v44  ;;  %10186 = vmatpush3.bf16.msra.mxu0 %v10509_v22 }
 0x734   : > { %10167 = vmatprep.subr.bf16.mxu1 %v10577_v1 }
 0x736   : > { %v5463_v36 = vpop.f32.mrf.mxu1  ;;  %10152 = vmatmul.mubr.msk.bf16.vlgmr.msra.gmra.mxu1 %vm3400_vm4, %v7288_v61  ;;  %10188 = vmatmul.mubr.msk.bf16.vlgmr.msra.gmra.mxu0 %vm3400_vm4, %v7525_v23  ;;  %v5700_v24 = vpop.f32.mrf.mxu0  ;;  %v7615_v61 = vld [vmem:[%s13250_s9 + $0x48] sm:$0xff]  ;;  %v7614_v23 = vld [vmem:[%s13250_s9 + $0x40] sm:$0xff] }
 0x737   : > { %v5469_v31 = vadd.f32 %v5463_v36, %v5390_v39  ;;  %10168 = vmatpush3.bf16.msra.mxu1 %v10510_v63  ;;  %10175 = vmatprep.mubr.msk.bf16.mxu1 %vm10578_vm1, %v10577_v1  ;;  %v7613_v36 = vld [vmem:[%s13250_s9 + $0x38] sm:$0xff] }
 0x738   : > { %v9865_v18 = vpop.f32.mrf.mxu1  ;;  %v9901_v53 = vpop.f32.mrf.mxu0  ;;  %10169 = vmatprep.subr.bf16.mxu1 %v10577_v1 }
 0x739   : > { %v5548_v58 = vadd.f32 %v5542_v27, %v5469_v31  ;;  %v7611_v31 = vld [vmem:[%s13250_s9 + $0x28] sm:$0xff] }
 0x73a   : > { %v5466_v21 = vpop.f32.mrf.mxu1  ;;  %v5703_v15 = vpop.f32.mrf.mxu0 }
 0x73b   : > { %10170 = vmatpush3.bf16.msra.mxu1 %v10511_v51 }
 0x73c   : > { %v9866_v0 = vpop.f32.mrf.mxu1  ;;  %v9902_v16 = vpop.f32.mrf.mxu0  ;;  %10171 = vmatprep.subr.bf16.mxu1 %v10577_v1 }
 0x73d   : > { %v7609_v0 = vld [vmem:[%s13250_s9 + $0x18] sm:$0xff] }
 0x73f   : > { %10172 = vmatpush3.bf16.msra.mxu1 %v10512_v19 }
 0x740   : > { %10173 = vmatprep.subr.bf16.mxu1 %v10577_v1 }
 0x743   : > { %10174 = vmatpush3.bf16.msra.mxu1 %v10513_v5 }
 0x744   : > { %10191 = vmatprep.subr.mxu1 %v10577_v1 }
 0x746   : > { %v5621_v11 = vpop.f32.mrf.mxu1  ;;  %v5858_v56 = vpop.f32.mrf.mxu0  ;;  %10176 = vmatmul.mubr.msk.bf16.vlgmr.msra.gmra.mxu1 %vm3400_vm4, %v7446_v59 }
 0x747   : > { %v5627_v33 = vadd.f32 %v5621_v11, %v5548_v58  ;;  %10223 = vmatprep.mubr.msk.f32.mxu1 %vm10578_vm1, %v10577_v1  ;;  %10192 = vmatpush3.msra.mxu1 %v7621_v30  ;;  %v7610_v58 = vld [vmem:[%s13250_s9 + $0x20] sm:$0xff] }
 0x748   : > { %v9889_v25 = vpop.f32.mrf.mxu1  ;;  %v9925_v43 = vpop.f32.mrf.mxu0  ;;  %10193 = vmatprep.subr.mxu1 %v10577_v1 }
 0x749   : > { %v5706_v6 = vadd.f32 %v5700_v24, %v5627_v33  ;;  %10194 = vmatpush3.msra.mxu1 %v7620_v50  ;;  %v7612_v24 = vld [vmem:[%s13250_s9 + $0x30] sm:$0xff]  ;;  %v7606_v33 = vld [vmem:[%s13250_s9] sm:$0xff] }
 0x74a   : > { %v5624_v45 = vpop.f32.mrf.mxu1  ;;  %v5861_v60 = vpop.f32.mrf.mxu0  ;;  %10195 = vmatprep.subr.mxu1 %v10577_v1 }
 0x74b   : > { %10196 = vmatpush3.msra.mxu1 %v7619_v49 }
 0x74c   : > { %v9890_v38 = vpop.f32.mrf.mxu1  ;;  %v9926_v26 = vpop.f32.mrf.mxu0  ;;  %10197 = vmatprep.subr.mxu1 %v10577_v1 }
 0x74d   : > { %10198 = vmatpush3.msra.mxu1 %v7618_v9 }
 0x74e   : > { %10199 = vmatprep.subr.mxu1 %v10577_v1 }
 0x74f   : > { %10200 = vmatpush3.msra.mxu1 %v7617_v37 }
 0x750   : > { %10201 = vmatprep.subr.mxu1 %v10577_v1 }
 0x751   : > { %10202 = vmatpush3.msra.mxu1 %v7616_v14 }
 0x752   : > { %10203 = vmatprep.subr.mxu1 %v10577_v1 }
 0x753   : > { %10204 = vmatpush3.msra.mxu1 %v7615_v61 }
 0x754   : > { %10205 = vmatprep.subr.mxu1 %v10577_v1 }
 0x755   : > { %10206 = vmatpush3.msra.mxu1 %v7614_v23 }
 0x756   : > { %v5779_v40 = vpop.f32.mrf.mxu1  ;;  %v6016_v42 = vpop.f32.mrf.mxu0  ;;  %10207 = vmatprep.subr.mxu1 %v10577_v1 }
 0x757   : > { %v5785_v41 = vadd.f32 %v5779_v40, %v5706_v6  ;;  %10208 = vmatpush3.msra.mxu1 %v7613_v36 }
 0x758   : > { %v9913_v48 = vpop.f32.mrf.mxu1  ;;  %v9949_v17 = vpop.f32.mrf.mxu0  ;;  %10209 = vmatprep.subr.mxu1 %v10577_v1 }
 0x759   : > { %v5864_v35 = vadd.f32 %v5858_v56, %v5785_v41  ;;  %10210 = vmatpush3.msra.mxu1 %v7612_v24  ;;  %v7607_v56 = vld [vmem:[%s13250_s9 + $0x8] sm:$0xff] }
 0x75a   : > { %v5782_v57 = vpop.f32.mrf.mxu1  ;;  %v6019_v3 = vpop.f32.mrf.mxu0  ;;  %10211 = vmatprep.subr.mxu1 %v10577_v1 }
 0x75b   : > { %10212 = vmatpush3.msra.mxu1 %v7611_v31 }
 0x75c   : > { %v9914_v62 = vpop.f32.mrf.mxu1  ;;  %v9950_v8 = vpop.f32.mrf.mxu0  ;;  %10213 = vmatprep.subr.mxu1 %v10577_v1 }
 0x75d   : > { %10214 = vmatpush3.msra.mxu1 %v7610_v58 }
 0x75e   : > { %10215 = vmatprep.subr.mxu1 %v10577_v1 }
 0x75f   : > { %10216 = vmatpush3.msra.mxu1 %v7609_v0 }
 0x760   : > { %10217 = vmatprep.subr.mxu1 %v10577_v1 }
 0x761   : > { %10218 = vmatpush3.msra.mxu1 %v7608_v32 }
 0x762   : > { %10219 = vmatprep.subr.mxu1 %v10577_v1 }
 0x763   : > { %10220 = vmatpush3.msra.mxu1 %v7607_v56 }
 0x764   : > { %10221 = vmatprep.subr.mxu1 %v10577_v1 }
 0x765   : > { %10222 = vmatpush3.msra.mxu1 %v7606_v33 }
 0x766   : > { %v5937_v4 = vpop.f32.mrf.mxu1  ;;  %v6174_v29 = vpop.f32.mrf.mxu0 }
 0x767   : > { %v5943_v55 = vadd.f32 %v5937_v4, %v5864_v35 }
 0x768   : > { %v9937_v54 = vpop.f32.mrf.mxu1  ;;  %v9973_v10 = vpop.f32.mrf.mxu0 }
 0x769   : > { %v6022_v46 = vadd.f32 %v6016_v42, %v5943_v55 }
 0x76a   : > { %v5940_v34 = vpop.f32.mrf.mxu1  ;;  %v6177_v20 = vpop.f32.mrf.mxu0 }
 0x76c   : > { %v9938_v27 = vpop.f32.mrf.mxu1  ;;  %v9974_v47 = vpop.f32.mrf.mxu0 }
 0x776   : > { %v6095_v28 = vpop.f32.mrf.mxu1  ;;  %v6332_v39 = vpop.f32.mrf.mxu0 }
 0x777   : > { %v6101_v13 = vadd.f32 %v6095_v28, %v6022_v46 }
 0x778   : > { %v9961_v2 = vpop.f32.mrf.mxu1  ;;  %v9997_v12 = vpop.f32.mrf.mxu0 }
 0x779   : > { %v6180_v52 = vadd.f32 %v6174_v29, %v6101_v13 }
 0x77a   : > { %v6098_v44 = vpop.f32.mrf.mxu1  ;;  %v6335_v22 = vpop.f32.mrf.mxu0 }
 0x77c   : > { %v9962_v7 = vpop.f32.mrf.mxu1  ;;  %v9998_v63 = vpop.f32.mrf.mxu0 }
 0x786   : > { %v6253_v51 = vpop.f32.mrf.mxu1  ;;  %v6490_v18 = vpop.f32.mrf.mxu0 }
 0x787   : > { %v6259_v53 = vadd.f32 %v6253_v51, %v6180_v52 }
 0x788   : > { %v9985_v21 = vpop.f32.mrf.mxu1  ;;  %v10021_v15 = vpop.f32.mrf.mxu0 }
 0x789   : > { %v6338_v19 = vadd.f32 %v6332_v39, %v6259_v53 }
 0x78a   : > { %v6256_v16 = vpop.f32.mrf.mxu1  ;;  %v6493_v5 = vpop.f32.mrf.mxu0 }
 0x78c   : > { %v9986_v59 = vpop.f32.mrf.mxu1  ;;  %v10022_v11 = vpop.f32.mrf.mxu0 }
 0x796   : > { %v6411_v25 = vpop.f32.mrf.mxu1  ;;  %v6648_v43 = vpop.f32.mrf.mxu0 }
 0x797   : > { %v6417_v6 = vadd.f32 %v6411_v25, %v6338_v19 }
 0x798   : > { %v10009_v45 = vpop.f32.mrf.mxu1  ;;  %v10045_v60 = vpop.f32.mrf.mxu0 }
 0x799   : > { %v6496_v38 = vadd.f32 %v6490_v18, %v6417_v6 }
 0x79a   : > { %v6414_v26 = vpop.f32.mrf.mxu1  ;;  %v6651_v40 = vpop.f32.mrf.mxu0 }
 0x79c   : > { %v10010_v42 = vpop.f32.mrf.mxu1  ;;  %v10046_v41 = vpop.f32.mrf.mxu0 }
 0x79d   : > { %v7603_v42 = vld [vmem:[%s13249_s8] sm:$0x1] }
 0x7a6   : > { %v6569_v48 = vpop.f32.mrf.mxu1  ;;  %v6806_v17 = vpop.f32.mrf.mxu0 }
 0x7a7   : > { %v6575_v35 = vadd.f32 %v6569_v48, %v6496_v38 }
 0x7a8   : > { %v10033_v57 = vpop.f32.mrf.mxu1  ;;  %v10069_v3 = vpop.f32.mrf.mxu0 }
 0x7a9   : > { %v6654_v62 = vadd.f32 %v6648_v43, %v6575_v35 }
 0x7aa   : > { %v6572_v8 = vpop.f32.mrf.mxu1  ;;  %v6809_v4 = vpop.f32.mrf.mxu0 }
 0x7ac   : > { %v10034_v1 = vpop.f32.mrf.mxu1  ;;  %v10070_v29 = vpop.f32.mrf.mxu0 }
 0x7b6   : > { %v6727_v55 = vpop.f32.mrf.mxu1  ;;  %v6964_v54 = vpop.f32.mrf.mxu0 }
 0x7b7   : > { %v6733_v10 = vadd.f32 %v6727_v55, %v6654_v62  ;;  %v7622_v62 = vld [vmem:[%s13251_s10] sm:$0x1] }
 0x7b8   : > { %v10057_v46 = vpop.f32.mrf.mxu1  ;;  %v10093_v34 = vpop.f32.mrf.mxu0 }
 0x7b9   : > { %v6812_v20 = vadd.f32 %v6806_v17, %v6733_v10 }
 0x7ba   : > { %v6730_v27 = vpop.f32.mrf.mxu1  ;;  %v6967_v47 = vpop.f32.mrf.mxu0 }
 0x7bc   : > { %v10058_v30 = vpop.f32.mrf.mxu1  ;;  %v10094_v50 = vpop.f32.mrf.mxu0 }
 0x7c6   : > { %v6885_v49 = vpop.f32.mrf.mxu1  ;;  %v7122_v28 = vpop.f32.mrf.mxu0 }
 0x7c7   : > { %v6891_v39 = vadd.f32 %v6885_v49, %v6812_v20 }
 0x7c8   : > { %v10081_v13 = vpop.f32.mrf.mxu1  ;;  %v10117_v9 = vpop.f32.mrf.mxu0 }
 0x7c9   : > { %v6970_v2 = vadd.f32 %v6964_v54, %v6891_v39 }
 0x7ca   : > { %v6888_v12 = vpop.f32.mrf.mxu1  ;;  %v7125_v37 = vpop.f32.mrf.mxu0 }
 0x7cc   : > { %v10082_v52 = vpop.f32.mrf.mxu1  ;;  %v10118_v44 = vpop.f32.mrf.mxu0 }
 0x7d6   : > { %v7043_v22 = vpop.f32.mrf.mxu1  ;;  %v7280_v14 = vpop.f32.mrf.mxu0 }
 0x7d7   : > { %v7049_v0 = vadd.f32 %v7043_v22, %v6970_v2 }
 0x7d8   : > { %v10105_v7 = vpop.f32.mrf.mxu1  ;;  %v10141_v63 = vpop.f32.mrf.mxu0 }
 0x7d9   : > { %v7128_v11 = vadd.f32 %v7122_v28, %v7049_v0 }
 0x7da   : > { %v7046_v61 = vpop.f32.mrf.mxu1  ;;  %v7283_v23 = vpop.f32.mrf.mxu0 }
 0x7dc   : > { %v10106_v36 = vpop.f32.mrf.mxu1  ;;  %v10142_v24 = vpop.f32.mrf.mxu0 }
 0x7e6   : > { %v7201_v31 = vpop.f32.mrf.mxu1  ;;  %v7438_v51 = vpop.f32.mrf.mxu0 }
 0x7e7   : > { %v7207_v25 = vadd.f32 %v7201_v31, %v7128_v11 }
 0x7e8   : > { %v10129_v18 = vpop.f32.mrf.mxu1  ;;  %v10165_v53 = vpop.f32.mrf.mxu0 }
 0x7e9   : > { %v7286_v45 = vadd.f32 %v7280_v14, %v7207_v25 }
 0x7ea   : > { %v7204_v58 = vpop.f32.mrf.mxu1  ;;  %v7441_v21 = vpop.f32.mrf.mxu0 }
 0x7ec   : > { %v10130_v15 = vpop.f32.mrf.mxu1  ;;  %v10166_v19 = vpop.f32.mrf.mxu0 }
 0x7f6   : > { %v7359_v16 = vpop.f32.mrf.mxu1  ;;  %v7596_v5 = vpop.f32.mrf.mxu0 }
 0x7f7   : > { %v7365_v60 = vadd.f32 %v7359_v16, %v7286_v45 }
 0x7f8   : > { %v10153_v32 = vpop.f32.mrf.mxu1  ;;  %v10189_v59 = vpop.f32.mrf.mxu0 }
 0x7f9   : > { %v7444_v38 = vadd.f32 %v7438_v51, %v7365_v60 }
 0x7fa   : > { %v7362_v56 = vpop.f32.mrf.mxu1  ;;  %v7599_v33 = vpop.f32.mrf.mxu0 }
 0x7fc   : > { %v10154_v43 = vpop.f32.mrf.mxu1  ;;  %v10190_v6 = vpop.f32.mrf.mxu0 }
 0x806   : > { %v7517_v26 = vpop.f32.mrf.mxu1 }
 0x807   : > { %v7523_v40 = vadd.f32 %v7517_v26, %v7444_v38 }
 0x808   : > { %v10177_v41 = vpop.f32.mrf.mxu1 }
 0x809   : > { %v7602_v48 = vadd.f32 %v7596_v5, %v7523_v40 }
 0x80a   : > { %v7520_v17 = vpop.f32.mrf.mxu1 }
 0x80b   : > { %v7604_v35 = vadd.f32 %v7603_v42, %v7602_v48 }
 0x80c   : > { %v10178_v57 = vpop.f32.mrf.mxu1 }
 0x80d   : > { %v7605_v3 = vmax.f32 %v7604_v35, 0.0 }
 0x80f   : > { %10224 = vmatmul.mubr.f32.vlgmr.msra.gmra.mxu1 %v7605_v3 }
 0x8cf   : > { %v7689_v8 = vpop.f32.mrf.mxu1 }
 0x8d0   : > { %v7690_v4 = vadd.f32 %v7689_v8, %v7622_v62 }
 0x8d1   : > { %v10225_v1 = vpop.f32.mrf.mxu1 }
 0x8d2   : > { %v7693_v29 = vmax.f32 %v7690_v4, 0.0 }
 0x8d4   : > { %7695 = vst.msk [vmem:[%s378_s30] sm:$0x1] %vm7694_vm9, %v7693_v29 }
 0x8d5   : > { %10528 = shalt.err (!%p10525_p3)
}
 0x8d6   : > { %s10529_s1 = scalar_lea.hbm %s7707_s12, 16  ;;  %s10533_s30 = scalar_lea.hbm %s13252_s11, 32 }
 0x8d7   : > { %p10530_p4 = scmp.ne.s32.totalorder %s7707_s12, %s10529_s1  ;;  %p10534_p9 = scmp.lt.s32.totalorder %s7707_s12, %s13252_s11 }
 0x8d8   : > { %p10535_p10 = scmp.lt.s32.totalorder %s10533_s30, %s10529_s1 }
 0x8d9   : > { %p10531_p7 = pnand %p10530_p4, %p10681_p5 }
 0x8da   : > { %p10536_p11 = por %p10535_p10, %p10534_p9 }
 0x8db   : > { %p10532_p8 = pneg %p10531_p7 }
 0x8dd   : > { %p10537_p12 = pnand %p10536_p11, %p10532_p8 }
 0x8df   : > { %10540 = shalt.err (!%p10537_p12)
}
 0x8e0   : > { %10231 = dma.vmem_to_hbm [thread:$0]  (%p10681_p5), %s7710_s13, 16, %s7707_s12, %s7697_s16  }
 0x8e1 PF: > { %p10237_p13 = scmp.ge.s32.totalorder %s10575_s20, 2  ;;  %s7721_s0 = sand.u32 1, %s10563_s17  }
 0x8e2   : > { %s7722_s24 = scalar_lea.sflag [#allocation6], %s7721_s0 }
 0x8e3   : > { %p10234_p0 = pnand %p10237_p13, %p10685_p6 }
 0x8e5   : > { %p10235_p1 = pneg %p10234_p0 }
 0x8e7   : > { %10558 = dma.done.wait (%p10235_p1), %s7722_s24, 16  }
 0x8e8   : > { %10560 = vsyncadd (%p10235_p1), %s7722_s24, 4294967280  ;;  %p21_p2 = scmp.ge.s32.totalorder %s10668_s23, 4   ;;  %s13259_s17 = smov %s10567_s18 }
 0x8e9   : > { %s13260_s18 = smov %s10571_s19  ;;  %s13261_s19 = smov %s10679_s26 }
 0x8ea   : > { %s13262_s20 = smov %s10668_s23  ;;  %23 = sbr.rel (!%p21_p2) target bundleno = 6 (0x6), region = 158 }
 0x8ef   :  { %7726 = vsyncpa [#allocation6], 1 }
 0x8f0   :  { %7728 = vsyncpa [#allocation6 + $0x1], 1 }

</bundles_post_ra>
